<compile_context>
chip_gen: v7x
topology: tpu7x:2x2x1
jax: 0.10.0
libtpu: 0.0.40
codegen_flags: <defaults>
</compile_context>

<pallas_src>
import jax
import jax.numpy as jnp
from jax.experimental import pallas as pl
from jax.experimental.pallas import tpu as pltpu


INPUT_DIM = 2816
H1, H2, H3 = 512, 256, 128
OUT_PAD = 128  # lane-dense padded output width; true output is column 0


def _mlp_kernel(x_ref,
                w1_ref, b1_ref,
                w2_ref, b2_ref,
                w3_ref, b3_ref,
                w4_ref, b4_ref,
                o_ref):
    # Cast the f32 input tile to bf16 in-kernel (VPU cast, no extra HBM pass).
    x = x_ref[...].astype(jnp.bfloat16)  # (TILE_B, INPUT_DIM)

    # Layer 1: Linear(+folded BN) -> ReLU
    h = jnp.dot(x, w1_ref[...], preferred_element_type=jnp.float32) + b1_ref[...]
    h = jnp.maximum(h, 0.0).astype(jnp.bfloat16)

    # Layer 2: Linear(+folded BN) -> ReLU
    h = jnp.dot(h, w2_ref[...], preferred_element_type=jnp.float32) + b2_ref[...]
    h = jnp.maximum(h, 0.0).astype(jnp.bfloat16)

    # Layer 3: Linear(+folded BN) -> ReLU
    h = jnp.dot(h, w3_ref[...], preferred_element_type=jnp.float32) + b3_ref[...]
    h = jnp.maximum(h, 0.0).astype(jnp.bfloat16)

    # Output layer: Linear (padded to 128 lanes) -> Sigmoid.
    z = jnp.dot(h, w4_ref[...], preferred_element_type=jnp.float32) + b4_ref[...]
    # exp and the approximate reciprocal both run on the (otherwise idle) EUP slot.
    # NOTE: padded columns 1..127 hold sigmoid(0)=0.5 -- never consume the padded
    # slab directly; the wrapper slices column 0.
    o_ref[...] = pl.reciprocal(1.0 + jnp.exp(-z), approx=True).astype(o_ref.dtype)


def _pick_tile_b(B, requested):
    """Largest batch tile <= requested that divides B, is a multiple of 8, and
    leaves >= 2 grid steps when possible (so both v7x TensorCores get work)."""
    if B <= 8:
        return B
    tile = min(requested, B)
    if B >= 16:
        tile = min(tile, B // 2)          # guarantee at least 2 grid steps
    tile = max(8, (tile // 8) * 8)        # sublane (8) granularity
    while tile >= 8 and B % tile != 0:
        tile -= 8
    return tile if tile >= 8 else B


def _const_spec(shape, single_buffer):
    """Weight spec: constant block index across the batch grid -> DMA'd once,
    VMEM-resident; optionally single-buffered (no wasteful double buffer)."""
    index_map = lambda i: (0,) * len(shape)
    if single_buffer:
        return pl.BlockSpec(shape, index_map, pipeline_mode=pl.Buffered(1))
    return pl.BlockSpec(shape, index_map)


def three_layer_regressor(x, kparams, *, tile_b=512):
    """x: (B, INPUT_DIM) f32.  kparams: folded/padded kernel params (fold_params).

    Returns a (B, 1) bf16 array (sigmoid outputs).  Default tile_b=512 is a good
    production choice on all generations; on v5e/v6e tile_b=1024 is also fine
    (vmem limit is raised automatically).  Tiny batches (like the demo) are
    handled by the auto tile picker.
    """
    B, in_dim = x.shape
    assert in_dim == INPUT_DIM, f"expected input dim {INPUT_DIM}, got {in_dim}"
    tile = _pick_tile_b(B, tile_b)
    grid = (B // tile,)

    x = x.astype(jnp.float32)  # no bf16 pre-cast: cast happens inside the kernel

    weights = (kparams["w1"], kparams["b1"],
               kparams["w2"], kparams["b2"],
               kparams["w3"], kparams["b3"],
               kparams["w4"], kparams["b4"])

    def build(single_buffer_weights):
        in_specs = [pl.BlockSpec((tile, in_dim), lambda i: (i, 0))]
        in_specs += [_const_spec(w.shape, single_buffer_weights) for w in weights]
        out_spec = pl.BlockSpec((tile, OUT_PAD), lambda i: (i, 0))
        return pl.pallas_call(
            _mlp_kernel,
            grid=grid,
            out_shape=jax.ShapeDtypeStruct((B, OUT_PAD), jnp.bfloat16),
            in_specs=in_specs,
            out_specs=out_spec,
            compiler_params=pltpu.CompilerParams(
                # Shard batch tiles across the 2 TensorCores on v7x.
                dimension_semantics=("parallel",),
                # 32 MiB is plenty for <=512-row f32 x tiles + resident weights;
                # only very large tiles (v5e/v6e, 1024 rows) need more headroom.
                vmem_limit_bytes=(48 << 20) if tile >= 1024 else (32 << 20),
            ),
        )

    try:
        out_padded = build(single_buffer_weights=True)(x, *weights)
    except Exception:
        # Fallback for JAX/Mosaic versions without Buffered(1) single-buffering;
        # identical semantics, just default double-buffered resident weights.
        out_padded = build(single_buffer_weights=False)(x, *weights)

    return out_padded[:, :1]


def init_params(key, input_dim=INPUT_DIM, h1=H1, h2=H2, h3=H3):
    """Deterministic synthetic f32 parameters (Linear + eval-mode BatchNorm1d stats)."""
    eps = 1e-5
    ks = jax.random.split(key, 20)

    def linear(kw, kb, fan_in, fan_out):
        bound = 1.0 / jnp.sqrt(fan_in)
        w = jax.random.uniform(kw, (fan_in, fan_out), jnp.float32, -bound, bound)
        b = jax.random.uniform(kb, (1, fan_out), jnp.float32, -bound, bound)
        return w, b

    def bn_fold(kg, kb2, km, kv, dim):
        gamma = 1.0 + 0.1 * jax.random.normal(kg, (1, dim), jnp.float32)
        beta = 0.1 * jax.random.normal(kb2, (1, dim), jnp.float32)
        running_mean = 0.1 * jax.random.normal(km, (1, dim), jnp.float32)
        running_var = 1.0 + 0.1 * jax.random.uniform(kv, (1, dim), jnp.float32)
        scale = gamma / jnp.sqrt(running_var + eps)
        shift = beta - running_mean * scale
        return scale, shift

    w1, b1 = linear(ks[0], ks[1], input_dim, h1)
    s1, t1 = bn_fold(ks[2], ks[3], ks[4], ks[5], h1)
    w2, b2 = linear(ks[6], ks[7], h1, h2)
    s2, t2 = bn_fold(ks[8], ks[9], ks[10], ks[11], h2)
    w3, b3 = linear(ks[12], ks[13], h2, h3)
    s3, t3 = bn_fold(ks[14], ks[15], ks[16], ks[17], h3)
    w4, b4 = linear(ks[18], ks[19], h3, 1)

    return dict(w1=w1, b1=b1, s1=s1, t1=t1,
                w2=w2, b2=b2, s2=s2, t2=t2,
                w3=w3, b3=b3, s3=s3, t3=t3,
                w4=w4, b4=b4)


def fold_params(p):
    """Fold eval-mode BN into the Linear layers, cast weights to bf16, pad the
    final layer to a lane-dense OUT_PAD-wide output."""
    def fold(w, b, s, t):
        w_f = (w * s).astype(jnp.bfloat16)       # (in, out) * (1, out)
        b_f = (b * s + t).astype(jnp.float32)    # added to the f32 accumulator
        return w_f, b_f

    w1, b1 = fold(p["w1"], p["b1"], p["s1"], p["t1"])
    w2, b2 = fold(p["w2"], p["b2"], p["s2"], p["t2"])
    w3, b3 = fold(p["w3"], p["b3"], p["s3"], p["t3"])

    w4 = jnp.zeros((p["w4"].shape[0], OUT_PAD), jnp.float32).at[:, :1].set(p["w4"])
    b4 = jnp.zeros((1, OUT_PAD), jnp.float32).at[:, :1].set(p["b4"])

    return dict(w1=w1, b1=b1, w2=w2, b2=b2, w3=w3, b3=b3,
                w4=w4.astype(jnp.bfloat16), b4=b4)


def reference_forward(x, p):
    """Pure-JAX f32 reference with explicit (unfolded) eval-mode BatchNorm."""
    h = jnp.maximum((x @ p["w1"] + p["b1"]) * p["s1"] + p["t1"], 0.0)
    h = jnp.maximum((h @ p["w2"] + p["b2"]) * p["s2"] + p["t2"], 0.0)
    h = jnp.maximum((h @ p["w3"] + p["b3"]) * p["s3"] + p["t3"], 0.0)
    return jax.nn.sigmoid(h @ p["w4"] + p["b4"])


if __name__ == "__main__":
    key = jax.random.PRNGKey(0)
    kx, kp = jax.random.split(key)

    # Small demo batch; the tile picker splits it into 2 tiles of 32 rows
    # (grid=(2,)) so the megacore path is exercised. Production batches should
    # be >= 512 rows so each tile keeps the MXU busy.
    B = 64
    x = jax.random.normal(kx, (B, INPUT_DIM), jnp.float32)

    params = init_params(kp)
    kparams = fold_params(params)

    out = three_layer_regressor(x, kparams, tile_b=512)
    out = jax.block_until_ready(out)

    ref = reference_forward(x, params)
    assert out.shape == (B, 1)
    # bf16 weights/activations/output + approx reciprocal vs f32 reference.
    assert jnp.allclose(out.astype(jnp.float32), ref, atol=2.5e-2, rtol=2.5e-2), \
        "mismatch vs JAX reference"

    print("KERNEL_OK")
</pallas_src>

<mosaic_0001>
module attributes {stable_mosaic.version = 11 : i64} {
  func.func @_mlp_kernel(%arg0: i32, %arg1: memref<32x2816xf32, #tpu.memory_space<vmem>>, %arg2: memref<2816x512xbf16, #tpu.memory_space<vmem>>, %arg3: memref<1x512xf32, #tpu.memory_space<vmem>>, %arg4: memref<512x256xbf16, #tpu.memory_space<vmem>>, %arg5: memref<1x256xf32, #tpu.memory_space<vmem>>, %arg6: memref<256x128xbf16, #tpu.memory_space<vmem>>, %arg7: memref<1x128xf32, #tpu.memory_space<vmem>>, %arg8: memref<128x128xbf16, #tpu.memory_space<vmem>>, %arg9: memref<1x128xf32, #tpu.memory_space<vmem>>, %arg10: memref<32x128xbf16, #tpu.memory_space<vmem>>) attributes {dimension_semantics = [#tpu.dimension_semantics<parallel>], iteration_bounds = array<i64: 2>, scalar_prefetch = 0 : i64, scratch_operands = 0 : i64, tpu.core_type = #tpu.core_type<tc>, window_params = [{transform_indices = @transform_0, window_bounds = array<i64: 32, 2816>}, {pipeline_mode = #tpu.pipeline_mode<synchronous>, transform_indices = @transform_1, window_bounds = array<i64: 2816, 512>}, {pipeline_mode = #tpu.pipeline_mode<synchronous>, transform_indices = @transform_2, window_bounds = array<i64: 1, 512>}, {pipeline_mode = #tpu.pipeline_mode<synchronous>, transform_indices = @transform_3, window_bounds = array<i64: 512, 256>}, {pipeline_mode = #tpu.pipeline_mode<synchronous>, transform_indices = @transform_4, window_bounds = array<i64: 1, 256>}, {pipeline_mode = #tpu.pipeline_mode<synchronous>, transform_indices = @transform_5, window_bounds = array<i64: 256, 128>}, {pipeline_mode = #tpu.pipeline_mode<synchronous>, transform_indices = @transform_6, window_bounds = array<i64: 1, 128>}, {pipeline_mode = #tpu.pipeline_mode<synchronous>, transform_indices = @transform_7, window_bounds = array<i64: 128, 128>}, {pipeline_mode = #tpu.pipeline_mode<synchronous>, transform_indices = @transform_8, window_bounds = array<i64: 1, 128>}, {transform_indices = @transform_9, window_bounds = array<i64: 32, 128>}]} {
    %c0 = arith.constant 0 : index
    %c0_0 = arith.constant 0 : index
    %0 = vector.load %arg1[%c0, %c0_0] : memref<32x2816xf32, #tpu.memory_space<vmem>>, vector<32x2816xf32>
    %1 = arith.truncf %0 : vector<32x2816xf32> to vector<32x2816xbf16>
    %c0_1 = arith.constant 0 : index
    %c0_2 = arith.constant 0 : index
    %2 = vector.load %arg2[%c0_1, %c0_2] : memref<2816x512xbf16, #tpu.memory_space<vmem>>, vector<2816x512xbf16>
    %cst = arith.constant dense<0.000000e+00> : vector<32x512xf32>
    %3 = tpu.matmul %1, %2, %cst {dimension_numbers = #tpu.dot_dimension_numbers<[1], [0], [0], [1], [0, 0, 1, 1], [], []>} : vector<32x2816xbf16>, vector<2816x512xbf16>, vector<32x512xf32> -> vector<32x512xf32>
    %c0_3 = arith.constant 0 : index
    %c0_4 = arith.constant 0 : index
    %4 = vector.load %arg3[%c0_3, %c0_4] : memref<1x512xf32, #tpu.memory_space<vmem>>, vector<1x512xf32>
    %5 = vector.broadcast %4 : vector<1x512xf32> to vector<32x512xf32>
    %6 = arith.addf %3, %5 : vector<32x512xf32>
    %cst_5 = arith.constant 0.000000e+00 : f32
    %7 = vector.broadcast %cst_5 : f32 to vector<32x512xf32>
    %8 = arith.maximumf %6, %7 : vector<32x512xf32>
    %9 = arith.truncf %8 : vector<32x512xf32> to vector<32x512xbf16>
    %c0_6 = arith.constant 0 : index
    %c0_7 = arith.constant 0 : index
    %10 = vector.load %arg4[%c0_6, %c0_7] : memref<512x256xbf16, #tpu.memory_space<vmem>>, vector<512x256xbf16>
    %cst_8 = arith.constant dense<0.000000e+00> : vector<32x256xf32>
    %11 = tpu.matmul %9, %10, %cst_8 {dimension_numbers = #tpu.dot_dimension_numbers<[1], [0], [0], [1], [0, 0, 1, 1], [], []>} : vector<32x512xbf16>, vector<512x256xbf16>, vector<32x256xf32> -> vector<32x256xf32>
    %c0_9 = arith.constant 0 : index
    %c0_10 = arith.constant 0 : index
    %12 = vector.load %arg5[%c0_9, %c0_10] : memref<1x256xf32, #tpu.memory_space<vmem>>, vector<1x256xf32>
    %13 = vector.broadcast %12 : vector<1x256xf32> to vector<32x256xf32>
    %14 = arith.addf %11, %13 : vector<32x256xf32>
    %cst_11 = arith.constant 0.000000e+00 : f32
    %15 = vector.broadcast %cst_11 : f32 to vector<32x256xf32>
    %16 = arith.maximumf %14, %15 : vector<32x256xf32>
    %17 = arith.truncf %16 : vector<32x256xf32> to vector<32x256xbf16>
    %c0_12 = arith.constant 0 : index
    %c0_13 = arith.constant 0 : index
    %18 = vector.load %arg6[%c0_12, %c0_13] : memref<256x128xbf16, #tpu.memory_space<vmem>>, vector<256x128xbf16>
    %cst_14 = arith.constant dense<0.000000e+00> : vector<32x128xf32>
    %19 = tpu.matmul %17, %18, %cst_14 {dimension_numbers = #tpu.dot_dimension_numbers<[1], [0], [0], [1], [0, 0, 1, 1], [], []>} : vector<32x256xbf16>, vector<256x128xbf16>, vector<32x128xf32> -> vector<32x128xf32>
    %c0_15 = arith.constant 0 : index
    %c0_16 = arith.constant 0 : index
    %20 = vector.load %arg7[%c0_15, %c0_16] : memref<1x128xf32, #tpu.memory_space<vmem>>, vector<1x128xf32>
    %21 = vector.broadcast %20 : vector<1x128xf32> to vector<32x128xf32>
    %22 = arith.addf %19, %21 : vector<32x128xf32>
    %cst_17 = arith.constant 0.000000e+00 : f32
    %23 = vector.broadcast %cst_17 : f32 to vector<32x128xf32>
    %24 = arith.maximumf %22, %23 : vector<32x128xf32>
    %25 = arith.truncf %24 : vector<32x128xf32> to vector<32x128xbf16>
    %c0_18 = arith.constant 0 : index
    %c0_19 = arith.constant 0 : index
    %26 = vector.load %arg8[%c0_18, %c0_19] : memref<128x128xbf16, #tpu.memory_space<vmem>>, vector<128x128xbf16>
    %cst_20 = arith.constant dense<0.000000e+00> : vector<32x128xf32>
    %27 = tpu.matmul %25, %26, %cst_20 {dimension_numbers = #tpu.dot_dimension_numbers<[1], [0], [0], [1], [0, 0, 1, 1], [], []>} : vector<32x128xbf16>, vector<128x128xbf16>, vector<32x128xf32> -> vector<32x128xf32>
    %c0_21 = arith.constant 0 : index
    %c0_22 = arith.constant 0 : index
    %28 = vector.load %arg9[%c0_21, %c0_22] : memref<1x128xf32, #tpu.memory_space<vmem>>, vector<1x128xf32>
    %29 = vector.broadcast %28 : vector<1x128xf32> to vector<32x128xf32>
    %30 = arith.addf %27, %29 : vector<32x128xf32>
    %cst_23 = arith.constant 0.000000e+00 : f32
    %31 = vector.broadcast %cst_23 : f32 to vector<32x128xf32>
    %32 = arith.subf %31, %30 : vector<32x128xf32>
    %33 = math.exp %32 : vector<32x128xf32>
    %cst_24 = arith.constant 1.000000e+00 : f32
    %34 = vector.broadcast %cst_24 : f32 to vector<32x128xf32>
    %35 = arith.addf %34, %33 : vector<32x128xf32>
    %36 = tpu.reciprocal %35 {approx = true} : vector<32x128xf32> -> vector<32x128xf32>
    %37 = arith.truncf %36 : vector<32x128xf32> to vector<32x128xbf16>
    %c0_25 = arith.constant 0 : index
    %c0_26 = arith.constant 0 : index
    %38 = vector.load %arg10[%c0_25, %c0_26] : memref<32x128xbf16, #tpu.memory_space<vmem>>, vector<32x128xbf16>
    tpu.vector_store %arg10[%c0_25, %c0_26], %37 {strides = array<i32>} : memref<32x128xbf16, #tpu.memory_space<vmem>>, vector<32x128xbf16>,
    return
  }
  func.func @transform_0(%arg0: i32) -> (i32, i32) {
    %c0_i32 = arith.constant 0 : i32
    %c0_i32_0 = arith.constant 0 : i32
    return %arg0, %c0_i32 : i32, i32
  }
  func.func @transform_1(%arg0: i32) -> (i32, i32) {
    %c0_i32 = arith.constant 0 : i32
    %c0_i32_0 = arith.constant 0 : i32
    %c0_i32_1 = arith.constant 0 : i32
    return %c0_i32, %c0_i32_0 : i32, i32
  }
  func.func @transform_2(%arg0: i32) -> (i32, i32) {
    %c0_i32 = arith.constant 0 : i32
    %c0_i32_0 = arith.constant 0 : i32
    %c0_i32_1 = arith.constant 0 : i32
    return %c0_i32, %c0_i32_0 : i32, i32
  }
  func.func @transform_3(%arg0: i32) -> (i32, i32) {
    %c0_i32 = arith.constant 0 : i32
    %c0_i32_0 = arith.constant 0 : i32
    %c0_i32_1 = arith.constant 0 : i32
    return %c0_i32, %c0_i32_0 : i32, i32
  }
  func.func @transform_4(%arg0: i32) -> (i32, i32) {
    %c0_i32 = arith.constant 0 : i32
    %c0_i32_0 = arith.constant 0 : i32
    %c0_i32_1 = arith.constant 0 : i32
    return %c0_i32, %c0_i32_0 : i32, i32
  }
  func.func @transform_5(%arg0: i32) -> (i32, i32) {
    %c0_i32 = arith.constant 0 : i32
    %c0_i32_0 = arith.constant 0 : i32
    %c0_i32_1 = arith.constant 0 : i32
    return %c0_i32, %c0_i32_0 : i32, i32
  }
  func.func @transform_6(%arg0: i32) -> (i32, i32) {
    %c0_i32 = arith.constant 0 : i32
    %c0_i32_0 = arith.constant 0 : i32
    %c0_i32_1 = arith.constant 0 : i32
    return %c0_i32, %c0_i32_0 : i32, i32
  }
  func.func @transform_7(%arg0: i32) -> (i32, i32) {
    %c0_i32 = arith.constant 0 : i32
    %c0_i32_0 = arith.constant 0 : i32
    %c0_i32_1 = arith.constant 0 : i32
    return %c0_i32, %c0_i32_0 : i32, i32
  }
  func.func @transform_8(%arg0: i32) -> (i32, i32) {
    %c0_i32 = arith.constant 0 : i32
    %c0_i32_0 = arith.constant 0 : i32
    %c0_i32_1 = arith.constant 0 : i32
    return %c0_i32, %c0_i32_0 : i32, i32
  }
  func.func @transform_9(%arg0: i32) -> (i32, i32) {
    %c0_i32 = arith.constant 0 : i32
    %c0_i32_0 = arith.constant 0 : i32
    return %arg0, %c0_i32 : i32, i32
  }
}

module attributes {stable_mosaic.version = 11 : i64} {
  func.func @_mlp_kernel(%arg0: i32, %arg1: memref<32x2816xf32, #tpu.memory_space<vmem>>, %arg2: memref<2816x512xbf16, #tpu.memory_space<vmem>>, %arg3: memref<1x512xf32, #tpu.memory_space<vmem>>, %arg4: memref<512x256xbf16, #tpu.memory_space<vmem>>, %arg5: memref<1x256xf32, #tpu.memory_space<vmem>>, %arg6: memref<256x128xbf16, #tpu.memory_space<vmem>>, %arg7: memref<1x128xf32, #tpu.memory_space<vmem>>, %arg8: memref<128x128xbf16, #tpu.memory_space<vmem>>, %arg9: memref<1x128xf32, #tpu.memory_space<vmem>>, %arg10: memref<32x128xbf16, #tpu.memory_space<vmem>>) attributes {dimension_semantics = [#tpu.dimension_semantics<parallel>], iteration_bounds = array<i64: 2>, scalar_prefetch = 0 : i64, scratch_operands = 0 : i64, tpu.core_type = #tpu.core_type<tc>, window_params = [{transform_indices = @transform_0, window_bounds = array<i64: 32, 2816>}, {pipeline_mode = #tpu.pipeline_mode<synchronous>, transform_indices = @transform_1, window_bounds = array<i64: 2816, 512>}, {pipeline_mode = #tpu.pipeline_mode<synchronous>, transform_indices = @transform_2, window_bounds = array<i64: 1, 512>}, {pipeline_mode = #tpu.pipeline_mode<synchronous>, transform_indices = @transform_3, window_bounds = array<i64: 512, 256>}, {pipeline_mode = #tpu.pipeline_mode<synchronous>, transform_indices = @transform_4, window_bounds = array<i64: 1, 256>}, {pipeline_mode = #tpu.pipeline_mode<synchronous>, transform_indices = @transform_5, window_bounds = array<i64: 256, 128>}, {pipeline_mode = #tpu.pipeline_mode<synchronous>, transform_indices = @transform_6, window_bounds = array<i64: 1, 128>}, {pipeline_mode = #tpu.pipeline_mode<synchronous>, transform_indices = @transform_7, window_bounds = array<i64: 128, 128>}, {pipeline_mode = #tpu.pipeline_mode<synchronous>, transform_indices = @transform_8, window_bounds = array<i64: 1, 128>}, {transform_indices = @transform_9, window_bounds = array<i64: 32, 128>}]} {
    %c0 = arith.constant 0 : index
    %c0_0 = arith.constant 0 : index
    %0 = vector.load %arg1[%c0, %c0_0] : memref<32x2816xf32, #tpu.memory_space<vmem>>, vector<32x2816xf32>
    %1 = arith.truncf %0 : vector<32x2816xf32> to vector<32x2816xbf16>
    %c0_1 = arith.constant 0 : index
    %c0_2 = arith.constant 0 : index
    %2 = vector.load %arg2[%c0_1, %c0_2] : memref<2816x512xbf16, #tpu.memory_space<vmem>>, vector<2816x512xbf16>
    %cst = arith.constant dense<0.000000e+00> : vector<32x512xf32>
    %3 = tpu.matmul %1, %2, %cst {dimension_numbers = #tpu.dot_dimension_numbers<[1], [0], [0], [1], [0, 0, 1, 1], [], []>} : vector<32x2816xbf16>, vector<2816x512xbf16>, vector<32x512xf32> -> vector<32x512xf32>
    %c0_3 = arith.constant 0 : index
    %c0_4 = arith.constant 0 : index
    %4 = vector.load %arg3[%c0_3, %c0_4] : memref<1x512xf32, #tpu.memory_space<vmem>>, vector<1x512xf32>
    %5 = vector.broadcast %4 : vector<1x512xf32> to vector<32x512xf32>
    %6 = arith.addf %3, %5 : vector<32x512xf32>
    %cst_5 = arith.constant 0.000000e+00 : f32
    %7 = vector.broadcast %cst_5 : f32 to vector<32x512xf32>
    %8 = arith.maximumf %6, %7 : vector<32x512xf32>
    %9 = arith.truncf %8 : vector<32x512xf32> to vector<32x512xbf16>
    %c0_6 = arith.constant 0 : index
    %c0_7 = arith.constant 0 : index
    %10 = vector.load %arg4[%c0_6, %c0_7] : memref<512x256xbf16, #tpu.memory_space<vmem>>, vector<512x256xbf16>
    %cst_8 = arith.constant dense<0.000000e+00> : vector<32x256xf32>
    %11 = tpu.matmul %9, %10, %cst_8 {dimension_numbers = #tpu.dot_dimension_numbers<[1], [0], [0], [1], [0, 0, 1, 1], [], []>} : vector<32x512xbf16>, vector<512x256xbf16>, vector<32x256xf32> -> vector<32x256xf32>
    %c0_9 = arith.constant 0 : index
    %c0_10 = arith.constant 0 : index
    %12 = vector.load %arg5[%c0_9, %c0_10] : memref<1x256xf32, #tpu.memory_space<vmem>>, vector<1x256xf32>
    %13 = vector.broadcast %12 : vector<1x256xf32> to vector<32x256xf32>
    %14 = arith.addf %11, %13 : vector<32x256xf32>
    %cst_11 = arith.constant 0.000000e+00 : f32
    %15 = vector.broadcast %cst_11 : f32 to vector<32x256xf32>
    %16 = arith.maximumf %14, %15 : vector<32x256xf32>
    %17 = arith.truncf %16 : vector<32x256xf32> to vector<32x256xbf16>
    %c0_12 = arith.constant 0 : index
    %c0_13 = arith.constant 0 : index
    %18 = vector.load %arg6[%c0_12, %c0_13] : memref<256x128xbf16, #tpu.memory_space<vmem>>, vector<256x128xbf16>
    %cst_14 = arith.constant dense<0.000000e+00> : vector<32x128xf32>
    %19 = tpu.matmul %17, %18, %cst_14 {dimension_numbers = #tpu.dot_dimension_numbers<[1], [0], [0], [1], [0, 0, 1, 1], [], []>} : vector<32x256xbf16>, vector<256x128xbf16>, vector<32x128xf32> -> vector<32x128xf32>
    %c0_15 = arith.constant 0 : index
    %c0_16 = arith.constant 0 : index
    %20 = vector.load %arg7[%c0_15, %c0_16] : memref<1x128xf32, #tpu.memory_space<vmem>>, vector<1x128xf32>
    %21 = vector.broadcast %20 : vector<1x128xf32> to vector<32x128xf32>
    %22 = arith.addf %19, %21 : vector<32x128xf32>
    %cst_17 = arith.constant 0.000000e+00 : f32
    %23 = vector.broadcast %cst_17 : f32 to vector<32x128xf32>
    %24 = arith.maximumf %22, %23 : vector<32x128xf32>
    %25 = arith.truncf %24 : vector<32x128xf32> to vector<32x128xbf16>
    %c0_18 = arith.constant 0 : index
    %c0_19 = arith.constant 0 : index
    %26 = vector.load %arg8[%c0_18, %c0_19] : memref<128x128xbf16, #tpu.memory_space<vmem>>, vector<128x128xbf16>
    %cst_20 = arith.constant dense<0.000000e+00> : vector<32x128xf32>
    %27 = tpu.matmul %25, %26, %cst_20 {dimension_numbers = #tpu.dot_dimension_numbers<[1], [0], [0], [1], [0, 0, 1, 1], [], []>} : vector<32x128xbf16>, vector<128x128xbf16>, vector<32x128xf32> -> vector<32x128xf32>
    %c0_21 = arith.constant 0 : index
    %c0_22 = arith.constant 0 : index
    %28 = vector.load %arg9[%c0_21, %c0_22] : memref<1x128xf32, #tpu.memory_space<vmem>>, vector<1x128xf32>
    %29 = vector.broadcast %28 : vector<1x128xf32> to vector<32x128xf32>
    %30 = arith.addf %27, %29 : vector<32x128xf32>
    %cst_23 = arith.constant 0.000000e+00 : f32
    %31 = vector.broadcast %cst_23 : f32 to vector<32x128xf32>
    %32 = arith.subf %31, %30 : vector<32x128xf32>
    %33 = math.exp %32 : vector<32x128xf32>
    %cst_24 = arith.constant 1.000000e+00 : f32
    %34 = vector.broadcast %cst_24 : f32 to vector<32x128xf32>
    %35 = arith.addf %34, %33 : vector<32x128xf32>
    %36 = tpu.reciprocal %35 {approx = true} : vector<32x128xf32> -> vector<32x128xf32>
    %37 = arith.truncf %36 : vector<32x128xf32> to vector<32x128xbf16>
    %c0_25 = arith.constant 0 : index
    %c0_26 = arith.constant 0 : index
    %38 = vector.load %arg10[%c0_25, %c0_26] : memref<32x128xbf16, #tpu.memory_space<vmem>>, vector<32x128xbf16>
    tpu.vector_store %arg10[%c0_25, %c0_26], %37 {strides = array<i32>} : memref<32x128xbf16, #tpu.memory_space<vmem>>, vector<32x128xbf16>,
    return
  }
  func.func @transform_0(%arg0: i32) -> (i32, i32) {
    %c0_i32 = arith.constant 0 : i32
    %c0_i32_0 = arith.constant 0 : i32
    return %arg0, %c0_i32 : i32, i32
  }
  func.func @transform_1(%arg0: i32) -> (i32, i32) {
    %c0_i32 = arith.constant 0 : i32
    %c0_i32_0 = arith.constant 0 : i32
    %c0_i32_1 = arith.constant 0 : i32
    return %c0_i32, %c0_i32_0 : i32, i32
  }
  func.func @transform_2(%arg0: i32) -> (i32, i32) {
    %c0_i32 = arith.constant 0 : i32
    %c0_i32_0 = arith.constant 0 : i32
    %c0_i32_1 = arith.constant 0 : i32
    return %c0_i32, %c0_i32_0 : i32, i32
  }
  func.func @transform_3(%arg0: i32) -> (i32, i32) {
    %c0_i32 = arith.constant 0 : i32
    %c0_i32_0 = arith.constant 0 : i32
    %c0_i32_1 = arith.constant 0 : i32
    return %c0_i32, %c0_i32_0 : i32, i32
  }
  func.func @transform_4(%arg0: i32) -> (i32, i32) {
    %c0_i32 = arith.constant 0 : i32
    %c0_i32_0 = arith.constant 0 : i32
    %c0_i32_1 = arith.constant 0 : i32
    return %c0_i32, %c0_i32_0 : i32, i32
  }
  func.func @transform_5(%arg0: i32) -> (i32, i32) {
    %c0_i32 = arith.constant 0 : i32
    %c0_i32_0 = arith.constant 0 : i32
    %c0_i32_1 = arith.constant 0 : i32
    return %c0_i32, %c0_i32_0 : i32, i32
  }
  func.func @transform_6(%arg0: i32) -> (i32, i32) {
    %c0_i32 = arith.constant 0 : i32
    %c0_i32_0 = arith.constant 0 : i32
    %c0_i32_1 = arith.constant 0 : i32
    return %c0_i32, %c0_i32_0 : i32, i32
  }
  func.func @transform_7(%arg0: i32) -> (i32, i32) {
    %c0_i32 = arith.constant 0 : i32
    %c0_i32_0 = arith.constant 0 : i32
    %c0_i32_1 = arith.constant 0 : i32
    return %c0_i32, %c0_i32_0 : i32, i32
  }
  func.func @transform_8(%arg0: i32) -> (i32, i32) {
    %c0_i32 = arith.constant 0 : i32
    %c0_i32_0 = arith.constant 0 : i32
    %c0_i32_1 = arith.constant 0 : i32
    return %c0_i32, %c0_i32_0 : i32, i32
  }
  func.func @transform_9(%arg0: i32) -> (i32, i32) {
    %c0_i32 = arith.constant 0 : i32
    %c0_i32_0 = arith.constant 0 : i32
    return %arg0, %c0_i32 : i32, i32
  }
}

</mosaic_0001>

<bundles_post_ra>
// kernel: tpu_custom_call.1
= control target key start
LH: loop header
LB: loop body
LE: loop exit
PB: predicated region body
PF: predicated region fallthrough
CT: control target
= control target key end

     0   :  { %s10557_s0 = inlined_call_operand.hbm [shape: f32[64,2816], index: 0, kind: input, shape index: {}]   ;;  %s10558_s1 = inlined_call_operand.hbm [shape: bf16[2816,512], index: 1, kind: input, shape index: {}]   ;;  %s10559_s2 = inlined_call_operand.hbm [shape: f32[1,512], index: 2, kind: input, shape index: {}]   ;;  %s10560_s3 = inlined_call_operand.hbm [shape: bf16[512,256], index: 3, kind: input, shape index: {}]   ;;  %s10561_s4 = inlined_call_operand.hbm [shape: f32[1,256], index: 4, kind: input, shape index: {}]   ;;  %s10562_s5 = inlined_call_operand.hbm [shape: bf16[256,128], index: 5, kind: input, shape index: {}]   ;;  %s10563_s6 = inlined_call_operand.hbm [shape: f32[1,128], index: 6, kind: input, shape index: {}]   ;;  %s10564_s7 = inlined_call_operand.hbm [shape: bf16[128,128], index: 7, kind: input, shape index: {}]   ;;  %s10565_s8 = inlined_call_operand.hbm [shape: f32[1,128], index: 8, kind: input, shape index: {}]   ;;  %s10566_s9 = inlined_call_operand.hbm [shape: bf16[64,128], index: 9, kind: output, shape index: {}]  }
   0x1   :  { %10571 = sst [smem:[#allocation24_spill]] %s10558_s1 }
   0x2   :  { %10572 = sst [smem:[#allocation25_spill]] %s10560_s3 }
   0x3   :  { %10573 = sst [smem:[#allocation26_spill]] %s10566_s9 }
   0x4   :  { %14 = vsyncpa [#allocation3], 0 }
   0x5   :  { %16 = vsyncpa [#allocation3 + $0x1], 0 }
   0x6   :  { %17 = vsyncpa [#allocation6], 0 }
   0x7   :  { %18 = vsyncpa [#allocation9], 0 }
   0x8   :  { %19 = vsyncpa [#allocation12], 0 }
   0x9   :  { %20 = vsyncpa [#allocation15], 0 }
   0xa   :  { %21 = vsyncpa [#allocation4], 0 }
   0xb   :  { %23 = vsyncpa [#allocation4 + $0x1], 0  ;;  %s9891_s30 = smov 0   ;;  %s9893_s10 = smov 0  }
   0xc   :  { %s9895_s11 = smov 0   ;;  %s9897_s12 = smov 0  }
   0xd LB: > { %s9821_s13 = smov [#allocation5]   ;;  %s9912_s15 = sadd.s32 4294967295, %s9819_s12   ;;  %s9819_s12 = sphi %s9897_s12, %s10600_s12   ;;  %s9815_s11 = sphi %s9895_s11, %s10599_s11   ;;  %s9811_s10 = sphi %s9893_s10, %s10598_s10   ;;  %s9807_s30 = sphi %s9891_s30, %s10597_s30  }
   0xe   : > { %s266_s14 = sshll.u32 %s9821_s13, 4  ;;  %p7059_p0 = scmp.ge.s32.totalorder %s9819_s12, 1  ;;  %s9917_s14 = int_to_ptr.vmem [resolvable:$true] %s266_s14 }
   0xf   : > { %p10568_p1 = scmp.eq.s32.totalorder %s9912_s15, 0  ;;  %p254_p2 = scmp.lt.s32.totalorder %s9819_s12, 3 }
  0x10   : > { %s9822_s17 = smov [#allocation8]   ;;  %s9823_s20 = smov [#allocation11]  }
  0x11   : > { %p9919_p3 = pnand %p7059_p0, %p254_p2  ;;  %s290_s18 = sshll.u32 %s9822_s17, 4  ;;  %s9932_s18 = int_to_ptr.vmem [resolvable:$true] %s290_s18 }
  0x12   : > { %s9934_s21 = sshll.u32 %s9823_s20, 4  ;;  %s10576_s1 = sld [smem:[#allocation24_spill]]  ;;  %s315_s21 = int_to_ptr.vmem [resolvable:$true] %s9934_s21 }
  0x13   : > { %s10574_s16 = scalar_select %p9919_p3, 1, 0 }
  0x14   : > { %p8190_p5 = pneg %p9919_p3 }
  0x16   : > { %p9928_p6 = pnand %p8190_p5, %p10568_p1 }
  0x18   : > { %s9483_s24 = scalar_lea.hbm %s10576_s1, 90112  ;;  %p9944_p8 = pneg %p9928_p6 }
  0x19   : > { %p9484_p7 = scmp.ne.s32.totalorder %s10576_s1, %s9483_s24  ;;  %p9490_p11 = scmp.lt.u32.totalorder %s9483_s24, %s10576_s1 }
  0x1b   : > { %p9486_p9 = pnand %p9944_p8, %p9484_p7 }
  0x1d   : > { %p9487_p10 = pneg %p9486_p9 }
  0x1f   : > { %p9492_p12 = pnand %p9490_p11, %p9487_p10 }
  0x21   : > { %9495 = shalt.err (!%p9492_p12)
}
  0x22   : > { %s9496_s13 = scalar_lea.vmem %s9917_s14, 90112  ;;  %p9504_p5 = scmp.lt.s32.totalorder %s9917_s14, %s9917_s14 }
  0x23   : > { %p9497_p13 = scmp.ne.s32.totalorder %s9917_s14, %s9496_s13  ;;  %p9505_p4 = scmp.lt.s32.totalorder %s9496_s13, %s9496_s13 }
  0x25   : > { %p9499_p0 = pnand %p9497_p13, %p9944_p8  ;;  %p9506_p7 = por %p9505_p4, %p9504_p5 }
  0x27   : > { %p9500_p2 = pneg %p9499_p0 }
  0x29   : > { %p9507_p9 = pnand %p9506_p7, %p9500_p2 }
  0x2b   : > { %9510 = shalt.err (!%p9507_p9)
}
  0x2c   : > { %s9824_s17 = smov 256   ;;  %s9825_s20 = smov 16  }
  0x2d   : > { %8193 = dma.hbm_to_vmem [thread:$0]  (!%p9928_p6), %s10576_s1, 90112, %s9917_s14, [#allocation6], %s9824_s17, %s9824_s17, %s9825_s20  }
  0x2e   : > { %s10578_s3 = sld [smem:[#allocation25_spill]] }
  0x34   : > { %s9511_s26 = scalar_lea.hbm %s10578_s3, 8192 }
  0x35   : > { %p9512_p4 = scmp.ne.s32.totalorder %s10578_s3, %s9511_s26  ;;  %p9518_p12 = scmp.lt.u32.totalorder %s9511_s26, %s10578_s3 }
  0x37   : > { %p9514_p10 = pnand %p9512_p4, %p9944_p8 }
  0x39   : > { %p9515_p11 = pneg %p9514_p10 }
  0x3b   : > { %p9520_p13 = pnand %p9518_p12, %p9515_p11 }
  0x3d   : > { %9523 = shalt.err (!%p9520_p13)
}
  0x3e   : > { %s9524_s14 = scalar_lea.vmem %s9932_s18, 8192  ;;  %p9532_p7 = scmp.lt.s32.totalorder %s9932_s18, %s9932_s18 }
  0x3f   : > { %p9525_p0 = scmp.ne.s32.totalorder %s9932_s18, %s9524_s14  ;;  %p9533_p9 = scmp.lt.s32.totalorder %s9524_s14, %s9524_s14 }
  0x41   : > { %p9527_p2 = pnand %p9525_p0, %p9944_p8  ;;  %p9534_p4 = por %p9533_p9, %p9532_p7 }
  0x43   : > { %p9528_p5 = pneg %p9527_p2 }
  0x45   : > { %p9535_p10 = pnand %p9534_p4, %p9528_p5 }
  0x47   : > { %9538 = shalt.err (!%p9535_p10)
}
  0x48   : > { %s9826_s17 = smov 128   ;;  %s9827_s9 = smov 8  }
  0x49   : > { %8199 = dma.hbm_to_vmem [thread:$0]  (!%p9928_p6), %s10578_s3, 8192, %s9932_s18, [#allocation9], %s9826_s17, %s9826_s17, %s9827_s9  }
  0x4a   : > { %s9539_s25 = scalar_lea.hbm %s10562_s5, 2048 }
  0x4b   : > { %p9540_p11 = scmp.ne.s32.totalorder %s10562_s5, %s9539_s25  ;;  %p9546_p0 = scmp.lt.u32.totalorder %s9539_s25, %s10562_s5 }
  0x4d   : > { %p9542_p12 = pnand %p9540_p11, %p9944_p8 }
  0x4f   : > { %p9543_p13 = pneg %p9542_p12 }
  0x51   : > { %p9548_p2 = pnand %p9546_p0, %p9543_p13 }
  0x53   : > { %9551 = shalt.err (!%p9548_p2)
}
  0x54   : > { %s9552_s14 = scalar_lea.vmem %s315_s21, 2048  ;;  %p9560_p4 = scmp.lt.s32.totalorder %s315_s21, %s315_s21 }
  0x55   : > { %p9553_p5 = scmp.ne.s32.totalorder %s315_s21, %s9552_s14  ;;  %p9561_p10 = scmp.lt.s32.totalorder %s9552_s14, %s9552_s14 }
  0x57   : > { %p9555_p7 = pnand %p9553_p5, %p9944_p8  ;;  %p9562_p1 = por %p9561_p10, %p9560_p4 }
  0x59   : > { %p9556_p9 = pneg %p9555_p7 }
  0x5b   : > { %p9563_p3 = pnand %p9562_p1, %p9556_p9 }
  0x5d   : > { %9566 = shalt.err (!%p9563_p3)
}
  0x5e   : > { %s9828_s18 = smov 64   ;;  %s9829_s17 = smov 4  }
  0x5f   : > { %8205 = dma.hbm_to_vmem [thread:$0]  (!%p9928_p6), %s10562_s5, 2048, %s315_s21, [#allocation12], %s9828_s18, %s9828_s18, %s9829_s17  }
  0x60   : > { %s9830_s22 = smov [#allocation14]   ;;  %s9831_s24 = smov [#allocation7]  }
  0x61   : > { %s338_s23 = sshll.u32 %s9830_s22, 4  ;;  %s280_s25 = sshll.u32 %s9831_s24, 4  ;;  %s339_s23 = int_to_ptr.vmem [resolvable:$true] %s338_s23  ;;  %s281_s25 = int_to_ptr.vmem [resolvable:$true] %s280_s25 }
  0x62   : > { %s9567_s29 = scalar_lea.hbm %s10564_s7, 1024 }
  0x63   : > { %p9568_p1 = scmp.ne.s32.totalorder %s10564_s7, %s9567_s29  ;;  %p9574_p12 = scmp.lt.u32.totalorder %s9567_s29, %s10564_s7 }
  0x65   : > { %p9570_p3 = pnand %p9568_p1, %p9944_p8 }
  0x67   : > { %p9571_p11 = pneg %p9570_p3 }
  0x69   : > { %p9576_p13 = pnand %p9574_p12, %p9571_p11 }
  0x6b   : > { %9579 = shalt.err (!%p9576_p13)
}
  0x6c   : > { %s9580_s21 = scalar_lea.vmem %s339_s23, 1024  ;;  %p9588_p7 = scmp.lt.s32.totalorder %s339_s23, %s339_s23 }
  0x6d   : > { %p9581_p0 = scmp.ne.s32.totalorder %s339_s23, %s9580_s21  ;;  %p9589_p9 = scmp.lt.s32.totalorder %s9580_s21, %s9580_s21 }
  0x6f   : > { %p9583_p2 = pnand %p9581_p0, %p9944_p8  ;;  %p9590_p4 = por %p9589_p9, %p9588_p7 }
  0x71   : > { %p9584_p5 = pneg %p9583_p2 }
  0x73   : > { %p9591_p10 = pnand %p9590_p4, %p9584_p5 }
  0x75   : > { %9594 = shalt.err (!%p9591_p10)
}
  0x76   : > { %8211 = dma.hbm_to_vmem [thread:$0]  (!%p9928_p6), %s10564_s7, 1024, %s339_s23, [#allocation15], %s9828_s18, %s9828_s18, %s9829_s17  }
  0x77   : > { %s9595_s22 = scalar_lea.hbm %s10559_s2, 64 }
  0x78   : > { %p9596_p1 = scmp.ne.s32.totalorder %s10559_s2, %s9595_s22  ;;  %p9602_p12 = scmp.lt.u32.totalorder %s9595_s22, %s10559_s2 }
  0x7a   : > { %p9598_p3 = pnand %p9596_p1, %p9944_p8 }
  0x7c   : > { %p9599_p11 = pneg %p9598_p3 }
  0x7e   : > { %p9604_p13 = pnand %p9602_p12, %p9599_p11 }
  0x80   : > { %9607 = shalt.err (!%p9604_p13)
}
  0x81   : > { %s9608_s13 = scalar_lea.vmem %s281_s25, 64  ;;  %p9616_p7 = scmp.lt.s32.totalorder %s281_s25, %s281_s25 }
  0x82   : > { %p9609_p0 = scmp.ne.s32.totalorder %s281_s25, %s9608_s13  ;;  %p9617_p9 = scmp.lt.s32.totalorder %s9608_s13, %s9608_s13 }
  0x84   : > { %p9611_p2 = pnand %p9609_p0, %p9944_p8  ;;  %p9618_p4 = por %p9617_p9, %p9616_p7 }
  0x86   : > { %p9612_p5 = pneg %p9611_p2 }
  0x88   : > { %p9619_p10 = pnand %p9618_p4, %p9612_p5 }
  0x8a   : > { %9622 = shalt.err (!%p9619_p10)
}
  0x8b   : > { %8196 = dma.hbm_to_vmem [thread:$0]  (!%p9928_p6), %s10559_s2, 64, %s281_s25, [#allocation6]  }
  0x8c   : > { %s9832_s23 = smov [#allocation10]   ;;  %s9833_s21 = smov [#allocation13]  }
  0x8d   : > { %s304_s14 = sshll.u32 %s9832_s23, 4  ;;  %s328_s9 = sshll.u32 %s9833_s21, 4  ;;  %s305_s14 = int_to_ptr.vmem [resolvable:$true] %s304_s14  ;;  %s329_s9 = int_to_ptr.vmem [resolvable:$true] %s328_s9 }
  0x8e   : > { %s9623_s3 = scalar_lea.hbm %s10561_s4, 32 }
  0x8f   : > { %p9624_p1 = scmp.ne.s32.totalorder %s10561_s4, %s9623_s3  ;;  %p9630_p12 = scmp.lt.u32.totalorder %s9623_s3, %s10561_s4 }
  0x91   : > { %p9626_p3 = pnand %p9624_p1, %p9944_p8 }
  0x93   : > { %p9627_p11 = pneg %p9626_p3 }
  0x95   : > { %p9632_p13 = pnand %p9630_p12, %p9627_p11 }
  0x97   : > { %9635 = shalt.err (!%p9632_p13)
}
  0x98   : > { %s9636_s25 = scalar_lea.vmem %s305_s14, 32  ;;  %p9644_p7 = scmp.lt.s32.totalorder %s305_s14, %s305_s14 }
  0x99   : > { %p9637_p0 = scmp.ne.s32.totalorder %s305_s14, %s9636_s25  ;;  %p9645_p9 = scmp.lt.s32.totalorder %s9636_s25, %s9636_s25 }
  0x9b   : > { %p9639_p2 = pnand %p9637_p0, %p9944_p8  ;;  %p9646_p4 = por %p9645_p9, %p9644_p7 }
  0x9d   : > { %p9640_p5 = pneg %p9639_p2 }
  0x9f   : > { %p9647_p10 = pnand %p9646_p4, %p9640_p5 }
  0xa1   : > { %9650 = shalt.err (!%p9647_p10)
}
  0xa2   : > { %8202 = dma.hbm_to_vmem [thread:$0]  (!%p9928_p6), %s10561_s4, 32, %s305_s14, [#allocation9]  }
  0xa3   : > { %s9651_s23 = scalar_lea.hbm %s10563_s6, 16 }
  0xa4   : > { %p9652_p1 = scmp.ne.s32.totalorder %s10563_s6, %s9651_s23  ;;  %p9658_p12 = scmp.lt.u32.totalorder %s9651_s23, %s10563_s6 }
  0xa6   : > { %p9654_p3 = pnand %p9652_p1, %p9944_p8 }
  0xa8   : > { %p9655_p11 = pneg %p9654_p3 }
  0xaa   : > { %p9660_p13 = pnand %p9658_p12, %p9655_p11 }
  0xac   : > { %9663 = shalt.err (!%p9660_p13)
}
  0xad   : > { %s9664_s22 = scalar_lea.vmem %s329_s9, 16  ;;  %s9671_s14 = scalar_lea.vmem %s329_s9, 32 }
  0xae   : > { %p9665_p0 = scmp.ne.s32.totalorder %s329_s9, %s9664_s22  ;;  %p9672_p7 = scmp.lt.s32.totalorder %s329_s9, %s329_s9 }
  0xaf   : > { %p9673_p9 = scmp.lt.s32.totalorder %s9671_s14, %s9664_s22 }
  0xb0   : > { %p9667_p2 = pnand %p9665_p0, %p9944_p8 }
  0xb1   : > { %p9674_p4 = por %p9673_p9, %p9672_p7 }
  0xb2   : > { %p9668_p5 = pneg %p9667_p2 }
  0xb4   : > { %p9675_p10 = pnand %p9674_p4, %p9668_p5 }
  0xb6   : > { %9678 = shalt.err (!%p9675_p10)
}
  0xb7   : > { %8208 = dma.hbm_to_vmem [thread:$0]  (!%p9928_p6), %s10563_s6, 16, %s329_s9, [#allocation12]  }
  0xb8   : > { %s9834_s28 = smov [#allocation16]   ;;  %s9679_s18 = scalar_lea.hbm %s10565_s8, 16 }
  0xb9   : > { %s352_s25 = sshll.u32 %s9834_s28, 4  ;;  %p9680_p1 = scmp.ne.s32.totalorder %s10565_s8, %s9679_s18  ;;  %s353_s25 = int_to_ptr.vmem [resolvable:$true] %s352_s25 }
  0xba   : > { %p9686_p12 = scmp.lt.u32.totalorder %s9679_s18, %s10565_s8 }
  0xbb   : > { %p9682_p3 = pnand %p9680_p1, %p9944_p8 }
  0xbd   : > { %p9683_p11 = pneg %p9682_p3 }
  0xbf   : > { %p9688_p13 = pnand %p9686_p12, %p9683_p11 }
  0xc1   : > { %9691 = shalt.err (!%p9688_p13)
}
  0xc2   : > { %s9692_s9 = scalar_lea.vmem %s353_s25, 16  ;;  %s9699_s1 = scalar_lea.vmem %s353_s25, 32 }
  0xc3   : > { %p9693_p0 = scmp.ne.s32.totalorder %s353_s25, %s9692_s9  ;;  %p9700_p7 = scmp.lt.s32.totalorder %s353_s25, %s353_s25 }
  0xc4   : > { %p9701_p9 = scmp.lt.s32.totalorder %s9699_s1, %s9692_s9 }
  0xc5   : > { %p9695_p2 = pnand %p9693_p0, %p9944_p8 }
  0xc6   : > { %p9702_p4 = por %p9701_p9, %p9700_p7 }
  0xc7   : > { %p9696_p5 = pneg %p9695_p2 }
  0xc9   : > { %p9703_p10 = pnand %p9702_p4, %p9696_p5 }
  0xcb   : > { %9706 = shalt.err (!%p9703_p10)
}
  0xcc   : > { %8214 = dma.hbm_to_vmem [thread:$0]  (!%p9928_p6), %s10565_s8, 16, %s353_s25, [#allocation15]  }
  0xcd   : > { %s7058_s27 = sadd.s32 4294967294, %s9819_s12   ;;  %s10099_s19 = sadd.s32 1, %s9819_s12  }
  0xce   : > { %s33_s14 = ssub.s32 %s9819_s12, %s10099_s19  ;;  %s36_s24 = sadd.s32 1, %s9815_s11 }
  0xcf   : > { %p34_p8 = scmp.eq.s32.totalorder %s33_s14, 0  ;;  %p43_p1 = scmp.ne.s32.totalorder %s9815_s11, %s9811_s10 }
  0xd0   : > { %p44_p3 = scmp.eq.s32.totalorder %s9819_s12, 0  ;;  %p49_p11 = scmp.ne.s32.totalorder %s9811_s10, %s9807_s30 }
  0xd1   : > { %s10110_s26 = scalar_select %p34_p8, %s9815_s11, %s36_s24  }
  0xd2   : > { %p45_p12 = por %p44_p3, %p43_p1  ;;  %p10579_p13 = scmp.eq.s32.totalorder %s9912_s15, 0 }
  0xd3   : > { %p241_p6 = scmp.eq.s32.totalorder %s9912_s15, 1  ;;  %p247_p2 = scmp.eq.s32.totalorder %s7058_s27, 1 }
  0xd4   : > { %p10114_p0 = por %p10579_p13, %p49_p11  ;;  %p8231_p5 = scmp.lt.s32.totalorder %s9819_s12, 2 }
  0xd5   : > { %s363_s25 = sand.u32 1, %s9815_s11   ;;  %p10121_p7 = por %p241_p6, %p43_p1 }
  0xd6   : > { %p10125_p9 = por %p247_p2, %p49_p11  ;;  %s8151_s18 = smul.u32 704, %s363_s25 }
  0xd7   : > { %s10581_s29 = scalar_select %p10121_p7, 1, 0 }
  0xd8   : > { %s10582_s13 = scalar_select %p10125_p9, 1, 0 }
  0xd9   : > { %s8152_s17 = smul.u32 11264, %s9819_s12  ;;  %p10130_p4 = pnand %p8231_p5, %p45_p12 }
  0xda   : > { %s367_s1 = scalar_lea.vmem [#allocation2], %s8151_s18  ;;  %s10141_s22 = scalar_lea.sflag [#allocation3], %s363_s25 }
  0xdb   : > { %s10137_s9 = scalar_lea.hbm %s10557_s0, %s8152_s17  ;;  %s375_s3 = sshll.u32 %s367_s1, 4  ;;  %s10139_s3 = int_to_ptr.vmem [resolvable:$true] %s375_s3 }
  0xdc   : > { %s9707_s27 = scalar_lea.hbm %s10137_s9, 11264  ;;  %p9709_p8 = pneg %p10130_p4 }
  0xdd   : > { %p9708_p10 = scmp.ne.s32.totalorder %s10137_s9, %s9707_s27  ;;  %s9712_s17 = scalar_lea.hbm %s10557_s0, 22528 }
  0xde   : > { %p9713_p11 = scmp.lt.u32.totalorder %s10137_s9, %s10557_s0  ;;  %p9714_p12 = scmp.lt.u32.totalorder %s9712_s17, %s9707_s27 }
  0xdf   : > { %p9710_p1 = pnand %p9709_p8, %p9708_p10  ;;  %p9716_p6 = scmp.lt.u32.totalorder %s9707_s27, %s10137_s9 }
  0xe0   : > { %p9715_p13 = por %p9714_p12, %p9713_p11 }
  0xe1   : > { %p9711_p3 = pneg %p9710_p1 }
  0xe2   : > { %p9717_p2 = por %p9716_p6, %p9715_p13 }
  0xe4   : > { %p9718_p5 = pnand %p9717_p2, %p9711_p3 }
  0xe6   : > { %9721 = shalt.err (!%p9718_p5)
}
  0xe7   : > { %s9722_s25 = scalar_lea.vmem %s10139_s3, 11264  ;;  %s9835_s18 = smov [#allocation2]  }
  0xe8   : > { %p9723_p10 = scmp.ne.s32.totalorder %s10139_s3, %s9722_s25  ;;  %s9727_s1 = sshll.u32 %s9835_s18, 4  ;;  %s9728_s1 = int_to_ptr.vmem [resolvable:$false] %s9727_s1 }
  0xe9   : > { %s9729_s14 = scalar_lea.vmem %s9728_s1, 22528  ;;  %p9730_p7 = scmp.lt.s32.totalorder %s10139_s3, %s9728_s1 }
  0xea   : > { %p9725_p1 = pnand %p9723_p10, %p9709_p8  ;;  %p9731_p11 = scmp.lt.s32.totalorder %s9729_s14, %s9722_s25 }
  0xec   : > { %p9726_p9 = pneg %p9725_p1  ;;  %p9732_p12 = por %p9731_p11, %p9730_p7 }
  0xee   : > { %p9733_p13 = pnand %p9732_p12, %p9726_p9 }
  0xf0   : > { %9736 = shalt.err (!%p9733_p13)
}
  0xf1   : > { %s9836_s27 = smov 2816   ;;  %s9837_s24 = smov 176  }
  0xf2   : > { %8218 = dma.hbm_to_vmem [thread:$0]  (!%p10130_p4), %s10137_s9, 11264, %s10139_s3, %s10141_s22, %s9836_s27, %s9836_s27, %s9837_s24  }
  0xf3   : > { %p10584_p8 = scmp.ne.s32.totalorder %s10574_s16, 0 }
  0xf4   : > { %s10172_s17 = sand.u32 (!%p10584_p8), 1, %s9811_s10  }
  0xf5   : > { %387 = sbr.rel (%p10584_p8) target bundleno = 1972 (0x7b4), region = 56  ;;  %s390_s20 = scalar_lea.sflag (!%p10584_p8), [#allocation3], %s10172_s17 }
  0xf6   : > { %s8153_s21 = smul.u32 (!%p10584_p8), 704, %s10172_s17 }
  0xf8   : > { %s10176_s25 = scalar_lea.vmem (!%p10584_p8), [#allocation2], %s8153_s21 }
  0xfc   : > { %9782 = dma.done.wait (%p10114_p0), %s390_s20, 11264  }
  0xfd   : > { %9784 = vsyncadd (%p10114_p0), %s390_s20, 4294956032  ;;  %p10585_p7 = scmp.eq.s32.totalorder %s9912_s15, 0 }
  0xff   : > { %9786 = dma.done.wait (%p10585_p7), [#allocation6], 90176   ;;  %p10586_p9 = pmov %p10585_p7 }
 0x100   : > { %p10587_p4 = pmov %p10585_p7 }
 0x101   : > { %9788 = vsyncadd (%p10586_p9), [#allocation6], 4294877120 }
 0x102   : > { %9790 = dma.done.wait (%p10587_p4), [#allocation9], 8224   ;;  %p10588_p3 = pmov %p10587_p4 }
 0x104   : > { %9792 = vsyncadd (%p10588_p3), [#allocation9], 4294959072  ;;  %p10589_p6 = pmov %p10588_p3 }
 0x105   : > { %p10590_p2 = pmov %p10588_p3 }
 0x106   : > { %9794 = dma.done.wait (%p10589_p6), [#allocation12], 2064  }
 0x107   : > { %9796 = vsyncadd (%p10590_p2), [#allocation12], 4294965232  ;;  %p10591_p0 = pmov %p10590_p2 }
 0x109   : > { %9798 = dma.done.wait (%p10591_p0), [#allocation15], 1040   ;;  %p10592_p5 = pmov %p10591_p0 }
 0x10a   : > { %v8291_v0 = vld [vmem:[#allocation5 + $0x4] ss:$16 sps:$4 sm:$0xff]   ;;  %v8295_v2 = vld [vmem:[#allocation5] ss:$16 sps:$4 sm:$0xff]   ;;  %v464_v46 = vld [vmem:[%s10176_s25 + $0x8] sm:$0xff]  ;;  %s7081_s16 = sshll.u32 %s10172_s17, 4 }
 0x10b   : > { %9800 = vsyncadd (%p10592_p5), [#allocation15], 4294966256  ;;  %v8293_v1 = vld [vmem:[#allocation5 + $0x204] ss:$16 sps:$4 sm:$0xff]   ;;  %4841 = vmatprep.subr.bf16.mxu1 %v8291_v0  ;;  %v8296_v3 = vld [vmem:[#allocation5 + $0x200] ss:$16 sps:$4 sm:$0xff]  }
 0x10c   : > { %4894 = vmatprep.subr.bf16.mxu0 %v8293_v1  ;;  %v8297_v4 = vld [vmem:[#allocation5 + $0x24] ss:$16 sps:$4 sm:$0xff]   ;;  %4842 = vmatpush1.bf16.msra.mxu1 %v8295_v2  ;;  %v8301_v6 = vld [vmem:[#allocation5 + $0x20] ss:$16 sps:$4 sm:$0xff]   ;;  %v486_v49 = vld [vmem:[%s10176_s25 + $0xb8] sm:$0xff]  ;;  %s7889_s28 = sshll.u32 %s9912_s15, 8 }
 0x10d   : > { %4895 = vmatpush1.bf16.msra.mxu0 %v8296_v3  ;;  %v8299_v5 = vld [vmem:[#allocation5 + $0x224] ss:$16 sps:$4 sm:$0xff]   ;;  %4843 = vmatprep.subr.bf16.mxu1 %v8297_v4  ;;  %v8302_v7 = vld [vmem:[#allocation5 + $0x220] ss:$16 sps:$4 sm:$0xff]   ;;  %v10200_v50 = vpack.c.bf16 %v486_v49, %v464_v46  ;;  %v466_v51 = vld [vmem:[%s10176_s25 + $0x18] sm:$0xff]  ;;  %s459_s23 = scalar_lea.vmem [#allocation17], %s7081_s16 }
 0x10e   : > { %4896 = vmatprep.subr.bf16.mxu0 %v8299_v5  ;;  %v8303_v8 = vld [vmem:[#allocation5 + $0x44] ss:$16 sps:$4 sm:$0xff]   ;;  %v8307_v10 = vld [vmem:[#allocation5 + $0x40] ss:$16 sps:$4 sm:$0xff]   ;;  %v488_v52 = vld [vmem:[%s10176_s25 + $0xc8] sm:$0xff]  ;;  %s6909_s9 = sshll.u32 %s459_s23, 4  ;;  %s10513_s9 = int_to_ptr.vmem [resolvable:$true] %s6909_s9 }
 0x10f   : > { %v8305_v9 = vld [vmem:[#allocation5 + $0x244] ss:$16 sps:$4 sm:$0xff]   ;;  %v8308_v11 = vld [vmem:[#allocation5 + $0x240] ss:$16 sps:$4 sm:$0xff]   ;;  %v10204_v55 = vpack.c.bf16 %v488_v52, %v466_v51  ;;  %4873 = vmatprep.mubr.bf16.mxu1 %v10200_v50  ;;  %s10593_s18 = sld [smem:[#allocation26_spill]]  ;;  %s6896_s15 = scalar_lea.sflag [#allocation4], %s10172_s17 }
 0x110   : > { %4844 = vmatpush1.bf16.msra.mxu1 %v8301_v6  ;;  %v8309_v12 = vld [vmem:[#allocation5 + $0x64] ss:$16 sps:$4 sm:$0xff]   ;;  %v8313_v14 = vld [vmem:[#allocation5 + $0x60] ss:$16 sps:$4 sm:$0xff]   ;;  %s9737_s14 = scalar_lea.vmem %s10513_s9, 256  ;;  %p10594_p1 = scmp.ne.s32.totalorder %s10581_s29, 0 }
 0x111   : > { %4897 = vmatpush1.bf16.msra.mxu0 %v8302_v7  ;;  %4845 = vmatprep.subr.bf16.mxu1 %v8303_v8  ;;  %v8311_v13 = vld [vmem:[#allocation5 + $0x264] ss:$16 sps:$4 sm:$0xff]   ;;  %v8314_v15 = vld [vmem:[#allocation5 + $0x260] ss:$16 sps:$4 sm:$0xff]   ;;  %p9738_p10 = scmp.ne.s32.totalorder %s10513_s9, %s9737_s14  ;;  %s9838_s27 = smov [#allocation17]  }
 0x112   : > { %4898 = vmatprep.subr.bf16.mxu0 %v8305_v9  ;;  %v8315_v16 = vld [vmem:[#allocation5 + $0x84] ss:$16 sps:$4 sm:$0xff]   ;;  %v8319_v18 = vld [vmem:[#allocation5 + $0x80] ss:$16 sps:$4 sm:$0xff]   ;;  %4926 = vmatprep.mubr.bf16.mxu0 %v10204_v55  ;;  %s9741_s24 = sshll.u32 %s9838_s27, 4  ;;  %s9742_s24 = int_to_ptr.vmem [resolvable:$false] %s9741_s24 }
 0x113   : > { %v8317_v17 = vld [vmem:[#allocation5 + $0x284] ss:$16 sps:$4 sm:$0xff]   ;;  %v8320_v19 = vld [vmem:[#allocation5 + $0x280] ss:$16 sps:$4 sm:$0xff]   ;;  %p9739_p11 = pnand %p9738_p10, %p10594_p1  ;;  %s9743_s21 = scalar_lea.vmem %s9742_s24, 512 }
 0x114   : > { %4846 = vmatpush1.bf16.msra.mxu1 %v8307_v10  ;;  %v8321_v20 = vld [vmem:[#allocation5 + $0xa4] ss:$16 sps:$4 sm:$0xff]   ;;  %v8325_v22 = vld [vmem:[#allocation5 + $0xa0] ss:$16 sps:$4 sm:$0xff]   ;;  %p9744_p13 = scmp.lt.s32.totalorder %s10513_s9, %s9742_s24  ;;  %p9745_p8 = scmp.lt.s32.totalorder %s9743_s21, %s9737_s14 }
 0x115   : > { %4899 = vmatpush1.bf16.msra.mxu0 %v8308_v11  ;;  %4847 = vmatprep.subr.bf16.mxu1 %v8309_v12  ;;  %v8323_v21 = vld [vmem:[#allocation5 + $0x2a4] ss:$16 sps:$4 sm:$0xff]   ;;  %v8326_v23 = vld [vmem:[#allocation5 + $0x2a0] ss:$16 sps:$4 sm:$0xff]   ;;  %v8392_v11 = vld [vmem:[#allocation5 + $0xc] ss:$16 sps:$4 sm:$0xff]   ;;  %s10511_s1 = scalar_lea.hbm %s10593_s18, %s7889_s28  ;;  %p9740_p12 = pneg %p9739_p11 }
 0x116   : > { %4900 = vmatprep.subr.bf16.mxu0 %v8311_v13  ;;  %v8327_v24 = vld [vmem:[#allocation5 + $0xc4] ss:$16 sps:$4 sm:$0xff]   ;;  %v8331_v26 = vld [vmem:[#allocation5 + $0xc0] ss:$16 sps:$4 sm:$0xff]   ;;  %p9746_p7 = por %p9745_p8, %p9744_p13 }
 0x117   : > { %v8329_v25 = vld [vmem:[#allocation5 + $0x2c4] ss:$16 sps:$4 sm:$0xff]   ;;  %v8332_v27 = vld [vmem:[#allocation5 + $0x2c0] ss:$16 sps:$4 sm:$0xff]  }
 0x118   : > { %4848 = vmatpush1.bf16.msra.mxu1 %v8313_v14  ;;  %v8333_v28 = vld [vmem:[#allocation5 + $0xe4] ss:$16 sps:$4 sm:$0xff]   ;;  %v8337_v30 = vld [vmem:[#allocation5 + $0xe0] ss:$16 sps:$4 sm:$0xff]   ;;  %v8390_v14 = vld [vmem:[#allocation5 + $0x8] ss:$16 sps:$4 sm:$0xff]   ;;  %p9747_p9 = pnand %p9746_p7, %p9740_p12 }
 0x119   : > { %4901 = vmatpush1.bf16.msra.mxu0 %v8314_v15  ;;  %4849 = vmatprep.subr.bf16.mxu1 %v8315_v16  ;;  %v8335_v29 = vld [vmem:[#allocation5 + $0x2e4] ss:$16 sps:$4 sm:$0xff]   ;;  %v8338_v31 = vld [vmem:[#allocation5 + $0x2e0] ss:$16 sps:$4 sm:$0xff]  }
 0x11a   : > { %4902 = vmatprep.subr.bf16.mxu0 %v8317_v17  ;;  %v8339_v32 = vld [vmem:[#allocation5 + $0x104] ss:$16 sps:$4 sm:$0xff]   ;;  %v8343_v34 = vld [vmem:[#allocation5 + $0x100] ss:$16 sps:$4 sm:$0xff]   ;;  %v8398_v17 = vld [vmem:[#allocation5 + $0x2c] ss:$16 sps:$4 sm:$0xff]  }
 0x11b   : > { %v8341_v33 = vld [vmem:[#allocation5 + $0x304] ss:$16 sps:$4 sm:$0xff]   ;;  %v8344_v35 = vld [vmem:[#allocation5 + $0x300] ss:$16 sps:$4 sm:$0xff]  }
 0x11c   : > { %4850 = vmatpush1.bf16.msra.mxu1 %v8319_v18  ;;  %v8345_v36 = vld [vmem:[#allocation5 + $0x124] ss:$16 sps:$4 sm:$0xff]   ;;  %v8349_v38 = vld [vmem:[#allocation5 + $0x120] ss:$16 sps:$4 sm:$0xff]  }
 0x11d   : > { %4903 = vmatpush1.bf16.msra.mxu0 %v8320_v19  ;;  %4851 = vmatprep.subr.bf16.mxu1 %v8321_v20  ;;  %v8347_v37 = vld [vmem:[#allocation5 + $0x324] ss:$16 sps:$4 sm:$0xff]   ;;  %v8350_v39 = vld [vmem:[#allocation5 + $0x320] ss:$16 sps:$4 sm:$0xff]   ;;  %v8396_v19 = vld [vmem:[#allocation5 + $0x28] ss:$16 sps:$4 sm:$0xff]  }
 0x11e   : > { %4904 = vmatprep.subr.bf16.mxu0 %v8323_v21  ;;  %v8351_v40 = vld [vmem:[#allocation5 + $0x144] ss:$16 sps:$4 sm:$0xff]   ;;  %v8355_v42 = vld [vmem:[#allocation5 + $0x140] ss:$16 sps:$4 sm:$0xff]   ;;  %v8404_v21 = vld [vmem:[#allocation5 + $0x4c] ss:$16 sps:$4 sm:$0xff]  }
 0x11f   : > { %v8353_v41 = vld [vmem:[#allocation5 + $0x344] ss:$16 sps:$4 sm:$0xff]   ;;  %v8356_v43 = vld [vmem:[#allocation5 + $0x340] ss:$16 sps:$4 sm:$0xff]  }
 0x120   : > { %4852 = vmatpush1.bf16.msra.mxu1 %v8325_v22  ;;  %v8357_v44 = vld [vmem:[#allocation5 + $0x164] ss:$16 sps:$4 sm:$0xff]   ;;  %v8361_v47 = vld [vmem:[#allocation5 + $0x160] ss:$16 sps:$4 sm:$0xff]  }
 0x121   : > { %4905 = vmatpush1.bf16.msra.mxu0 %v8326_v23  ;;  %4853 = vmatprep.subr.bf16.mxu1 %v8327_v24  ;;  %v8359_v45 = vld [vmem:[#allocation5 + $0x364] ss:$16 sps:$4 sm:$0xff]   ;;  %v8362_v48 = vld [vmem:[#allocation5 + $0x360] ss:$16 sps:$4 sm:$0xff]   ;;  %v8402_v23 = vld [vmem:[#allocation5 + $0x48] ss:$16 sps:$4 sm:$0xff]  }
 0x122   : > { %4906 = vmatprep.subr.bf16.mxu0 %v8329_v25  ;;  %v8363_v53 = vld [vmem:[#allocation5 + $0x184] ss:$16 sps:$4 sm:$0xff]   ;;  %v8367_v56 = vld [vmem:[#allocation5 + $0x180] ss:$16 sps:$4 sm:$0xff]   ;;  %v8410_v25 = vld [vmem:[#allocation5 + $0x6c] ss:$16 sps:$4 sm:$0xff]  }
 0x123   : > { %v8365_v54 = vld [vmem:[#allocation5 + $0x384] ss:$16 sps:$4 sm:$0xff]   ;;  %v8368_v57 = vld [vmem:[#allocation5 + $0x380] ss:$16 sps:$4 sm:$0xff]  }
 0x124   : > { %4854 = vmatpush1.bf16.msra.mxu1 %v8331_v26  ;;  %v8369_v58 = vld [vmem:[#allocation5 + $0x1a4] ss:$16 sps:$4 sm:$0xff]   ;;  %v8373_v60 = vld [vmem:[#allocation5 + $0x1a0] ss:$16 sps:$4 sm:$0xff]  }
 0x125   : > { %4907 = vmatpush1.bf16.msra.mxu0 %v8332_v27  ;;  %4855 = vmatprep.subr.bf16.mxu1 %v8333_v28  ;;  %v8371_v59 = vld [vmem:[#allocation5 + $0x3a4] ss:$16 sps:$4 sm:$0xff]   ;;  %v8374_v61 = vld [vmem:[#allocation5 + $0x3a0] ss:$16 sps:$4 sm:$0xff]   ;;  %v8408_v27 = vld [vmem:[#allocation5 + $0x68] ss:$16 sps:$4 sm:$0xff]  }
 0x126   : > { %4908 = vmatprep.subr.bf16.mxu0 %v8335_v29  ;;  %v8375_v62 = vld [vmem:[#allocation5 + $0x1c4] ss:$16 sps:$4 sm:$0xff]   ;;  %v8379_v0 = vld [vmem:[#allocation5 + $0x1c0] ss:$16 sps:$4 sm:$0xff]   ;;  %v8416_v29 = vld [vmem:[#allocation5 + $0x8c] ss:$16 sps:$4 sm:$0xff]  }
 0x127   : > { %v8377_v63 = vld [vmem:[#allocation5 + $0x3c4] ss:$16 sps:$4 sm:$0xff]   ;;  %v8380_v1 = vld [vmem:[#allocation5 + $0x3c0] ss:$16 sps:$4 sm:$0xff]  }
 0x128   : > { %4856 = vmatpush1.bf16.msra.mxu1 %v8337_v30  ;;  %v8381_v2 = vld [vmem:[#allocation5 + $0x1e4] ss:$16 sps:$4 sm:$0xff]   ;;  %v8385_v4 = vld [vmem:[#allocation5 + $0x1e0] ss:$16 sps:$4 sm:$0xff]  }
 0x129   : > { %4909 = vmatpush1.bf16.msra.mxu0 %v8338_v31  ;;  %4857 = vmatprep.subr.bf16.mxu1 %v8339_v32  ;;  %v8383_v3 = vld [vmem:[#allocation5 + $0x3e4] ss:$16 sps:$4 sm:$0xff]   ;;  %v8386_v5 = vld [vmem:[#allocation5 + $0x3e0] ss:$16 sps:$4 sm:$0xff]   ;;  %v8414_v31 = vld [vmem:[#allocation5 + $0x88] ss:$16 sps:$4 sm:$0xff]  }
 0x12a   : > { %4910 = vmatprep.subr.bf16.mxu0 %v8341_v33  ;;  %v463_v6 = vld [vmem:[%s10176_s25] sm:$0xff]  ;;  %v485_v7 = vld [vmem:[%s10176_s25 + $0xb0] sm:$0xff]  ;;  %v8422_v33 = vld [vmem:[#allocation5 + $0xac] ss:$16 sps:$4 sm:$0xff]  }
 0x12b   : > { %v8389_v8 = vld [vmem:[#allocation5 + $0x404] ss:$16 sps:$4 sm:$0xff]   ;;  %v10212_v12 = vpack.c.bf16 %v485_v7, %v463_v6  ;;  %v8387_v13 = vld [vmem:[#allocation5 + $0x400] ss:$16 sps:$4 sm:$0xff]   ;;  %v8450_v7 = vld [vmem:[#allocation5 + $0x148] ss:$16 sps:$4 sm:$0xff]  }
 0x12c   : > { %4858 = vmatpush1.bf16.msra.mxu1 %v8343_v34  ;;  %v465_v9 = vld [vmem:[%s10176_s25 + $0x10] sm:$0xff]  ;;  %v487_v10 = vld [vmem:[%s10176_s25 + $0xc0] sm:$0xff] }
 0x12d   : > { %4911 = vmatpush1.bf16.msra.mxu0 %v8344_v35  ;;  %4859 = vmatprep.subr.bf16.mxu1 %v8345_v36  ;;  %v10214_v15 = vpack.c.bf16 %v487_v10, %v465_v9  ;;  %v8395_v16 = vld [vmem:[#allocation5 + $0x424] ss:$16 sps:$4 sm:$0xff]   ;;  %v8393_v18 = vld [vmem:[#allocation5 + $0x420] ss:$16 sps:$4 sm:$0xff]   ;;  %v8420_v35 = vld [vmem:[#allocation5 + $0xa8] ss:$16 sps:$4 sm:$0xff]  }
 0x12e   : > { %4912 = vmatprep.subr.bf16.mxu0 %v8347_v37  ;;  %v8401_v20 = vld [vmem:[#allocation5 + $0x444] ss:$16 sps:$4 sm:$0xff]   ;;  %v8399_v22 = vld [vmem:[#allocation5 + $0x440] ss:$16 sps:$4 sm:$0xff]   ;;  %v508_v36 = vld [vmem:[%s10176_s25 + $0x168] sm:$0xff] }
 0x12f   : > { %v8407_v24 = vld [vmem:[#allocation5 + $0x464] ss:$16 sps:$4 sm:$0xff]   ;;  %v8405_v26 = vld [vmem:[#allocation5 + $0x460] ss:$16 sps:$4 sm:$0xff]   ;;  %v530_v37 = vld [vmem:[%s10176_s25 + $0x218] sm:$0xff] }
 0x130   : > { %4860 = vmatpush1.bf16.msra.mxu1 %v8349_v38  ;;  %v8413_v28 = vld [vmem:[#allocation5 + $0x484] ss:$16 sps:$4 sm:$0xff]   ;;  %v8411_v30 = vld [vmem:[#allocation5 + $0x480] ss:$16 sps:$4 sm:$0xff]   ;;  %v8458_v9 = vld [vmem:[#allocation5 + $0x16c] ss:$16 sps:$4 sm:$0xff]  }
 0x131   : > { %4913 = vmatpush1.bf16.msra.mxu0 %v8350_v39  ;;  %4861 = vmatprep.subr.bf16.mxu1 %v8351_v40  ;;  %v8419_v32 = vld [vmem:[#allocation5 + $0x4a4] ss:$16 sps:$4 sm:$0xff]   ;;  %v8417_v34 = vld [vmem:[#allocation5 + $0x4a0] ss:$16 sps:$4 sm:$0xff]   ;;  %v10222_v40 = vpack.c.bf16 %v530_v37, %v508_v36 }
 0x132   : > { %4914 = vmatprep.subr.bf16.mxu0 %v8353_v41  ;;  %v507_v38 = vld [vmem:[%s10176_s25 + $0x160] sm:$0xff]  ;;  %v529_v39 = vld [vmem:[%s10176_s25 + $0x210] sm:$0xff] }
 0x133   : > { %v10224_v41 = vpack.c.bf16 %v529_v39, %v507_v38  ;;  %v509_v49 = vld [vmem:[%s10176_s25 + $0x170] sm:$0xff]  ;;  %v531_v51 = vld [vmem:[%s10176_s25 + $0x220] sm:$0xff]  ;;  %v8494_v38 = vld [vmem:[#allocation5 + $0x22c] ss:$16 sps:$4 sm:$0xff]  }
 0x134   : > { %4862 = vmatpush1.bf16.msra.mxu1 %v8355_v42  ;;  %v510_v42 = vld [vmem:[%s10176_s25 + $0x178] sm:$0xff]  ;;  %v8431_v52 = vld [vmem:[#allocation5 + $0x4e4] ss:$16 sps:$4 sm:$0xff]   ;;  %v8447_v6 = vld [vmem:[#allocation5 + $0x540] ss:$16 sps:$4 sm:$0xff]  }
 0x135   : > { %4915 = vmatpush1.bf16.msra.mxu0 %v8356_v43  ;;  %4863 = vmatprep.subr.bf16.mxu1 %v8357_v44  ;;  %v532_v43 = vld [vmem:[%s10176_s25 + $0x228] sm:$0xff]  ;;  %v8425_v44 = vld [vmem:[#allocation5 + $0x4c4] ss:$16 sps:$4 sm:$0xff]   ;;  %v8453_v10 = vld [vmem:[#allocation5 + $0x560] ss:$16 sps:$4 sm:$0xff]  }
 0x136   : > { %4916 = vmatprep.subr.bf16.mxu0 %v8359_v45  ;;  %v8428_v45 = vld [vmem:[#allocation5 + $0xcc] ss:$16 sps:$4 sm:$0xff]   ;;  %v10228_v46 = vpack.c.bf16 %v532_v43, %v510_v42  ;;  %v8491_v37 = vld [vmem:[#allocation5 + $0x624] ss:$16 sps:$4 sm:$0xff]   ;;  %v8489_v43 = vld [vmem:[#allocation5 + $0x620] ss:$16 sps:$4 sm:$0xff]  }
 0x137   : > { %v512_v39 = vld [vmem:[%s10176_s25 + $0x188] sm:$0xff]  ;;  %v534_v42 = vld [vmem:[%s10176_s25 + $0x238] sm:$0xff] }
 0x138   : > { %4864 = vmatpush1.bf16.msra.mxu1 %v8361_v47  ;;  %v8423_v47 = vld [vmem:[#allocation5 + $0x4c0] ss:$16 sps:$4 sm:$0xff]  }
 0x139   : > { %4917 = vmatpush1.bf16.msra.mxu0 %v8362_v48  ;;  %4865 = vmatprep.subr.bf16.mxu1 %v8363_v53  ;;  %v8426_v48 = vld [vmem:[#allocation5 + $0xc8] ss:$16 sps:$4 sm:$0xff]   ;;  %v10235_v53 = vpack.c.bf16 %v531_v51, %v509_v49  ;;  %v511_v49 = vld [vmem:[%s10176_s25 + $0x180] sm:$0xff]  ;;  %v533_v51 = vld [vmem:[%s10176_s25 + $0x230] sm:$0xff] }
 0x13a   : > { %4918 = vmatprep.subr.bf16.mxu0 %v8365_v54  ;;  %v8434_v54 = vld [vmem:[#allocation5 + $0xec] ss:$16 sps:$4 sm:$0xff]  }
 0x13c   : > { %4866 = vmatpush1.bf16.msra.mxu1 %v8367_v56  ;;  %v468_v56 = vld [vmem:[%s10176_s25 + $0x28] sm:$0xff] }
 0x13d   : > { %4919 = vmatpush1.bf16.msra.mxu0 %v8368_v57  ;;  %4867 = vmatprep.subr.bf16.mxu1 %v8369_v58  ;;  %v490_v57 = vld [vmem:[%s10176_s25 + $0xd8] sm:$0xff]  ;;  %v8429_v58 = vld [vmem:[#allocation5 + $0x4e0] ss:$16 sps:$4 sm:$0xff]  }
 0x13e   : > { %4920 = vmatprep.subr.bf16.mxu0 %v8371_v59  ;;  %v8432_v59 = vld [vmem:[#allocation5 + $0xe8] ss:$16 sps:$4 sm:$0xff]  }
 0x140   : > { %4868 = vmatpush1.bf16.msra.mxu1 %v8373_v60  ;;  %v10241_v60 = vpack.c.bf16 %v490_v57, %v468_v56  ;;  %v10258_v56 = vpack.c.bf16 %v533_v51, %v511_v49  ;;  %v492_v57 = vld [vmem:[%s10176_s25 + $0xe8] sm:$0xff]  ;;  %v8573_v49 = vld [vmem:[#allocation5 + $0x7e0] ss:$16 sps:$4 sm:$0xff]  }
 0x141   : > { %4921 = vmatpush1.bf16.msra.mxu0 %v8374_v61  ;;  %4869 = vmatprep.subr.bf16.mxu1 %v8375_v62  ;;  %v8437_v61 = vld [vmem:[#allocation5 + $0x504] ss:$16 sps:$4 sm:$0xff]   ;;  %v8440_v62 = vld [vmem:[#allocation5 + $0x10c] ss:$16 sps:$4 sm:$0xff]   ;;  %v8576_v51 = vld [vmem:[#allocation5 + $0x3e8] ss:$16 sps:$4 sm:$0xff]  }
 0x142   : > { %4922 = vmatprep.subr.bf16.mxu0 %v8377_v63  ;;  %v8435_v63 = vld [vmem:[#allocation5 + $0x500] ss:$16 sps:$4 sm:$0xff]  }
 0x144   : > { %4870 = vmatpush1.bf16.msra.mxu1 %v8379_v0  ;;  %v8438_v0 = vld [vmem:[#allocation5 + $0x108] ss:$16 sps:$4 sm:$0xff]  }
 0x145   : > { %4923 = vmatpush1.bf16.msra.mxu0 %v8380_v1  ;;  %4871 = vmatprep.subr.bf16.mxu1 %v8381_v2  ;;  %v8443_v1 = vld [vmem:[#allocation5 + $0x524] ss:$16 sps:$4 sm:$0xff]   ;;  %v8441_v2 = vld [vmem:[#allocation5 + $0x520] ss:$16 sps:$4 sm:$0xff]  }
 0x146   : > { %4924 = vmatprep.subr.bf16.mxu0 %v8383_v3  ;;  %v8444_v3 = vld [vmem:[#allocation5 + $0x128] ss:$16 sps:$4 sm:$0xff]  }
 0x148   : > { %4872 = vmatpush1.bf16.msra.mxu1 %v8385_v4  ;;  %v8449_v4 = vld [vmem:[#allocation5 + $0x544] ss:$16 sps:$4 sm:$0xff]  }
 0x149   : > { %4925 = vmatpush1.bf16.msra.mxu0 %v8386_v5  ;;  %5424 = vmatprep.subr.bf16.mxu1 %v8392_v11  ;;  %v8452_v5 = vld [vmem:[#allocation5 + $0x14c] ss:$16 sps:$4 sm:$0xff]   ;;  %v8456_v11 = vld [vmem:[#allocation5 + $0x168] ss:$16 sps:$4 sm:$0xff]  }
 0x14a   : > { %4947 = vmatprep.subr.bf16.mxu0 %v8389_v8  ;;  %v8455_v8 = vld [vmem:[#allocation5 + $0x564] ss:$16 sps:$4 sm:$0xff]  }
 0x14b   : > { %4874 = vmatmul.mubr.bf16.vlgmr.msra.gmra.mrb[0].mxu1 %v10212_v12 }
 0x14c   : > { %4927 = vmatmul.mubr.bf16.vlgmr.msra.gmra.mrb[0].mxu0 %v10214_v15  ;;  %5425 = vmatpush1.bf16.msra.mxu1 %v8390_v14  ;;  %v8464_v14 = vld [vmem:[#allocation5 + $0x18c] ss:$16 sps:$4 sm:$0xff]  }
 0x14d   : > { %4948 = vmatpush1.bf16.msra.mxu0 %v8387_v13  ;;  %5426 = vmatprep.subr.bf16.mxu1 %v8398_v17  ;;  %v8461_v13 = vld [vmem:[#allocation5 + $0x584] ss:$16 sps:$4 sm:$0xff]   ;;  %v8462_v17 = vld [vmem:[#allocation5 + $0x188] ss:$16 sps:$4 sm:$0xff]  }
 0x14e   : > { %4949 = vmatprep.subr.bf16.mxu0 %v8395_v16  ;;  %4883 = vmatprep.mubr.bf16.mxu1 %v10222_v40  ;;  %v8459_v16 = vld [vmem:[#allocation5 + $0x580] ss:$16 sps:$4 sm:$0xff]  }
 0x14f   : > { %4936 = vmatprep.mubr.bf16.mxu0 %v10228_v46 }
 0x150   : > { %5427 = vmatpush1.bf16.msra.mxu1 %v8396_v19  ;;  %v8470_v19 = vld [vmem:[#allocation5 + $0x1ac] ss:$16 sps:$4 sm:$0xff]  }
 0x151   : > { %4950 = vmatpush1.bf16.msra.mxu0 %v8393_v18  ;;  %5428 = vmatprep.subr.bf16.mxu1 %v8404_v21  ;;  %v8467_v18 = vld [vmem:[#allocation5 + $0x5a4] ss:$16 sps:$4 sm:$0xff]   ;;  %v8468_v21 = vld [vmem:[#allocation5 + $0x1a8] ss:$16 sps:$4 sm:$0xff]  }
 0x152   : > { %4951 = vmatprep.subr.bf16.mxu0 %v8401_v20  ;;  %v8465_v20 = vld [vmem:[#allocation5 + $0x5a0] ss:$16 sps:$4 sm:$0xff]  }
 0x153   : > { %4884 = vmatmul.mubr.bf16.gmra.mrb[4].mxu1 %v10224_v41 }
 0x154   : > { %5429 = vmatpush1.bf16.msra.mxu1 %v8402_v23  ;;  %4937 = vmatmul.mubr.bf16.gmra.mrb[4].mxu0 %v10235_v53  ;;  %v8476_v23 = vld [vmem:[#allocation5 + $0x1cc] ss:$16 sps:$4 sm:$0xff]  }
 0x155   : > { %4952 = vmatpush1.bf16.msra.mxu0 %v8399_v22  ;;  %5430 = vmatprep.subr.bf16.mxu1 %v8410_v25  ;;  %v8473_v22 = vld [vmem:[#allocation5 + $0x5c4] ss:$16 sps:$4 sm:$0xff]   ;;  %v8474_v25 = vld [vmem:[#allocation5 + $0x1c8] ss:$16 sps:$4 sm:$0xff]  }
 0x156   : > { %4953 = vmatprep.subr.bf16.mxu0 %v8407_v24  ;;  %5456 = vmatprep.mubr.bf16.mxu1 %v10200_v50  ;;  %v8446_v50 = vld [vmem:[#allocation5 + $0x12c] ss:$16 sps:$4 sm:$0xff]   ;;  %v8471_v24 = vld [vmem:[#allocation5 + $0x5c0] ss:$16 sps:$4 sm:$0xff]  }
 0x157   : > { %4979 = vmatprep.mubr.bf16.mxu0 %v10241_v60 }
 0x158   : > { %5431 = vmatpush1.bf16.msra.mxu1 %v8408_v27  ;;  %v8482_v27 = vld [vmem:[#allocation5 + $0x1ec] ss:$16 sps:$4 sm:$0xff]  }
 0x159   : > { %4954 = vmatpush1.bf16.msra.mxu0 %v8405_v26  ;;  %5432 = vmatprep.subr.bf16.mxu1 %v8416_v29  ;;  %v8479_v26 = vld [vmem:[#allocation5 + $0x5e4] ss:$16 sps:$4 sm:$0xff]   ;;  %v8480_v29 = vld [vmem:[#allocation5 + $0x1e8] ss:$16 sps:$4 sm:$0xff]  }
 0x15a   : > { %4955 = vmatprep.subr.bf16.mxu0 %v8413_v28  ;;  %v8477_v28 = vld [vmem:[#allocation5 + $0x5e0] ss:$16 sps:$4 sm:$0xff]  }
 0x15c   : > { %5433 = vmatpush1.bf16.msra.mxu1 %v8414_v31  ;;  %v467_v31 = vld [vmem:[%s10176_s25 + $0x20] sm:$0xff] }
 0x15d   : > { %4956 = vmatpush1.bf16.msra.mxu0 %v8411_v30  ;;  %5434 = vmatprep.subr.bf16.mxu1 %v8422_v33  ;;  %v8485_v30 = vld [vmem:[#allocation5 + $0x604] ss:$16 sps:$4 sm:$0xff]   ;;  %v8488_v33 = vld [vmem:[#allocation5 + $0x20c] ss:$16 sps:$4 sm:$0xff]  }
 0x15e   : > { %4957 = vmatprep.subr.bf16.mxu0 %v8419_v32  ;;  %v489_v32 = vld [vmem:[%s10176_s25 + $0xd0] sm:$0xff] }
 0x15f   : > { %v10246_v36 = vpack.c.bf16 %v489_v32, %v467_v31  ;;  %v8560_v31 = vld [vmem:[#allocation5 + $0x38c] ss:$16 sps:$4 sm:$0xff]   ;;  %v8555_v32 = vld [vmem:[#allocation5 + $0x780] ss:$16 sps:$4 sm:$0xff]  }
 0x160   : > { %5435 = vmatpush1.bf16.msra.mxu1 %v8420_v35  ;;  %v8486_v35 = vld [vmem:[#allocation5 + $0x208] ss:$16 sps:$4 sm:$0xff]  }
 0x161   : > { %4958 = vmatpush1.bf16.msra.mxu0 %v8417_v34  ;;  %5436 = vmatprep.subr.bf16.mxu1 %v8428_v45  ;;  %v8483_v34 = vld [vmem:[#allocation5 + $0x600] ss:$16 sps:$4 sm:$0xff]   ;;  %v8492_v45 = vld [vmem:[#allocation5 + $0x228] ss:$16 sps:$4 sm:$0xff]  }
 0x162   : > { %4959 = vmatprep.subr.bf16.mxu0 %v8425_v44  ;;  %v10250_v44 = vpack.c.bf16 %v534_v42, %v512_v39  ;;  %v8569_v39 = vld [vmem:[#allocation5 + $0x7c4] ss:$16 sps:$4 sm:$0xff]   ;;  %v8572_v42 = vld [vmem:[#allocation5 + $0x3cc] ss:$16 sps:$4 sm:$0xff]  }
 0x164   : > { %5437 = vmatpush1.bf16.msra.mxu1 %v8426_v48  ;;  %v8500_v48 = vld [vmem:[#allocation5 + $0x24c] ss:$16 sps:$4 sm:$0xff]  }
 0x165   : > { %4960 = vmatpush1.bf16.msra.mxu0 %v8423_v47  ;;  %5438 = vmatprep.subr.bf16.mxu1 %v8434_v54  ;;  %v8497_v47 = vld [vmem:[#allocation5 + $0x644] ss:$16 sps:$4 sm:$0xff]   ;;  %v8498_v54 = vld [vmem:[#allocation5 + $0x248] ss:$16 sps:$4 sm:$0xff]  }
 0x166   : > { %4961 = vmatprep.subr.bf16.mxu0 %v8431_v52  ;;  %v8495_v52 = vld [vmem:[#allocation5 + $0x640] ss:$16 sps:$4 sm:$0xff]  }
 0x168   : > { %5439 = vmatpush1.bf16.msra.mxu1 %v8432_v59  ;;  %v8506_v59 = vld [vmem:[#allocation5 + $0x26c] ss:$16 sps:$4 sm:$0xff]  }
 0x169   : > { %4962 = vmatpush1.bf16.msra.mxu0 %v8429_v58  ;;  %5440 = vmatprep.subr.bf16.mxu1 %v8440_v62  ;;  %v8503_v58 = vld [vmem:[#allocation5 + $0x664] ss:$16 sps:$4 sm:$0xff]   ;;  %v8501_v62 = vld [vmem:[#allocation5 + $0x660] ss:$16 sps:$4 sm:$0xff]  }
 0x16a   : > { %4963 = vmatprep.subr.bf16.mxu0 %v8437_v61 }
 0x16c   : > { %5441 = vmatpush1.bf16.msra.mxu1 %v8438_v0  ;;  %v8512_v0 = vld [vmem:[#allocation5 + $0x28c] ss:$16 sps:$4 sm:$0xff]  }
 0x16d   : > { %4964 = vmatpush1.bf16.msra.mxu0 %v8435_v63  ;;  %5442 = vmatprep.subr.bf16.mxu1 %v8446_v50  ;;  %v8504_v63 = vld [vmem:[#allocation5 + $0x268] ss:$16 sps:$4 sm:$0xff]  }
 0x16e   : > { %4965 = vmatprep.subr.bf16.mxu0 %v8443_v1  ;;  %v8507_v1 = vld [vmem:[#allocation5 + $0x680] ss:$16 sps:$4 sm:$0xff]   ;;  %v8510_v50 = vld [vmem:[#allocation5 + $0x288] ss:$16 sps:$4 sm:$0xff]  }
 0x170   : > { %5443 = vmatpush1.bf16.msra.mxu1 %v8444_v3  ;;  %v8518_v3 = vld [vmem:[#allocation5 + $0x2ac] ss:$16 sps:$4 sm:$0xff]  }
 0x171   : > { %4966 = vmatpush1.bf16.msra.mxu0 %v8441_v2  ;;  %5444 = vmatprep.subr.bf16.mxu1 %v8452_v5  ;;  %v8515_v2 = vld [vmem:[#allocation5 + $0x6a4] ss:$16 sps:$4 sm:$0xff]  }
 0x172   : > { %4967 = vmatprep.subr.bf16.mxu0 %v8449_v4  ;;  %v8513_v4 = vld [vmem:[#allocation5 + $0x6a0] ss:$16 sps:$4 sm:$0xff]   ;;  %v8521_v5 = vld [vmem:[#allocation5 + $0x6c4] ss:$16 sps:$4 sm:$0xff]  }
 0x174   : > { %5445 = vmatpush1.bf16.msra.mxu1 %v8450_v7  ;;  %v8519_v7 = vld [vmem:[#allocation5 + $0x6c0] ss:$16 sps:$4 sm:$0xff]  }
 0x175   : > { %4968 = vmatpush1.bf16.msra.mxu0 %v8447_v6  ;;  %5446 = vmatprep.subr.bf16.mxu1 %v8458_v9  ;;  %v8524_v6 = vld [vmem:[#allocation5 + $0x2cc] ss:$16 sps:$4 sm:$0xff]  }
 0x176   : > { %4969 = vmatprep.subr.bf16.mxu0 %v8455_v8  ;;  %v8522_v8 = vld [vmem:[#allocation5 + $0x2c8] ss:$16 sps:$4 sm:$0xff]   ;;  %v8530_v9 = vld [vmem:[#allocation5 + $0x2ec] ss:$16 sps:$4 sm:$0xff]  }
 0x178   : > { %5447 = vmatpush1.bf16.msra.mxu1 %v8456_v11  ;;  %v8528_v11 = vld [vmem:[#allocation5 + $0x2e8] ss:$16 sps:$4 sm:$0xff]  }
 0x179   : > { %4970 = vmatpush1.bf16.msra.mxu0 %v8453_v10  ;;  %5448 = vmatprep.subr.bf16.mxu1 %v8464_v14  ;;  %v8525_v10 = vld [vmem:[#allocation5 + $0x6e0] ss:$16 sps:$4 sm:$0xff]   ;;  %v8536_v14 = vld [vmem:[#allocation5 + $0x30c] ss:$16 sps:$4 sm:$0xff]  }
 0x17a   : > { %4971 = vmatprep.subr.bf16.mxu0 %v8461_v13  ;;  %v8533_v13 = vld [vmem:[#allocation5 + $0x704] ss:$16 sps:$4 sm:$0xff]  }
 0x17c   : > { %5449 = vmatpush1.bf16.msra.mxu1 %v8462_v17  ;;  %v8534_v17 = vld [vmem:[#allocation5 + $0x308] ss:$16 sps:$4 sm:$0xff]  }
 0x17d   : > { %4972 = vmatpush1.bf16.msra.mxu0 %v8459_v16  ;;  %5450 = vmatprep.subr.bf16.mxu1 %v8470_v19  ;;  %v8531_v16 = vld [vmem:[#allocation5 + $0x700] ss:$16 sps:$4 sm:$0xff]   ;;  %v8542_v19 = vld [vmem:[#allocation5 + $0x32c] ss:$16 sps:$4 sm:$0xff]  }
 0x17e   : > { %4973 = vmatprep.subr.bf16.mxu0 %v8467_v18  ;;  %v8539_v18 = vld [vmem:[#allocation5 + $0x724] ss:$16 sps:$4 sm:$0xff]  }
 0x180   : > { %5451 = vmatpush1.bf16.msra.mxu1 %v8468_v21  ;;  %v8540_v21 = vld [vmem:[#allocation5 + $0x328] ss:$16 sps:$4 sm:$0xff]  }
 0x181   : > { %4974 = vmatpush1.bf16.msra.mxu0 %v8465_v20  ;;  %5452 = vmatprep.subr.bf16.mxu1 %v8476_v23  ;;  %v8537_v20 = vld [vmem:[#allocation5 + $0x720] ss:$16 sps:$4 sm:$0xff]   ;;  %v8548_v23 = vld [vmem:[#allocation5 + $0x34c] ss:$16 sps:$4 sm:$0xff]  }
 0x182   : > { %4975 = vmatprep.subr.bf16.mxu0 %v8473_v22  ;;  %v8545_v22 = vld [vmem:[#allocation5 + $0x744] ss:$16 sps:$4 sm:$0xff]  }
 0x184   : > { %5453 = vmatpush1.bf16.msra.mxu1 %v8474_v25  ;;  %v8546_v25 = vld [vmem:[#allocation5 + $0x348] ss:$16 sps:$4 sm:$0xff]  }
 0x185   : > { %4976 = vmatpush1.bf16.msra.mxu0 %v8471_v24  ;;  %5454 = vmatprep.subr.bf16.mxu1 %v8482_v27  ;;  %v8543_v24 = vld [vmem:[#allocation5 + $0x740] ss:$16 sps:$4 sm:$0xff]   ;;  %v8554_v27 = vld [vmem:[#allocation5 + $0x36c] ss:$16 sps:$4 sm:$0xff]  }
 0x186   : > { %4977 = vmatprep.subr.bf16.mxu0 %v8479_v26  ;;  %v8551_v26 = vld [vmem:[#allocation5 + $0x764] ss:$16 sps:$4 sm:$0xff]  }
 0x188   : > { %5455 = vmatpush1.bf16.msra.mxu1 %v8480_v29  ;;  %v8552_v29 = vld [vmem:[#allocation5 + $0x368] ss:$16 sps:$4 sm:$0xff]  }
 0x189   : > { %4978 = vmatpush1.bf16.msra.mxu0 %v8477_v28  ;;  %5477 = vmatprep.subr.bf16.mxu1 %v8488_v33  ;;  %v8549_v28 = vld [vmem:[#allocation5 + $0x760] ss:$16 sps:$4 sm:$0xff]   ;;  %v8558_v33 = vld [vmem:[#allocation5 + $0x388] ss:$16 sps:$4 sm:$0xff]  }
 0x18a   : > { %5000 = vmatprep.subr.bf16.mxu0 %v8485_v30  ;;  %v8557_v30 = vld [vmem:[#allocation5 + $0x784] ss:$16 sps:$4 sm:$0xff]  }
 0x18b   : > { %5457 = vmatmul.mubr.bf16.vlgmr.msra.gmra.mrb[8].mxu1 %v10212_v12  ;;  %v470_v12 = vld [vmem:[%s10176_s25 + $0x38] sm:$0xff] }
 0x18c   : > { %4980 = vmatmul.mubr.bf16.vlgmr.msra.gmra.mrb[0].mxu0 %v10246_v36  ;;  %5478 = vmatpush1.bf16.msra.mxu1 %v8486_v35  ;;  %v10262_v61 = vpack.c.bf16 %v492_v57, %v470_v12  ;;  %v8566_v35 = vld [vmem:[#allocation5 + $0x3ac] ss:$16 sps:$4 sm:$0xff]   ;;  %v491_v12 = vld [vmem:[%s10176_s25 + $0xe0] sm:$0xff] }
 0x18d   : > { %5001 = vmatpush1.bf16.msra.mxu0 %v8483_v34  ;;  %5479 = vmatprep.subr.bf16.mxu1 %v8494_v38  ;;  %v8563_v34 = vld [vmem:[#allocation5 + $0x7a4] ss:$16 sps:$4 sm:$0xff]   ;;  %v8564_v38 = vld [vmem:[#allocation5 + $0x3a8] ss:$16 sps:$4 sm:$0xff]   ;;  %v8584_v57 = vld [vmem:[#allocation5 + $0x40c] ss:$16 sps:$4 sm:$0xff]  }
 0x18e   : > { %5002 = vmatprep.subr.bf16.mxu0 %v8491_v37  ;;  %4989 = vmatprep.mubr.bf16.mxu0 %v10250_v44  ;;  %v8561_v37 = vld [vmem:[#allocation5 + $0x7a0] ss:$16 sps:$4 sm:$0xff]  }
 0x18f   : > { %5466 = vmatprep.mubr.bf16.mxu1 %v10222_v40  ;;  %v8509_v40 = vld [vmem:[#allocation5 + $0x684] ss:$16 sps:$4 sm:$0xff]  }
 0x190   : > { %5480 = vmatpush1.bf16.msra.mxu1 %v8492_v45  ;;  %v8570_v45 = vld [vmem:[#allocation5 + $0x3c8] ss:$16 sps:$4 sm:$0xff]  }
 0x191   : > { %5003 = vmatpush1.bf16.msra.mxu0 %v8489_v43  ;;  %5481 = vmatprep.subr.bf16.mxu1 %v8500_v48  ;;  %v8567_v43 = vld [vmem:[#allocation5 + $0x7c0] ss:$16 sps:$4 sm:$0xff]   ;;  %v8578_v48 = vld [vmem:[#allocation5 + $0x3ec] ss:$16 sps:$4 sm:$0xff]  }
 0x192   : > { %5004 = vmatprep.subr.bf16.mxu0 %v8497_v47  ;;  %v8575_v47 = vld [vmem:[#allocation5 + $0x7e4] ss:$16 sps:$4 sm:$0xff]  }
 0x193   : > { %5467 = vmatmul.mubr.bf16.gmra.mrb[12].mxu1 %v10224_v41  ;;  %v8516_v41 = vld [vmem:[#allocation5 + $0x2a8] ss:$16 sps:$4 sm:$0xff]  }
 0x194   : > { %4990 = vmatmul.mubr.bf16.gmra.mrb[4].mxu0 %v10258_v56  ;;  %5482 = vmatpush1.bf16.msra.mxu1 %v8498_v54  ;;  %v469_v54 = vld [vmem:[%s10176_s25 + $0x30] sm:$0xff] }
 0x195   : > { %5005 = vmatpush1.bf16.msra.mxu0 %v8495_v52  ;;  %5483 = vmatprep.subr.bf16.mxu1 %v8506_v59  ;;  %v8581_v52 = vld [vmem:[#allocation5 + $0x804] ss:$16 sps:$4 sm:$0xff]   ;;  %v8582_v59 = vld [vmem:[#allocation5 + $0x408] ss:$16 sps:$4 sm:$0xff]  }
 0x196   : > { %5006 = vmatprep.subr.bf16.mxu0 %v8503_v58  ;;  %5032 = vmatprep.mubr.bf16.mxu0 %v10262_v61  ;;  %v8579_v58 = vld [vmem:[#allocation5 + $0x800] ss:$16 sps:$4 sm:$0xff]  }
 0x197   : > { %5509 = vmatprep.mubr.bf16.mxu1 %v10204_v55  ;;  %v8527_v55 = vld [vmem:[#allocation5 + $0x6e4] ss:$16 sps:$4 sm:$0xff]  }
 0x198   : > { %5484 = vmatpush1.bf16.msra.mxu1 %v8504_v63  ;;  %v514_v63 = vld [vmem:[%s10176_s25 + $0x198] sm:$0xff] }
 0x199   : > { %5007 = vmatpush1.bf16.msra.mxu0 %v8501_v62  ;;  %5485 = vmatprep.subr.bf16.mxu1 %v8512_v0  ;;  %v10270_v62 = vpack.c.bf16 %v491_v12, %v469_v54  ;;  %v8587_v0 = vld [vmem:[#allocation5 + $0x824] ss:$16 sps:$4 sm:$0xff]   ;;  %v8656_v54 = vld [vmem:[#allocation5 + $0x58c] ss:$16 sps:$4 sm:$0xff]   ;;  %v8651_v12 = vld [vmem:[#allocation5 + $0x980] ss:$16 sps:$4 sm:$0xff]  }
 0x19a   : > { %5008 = vmatprep.subr.bf16.mxu0 %v8509_v40  ;;  %v536_v40 = vld [vmem:[%s10176_s25 + $0x248] sm:$0xff] }
 0x19c   : > { %5486 = vmatpush1.bf16.msra.mxu1 %v8510_v50  ;;  %v8585_v50 = vld [vmem:[#allocation5 + $0x820] ss:$16 sps:$4 sm:$0xff]  }
 0x19d   : > { %5009 = vmatpush1.bf16.msra.mxu0 %v8507_v1  ;;  %5487 = vmatprep.subr.bf16.mxu1 %v8518_v3  ;;  %v8590_v1 = vld [vmem:[#allocation5 + $0x42c] ss:$16 sps:$4 sm:$0xff]   ;;  %v8588_v3 = vld [vmem:[#allocation5 + $0x428] ss:$16 sps:$4 sm:$0xff]  }
 0x19e   : > { %5010 = vmatprep.subr.bf16.mxu0 %v8515_v2  ;;  %v10274_v2 = vpack.c.bf16 %v536_v40, %v514_v63  ;;  %v8657_v63 = vld [vmem:[#allocation5 + $0x9a0] ss:$16 sps:$4 sm:$0xff]   ;;  %v8660_v40 = vld [vmem:[#allocation5 + $0x5a8] ss:$16 sps:$4 sm:$0xff]  }
 0x1a0   : > { %5488 = vmatpush1.bf16.msra.mxu1 %v8516_v41  ;;  %v535_v41 = vld [vmem:[%s10176_s25 + $0x240] sm:$0xff] }
 0x1a1   : > { %5011 = vmatpush1.bf16.msra.mxu0 %v8513_v4  ;;  %5489 = vmatprep.subr.bf16.mxu1 %v8524_v6  ;;  %v513_v4 = vld [vmem:[%s10176_s25 + $0x190] sm:$0xff]  ;;  %v8596_v6 = vld [vmem:[#allocation5 + $0x44c] ss:$16 sps:$4 sm:$0xff]  }
 0x1a2   : > { %5012 = vmatprep.subr.bf16.mxu0 %v8521_v5  ;;  %v8593_v5 = vld [vmem:[#allocation5 + $0x844] ss:$16 sps:$4 sm:$0xff]  }
 0x1a4   : > { %5490 = vmatpush1.bf16.msra.mxu1 %v8522_v8  ;;  %v472_v8 = vld [vmem:[%s10176_s25 + $0x48] sm:$0xff] }
 0x1a5   : > { %5013 = vmatpush1.bf16.msra.mxu0 %v8519_v7  ;;  %5491 = vmatprep.subr.bf16.mxu1 %v8530_v9  ;;  %v8591_v7 = vld [vmem:[#allocation5 + $0x840] ss:$16 sps:$4 sm:$0xff]   ;;  %v494_v9 = vld [vmem:[%s10176_s25 + $0xf8] sm:$0xff] }
 0x1a6   : > { %5014 = vmatprep.subr.bf16.mxu0 %v8527_v55  ;;  %v10283_v55 = vpack.c.bf16 %v535_v41, %v513_v4  ;;  %v8671_v4 = vld [vmem:[#allocation5 + $0x9e4] ss:$16 sps:$4 sm:$0xff]   ;;  %v8674_v41 = vld [vmem:[#allocation5 + $0x5ec] ss:$16 sps:$4 sm:$0xff]  }
 0x1a8   : > { %5492 = vmatpush1.bf16.msra.mxu1 %v8528_v11  ;;  %v8602_v11 = vld [vmem:[#allocation5 + $0x46c] ss:$16 sps:$4 sm:$0xff]  }
 0x1a9   : > { %5015 = vmatpush1.bf16.msra.mxu0 %v8525_v10  ;;  %5493 = vmatprep.subr.bf16.mxu1 %v8536_v14  ;;  %v8599_v10 = vld [vmem:[#allocation5 + $0x864] ss:$16 sps:$4 sm:$0xff]   ;;  %v8597_v14 = vld [vmem:[#allocation5 + $0x860] ss:$16 sps:$4 sm:$0xff]  }
 0x1aa   : > { %5016 = vmatprep.subr.bf16.mxu0 %v8533_v13  ;;  %v10286_v13 = vpack.c.bf16 %v494_v9, %v472_v8  ;;  %v493_v8 = vld [vmem:[%s10176_s25 + $0xf0] sm:$0xff] }
 0x1ab   : > { %v8677_v9 = vld [vmem:[#allocation5 + $0xa04] ss:$16 sps:$4 sm:$0xff]  }
 0x1ac   : > { %5494 = vmatpush1.bf16.msra.mxu1 %v8534_v17  ;;  %v8608_v17 = vld [vmem:[#allocation5 + $0x48c] ss:$16 sps:$4 sm:$0xff]  }
 0x1ad   : > { %5017 = vmatpush1.bf16.msra.mxu0 %v8531_v16  ;;  %5495 = vmatprep.subr.bf16.mxu1 %v8542_v19  ;;  %v8605_v16 = vld [vmem:[#allocation5 + $0x884] ss:$16 sps:$4 sm:$0xff]   ;;  %v8606_v19 = vld [vmem:[#allocation5 + $0x488] ss:$16 sps:$4 sm:$0xff]  }
 0x1ae   : > { %5018 = vmatprep.subr.bf16.mxu0 %v8539_v18  ;;  %v8603_v18 = vld [vmem:[#allocation5 + $0x880] ss:$16 sps:$4 sm:$0xff]  }
 0x1b0   : > { %5496 = vmatpush1.bf16.msra.mxu1 %v8540_v21  ;;  %v8614_v21 = vld [vmem:[#allocation5 + $0x4ac] ss:$16 sps:$4 sm:$0xff]  }
 0x1b1   : > { %5019 = vmatpush1.bf16.msra.mxu0 %v8537_v20  ;;  %5497 = vmatprep.subr.bf16.mxu1 %v8548_v23  ;;  %v8611_v20 = vld [vmem:[#allocation5 + $0x8a4] ss:$16 sps:$4 sm:$0xff]  }
 0x1b2   : > { %5020 = vmatprep.subr.bf16.mxu0 %v8545_v22  ;;  %v8612_v22 = vld [vmem:[#allocation5 + $0x4a8] ss:$16 sps:$4 sm:$0xff]   ;;  %v8617_v23 = vld [vmem:[#allocation5 + $0x8c4] ss:$16 sps:$4 sm:$0xff]  }
 0x1b4   : > { %5498 = vmatpush1.bf16.msra.mxu1 %v8546_v25  ;;  %v8615_v25 = vld [vmem:[#allocation5 + $0x8c0] ss:$16 sps:$4 sm:$0xff]  }
 0x1b5   : > { %5021 = vmatpush1.bf16.msra.mxu0 %v8543_v24  ;;  %5499 = vmatprep.subr.bf16.mxu1 %v8554_v27  ;;  %v8620_v24 = vld [vmem:[#allocation5 + $0x4cc] ss:$16 sps:$4 sm:$0xff]  }
 0x1b6   : > { %5022 = vmatprep.subr.bf16.mxu0 %v8551_v26  ;;  %v8623_v26 = vld [vmem:[#allocation5 + $0x8e4] ss:$16 sps:$4 sm:$0xff]   ;;  %v8626_v27 = vld [vmem:[#allocation5 + $0x4ec] ss:$16 sps:$4 sm:$0xff]  }
 0x1b8   : > { %5500 = vmatpush1.bf16.msra.mxu1 %v8552_v29  ;;  %v8624_v29 = vld [vmem:[#allocation5 + $0x4e8] ss:$16 sps:$4 sm:$0xff]  }
 0x1b9   : > { %5023 = vmatpush1.bf16.msra.mxu0 %v8549_v28  ;;  %5501 = vmatprep.subr.bf16.mxu1 %v8560_v31  ;;  %v8621_v28 = vld [vmem:[#allocation5 + $0x8e0] ss:$16 sps:$4 sm:$0xff]   ;;  %v8632_v31 = vld [vmem:[#allocation5 + $0x50c] ss:$16 sps:$4 sm:$0xff]  }
 0x1ba   : > { %5024 = vmatprep.subr.bf16.mxu0 %v8557_v30  ;;  %v8629_v30 = vld [vmem:[#allocation5 + $0x904] ss:$16 sps:$4 sm:$0xff]  }
 0x1bc   : > { %5502 = vmatpush1.bf16.msra.mxu1 %v8558_v33  ;;  %v8630_v33 = vld [vmem:[#allocation5 + $0x508] ss:$16 sps:$4 sm:$0xff]  }
 0x1bd   : > { %5025 = vmatpush1.bf16.msra.mxu0 %v8555_v32  ;;  %5503 = vmatprep.subr.bf16.mxu1 %v8566_v35  ;;  %v8627_v32 = vld [vmem:[#allocation5 + $0x900] ss:$16 sps:$4 sm:$0xff]   ;;  %v8638_v35 = vld [vmem:[#allocation5 + $0x52c] ss:$16 sps:$4 sm:$0xff]  }
 0x1be   : > { %5026 = vmatprep.subr.bf16.mxu0 %v8563_v34  ;;  %v8635_v34 = vld [vmem:[#allocation5 + $0x924] ss:$16 sps:$4 sm:$0xff]  }
 0x1c0   : > { %5504 = vmatpush1.bf16.msra.mxu1 %v8564_v38  ;;  %v8636_v38 = vld [vmem:[#allocation5 + $0x528] ss:$16 sps:$4 sm:$0xff]  }
 0x1c1   : > { %5027 = vmatpush1.bf16.msra.mxu0 %v8561_v37  ;;  %5505 = vmatprep.subr.bf16.mxu1 %v8572_v42  ;;  %v8633_v37 = vld [vmem:[#allocation5 + $0x920] ss:$16 sps:$4 sm:$0xff]   ;;  %v8644_v42 = vld [vmem:[#allocation5 + $0x54c] ss:$16 sps:$4 sm:$0xff]  }
 0x1c2   : > { %5028 = vmatprep.subr.bf16.mxu0 %v8569_v39  ;;  %v8641_v39 = vld [vmem:[#allocation5 + $0x944] ss:$16 sps:$4 sm:$0xff]  }
 0x1c4   : > { %5506 = vmatpush1.bf16.msra.mxu1 %v8570_v45  ;;  %v8642_v45 = vld [vmem:[#allocation5 + $0x548] ss:$16 sps:$4 sm:$0xff]  }
 0x1c5   : > { %5029 = vmatpush1.bf16.msra.mxu0 %v8567_v43  ;;  %5507 = vmatprep.subr.bf16.mxu1 %v8578_v48  ;;  %v8639_v43 = vld [vmem:[#allocation5 + $0x940] ss:$16 sps:$4 sm:$0xff]   ;;  %v8650_v48 = vld [vmem:[#allocation5 + $0x56c] ss:$16 sps:$4 sm:$0xff]  }
 0x1c6   : > { %5030 = vmatprep.subr.bf16.mxu0 %v8575_v47  ;;  %v8647_v47 = vld [vmem:[#allocation5 + $0x964] ss:$16 sps:$4 sm:$0xff]  }
 0x1c8   : > { %5508 = vmatpush1.bf16.msra.mxu1 %v8576_v51  ;;  %v8648_v51 = vld [vmem:[#allocation5 + $0x568] ss:$16 sps:$4 sm:$0xff]  }
 0x1c9   : > { %5031 = vmatpush1.bf16.msra.mxu0 %v8573_v49  ;;  %5530 = vmatprep.subr.bf16.mxu1 %v8584_v57  ;;  %v8645_v49 = vld [vmem:[#allocation5 + $0x960] ss:$16 sps:$4 sm:$0xff]   ;;  %v8654_v57 = vld [vmem:[#allocation5 + $0x588] ss:$16 sps:$4 sm:$0xff]  }
 0x1ca   : > { %5053 = vmatprep.subr.bf16.mxu0 %v8581_v52  ;;  %v8653_v52 = vld [vmem:[#allocation5 + $0x984] ss:$16 sps:$4 sm:$0xff]  }
 0x1cb   : > { %5510 = vmatmul.mubr.bf16.vlgmr.msra.gmra.mrb[8].mxu1 %v10214_v15  ;;  %v8594_v15 = vld [vmem:[#allocation5 + $0x448] ss:$16 sps:$4 sm:$0xff]  }
 0x1cc   : > { %5033 = vmatmul.mubr.bf16.vlgmr.msra.gmra.mrb[0].mxu0 %v10270_v62  ;;  %5531 = vmatpush1.bf16.msra.mxu1 %v8582_v59  ;;  %v8662_v59 = vld [vmem:[#allocation5 + $0x5ac] ss:$16 sps:$4 sm:$0xff]  }
 0x1cd   : > { %5054 = vmatpush1.bf16.msra.mxu0 %v8579_v58  ;;  %5532 = vmatprep.subr.bf16.mxu1 %v8590_v1  ;;  %v8659_v58 = vld [vmem:[#allocation5 + $0x9a4] ss:$16 sps:$4 sm:$0xff]   ;;  %v8668_v1 = vld [vmem:[#allocation5 + $0x5cc] ss:$16 sps:$4 sm:$0xff]  }
 0x1ce   : > { %5055 = vmatprep.subr.bf16.mxu0 %v8587_v0  ;;  %5042 = vmatprep.mubr.bf16.mxu0 %v10274_v2  ;;  %v8665_v0 = vld [vmem:[#allocation5 + $0x9c4] ss:$16 sps:$4 sm:$0xff]  }
 0x1cf   : > { %5519 = vmatprep.mubr.bf16.mxu1 %v10228_v46  ;;  %v8600_v46 = vld [vmem:[#allocation5 + $0x468] ss:$16 sps:$4 sm:$0xff]  }
 0x1d0   : > { %5533 = vmatpush1.bf16.msra.mxu1 %v8588_v3  ;;  %v8666_v3 = vld [vmem:[#allocation5 + $0x5c8] ss:$16 sps:$4 sm:$0xff]  }
 0x1d1   : > { %5056 = vmatpush1.bf16.msra.mxu0 %v8585_v50  ;;  %5534 = vmatprep.subr.bf16.mxu1 %v8596_v6  ;;  %v8663_v50 = vld [vmem:[#allocation5 + $0x9c0] ss:$16 sps:$4 sm:$0xff]   ;;  %v8672_v6 = vld [vmem:[#allocation5 + $0x5e8] ss:$16 sps:$4 sm:$0xff]  }
 0x1d2   : > { %5057 = vmatprep.subr.bf16.mxu0 %v8593_v5  ;;  %v8669_v5 = vld [vmem:[#allocation5 + $0x9e0] ss:$16 sps:$4 sm:$0xff]  }
 0x1d3   : > { %5520 = vmatmul.mubr.bf16.gmra.mrb[12].mxu1 %v10235_v53  ;;  %v8609_v53 = vld [vmem:[#allocation5 + $0x8a0] ss:$16 sps:$4 sm:$0xff]  }
 0x1d4   : > { %5043 = vmatmul.mubr.bf16.gmra.mrb[4].mxu0 %v10283_v55  ;;  %5535 = vmatpush1.bf16.msra.mxu1 %v8594_v15  ;;  %v8680_v15 = vld [vmem:[#allocation5 + $0x60c] ss:$16 sps:$4 sm:$0xff]  }
 0x1d5   : > { %5058 = vmatpush1.bf16.msra.mxu0 %v8591_v7  ;;  %5536 = vmatprep.subr.bf16.mxu1 %v8602_v11  ;;  %v471_v7 = vld [vmem:[%s10176_s25 + $0x40] sm:$0xff]  ;;  %v516_v11 = vld [vmem:[%s10176_s25 + $0x1a8] sm:$0xff] }
 0x1d6   : > { %5059 = vmatprep.subr.bf16.mxu0 %v8599_v10  ;;  %5085 = vmatprep.mubr.bf16.mxu0 %v10286_v13  ;;  %v8675_v10 = vld [vmem:[#allocation5 + $0xa00] ss:$16 sps:$4 sm:$0xff]  }
 0x1d7   : > { %5562 = vmatprep.mubr.bf16.mxu1 %v10241_v60  ;;  %v8618_v60 = vld [vmem:[#allocation5 + $0x4c8] ss:$16 sps:$4 sm:$0xff]  }
 0x1d8   : > { %5537 = vmatpush1.bf16.msra.mxu1 %v8600_v46  ;;  %v538_v46 = vld [vmem:[%s10176_s25 + $0x258] sm:$0xff] }
 0x1d9   : > { %5060 = vmatpush1.bf16.msra.mxu0 %v8597_v14  ;;  %5538 = vmatprep.subr.bf16.mxu1 %v8608_v17  ;;  %v10295_v14 = vpack.c.bf16 %v493_v8, %v471_v7  ;;  %v8683_v17 = vld [vmem:[#allocation5 + $0xa24] ss:$16 sps:$4 sm:$0xff]   ;;  %v8746_v8 = vld [vmem:[#allocation5 + $0x76c] ss:$16 sps:$4 sm:$0xff]  }
 0x1da   : > { %5061 = vmatprep.subr.bf16.mxu0 %v8605_v16  ;;  %v8678_v16 = vld [vmem:[#allocation5 + $0x608] ss:$16 sps:$4 sm:$0xff]   ;;  %v8743_v7 = vld [vmem:[#allocation5 + $0xb64] ss:$16 sps:$4 sm:$0xff]  }
 0x1dc   : > { %5539 = vmatpush1.bf16.msra.mxu1 %v8606_v19  ;;  %v8681_v19 = vld [vmem:[#allocation5 + $0xa20] ss:$16 sps:$4 sm:$0xff]  }
 0x1dd   : > { %5062 = vmatpush1.bf16.msra.mxu0 %v8603_v18  ;;  %5540 = vmatprep.subr.bf16.mxu1 %v8614_v21  ;;  %v8686_v18 = vld [vmem:[#allocation5 + $0x62c] ss:$16 sps:$4 sm:$0xff]   ;;  %v10298_v21 = vpack.c.bf16 %v538_v46, %v516_v11  ;;  %v8744_v11 = vld [vmem:[#allocation5 + $0x768] ss:$16 sps:$4 sm:$0xff]  }
 0x1de   : > { %5063 = vmatprep.subr.bf16.mxu0 %v8611_v20  ;;  %v8684_v20 = vld [vmem:[#allocation5 + $0x628] ss:$16 sps:$4 sm:$0xff]  }
 0x1e0   : > { %5541 = vmatpush1.bf16.msra.mxu1 %v8612_v22  ;;  %v537_v22 = vld [vmem:[%s10176_s25 + $0x250] sm:$0xff] }
 0x1e1   : > { %5064 = vmatpush1.bf16.msra.mxu0 %v8609_v53  ;;  %5542 = vmatprep.subr.bf16.mxu1 %v8620_v24  ;;  %v515_v53 = vld [vmem:[%s10176_s25 + $0x1a0] sm:$0xff]  ;;  %v8692_v24 = vld [vmem:[#allocation5 + $0x64c] ss:$16 sps:$4 sm:$0xff]  }
 0x1e2   : > { %5065 = vmatprep.subr.bf16.mxu0 %v8617_v23  ;;  %v8689_v23 = vld [vmem:[#allocation5 + $0xa44] ss:$16 sps:$4 sm:$0xff]  }
 0x1e4   : > { %5543 = vmatpush1.bf16.msra.mxu1 %v8618_v60  ;;  %v474_v60 = vld [vmem:[%s10176_s25 + $0x58] sm:$0xff] }
 0x1e5   : > { %5066 = vmatpush1.bf16.msra.mxu0 %v8615_v25  ;;  %5544 = vmatprep.subr.bf16.mxu1 %v8626_v27  ;;  %v8687_v25 = vld [vmem:[#allocation5 + $0xa40] ss:$16 sps:$4 sm:$0xff]   ;;  %v496_v27 = vld [vmem:[%s10176_s25 + $0x108] sm:$0xff] }
 0x1e6   : > { %5067 = vmatprep.subr.bf16.mxu0 %v8623_v26  ;;  %v10307_v26 = vpack.c.bf16 %v537_v22, %v515_v53  ;;  %v8755_v53 = vld [vmem:[#allocation5 + $0xba4] ss:$16 sps:$4 sm:$0xff]   ;;  %v8758_v22 = vld [vmem:[#allocation5 + $0x7ac] ss:$16 sps:$4 sm:$0xff]  }
 0x1e8   : > { %5545 = vmatpush1.bf16.msra.mxu1 %v8624_v29  ;;  %v8698_v29 = vld [vmem:[#allocation5 + $0x66c] ss:$16 sps:$4 sm:$0xff]  }
 0x1e9   : > { %5068 = vmatpush1.bf16.msra.mxu0 %v8621_v28  ;;  %5546 = vmatprep.subr.bf16.mxu1 %v8632_v31  ;;  %v8695_v28 = vld [vmem:[#allocation5 + $0xa64] ss:$16 sps:$4 sm:$0xff]   ;;  %v8696_v31 = vld [vmem:[#allocation5 + $0x668] ss:$16 sps:$4 sm:$0xff]  }
 0x1ea   : > { %5069 = vmatprep.subr.bf16.mxu0 %v8629_v30  ;;  %v10310_v30 = vpack.c.bf16 %v496_v27, %v474_v60  ;;  %v8764_v60 = vld [vmem:[#allocation5 + $0x7cc] ss:$16 sps:$4 sm:$0xff]   ;;  %v8759_v27 = vld [vmem:[#allocation5 + $0xbc0] ss:$16 sps:$4 sm:$0xff]  }
 0x1ec   : > { %5547 = vmatpush1.bf16.msra.mxu1 %v8630_v33  ;;  %v8704_v33 = vld [vmem:[#allocation5 + $0x68c] ss:$16 sps:$4 sm:$0xff]  }
 0x1ed   : > { %5070 = vmatpush1.bf16.msra.mxu0 %v8627_v32  ;;  %5548 = vmatprep.subr.bf16.mxu1 %v8638_v35  ;;  %v8701_v32 = vld [vmem:[#allocation5 + $0xa84] ss:$16 sps:$4 sm:$0xff]   ;;  %v8702_v35 = vld [vmem:[#allocation5 + $0x688] ss:$16 sps:$4 sm:$0xff]  }
 0x1ee   : > { %5071 = vmatprep.subr.bf16.mxu0 %v8635_v34  ;;  %v8699_v34 = vld [vmem:[#allocation5 + $0xa80] ss:$16 sps:$4 sm:$0xff]  }
 0x1f0   : > { %5549 = vmatpush1.bf16.msra.mxu1 %v8636_v38  ;;  %v8705_v38 = vld [vmem:[#allocation5 + $0xaa0] ss:$16 sps:$4 sm:$0xff]  }
 0x1f1   : > { %5072 = vmatpush1.bf16.msra.mxu0 %v8633_v37  ;;  %5550 = vmatprep.subr.bf16.mxu1 %v8644_v42  ;;  %v8707_v37 = vld [vmem:[#allocation5 + $0xaa4] ss:$16 sps:$4 sm:$0xff]  }
 0x1f2   : > { %5073 = vmatprep.subr.bf16.mxu0 %v8641_v39  ;;  %v8708_v39 = vld [vmem:[#allocation5 + $0x6a8] ss:$16 sps:$4 sm:$0xff]   ;;  %v8713_v42 = vld [vmem:[#allocation5 + $0xac4] ss:$16 sps:$4 sm:$0xff]  }
 0x1f4   : > { %5551 = vmatpush1.bf16.msra.mxu1 %v8642_v45 }
 0x1f5   : > { %5074 = vmatpush1.bf16.msra.mxu0 %v8639_v43  ;;  %5552 = vmatprep.subr.bf16.mxu1 %v8650_v48  ;;  %v8716_v43 = vld [vmem:[#allocation5 + $0x6cc] ss:$16 sps:$4 sm:$0xff]  }
 0x1f6   : > { %5075 = vmatprep.subr.bf16.mxu0 %v8647_v47 }
 0x1f8   : > { %5553 = vmatpush1.bf16.msra.mxu1 %v8648_v51 }
 0x1f9   : > { %5076 = vmatpush1.bf16.msra.mxu0 %v8645_v49  ;;  %5554 = vmatprep.subr.bf16.mxu1 %v8656_v54  ;;  %v8714_v49 = vld [vmem:[#allocation5 + $0x6c8] ss:$16 sps:$4 sm:$0xff]   ;;  %v8722_v54 = vld [vmem:[#allocation5 + $0x6ec] ss:$16 sps:$4 sm:$0xff]  }
 0x1fa   : > { %5077 = vmatprep.subr.bf16.mxu0 %v8653_v52  ;;  %v8719_v52 = vld [vmem:[#allocation5 + $0xae4] ss:$16 sps:$4 sm:$0xff]  }
 0x1fc   : > { %5555 = vmatpush1.bf16.msra.mxu1 %v8654_v57  ;;  %v8720_v57 = vld [vmem:[#allocation5 + $0x6e8] ss:$16 sps:$4 sm:$0xff]  }
 0x1fd   : > { %5078 = vmatpush1.bf16.msra.mxu0 %v8651_v12  ;;  %5556 = vmatprep.subr.bf16.mxu1 %v8662_v59  ;;  %v8717_v12 = vld [vmem:[#allocation5 + $0xae0] ss:$16 sps:$4 sm:$0xff]   ;;  %v8728_v59 = vld [vmem:[#allocation5 + $0x70c] ss:$16 sps:$4 sm:$0xff]  }
 0x1fe   : > { %5079 = vmatprep.subr.bf16.mxu0 %v8659_v58  ;;  %v8725_v58 = vld [vmem:[#allocation5 + $0xb04] ss:$16 sps:$4 sm:$0xff]  }
 0x200   : > { %5557 = vmatpush1.bf16.msra.mxu1 %v8660_v40  ;;  %v8726_v40 = vld [vmem:[#allocation5 + $0x708] ss:$16 sps:$4 sm:$0xff]  }
 0x201   : > { %5080 = vmatpush1.bf16.msra.mxu0 %v8657_v63  ;;  %5558 = vmatprep.subr.bf16.mxu1 %v8668_v1  ;;  %v8723_v63 = vld [vmem:[#allocation5 + $0xb00] ss:$16 sps:$4 sm:$0xff]   ;;  %v8734_v1 = vld [vmem:[#allocation5 + $0x72c] ss:$16 sps:$4 sm:$0xff]  }
 0x202   : > { %5081 = vmatprep.subr.bf16.mxu0 %v8665_v0  ;;  %v8731_v0 = vld [vmem:[#allocation5 + $0xb24] ss:$16 sps:$4 sm:$0xff]  }
 0x204   : > { %5559 = vmatpush1.bf16.msra.mxu1 %v8666_v3  ;;  %v8732_v3 = vld [vmem:[#allocation5 + $0x728] ss:$16 sps:$4 sm:$0xff]  }
 0x205   : > { %5082 = vmatpush1.bf16.msra.mxu0 %v8663_v50  ;;  %5560 = vmatprep.subr.bf16.mxu1 %v8674_v41  ;;  %v8729_v50 = vld [vmem:[#allocation5 + $0xb20] ss:$16 sps:$4 sm:$0xff]   ;;  %v8740_v41 = vld [vmem:[#allocation5 + $0x74c] ss:$16 sps:$4 sm:$0xff]  }
 0x206   : > { %5083 = vmatprep.subr.bf16.mxu0 %v8671_v4  ;;  %v8737_v4 = vld [vmem:[#allocation5 + $0xb44] ss:$16 sps:$4 sm:$0xff]  }
 0x208   : > { %5561 = vmatpush1.bf16.msra.mxu1 %v8672_v6  ;;  %v8738_v6 = vld [vmem:[#allocation5 + $0x748] ss:$16 sps:$4 sm:$0xff]  }
 0x209   : > { %5084 = vmatpush1.bf16.msra.mxu0 %v8669_v5  ;;  %5583 = vmatprep.subr.bf16.mxu1 %v8680_v15  ;;  %v8735_v5 = vld [vmem:[#allocation5 + $0xb40] ss:$16 sps:$4 sm:$0xff]  }
 0x20a   : > { %5106 = vmatprep.subr.bf16.mxu0 %v8677_v9  ;;  %v8741_v15 = vld [vmem:[#allocation5 + $0xb60] ss:$16 sps:$4 sm:$0xff]  }
 0x20b   : > { %5563 = vmatmul.mubr.bf16.vlgmr.msra.gmra.mrb[8].mxu1 %v10246_v36  ;;  %v8690_v36 = vld [vmem:[#allocation5 + $0x648] ss:$16 sps:$4 sm:$0xff]  }
 0x20c   : > { %5086 = vmatmul.mubr.bf16.vlgmr.msra.gmra.mrb[0].mxu0 %v10295_v14  ;;  %5584 = vmatpush1.bf16.msra.mxu1 %v8678_v16  ;;  %v8749_v16 = vld [vmem:[#allocation5 + $0xb84] ss:$16 sps:$4 sm:$0xff]  }
 0x20d   : > { %5107 = vmatpush1.bf16.msra.mxu0 %v8675_v10  ;;  %5585 = vmatprep.subr.bf16.mxu1 %v8686_v18 }
 0x20e   : > { %5108 = vmatprep.subr.bf16.mxu0 %v8683_v17  ;;  %5095 = vmatprep.mubr.bf16.mxu0 %v10298_v21  ;;  %v8752_v17 = vld [vmem:[#allocation5 + $0x78c] ss:$16 sps:$4 sm:$0xff]  }
 0x20f   : > { %5572 = vmatprep.mubr.bf16.mxu1 %v10250_v44  ;;  %v8693_v44 = vld [vmem:[#allocation5 + $0xa60] ss:$16 sps:$4 sm:$0xff]  }
 0x210   : > { %5586 = vmatpush1.bf16.msra.mxu1 %v8684_v20  ;;  %v8750_v20 = vld [vmem:[#allocation5 + $0x788] ss:$16 sps:$4 sm:$0xff]  }
 0x211   : > { %5109 = vmatpush1.bf16.msra.mxu0 %v8681_v19  ;;  %5587 = vmatprep.subr.bf16.mxu1 %v8692_v24  ;;  %v8747_v19 = vld [vmem:[#allocation5 + $0xb80] ss:$16 sps:$4 sm:$0xff]   ;;  %v8756_v24 = vld [vmem:[#allocation5 + $0x7a8] ss:$16 sps:$4 sm:$0xff]  }
 0x212   : > { %5110 = vmatprep.subr.bf16.mxu0 %v8689_v23  ;;  %v8753_v23 = vld [vmem:[#allocation5 + $0xba0] ss:$16 sps:$4 sm:$0xff]  }
 0x213   : > { %5573 = vmatmul.mubr.bf16.gmra.mrb[12].mxu1 %v10258_v56  ;;  %v8710_v56 = vld [vmem:[#allocation5 + $0x6ac] ss:$16 sps:$4 sm:$0xff]  }
 0x214   : > { %5096 = vmatmul.mubr.bf16.gmra.mrb[4].mxu0 %v10307_v26  ;;  %5588 = vmatpush1.bf16.msra.mxu1 %v8690_v36  ;;  %v8762_v36 = vld [vmem:[#allocation5 + $0x7c8] ss:$16 sps:$4 sm:$0xff]  }
 0x215   : > { %5111 = vmatpush1.bf16.msra.mxu0 %v8687_v25  ;;  %5589 = vmatprep.subr.bf16.mxu1 %v8698_v29  ;;  %v8761_v25 = vld [vmem:[#allocation5 + $0xbc4] ss:$16 sps:$4 sm:$0xff]   ;;  %v8770_v29 = vld [vmem:[#allocation5 + $0x7ec] ss:$16 sps:$4 sm:$0xff]  }
 0x216   : > { %5112 = vmatprep.subr.bf16.mxu0 %v8695_v28  ;;  %5138 = vmatprep.mubr.bf16.mxu0 %v10310_v30  ;;  %v8767_v28 = vld [vmem:[#allocation5 + $0xbe4] ss:$16 sps:$4 sm:$0xff]  }
 0x217   : > { %5615 = vmatprep.mubr.bf16.mxu1 %v10262_v61  ;;  %v8711_v61 = vld [vmem:[#allocation5 + $0xac0] ss:$16 sps:$4 sm:$0xff]  }
 0x218   : > { %5590 = vmatpush1.bf16.msra.mxu1 %v8696_v31  ;;  %v8768_v31 = vld [vmem:[#allocation5 + $0x7e8] ss:$16 sps:$4 sm:$0xff]  }
 0x219   : > { %5113 = vmatpush1.bf16.msra.mxu0 %v8693_v44  ;;  %5591 = vmatprep.subr.bf16.mxu1 %v8704_v33  ;;  %v8765_v44 = vld [vmem:[#allocation5 + $0xbe0] ss:$16 sps:$4 sm:$0xff]   ;;  %v8776_v33 = vld [vmem:[#allocation5 + $0x80c] ss:$16 sps:$4 sm:$0xff]  }
 0x21a   : > { %5114 = vmatprep.subr.bf16.mxu0 %v8701_v32  ;;  %v8773_v32 = vld [vmem:[#allocation5 + $0xc04] ss:$16 sps:$4 sm:$0xff]  }
 0x21c   : > { %5592 = vmatpush1.bf16.msra.mxu1 %v8702_v35  ;;  %v495_v35 = vld [vmem:[%s10176_s25 + $0x100] sm:$0xff] }
 0x21d   : > { %5115 = vmatpush1.bf16.msra.mxu0 %v8699_v34  ;;  %5593 = vmatprep.subr.bf16.mxu1 %v8710_v56  ;;  %v473_v34 = vld [vmem:[%s10176_s25 + $0x50] sm:$0xff]  ;;  %v540_v56 = vld [vmem:[%s10176_s25 + $0x268] sm:$0xff] }
 0x21e   : > { %5116 = vmatprep.subr.bf16.mxu0 %v8707_v37  ;;  %v10316_v45 = vpop.f32.mrb[0].mxu1  ;;  %v518_v37 = vld [vmem:[%s10176_s25 + $0x1b8] sm:$0xff] }
 0x21f   : > { %v10318_v47 = vpop.f32.mrb[1].mxu1 }
 0x220   : > { %v10320_v48 = vpop.f32.mrb[2].mxu1  ;;  %5594 = vmatpush1.bf16.msra.mxu1 %v8708_v39  ;;  %v8771_v39 = vld [vmem:[#allocation5 + $0xc00] ss:$16 sps:$4 sm:$0xff]  }
 0x221   : > { %5117 = vmatpush1.bf16.msra.mxu0 %v8705_v38  ;;  %v10322_v51 = vpop.f32.mrb[3].mxu1  ;;  %5595 = vmatprep.subr.bf16.mxu1 %v8716_v43  ;;  %v10336_v38 = vpack.c.bf16 %v495_v35, %v473_v34  ;;  %v8779_v43 = vld [vmem:[#allocation5 + $0xc24] ss:$16 sps:$4 sm:$0xff]   ;;  %v8831_v34 = vld [vmem:[#allocation5 + $0xd40] ss:$16 sps:$4 sm:$0xff]  }
 0x222   : > { %5118 = vmatprep.subr.bf16.mxu0 %v8713_v42  ;;  %v8774_v42 = vld [vmem:[#allocation5 + $0x808] ss:$16 sps:$4 sm:$0xff]  }
 0x223   : > { %v8834_v35 = vld [vmem:[#allocation5 + $0x948] ss:$16 sps:$4 sm:$0xff]  }
 0x224   : > { %5596 = vmatpush1.bf16.msra.mxu1 %v8714_v49  ;;  %v8777_v49 = vld [vmem:[#allocation5 + $0xc20] ss:$16 sps:$4 sm:$0xff]  }
 0x225   : > { %5119 = vmatpush1.bf16.msra.mxu0 %v8711_v61  ;;  %5597 = vmatprep.subr.bf16.mxu1 %v8722_v54  ;;  %v8782_v61 = vld [vmem:[#allocation5 + $0x82c] ss:$16 sps:$4 sm:$0xff]   ;;  %v10338_v54 = vpack.c.bf16 %v540_v56, %v518_v37  ;;  %v8839_v37 = vld [vmem:[#allocation5 + $0xd64] ss:$16 sps:$4 sm:$0xff]  }
 0x226   : > { %5120 = vmatprep.subr.bf16.mxu0 %v8719_v52  ;;  %v10324_v9 = vpop.f32.mrb[4].mxu1  ;;  %v8780_v52 = vld [vmem:[#allocation5 + $0x828] ss:$16 sps:$4 sm:$0xff]   ;;  %v8842_v56 = vld [vmem:[#allocation5 + $0x96c] ss:$16 sps:$4 sm:$0xff]  }
 0x227   : > { %v10326_v10 = vpop.f32.mrb[5].mxu1 }
 0x228   : > { %5598 = vmatpush1.bf16.msra.mxu1 %v8720_v57  ;;  %v10328_v46 = vpop.f32.mrb[6].mxu1  ;;  %v8788_v57 = vld [vmem:[#allocation5 + $0x84c] ss:$16 sps:$4 sm:$0xff]  }
 0x229   : > { %5121 = vmatpush1.bf16.msra.mxu0 %v8717_v12  ;;  %5599 = vmatprep.subr.bf16.mxu1 %v8728_v59  ;;  %v10330_v18 = vpop.f32.mrb[7].mxu1  ;;  %v8785_v12 = vld [vmem:[#allocation5 + $0xc44] ss:$16 sps:$4 sm:$0xff]  }
 0x22a   : > { %5122 = vmatprep.subr.bf16.mxu0 %v8725_v58  ;;  %v517_v58 = vld [vmem:[%s10176_s25 + $0x1b0] sm:$0xff]  ;;  %v539_v59 = vld [vmem:[%s10176_s25 + $0x260] sm:$0xff] }
 0x22c   : > { %5600 = vmatpush1.bf16.msra.mxu1 %v8726_v40  ;;  %v498_v40 = vld [vmem:[%s10176_s25 + $0x118] sm:$0xff] }
 0x22d   : > { %5123 = vmatpush1.bf16.msra.mxu0 %v8723_v63  ;;  %5601 = vmatprep.subr.bf16.mxu1 %v8734_v1  ;;  %v476_v63 = vld [vmem:[%s10176_s25 + $0x68] sm:$0xff]  ;;  %v8783_v1 = vld [vmem:[#allocation5 + $0xc40] ss:$16 sps:$4 sm:$0xff]  }
 0x22e   : > { %5124 = vmatprep.subr.bf16.mxu0 %v8731_v0  ;;  %v10348_v0 = vpack.c.bf16 %v539_v59, %v517_v58  ;;  %v8849_v58 = vld [vmem:[#allocation5 + $0xda0] ss:$16 sps:$4 sm:$0xff]   ;;  %v8852_v59 = vld [vmem:[#allocation5 + $0x9a8] ss:$16 sps:$4 sm:$0xff]  }
 0x230   : > { %5602 = vmatpush1.bf16.msra.mxu1 %v8732_v3  ;;  %v8794_v3 = vld [vmem:[#allocation5 + $0x86c] ss:$16 sps:$4 sm:$0xff]  }
 0x231   : > { %5125 = vmatpush1.bf16.msra.mxu0 %v8729_v50  ;;  %5603 = vmatprep.subr.bf16.mxu1 %v8740_v41  ;;  %v8791_v50 = vld [vmem:[#allocation5 + $0xc64] ss:$16 sps:$4 sm:$0xff]   ;;  %v8789_v41 = vld [vmem:[#allocation5 + $0xc60] ss:$16 sps:$4 sm:$0xff]  }
 0x232   : > { %5126 = vmatprep.subr.bf16.mxu0 %v8737_v4  ;;  %v10350_v4 = vpack.c.bf16 %v498_v40, %v476_v63  ;;  %v8857_v63 = vld [vmem:[#allocation5 + $0xdc4] ss:$16 sps:$4 sm:$0xff]   ;;  %v8860_v40 = vld [vmem:[#allocation5 + $0x9cc] ss:$16 sps:$4 sm:$0xff]  }
 0x234   : > { %5604 = vmatpush1.bf16.msra.mxu1 %v8738_v6  ;;  %v8800_v6 = vld [vmem:[#allocation5 + $0x88c] ss:$16 sps:$4 sm:$0xff]  }
 0x235   : > { %5127 = vmatpush1.bf16.msra.mxu0 %v8735_v5  ;;  %5605 = vmatprep.subr.bf16.mxu1 %v8746_v8  ;;  %v8797_v5 = vld [vmem:[#allocation5 + $0xc84] ss:$16 sps:$4 sm:$0xff]   ;;  %v8798_v8 = vld [vmem:[#allocation5 + $0x888] ss:$16 sps:$4 sm:$0xff]  }
 0x236   : > { %5128 = vmatprep.subr.bf16.mxu0 %v8743_v7  ;;  %v8795_v7 = vld [vmem:[#allocation5 + $0xc80] ss:$16 sps:$4 sm:$0xff]  }
 0x238   : > { %5606 = vmatpush1.bf16.msra.mxu1 %v8744_v11  ;;  %v8801_v11 = vld [vmem:[#allocation5 + $0xca0] ss:$16 sps:$4 sm:$0xff]  }
 0x239   : > { %5129 = vmatpush1.bf16.msra.mxu0 %v8741_v15  ;;  %5607 = vmatprep.subr.bf16.mxu1 %v8752_v17  ;;  %v8803_v15 = vld [vmem:[#allocation5 + $0xca4] ss:$16 sps:$4 sm:$0xff]  }
 0x23a   : > { %5130 = vmatprep.subr.bf16.mxu0 %v8749_v16  ;;  %v8804_v16 = vld [vmem:[#allocation5 + $0x8a8] ss:$16 sps:$4 sm:$0xff]   ;;  %v8809_v17 = vld [vmem:[#allocation5 + $0xcc4] ss:$16 sps:$4 sm:$0xff]  }
 0x23c   : > { %5608 = vmatpush1.bf16.msra.mxu1 %v8750_v20  ;;  %v8807_v20 = vld [vmem:[#allocation5 + $0xcc0] ss:$16 sps:$4 sm:$0xff]  }
 0x23d   : > { %5131 = vmatpush1.bf16.msra.mxu0 %v8747_v19  ;;  %5609 = vmatprep.subr.bf16.mxu1 %v8758_v22  ;;  %v8812_v19 = vld [vmem:[#allocation5 + $0x8cc] ss:$16 sps:$4 sm:$0xff]  }
 0x23e   : > { %5132 = vmatprep.subr.bf16.mxu0 %v8755_v53  ;;  %v8815_v53 = vld [vmem:[#allocation5 + $0xce4] ss:$16 sps:$4 sm:$0xff]   ;;  %v8818_v22 = vld [vmem:[#allocation5 + $0x8ec] ss:$16 sps:$4 sm:$0xff]  }
 0x240   : > { %5610 = vmatpush1.bf16.msra.mxu1 %v8756_v24  ;;  %v8816_v24 = vld [vmem:[#allocation5 + $0x8e8] ss:$16 sps:$4 sm:$0xff]  }
 0x241   : > { %5133 = vmatpush1.bf16.msra.mxu0 %v8753_v23  ;;  %5611 = vmatprep.subr.bf16.mxu1 %v8764_v60  ;;  %v8813_v23 = vld [vmem:[#allocation5 + $0xce0] ss:$16 sps:$4 sm:$0xff]   ;;  %v8824_v60 = vld [vmem:[#allocation5 + $0x90c] ss:$16 sps:$4 sm:$0xff]  }
 0x242   : > { %5134 = vmatprep.subr.bf16.mxu0 %v8761_v25  ;;  %v8821_v25 = vld [vmem:[#allocation5 + $0xd04] ss:$16 sps:$4 sm:$0xff]  }
 0x244   : > { %5612 = vmatpush1.bf16.msra.mxu1 %v8762_v36  ;;  %v8822_v36 = vld [vmem:[#allocation5 + $0x908] ss:$16 sps:$4 sm:$0xff]  }
 0x245   : > { %5135 = vmatpush1.bf16.msra.mxu0 %v8759_v27  ;;  %5613 = vmatprep.subr.bf16.mxu1 %v8770_v29  ;;  %v8819_v27 = vld [vmem:[#allocation5 + $0xd00] ss:$16 sps:$4 sm:$0xff]   ;;  %v8830_v29 = vld [vmem:[#allocation5 + $0x92c] ss:$16 sps:$4 sm:$0xff]  }
 0x246   : > { %5136 = vmatprep.subr.bf16.mxu0 %v8767_v28  ;;  %v8827_v28 = vld [vmem:[#allocation5 + $0xd24] ss:$16 sps:$4 sm:$0xff]  }
 0x248   : > { %5614 = vmatpush1.bf16.msra.mxu1 %v8768_v31  ;;  %v8828_v31 = vld [vmem:[#allocation5 + $0x928] ss:$16 sps:$4 sm:$0xff]  }
 0x249   : > { %5137 = vmatpush1.bf16.msra.mxu0 %v8765_v44  ;;  %5636 = vmatprep.subr.bf16.mxu1 %v8776_v33  ;;  %v8825_v44 = vld [vmem:[#allocation5 + $0xd20] ss:$16 sps:$4 sm:$0xff]   ;;  %v8836_v33 = vld [vmem:[#allocation5 + $0x94c] ss:$16 sps:$4 sm:$0xff]  }
 0x24a   : > { %5159 = vmatprep.subr.bf16.mxu0 %v8773_v32  ;;  %v8833_v32 = vld [vmem:[#allocation5 + $0xd44] ss:$16 sps:$4 sm:$0xff]  }
 0x24b   : > { %5616 = vmatmul.mubr.bf16.vlgmr.msra.gmra.mrb[8].mxu1 %v10270_v62  ;;  %v8786_v62 = vld [vmem:[#allocation5 + $0x848] ss:$16 sps:$4 sm:$0xff]  }
 0x24c   : > { %5139 = vmatmul.mubr.bf16.vlgmr.msra.gmra.mrb[0].mxu0 %v10336_v38  ;;  %5637 = vmatpush1.bf16.msra.mxu1 %v8774_v42  ;;  %v8840_v42 = vld [vmem:[#allocation5 + $0x968] ss:$16 sps:$4 sm:$0xff]  }
 0x24d   : > { %5160 = vmatpush1.bf16.msra.mxu0 %v8771_v39  ;;  %5638 = vmatprep.subr.bf16.mxu1 %v8782_v61  ;;  %v8837_v39 = vld [vmem:[#allocation5 + $0xd60] ss:$16 sps:$4 sm:$0xff]   ;;  %v8848_v61 = vld [vmem:[#allocation5 + $0x98c] ss:$16 sps:$4 sm:$0xff]  }
 0x24e   : > { %5161 = vmatprep.subr.bf16.mxu0 %v8779_v43  ;;  %5148 = vmatprep.mubr.bf16.mxu0 %v10338_v54  ;;  %v8845_v43 = vld [vmem:[#allocation5 + $0xd84] ss:$16 sps:$4 sm:$0xff]  }
 0x24f   : > { %5625 = vmatprep.mubr.bf16.mxu1 %v10274_v2  ;;  %v8792_v2 = vld [vmem:[#allocation5 + $0x868] ss:$16 sps:$4 sm:$0xff]  }
 0x250   : > { %5639 = vmatpush1.bf16.msra.mxu1 %v8780_v52  ;;  %v8846_v52 = vld [vmem:[#allocation5 + $0x988] ss:$16 sps:$4 sm:$0xff]  }
 0x251   : > { %5162 = vmatpush1.bf16.msra.mxu0 %v8777_v49  ;;  %5640 = vmatprep.subr.bf16.mxu1 %v8788_v57  ;;  %v8843_v49 = vld [vmem:[#allocation5 + $0xd80] ss:$16 sps:$4 sm:$0xff]   ;;  %v8854_v57 = vld [vmem:[#allocation5 + $0x9ac] ss:$16 sps:$4 sm:$0xff]  }
 0x252   : > { %5163 = vmatprep.subr.bf16.mxu0 %v8785_v12  ;;  %v8851_v12 = vld [vmem:[#allocation5 + $0xda4] ss:$16 sps:$4 sm:$0xff]  }
 0x253   : > { %5626 = vmatmul.mubr.bf16.gmra.mrb[12].mxu1 %v10283_v55  ;;  %v8806_v55 = vld [vmem:[#allocation5 + $0x8ac] ss:$16 sps:$4 sm:$0xff]  }
 0x254   : > { %5149 = vmatmul.mubr.bf16.gmra.mrb[4].mxu0 %v10348_v0  ;;  %5641 = vmatpush1.bf16.msra.mxu1 %v8786_v62  ;;  %v8858_v62 = vld [vmem:[#allocation5 + $0x9c8] ss:$16 sps:$4 sm:$0xff]  }
 0x255   : > { %5164 = vmatpush1.bf16.msra.mxu0 %v8783_v1  ;;  %5642 = vmatprep.subr.bf16.mxu1 %v8794_v3  ;;  %v8855_v1 = vld [vmem:[#allocation5 + $0xdc0] ss:$16 sps:$4 sm:$0xff]   ;;  %v8866_v3 = vld [vmem:[#allocation5 + $0x9ec] ss:$16 sps:$4 sm:$0xff]  }
 0x256   : > { %5165 = vmatprep.subr.bf16.mxu0 %v8791_v50  ;;  %5191 = vmatprep.mubr.bf16.mxu0 %v10350_v4  ;;  %v8863_v50 = vld [vmem:[#allocation5 + $0xde4] ss:$16 sps:$4 sm:$0xff]  }
 0x257   : > { %5668 = vmatprep.mubr.bf16.mxu1 %v10286_v13  ;;  %v8810_v13 = vld [vmem:[#allocation5 + $0x8c8] ss:$16 sps:$4 sm:$0xff]  }
 0x258   : > { %5643 = vmatpush1.bf16.msra.mxu1 %v8792_v2  ;;  %v8864_v2 = vld [vmem:[#allocation5 + $0x9e8] ss:$16 sps:$4 sm:$0xff]  }
 0x259   : > { %5166 = vmatpush1.bf16.msra.mxu0 %v8789_v41  ;;  %5644 = vmatprep.subr.bf16.mxu1 %v8800_v6  ;;  %v8861_v41 = vld [vmem:[#allocation5 + $0xde0] ss:$16 sps:$4 sm:$0xff]   ;;  %v8872_v6 = vld [vmem:[#allocation5 + $0xa0c] ss:$16 sps:$4 sm:$0xff]  }
 0x25a   : > { %5167 = vmatprep.subr.bf16.mxu0 %v8797_v5  ;;  %v8869_v5 = vld [vmem:[#allocation5 + $0xe04] ss:$16 sps:$4 sm:$0xff]  }
 0x25c   : > { %5645 = vmatpush1.bf16.msra.mxu1 %v8798_v8  ;;  %v497_v8 = vld [vmem:[%s10176_s25 + $0x110] sm:$0xff] }
 0x25d   : > { %5168 = vmatpush1.bf16.msra.mxu0 %v8795_v7  ;;  %5646 = vmatprep.subr.bf16.mxu1 %v8806_v55  ;;  %v475_v7 = vld [vmem:[%s10176_s25 + $0x60] sm:$0xff]  ;;  %v542_v55 = vld [vmem:[%s10176_s25 + $0x278] sm:$0xff] }
 0x25e   : > { %5169 = vmatprep.subr.bf16.mxu0 %v8803_v15  ;;  %v520_v15 = vld [vmem:[%s10176_s25 + $0x1c8] sm:$0xff] }
 0x260   : > { %5647 = vmatpush1.bf16.msra.mxu1 %v8804_v16  ;;  %v8867_v16 = vld [vmem:[#allocation5 + $0xe00] ss:$16 sps:$4 sm:$0xff]  }
 0x261   : > { %5170 = vmatpush1.bf16.msra.mxu0 %v8801_v11  ;;  %5648 = vmatprep.subr.bf16.mxu1 %v8812_v19  ;;  %v10360_v11 = vpack.c.bf16 %v497_v8, %v475_v7  ;;  %v8875_v19 = vld [vmem:[#allocation5 + $0xe24] ss:$16 sps:$4 sm:$0xff]   ;;  %v8927_v7 = vld [vmem:[#allocation5 + $0xf40] ss:$16 sps:$4 sm:$0xff]   ;;  %v8930_v8 = vld [vmem:[#allocation5 + $0xb48] ss:$16 sps:$4 sm:$0xff]  }
 0x262   : > { %5171 = vmatprep.subr.bf16.mxu0 %v8809_v17  ;;  %v8870_v17 = vld [vmem:[#allocation5 + $0xa08] ss:$16 sps:$4 sm:$0xff]  }
 0x264   : > { %5649 = vmatpush1.bf16.msra.mxu1 %v8810_v13  ;;  %v8873_v13 = vld [vmem:[#allocation5 + $0xe20] ss:$16 sps:$4 sm:$0xff]  }
 0x265   : > { %5172 = vmatpush1.bf16.msra.mxu0 %v8807_v20  ;;  %5650 = vmatprep.subr.bf16.mxu1 %v8818_v22  ;;  %v8878_v20 = vld [vmem:[#allocation5 + $0xa2c] ss:$16 sps:$4 sm:$0xff]   ;;  %v10362_v22 = vpack.c.bf16 %v542_v55, %v520_v15  ;;  %v8935_v15 = vld [vmem:[#allocation5 + $0xf64] ss:$16 sps:$4 sm:$0xff]  }
 0x266   : > { %5173 = vmatprep.subr.bf16.mxu0 %v8815_v53  ;;  %v8876_v53 = vld [vmem:[#allocation5 + $0xa28] ss:$16 sps:$4 sm:$0xff]   ;;  %v8938_v55 = vld [vmem:[#allocation5 + $0xb6c] ss:$16 sps:$4 sm:$0xff]  }
 0x268   : > { %5651 = vmatpush1.bf16.msra.mxu1 %v8816_v24  ;;  %v8884_v24 = vld [vmem:[#allocation5 + $0xa4c] ss:$16 sps:$4 sm:$0xff]  }
 0x269   : > { %5174 = vmatpush1.bf16.msra.mxu0 %v8813_v23  ;;  %5652 = vmatprep.subr.bf16.mxu1 %v8824_v60  ;;  %v8881_v23 = vld [vmem:[#allocation5 + $0xe44] ss:$16 sps:$4 sm:$0xff]  }
 0x26a   : > { %5175 = vmatprep.subr.bf16.mxu0 %v8821_v25  ;;  %v519_v25 = vld [vmem:[%s10176_s25 + $0x1c0] sm:$0xff]  ;;  %v541_v60 = vld [vmem:[%s10176_s25 + $0x270] sm:$0xff] }
 0x26c   : > { %5653 = vmatpush1.bf16.msra.mxu1 %v8822_v36  ;;  %v500_v36 = vld [vmem:[%s10176_s25 + $0x128] sm:$0xff] }
 0x26d   : > { %5176 = vmatpush1.bf16.msra.mxu0 %v8819_v27  ;;  %5654 = vmatprep.subr.bf16.mxu1 %v8830_v29  ;;  %v478_v27 = vld [vmem:[%s10176_s25 + $0x78] sm:$0xff]  ;;  %v8879_v29 = vld [vmem:[#allocation5 + $0xe40] ss:$16 sps:$4 sm:$0xff]  }
 0x26e   : > { %5177 = vmatprep.subr.bf16.mxu0 %v8827_v28  ;;  %v10372_v28 = vpack.c.bf16 %v541_v60, %v519_v25  ;;  %v8945_v25 = vld [vmem:[#allocation5 + $0xfa0] ss:$16 sps:$4 sm:$0xff]   ;;  %v8948_v60 = vld [vmem:[#allocation5 + $0xba8] ss:$16 sps:$4 sm:$0xff]  }
 0x270   : > { %5655 = vmatpush1.bf16.msra.mxu1 %v8828_v31  ;;  %v8890_v31 = vld [vmem:[#allocation5 + $0xa6c] ss:$16 sps:$4 sm:$0xff]  }
 0x271   : > { %5178 = vmatpush1.bf16.msra.mxu0 %v8825_v44  ;;  %5656 = vmatprep.subr.bf16.mxu1 %v8836_v33  ;;  %v8887_v44 = vld [vmem:[#allocation5 + $0xe64] ss:$16 sps:$4 sm:$0xff]   ;;  %v8885_v33 = vld [vmem:[#allocation5 + $0xe60] ss:$16 sps:$4 sm:$0xff]  }
 0x272   : > { %5179 = vmatprep.subr.bf16.mxu0 %v8833_v32  ;;  %v10374_v32 = vpack.c.bf16 %v500_v36, %v478_v27  ;;  %v8953_v27 = vld [vmem:[#allocation5 + $0xfc4] ss:$16 sps:$4 sm:$0xff]   ;;  %v8956_v36 = vld [vmem:[#allocation5 + $0xbcc] ss:$16 sps:$4 sm:$0xff]  }
 0x274   : > { %5657 = vmatpush1.bf16.msra.mxu1 %v8834_v35  ;;  %v8896_v35 = vld [vmem:[#allocation5 + $0xa8c] ss:$16 sps:$4 sm:$0xff]  }
 0x275   : > { %5180 = vmatpush1.bf16.msra.mxu0 %v8831_v34  ;;  %5658 = vmatprep.subr.bf16.mxu1 %v8842_v56  ;;  %v8893_v34 = vld [vmem:[#allocation5 + $0xe84] ss:$16 sps:$4 sm:$0xff]   ;;  %v8894_v56 = vld [vmem:[#allocation5 + $0xa88] ss:$16 sps:$4 sm:$0xff]  }
 0x276   : > { %5181 = vmatprep.subr.bf16.mxu0 %v8839_v37  ;;  %v8891_v37 = vld [vmem:[#allocation5 + $0xe80] ss:$16 sps:$4 sm:$0xff]  }
 0x278   : > { %5659 = vmatpush1.bf16.msra.mxu1 %v8840_v42  ;;  %v8897_v42 = vld [vmem:[#allocation5 + $0xea0] ss:$16 sps:$4 sm:$0xff]  }
 0x279   : > { %5182 = vmatpush1.bf16.msra.mxu0 %v8837_v39  ;;  %5660 = vmatprep.subr.bf16.mxu1 %v8848_v61  ;;  %v8899_v39 = vld [vmem:[#allocation5 + $0xea4] ss:$16 sps:$4 sm:$0xff]  }
 0x27a   : > { %5183 = vmatprep.subr.bf16.mxu0 %v8845_v43  ;;  %v8900_v43 = vld [vmem:[#allocation5 + $0xaa8] ss:$16 sps:$4 sm:$0xff]   ;;  %v8905_v61 = vld [vmem:[#allocation5 + $0xec4] ss:$16 sps:$4 sm:$0xff]  }
 0x27c   : > { %5661 = vmatpush1.bf16.msra.mxu1 %v8846_v52  ;;  %v8903_v52 = vld [vmem:[#allocation5 + $0xec0] ss:$16 sps:$4 sm:$0xff]  }
 0x27d   : > { %5184 = vmatpush1.bf16.msra.mxu0 %v8843_v49  ;;  %5662 = vmatprep.subr.bf16.mxu1 %v8854_v57  ;;  %v8908_v49 = vld [vmem:[#allocation5 + $0xacc] ss:$16 sps:$4 sm:$0xff]  }
 0x27e   : > { %5185 = vmatprep.subr.bf16.mxu0 %v8851_v12  ;;  %v8911_v12 = vld [vmem:[#allocation5 + $0xee4] ss:$16 sps:$4 sm:$0xff]   ;;  %v8914_v57 = vld [vmem:[#allocation5 + $0xaec] ss:$16 sps:$4 sm:$0xff]  }
 0x280   : > { %5663 = vmatpush1.bf16.msra.mxu1 %v8852_v59  ;;  %v8912_v59 = vld [vmem:[#allocation5 + $0xae8] ss:$16 sps:$4 sm:$0xff]  }
 0x281   : > { %5186 = vmatpush1.bf16.msra.mxu0 %v8849_v58  ;;  %5664 = vmatprep.subr.bf16.mxu1 %v8860_v40  ;;  %v8909_v58 = vld [vmem:[#allocation5 + $0xee0] ss:$16 sps:$4 sm:$0xff]   ;;  %v8920_v40 = vld [vmem:[#allocation5 + $0xb0c] ss:$16 sps:$4 sm:$0xff]  }
 0x282   : > { %5187 = vmatprep.subr.bf16.mxu0 %v8857_v63  ;;  %v8917_v63 = vld [vmem:[#allocation5 + $0xf04] ss:$16 sps:$4 sm:$0xff]  }
 0x284   : > { %5665 = vmatpush1.bf16.msra.mxu1 %v8858_v62  ;;  %v8918_v62 = vld [vmem:[#allocation5 + $0xb08] ss:$16 sps:$4 sm:$0xff]  }
 0x285   : > { %5188 = vmatpush1.bf16.msra.mxu0 %v8855_v1  ;;  %5666 = vmatprep.subr.bf16.mxu1 %v8866_v3  ;;  %v8915_v1 = vld [vmem:[#allocation5 + $0xf00] ss:$16 sps:$4 sm:$0xff]   ;;  %v8926_v3 = vld [vmem:[#allocation5 + $0xb2c] ss:$16 sps:$4 sm:$0xff]  }
 0x286   : > { %5189 = vmatprep.subr.bf16.mxu0 %v8863_v50  ;;  %v8923_v50 = vld [vmem:[#allocation5 + $0xf24] ss:$16 sps:$4 sm:$0xff]  }
 0x288   : > { %5667 = vmatpush1.bf16.msra.mxu1 %v8864_v2  ;;  %v8924_v2 = vld [vmem:[#allocation5 + $0xb28] ss:$16 sps:$4 sm:$0xff]  }
 0x289   : > { %5190 = vmatpush1.bf16.msra.mxu0 %v8861_v41  ;;  %5689 = vmatprep.subr.bf16.mxu1 %v8872_v6  ;;  %v8921_v41 = vld [vmem:[#allocation5 + $0xf20] ss:$16 sps:$4 sm:$0xff]   ;;  %v8932_v6 = vld [vmem:[#allocation5 + $0xb4c] ss:$16 sps:$4 sm:$0xff]  }
 0x28a   : > { %5212 = vmatprep.subr.bf16.mxu0 %v8869_v5  ;;  %v8929_v5 = vld [vmem:[#allocation5 + $0xf44] ss:$16 sps:$4 sm:$0xff]  }
 0x28b   : > { %5669 = vmatmul.mubr.bf16.vlgmr.msra.gmra.mrb[8].mxu1 %v10295_v14  ;;  %v8882_v14 = vld [vmem:[#allocation5 + $0xa48] ss:$16 sps:$4 sm:$0xff]  }
 0x28c   : > { %5192 = vmatmul.mubr.bf16.vlgmr.msra.gmra.mrb[0].mxu0 %v10360_v11  ;;  %5690 = vmatpush1.bf16.msra.mxu1 %v8870_v17  ;;  %v8936_v17 = vld [vmem:[#allocation5 + $0xb68] ss:$16 sps:$4 sm:$0xff]  }
 0x28d   : > { %5213 = vmatpush1.bf16.msra.mxu0 %v8867_v16  ;;  %5691 = vmatprep.subr.bf16.mxu1 %v8878_v20  ;;  %v8933_v16 = vld [vmem:[#allocation5 + $0xf60] ss:$16 sps:$4 sm:$0xff]   ;;  %v8944_v20 = vld [vmem:[#allocation5 + $0xb8c] ss:$16 sps:$4 sm:$0xff]  }
 0x28e   : > { %5214 = vmatprep.subr.bf16.mxu0 %v8875_v19  ;;  %5201 = vmatprep.mubr.bf16.mxu0 %v10362_v22  ;;  %v8941_v19 = vld [vmem:[#allocation5 + $0xf84] ss:$16 sps:$4 sm:$0xff]  }
 0x28f   : > { %5678 = vmatprep.mubr.bf16.mxu1 %v10298_v21  ;;  %v8888_v21 = vld [vmem:[#allocation5 + $0xa68] ss:$16 sps:$4 sm:$0xff]  }
 0x290   : > { %5692 = vmatpush1.bf16.msra.mxu1 %v8876_v53  ;;  %v8942_v53 = vld [vmem:[#allocation5 + $0xb88] ss:$16 sps:$4 sm:$0xff]  }
 0x291   : > { %5215 = vmatpush1.bf16.msra.mxu0 %v8873_v13  ;;  %5693 = vmatprep.subr.bf16.mxu1 %v8884_v24  ;;  %v8939_v13 = vld [vmem:[#allocation5 + $0xf80] ss:$16 sps:$4 sm:$0xff]   ;;  %v8950_v24 = vld [vmem:[#allocation5 + $0xbac] ss:$16 sps:$4 sm:$0xff]  }
 0x292   : > { %5216 = vmatprep.subr.bf16.mxu0 %v8881_v23  ;;  %v8947_v23 = vld [vmem:[#allocation5 + $0xfa4] ss:$16 sps:$4 sm:$0xff]  }
 0x293   : > { %5679 = vmatmul.mubr.bf16.gmra.mrb[12].mxu1 %v10307_v26  ;;  %v8902_v26 = vld [vmem:[#allocation5 + $0xaac] ss:$16 sps:$4 sm:$0xff]  }
 0x294   : > { %5202 = vmatmul.mubr.bf16.gmra.mrb[4].mxu0 %v10372_v28  ;;  %5694 = vmatpush1.bf16.msra.mxu1 %v8882_v14  ;;  %v8954_v14 = vld [vmem:[#allocation5 + $0xbc8] ss:$16 sps:$4 sm:$0xff]  }
 0x295   : > { %5217 = vmatpush1.bf16.msra.mxu0 %v8879_v29  ;;  %5695 = vmatprep.subr.bf16.mxu1 %v8890_v31  ;;  %v8951_v29 = vld [vmem:[#allocation5 + $0xfc0] ss:$16 sps:$4 sm:$0xff]   ;;  %v8962_v31 = vld [vmem:[#allocation5 + $0xbec] ss:$16 sps:$4 sm:$0xff]  }
 0x296   : > { %5218 = vmatprep.subr.bf16.mxu0 %v8887_v44  ;;  %5244 = vmatprep.mubr.bf16.mxu0 %v10374_v32  ;;  %v8959_v44 = vld [vmem:[#allocation5 + $0xfe4] ss:$16 sps:$4 sm:$0xff]  }
 0x297   : > { %5721 = vmatprep.mubr.bf16.mxu1 %v10310_v30  ;;  %v8906_v30 = vld [vmem:[#allocation5 + $0xac8] ss:$16 sps:$4 sm:$0xff]  }
 0x298   : > { %5696 = vmatpush1.bf16.msra.mxu1 %v8888_v21  ;;  %v8960_v21 = vld [vmem:[#allocation5 + $0xbe8] ss:$16 sps:$4 sm:$0xff]  }
 0x299   : > { %5219 = vmatpush1.bf16.msra.mxu0 %v8885_v33  ;;  %5697 = vmatprep.subr.bf16.mxu1 %v8896_v35  ;;  %v8957_v33 = vld [vmem:[#allocation5 + $0xfe0] ss:$16 sps:$4 sm:$0xff]   ;;  %v8968_v35 = vld [vmem:[#allocation5 + $0xc0c] ss:$16 sps:$4 sm:$0xff]  }
 0x29a   : > { %5220 = vmatprep.subr.bf16.mxu0 %v8893_v34  ;;  %v8965_v34 = vld [vmem:[#allocation5 + $0x1004] ss:$16 sps:$4 sm:$0xff]  }
 0x29c   : > { %5698 = vmatpush1.bf16.msra.mxu1 %v8894_v56  ;;  %v499_v56 = vld [vmem:[%s10176_s25 + $0x120] sm:$0xff] }
 0x29d   : > { %5221 = vmatpush1.bf16.msra.mxu0 %v8891_v37  ;;  %5699 = vmatprep.subr.bf16.mxu1 %v8902_v26  ;;  %v477_v37 = vld [vmem:[%s10176_s25 + $0x70] sm:$0xff]  ;;  %v544_v26 = vld [vmem:[%s10176_s25 + $0x288] sm:$0xff] }
 0x29e   : > { %5222 = vmatprep.subr.bf16.mxu0 %v8899_v39  ;;  %v522_v39 = vld [vmem:[%s10176_s25 + $0x1d8] sm:$0xff] }
 0x2a0   : > { %5700 = vmatpush1.bf16.msra.mxu1 %v8900_v43  ;;  %v8963_v43 = vld [vmem:[#allocation5 + $0x1000] ss:$16 sps:$4 sm:$0xff]  }
 0x2a1   : > { %5223 = vmatpush1.bf16.msra.mxu0 %v8897_v42  ;;  %5701 = vmatprep.subr.bf16.mxu1 %v8908_v49  ;;  %v10384_v42 = vpack.c.bf16 %v499_v56, %v477_v37  ;;  %v8971_v49 = vld [vmem:[#allocation5 + $0x1024] ss:$16 sps:$4 sm:$0xff]   ;;  %v9023_v37 = vld [vmem:[#allocation5 + $0x1140] ss:$16 sps:$4 sm:$0xff]   ;;  %v9026_v56 = vld [vmem:[#allocation5 + $0xd48] ss:$16 sps:$4 sm:$0xff]  }
 0x2a2   : > { %5224 = vmatprep.subr.bf16.mxu0 %v8905_v61  ;;  %v8966_v61 = vld [vmem:[#allocation5 + $0xc08] ss:$16 sps:$4 sm:$0xff]  }
 0x2a4   : > { %5702 = vmatpush1.bf16.msra.mxu1 %v8906_v30  ;;  %v8969_v30 = vld [vmem:[#allocation5 + $0x1020] ss:$16 sps:$4 sm:$0xff]  }
 0x2a5   : > { %5225 = vmatpush1.bf16.msra.mxu0 %v8903_v52  ;;  %5703 = vmatprep.subr.bf16.mxu1 %v8914_v57  ;;  %v8974_v52 = vld [vmem:[#allocation5 + $0xc2c] ss:$16 sps:$4 sm:$0xff]   ;;  %v10386_v57 = vpack.c.bf16 %v544_v26, %v522_v39  ;;  %v9031_v39 = vld [vmem:[#allocation5 + $0x1164] ss:$16 sps:$4 sm:$0xff]  }
 0x2a6   : > { %5226 = vmatprep.subr.bf16.mxu0 %v8911_v12  ;;  %v8972_v12 = vld [vmem:[#allocation5 + $0xc28] ss:$16 sps:$4 sm:$0xff]   ;;  %v9034_v26 = vld [vmem:[#allocation5 + $0xd6c] ss:$16 sps:$4 sm:$0xff]  }
 0x2a8   : > { %5704 = vmatpush1.bf16.msra.mxu1 %v8912_v59  ;;  %v8980_v59 = vld [vmem:[#allocation5 + $0xc4c] ss:$16 sps:$4 sm:$0xff]  }
 0x2a9   : > { %5227 = vmatpush1.bf16.msra.mxu0 %v8909_v58  ;;  %5705 = vmatprep.subr.bf16.mxu1 %v8920_v40  ;;  %v8977_v58 = vld [vmem:[#allocation5 + $0x1044] ss:$16 sps:$4 sm:$0xff]  }
 0x2aa   : > { %5228 = vmatprep.subr.bf16.mxu0 %v8917_v63  ;;  %v521_v63 = vld [vmem:[%s10176_s25 + $0x1d0] sm:$0xff]  ;;  %v543_v40 = vld [vmem:[%s10176_s25 + $0x280] sm:$0xff] }
 0x2ac   : > { %5706 = vmatpush1.bf16.msra.mxu1 %v8918_v62  ;;  %v502_v62 = vld [vmem:[%s10176_s25 + $0x138] sm:$0xff] }
 0x2ad   : > { %5229 = vmatpush1.bf16.msra.mxu0 %v8915_v1  ;;  %5707 = vmatprep.subr.bf16.mxu1 %v8926_v3  ;;  %v480_v1 = vld [vmem:[%s10176_s25 + $0x88] sm:$0xff]  ;;  %v8975_v3 = vld [vmem:[#allocation5 + $0x1040] ss:$16 sps:$4 sm:$0xff]  }
 0x2ae   : > { %5230 = vmatprep.subr.bf16.mxu0 %v8923_v50  ;;  %v10396_v50 = vpack.c.bf16 %v543_v40, %v521_v63  ;;  %v9041_v63 = vld [vmem:[#allocation5 + $0x11a0] ss:$16 sps:$4 sm:$0xff]   ;;  %v9044_v40 = vld [vmem:[#allocation5 + $0xda8] ss:$16 sps:$4 sm:$0xff]  }
 0x2b0   : > { %5708 = vmatpush1.bf16.msra.mxu1 %v8924_v2  ;;  %v8986_v2 = vld [vmem:[#allocation5 + $0xc6c] ss:$16 sps:$4 sm:$0xff]  }
 0x2b1   : > { %5231 = vmatpush1.bf16.msra.mxu0 %v8921_v41  ;;  %5709 = vmatprep.subr.bf16.mxu1 %v8932_v6  ;;  %v8983_v41 = vld [vmem:[#allocation5 + $0x1064] ss:$16 sps:$4 sm:$0xff]   ;;  %v8981_v6 = vld [vmem:[#allocation5 + $0x1060] ss:$16 sps:$4 sm:$0xff]  }
 0x2b2   : > { %5232 = vmatprep.subr.bf16.mxu0 %v8929_v5  ;;  %v10398_v5 = vpack.c.bf16 %v502_v62, %v480_v1  ;;  %v9049_v1 = vld [vmem:[#allocation5 + $0x11c4] ss:$16 sps:$4 sm:$0xff]   ;;  %v9052_v62 = vld [vmem:[#allocation5 + $0xdcc] ss:$16 sps:$4 sm:$0xff]  }
 0x2b4   : > { %5710 = vmatpush1.bf16.msra.mxu1 %v8930_v8  ;;  %v8992_v8 = vld [vmem:[#allocation5 + $0xc8c] ss:$16 sps:$4 sm:$0xff]  }
 0x2b5   : > { %5233 = vmatpush1.bf16.msra.mxu0 %v8927_v7  ;;  %5711 = vmatprep.subr.bf16.mxu1 %v8938_v55  ;;  %v8989_v7 = vld [vmem:[#allocation5 + $0x1084] ss:$16 sps:$4 sm:$0xff]   ;;  %v8990_v55 = vld [vmem:[#allocation5 + $0xc88] ss:$16 sps:$4 sm:$0xff]  }
 0x2b6   : > { %5234 = vmatprep.subr.bf16.mxu0 %v8935_v15  ;;  %v8987_v15 = vld [vmem:[#allocation5 + $0x1080] ss:$16 sps:$4 sm:$0xff]  }
 0x2b8   : > { %5712 = vmatpush1.bf16.msra.mxu1 %v8936_v17  ;;  %v8993_v17 = vld [vmem:[#allocation5 + $0x10a0] ss:$16 sps:$4 sm:$0xff]  }
 0x2b9   : > { %5235 = vmatpush1.bf16.msra.mxu0 %v8933_v16  ;;  %5713 = vmatprep.subr.bf16.mxu1 %v8944_v20  ;;  %v8995_v16 = vld [vmem:[#allocation5 + $0x10a4] ss:$16 sps:$4 sm:$0xff]  }
 0x2ba   : > { %5236 = vmatprep.subr.bf16.mxu0 %v8941_v19  ;;  %v8996_v19 = vld [vmem:[#allocation5 + $0xca8] ss:$16 sps:$4 sm:$0xff]   ;;  %v9001_v20 = vld [vmem:[#allocation5 + $0x10c4] ss:$16 sps:$4 sm:$0xff]  }
 0x2bc   : > { %5714 = vmatpush1.bf16.msra.mxu1 %v8942_v53  ;;  %v8999_v53 = vld [vmem:[#allocation5 + $0x10c0] ss:$16 sps:$4 sm:$0xff]  }
 0x2bd   : > { %5237 = vmatpush1.bf16.msra.mxu0 %v8939_v13  ;;  %5715 = vmatprep.subr.bf16.mxu1 %v8950_v24  ;;  %v9004_v13 = vld [vmem:[#allocation5 + $0xccc] ss:$16 sps:$4 sm:$0xff]  }
 0x2be   : > { %5238 = vmatprep.subr.bf16.mxu0 %v8947_v23  ;;  %v9007_v23 = vld [vmem:[#allocation5 + $0x10e4] ss:$16 sps:$4 sm:$0xff]   ;;  %v9010_v24 = vld [vmem:[#allocation5 + $0xcec] ss:$16 sps:$4 sm:$0xff]  }
 0x2c0   : > { %5716 = vmatpush1.bf16.msra.mxu1 %v8948_v60  ;;  %v9008_v60 = vld [vmem:[#allocation5 + $0xce8] ss:$16 sps:$4 sm:$0xff]  }
 0x2c1   : > { %5239 = vmatpush1.bf16.msra.mxu0 %v8945_v25  ;;  %5717 = vmatprep.subr.bf16.mxu1 %v8956_v36  ;;  %v9005_v25 = vld [vmem:[#allocation5 + $0x10e0] ss:$16 sps:$4 sm:$0xff]   ;;  %v9016_v36 = vld [vmem:[#allocation5 + $0xd0c] ss:$16 sps:$4 sm:$0xff]  }
 0x2c2   : > { %5240 = vmatprep.subr.bf16.mxu0 %v8953_v27  ;;  %v9013_v27 = vld [vmem:[#allocation5 + $0x1104] ss:$16 sps:$4 sm:$0xff]  }
 0x2c4   : > { %5718 = vmatpush1.bf16.msra.mxu1 %v8954_v14  ;;  %v9014_v14 = vld [vmem:[#allocation5 + $0xd08] ss:$16 sps:$4 sm:$0xff]  }
 0x2c5   : > { %5241 = vmatpush1.bf16.msra.mxu0 %v8951_v29  ;;  %5719 = vmatprep.subr.bf16.mxu1 %v8962_v31  ;;  %v9011_v29 = vld [vmem:[#allocation5 + $0x1100] ss:$16 sps:$4 sm:$0xff]   ;;  %v9022_v31 = vld [vmem:[#allocation5 + $0xd2c] ss:$16 sps:$4 sm:$0xff]  }
 0x2c6   : > { %5242 = vmatprep.subr.bf16.mxu0 %v8959_v44  ;;  %v9019_v44 = vld [vmem:[#allocation5 + $0x1124] ss:$16 sps:$4 sm:$0xff]  }
 0x2c8   : > { %5720 = vmatpush1.bf16.msra.mxu1 %v8960_v21  ;;  %v9020_v21 = vld [vmem:[#allocation5 + $0xd28] ss:$16 sps:$4 sm:$0xff]  }
 0x2c9   : > { %5243 = vmatpush1.bf16.msra.mxu0 %v8957_v33  ;;  %5742 = vmatprep.subr.bf16.mxu1 %v8968_v35  ;;  %v9017_v33 = vld [vmem:[#allocation5 + $0x1120] ss:$16 sps:$4 sm:$0xff]   ;;  %v9028_v35 = vld [vmem:[#allocation5 + $0xd4c] ss:$16 sps:$4 sm:$0xff]  }
 0x2ca   : > { %5265 = vmatprep.subr.bf16.mxu0 %v8965_v34  ;;  %v9025_v34 = vld [vmem:[#allocation5 + $0x1144] ss:$16 sps:$4 sm:$0xff]  }
 0x2cb   : > { %5722 = vmatmul.mubr.bf16.vlgmr.msra.gmra.mrb[8].mxu1 %v10336_v38  ;;  %v8978_v38 = vld [vmem:[#allocation5 + $0xc48] ss:$16 sps:$4 sm:$0xff]  }
 0x2cc   : > { %5245 = vmatmul.mubr.bf16.vlgmr.msra.gmra.mrb[0].mxu0 %v10384_v42  ;;  %5743 = vmatpush1.bf16.msra.mxu1 %v8966_v61  ;;  %v9032_v61 = vld [vmem:[#allocation5 + $0xd68] ss:$16 sps:$4 sm:$0xff]  }
 0x2cd   : > { %5266 = vmatpush1.bf16.msra.mxu0 %v8963_v43  ;;  %5744 = vmatprep.subr.bf16.mxu1 %v8974_v52  ;;  %v9029_v43 = vld [vmem:[#allocation5 + $0x1160] ss:$16 sps:$4 sm:$0xff]   ;;  %v9040_v52 = vld [vmem:[#allocation5 + $0xd8c] ss:$16 sps:$4 sm:$0xff]  }
 0x2ce   : > { %5267 = vmatprep.subr.bf16.mxu0 %v8971_v49  ;;  %5254 = vmatprep.mubr.bf16.mxu0 %v10386_v57  ;;  %v9037_v49 = vld [vmem:[#allocation5 + $0x1184] ss:$16 sps:$4 sm:$0xff]  }
 0x2cf   : > { %5731 = vmatprep.mubr.bf16.mxu1 %v10338_v54  ;;  %v8984_v54 = vld [vmem:[#allocation5 + $0xc68] ss:$16 sps:$4 sm:$0xff]  }
 0x2d0   : > { %5745 = vmatpush1.bf16.msra.mxu1 %v8972_v12  ;;  %v9038_v12 = vld [vmem:[#allocation5 + $0xd88] ss:$16 sps:$4 sm:$0xff]  }
 0x2d1   : > { %5268 = vmatpush1.bf16.msra.mxu0 %v8969_v30  ;;  %5746 = vmatprep.subr.bf16.mxu1 %v8980_v59  ;;  %v9035_v30 = vld [vmem:[#allocation5 + $0x1180] ss:$16 sps:$4 sm:$0xff]   ;;  %v9046_v59 = vld [vmem:[#allocation5 + $0xdac] ss:$16 sps:$4 sm:$0xff]  }
 0x2d2   : > { %5269 = vmatprep.subr.bf16.mxu0 %v8977_v58  ;;  %v9043_v58 = vld [vmem:[#allocation5 + $0x11a4] ss:$16 sps:$4 sm:$0xff]  }
 0x2d3   : > { %5732 = vmatmul.mubr.bf16.gmra.mrb[12].mxu1 %v10348_v0  ;;  %v8998_v0 = vld [vmem:[#allocation5 + $0xcac] ss:$16 sps:$4 sm:$0xff]  }
 0x2d4   : > { %5255 = vmatmul.mubr.bf16.gmra.mrb[4].mxu0 %v10396_v50  ;;  %5747 = vmatpush1.bf16.msra.mxu1 %v8978_v38  ;;  %v9050_v38 = vld [vmem:[#allocation5 + $0xdc8] ss:$16 sps:$4 sm:$0xff]  }
 0x2d5   : > { %5270 = vmatpush1.bf16.msra.mxu0 %v8975_v3  ;;  %5748 = vmatprep.subr.bf16.mxu1 %v8986_v2  ;;  %v9047_v3 = vld [vmem:[#allocation5 + $0x11c0] ss:$16 sps:$4 sm:$0xff]   ;;  %v9058_v2 = vld [vmem:[#allocation5 + $0xdec] ss:$16 sps:$4 sm:$0xff]  }
 0x2d6   : > { %5271 = vmatprep.subr.bf16.mxu0 %v8983_v41  ;;  %5297 = vmatprep.mubr.bf16.mxu0 %v10398_v5  ;;  %v9055_v41 = vld [vmem:[#allocation5 + $0x11e4] ss:$16 sps:$4 sm:$0xff]  }
 0x2d7   : > { %5774 = vmatprep.mubr.bf16.mxu1 %v10350_v4  ;;  %v9002_v4 = vld [vmem:[#allocation5 + $0xcc8] ss:$16 sps:$4 sm:$0xff]  }
 0x2d8   : > { %5749 = vmatpush1.bf16.msra.mxu1 %v8984_v54  ;;  %v9056_v54 = vld [vmem:[#allocation5 + $0xde8] ss:$16 sps:$4 sm:$0xff]  }
 0x2d9   : > { %5272 = vmatpush1.bf16.msra.mxu0 %v8981_v6  ;;  %5750 = vmatprep.subr.bf16.mxu1 %v8992_v8  ;;  %v9053_v6 = vld [vmem:[#allocation5 + $0x11e0] ss:$16 sps:$4 sm:$0xff]  }
 0x2da   : > { %5273 = vmatprep.subr.bf16.mxu0 %v8989_v7  ;;  %v479_v7 = vld [vmem:[%s10176_s25 + $0x80] sm:$0xff]  ;;  %v501_v8 = vld [vmem:[%s10176_s25 + $0x130] sm:$0xff] }
 0x2dc   : > { %5751 = vmatpush1.bf16.msra.mxu1 %v8990_v55  ;;  %v9064_v55 = vld [vmem:[#allocation5 + $0xe0c] ss:$16 sps:$4 sm:$0xff]  }
 0x2dd   : > { %5274 = vmatpush1.bf16.msra.mxu0 %v8987_v15  ;;  %5752 = vmatprep.subr.bf16.mxu1 %v8998_v0  ;;  %v9061_v15 = vld [vmem:[#allocation5 + $0x1204] ss:$16 sps:$4 sm:$0xff]   ;;  %v10406_v0 = vpack.c.bf16 %v501_v8, %v479_v7  ;;  %v9124_v8 = vld [vmem:[#allocation5 + $0xf4c] ss:$16 sps:$4 sm:$0xff]  }
 0x2de   : > { %5275 = vmatprep.subr.bf16.mxu0 %v8995_v16  ;;  %v9059_v16 = vld [vmem:[#allocation5 + $0x1200] ss:$16 sps:$4 sm:$0xff]   ;;  %v9121_v7 = vld [vmem:[#allocation5 + $0x1344] ss:$16 sps:$4 sm:$0xff]  }
 0x2e0   : > { %5753 = vmatpush1.bf16.msra.mxu1 %v8996_v19  ;;  %v546_v19 = vld [vmem:[%s10176_s25 + $0x298] sm:$0xff] }
 0x2e1   : > { %5276 = vmatpush1.bf16.msra.mxu0 %v8993_v17  ;;  %5754 = vmatprep.subr.bf16.mxu1 %v9004_v13  ;;  %v524_v17 = vld [vmem:[%s10176_s25 + $0x1e8] sm:$0xff]  ;;  %v9067_v13 = vld [vmem:[#allocation5 + $0x1224] ss:$16 sps:$4 sm:$0xff]  }
 0x2e2   : > { %5277 = vmatprep.subr.bf16.mxu0 %v9001_v20  ;;  %v9062_v20 = vld [vmem:[#allocation5 + $0xe08] ss:$16 sps:$4 sm:$0xff]  }
 0x2e4   : > { %5755 = vmatpush1.bf16.msra.mxu1 %v9002_v4  ;;  %v10410_v4 = vpack.c.bf16 %v546_v19, %v524_v17  ;;  %v9130_v17 = vld [vmem:[#allocation5 + $0xf6c] ss:$16 sps:$4 sm:$0xff]   ;;  %v9125_v19 = vld [vmem:[#allocation5 + $0x1360] ss:$16 sps:$4 sm:$0xff]  }
 0x2e5   : > { %5278 = vmatpush1.bf16.msra.mxu0 %v8999_v53  ;;  %5756 = vmatprep.subr.bf16.mxu1 %v9010_v24  ;;  %v9070_v53 = vld [vmem:[#allocation5 + $0xe2c] ss:$16 sps:$4 sm:$0xff]   ;;  %v9068_v24 = vld [vmem:[#allocation5 + $0xe28] ss:$16 sps:$4 sm:$0xff]  }
 0x2e6   : > { %5279 = vmatprep.subr.bf16.mxu0 %v9007_v23  ;;  %v9065_v23 = vld [vmem:[#allocation5 + $0x1220] ss:$16 sps:$4 sm:$0xff]  }
 0x2e8   : > { %5757 = vmatpush1.bf16.msra.mxu1 %v9008_v60  ;;  %v545_v60 = vld [vmem:[%s10176_s25 + $0x290] sm:$0xff] }
 0x2e9   : > { %5280 = vmatpush1.bf16.msra.mxu0 %v9005_v25  ;;  %5758 = vmatprep.subr.bf16.mxu1 %v9016_v36  ;;  %v523_v25 = vld [vmem:[%s10176_s25 + $0x1e0] sm:$0xff]  ;;  %v9076_v36 = vld [vmem:[#allocation5 + $0xe4c] ss:$16 sps:$4 sm:$0xff]  }
 0x2ea   : > { %5281 = vmatprep.subr.bf16.mxu0 %v9013_v27  ;;  %v9073_v27 = vld [vmem:[#allocation5 + $0x1244] ss:$16 sps:$4 sm:$0xff]  }
 0x2ec   : > { %5759 = vmatpush1.bf16.msra.mxu1 %v9014_v14  ;;  %v482_v14 = vld [vmem:[%s10176_s25 + $0x98] sm:$0xff] }
 0x2ed   : > { %5282 = vmatpush1.bf16.msra.mxu0 %v9011_v29  ;;  %5760 = vmatprep.subr.bf16.mxu1 %v9022_v31  ;;  %v10418_v29 = vpack.c.bf16 %v545_v60, %v523_v25  ;;  %v9074_v31 = vld [vmem:[#allocation5 + $0xe48] ss:$16 sps:$4 sm:$0xff]   ;;  %v9139_v25 = vld [vmem:[#allocation5 + $0x13a4] ss:$16 sps:$4 sm:$0xff]   ;;  %v9142_v60 = vld [vmem:[#allocation5 + $0xfac] ss:$16 sps:$4 sm:$0xff]  }
 0x2ee   : > { %5283 = vmatprep.subr.bf16.mxu0 %v9019_v44  ;;  %v504_v44 = vld [vmem:[%s10176_s25 + $0x148] sm:$0xff] }
 0x2f0   : > { %5761 = vmatpush1.bf16.msra.mxu1 %v9020_v21  ;;  %v9082_v21 = vld [vmem:[#allocation5 + $0xe6c] ss:$16 sps:$4 sm:$0xff]  }
 0x2f1   : > { %5284 = vmatpush1.bf16.msra.mxu0 %v9017_v33  ;;  %5762 = vmatprep.subr.bf16.mxu1 %v9028_v35  ;;  %v9079_v33 = vld [vmem:[#allocation5 + $0x1264] ss:$16 sps:$4 sm:$0xff]   ;;  %v9080_v35 = vld [vmem:[#allocation5 + $0xe68] ss:$16 sps:$4 sm:$0xff]  }
 0x2f2   : > { %5285 = vmatprep.subr.bf16.mxu0 %v9025_v34  ;;  %v10422_v34 = vpack.c.bf16 %v504_v44, %v482_v14  ;;  %v9145_v14 = vld [vmem:[#allocation5 + $0x13c4] ss:$16 sps:$4 sm:$0xff]   ;;  %v9148_v44 = vld [vmem:[#allocation5 + $0xfcc] ss:$16 sps:$4 sm:$0xff]  }
 0x2f4   : > { %5763 = vmatpush1.bf16.msra.mxu1 %v9026_v56  ;;  %v9088_v56 = vld [vmem:[#allocation5 + $0xe8c] ss:$16 sps:$4 sm:$0xff]  }
 0x2f5   : > { %5286 = vmatpush1.bf16.msra.mxu0 %v9023_v37  ;;  %5764 = vmatprep.subr.bf16.mxu1 %v9034_v26  ;;  %v9085_v37 = vld [vmem:[#allocation5 + $0x1284] ss:$16 sps:$4 sm:$0xff]   ;;  %v9086_v26 = vld [vmem:[#allocation5 + $0xe88] ss:$16 sps:$4 sm:$0xff]  }
 0x2f6   : > { %5287 = vmatprep.subr.bf16.mxu0 %v9031_v39  ;;  %v9083_v39 = vld [vmem:[#allocation5 + $0x1280] ss:$16 sps:$4 sm:$0xff]  }
 0x2f8   : > { %5765 = vmatpush1.bf16.msra.mxu1 %v9032_v61  ;;  %v9089_v61 = vld [vmem:[#allocation5 + $0x12a0] ss:$16 sps:$4 sm:$0xff]  }
 0x2f9   : > { %5288 = vmatpush1.bf16.msra.mxu0 %v9029_v43  ;;  %5766 = vmatprep.subr.bf16.mxu1 %v9040_v52  ;;  %v9091_v43 = vld [vmem:[#allocation5 + $0x12a4] ss:$16 sps:$4 sm:$0xff]  }
 0x2fa   : > { %5289 = vmatprep.subr.bf16.mxu0 %v9037_v49  ;;  %v9092_v49 = vld [vmem:[#allocation5 + $0xea8] ss:$16 sps:$4 sm:$0xff]   ;;  %v9097_v52 = vld [vmem:[#allocation5 + $0x12c4] ss:$16 sps:$4 sm:$0xff]  }
 0x2fc   : > { %5767 = vmatpush1.bf16.msra.mxu1 %v9038_v12  ;;  %v9095_v12 = vld [vmem:[#allocation5 + $0x12c0] ss:$16 sps:$4 sm:$0xff]  }
 0x2fd   : > { %5290 = vmatpush1.bf16.msra.mxu0 %v9035_v30  ;;  %5768 = vmatprep.subr.bf16.mxu1 %v9046_v59  ;;  %v9100_v30 = vld [vmem:[#allocation5 + $0xecc] ss:$16 sps:$4 sm:$0xff]  }
 0x2fe   : > { %5291 = vmatprep.subr.bf16.mxu0 %v9043_v58  ;;  %v9103_v58 = vld [vmem:[#allocation5 + $0x12e4] ss:$16 sps:$4 sm:$0xff]   ;;  %v9106_v59 = vld [vmem:[#allocation5 + $0xeec] ss:$16 sps:$4 sm:$0xff]  }
 0x300   : > { %5769 = vmatpush1.bf16.msra.mxu1 %v9044_v40  ;;  %v9104_v40 = vld [vmem:[#allocation5 + $0xee8] ss:$16 sps:$4 sm:$0xff]  }
 0x301   : > { %5292 = vmatpush1.bf16.msra.mxu0 %v9041_v63  ;;  %5770 = vmatprep.subr.bf16.mxu1 %v9052_v62  ;;  %v9101_v63 = vld [vmem:[#allocation5 + $0x12e0] ss:$16 sps:$4 sm:$0xff]   ;;  %v9112_v62 = vld [vmem:[#allocation5 + $0xf0c] ss:$16 sps:$4 sm:$0xff]  }
 0x302   : > { %5293 = vmatprep.subr.bf16.mxu0 %v9049_v1  ;;  %v9109_v1 = vld [vmem:[#allocation5 + $0x1304] ss:$16 sps:$4 sm:$0xff]  }
 0x304   : > { %5771 = vmatpush1.bf16.msra.mxu1 %v9050_v38  ;;  %v9110_v38 = vld [vmem:[#allocation5 + $0xf08] ss:$16 sps:$4 sm:$0xff]  }
 0x305   : > { %5294 = vmatpush1.bf16.msra.mxu0 %v9047_v3  ;;  %5772 = vmatprep.subr.bf16.mxu1 %v9058_v2  ;;  %v9107_v3 = vld [vmem:[#allocation5 + $0x1300] ss:$16 sps:$4 sm:$0xff]   ;;  %v9118_v2 = vld [vmem:[#allocation5 + $0xf2c] ss:$16 sps:$4 sm:$0xff]  }
 0x306   : > { %5295 = vmatprep.subr.bf16.mxu0 %v9055_v41  ;;  %v9115_v41 = vld [vmem:[#allocation5 + $0x1324] ss:$16 sps:$4 sm:$0xff]  }
 0x308   : > { %5773 = vmatpush1.bf16.msra.mxu1 %v9056_v54  ;;  %v9116_v54 = vld [vmem:[#allocation5 + $0xf28] ss:$16 sps:$4 sm:$0xff]  }
 0x309   : > { %5296 = vmatpush1.bf16.msra.mxu0 %v9053_v6  ;;  %5795 = vmatprep.subr.bf16.mxu1 %v9064_v55  ;;  %v9113_v6 = vld [vmem:[#allocation5 + $0x1320] ss:$16 sps:$4 sm:$0xff]   ;;  %v9122_v55 = vld [vmem:[#allocation5 + $0xf48] ss:$16 sps:$4 sm:$0xff]  }
 0x30a   : > { %5318 = vmatprep.subr.bf16.mxu0 %v9061_v15  ;;  %v9119_v15 = vld [vmem:[#allocation5 + $0x1340] ss:$16 sps:$4 sm:$0xff]  }
 0x30b   : > { %5775 = vmatmul.mubr.bf16.vlgmr.msra.gmra.mrb[8].mxu1 %v10360_v11  ;;  %v9071_v11 = vld [vmem:[#allocation5 + $0x1240] ss:$16 sps:$4 sm:$0xff]  }
 0x30c   : > { %5298 = vmatmul.mubr.bf16.vlgmr.msra.gmra.mrb[0].mxu0 %v10406_v0  ;;  %5796 = vmatpush1.bf16.msra.mxu1 %v9062_v20  ;;  %v9128_v20 = vld [vmem:[#allocation5 + $0xf68] ss:$16 sps:$4 sm:$0xff]  }
 0x30d   : > { %5319 = vmatpush1.bf16.msra.mxu0 %v9059_v16  ;;  %5797 = vmatprep.subr.bf16.mxu1 %v9070_v53  ;;  %v9127_v16 = vld [vmem:[#allocation5 + $0x1364] ss:$16 sps:$4 sm:$0xff]   ;;  %v9136_v53 = vld [vmem:[#allocation5 + $0xf8c] ss:$16 sps:$4 sm:$0xff]  }
 0x30e   : > { %5320 = vmatprep.subr.bf16.mxu0 %v9067_v13  ;;  %5307 = vmatprep.mubr.bf16.mxu0 %v10410_v4  ;;  %v9133_v13 = vld [vmem:[#allocation5 + $0x1384] ss:$16 sps:$4 sm:$0xff]  }
 0x30f   : > { %5784 = vmatprep.mubr.bf16.mxu1 %v10362_v22  ;;  %v9077_v22 = vld [vmem:[#allocation5 + $0x1260] ss:$16 sps:$4 sm:$0xff]  }
 0x310   : > { %5798 = vmatpush1.bf16.msra.mxu1 %v9068_v24  ;;  %v9134_v24 = vld [vmem:[#allocation5 + $0xf88] ss:$16 sps:$4 sm:$0xff]  }
 0x311   : > { %5321 = vmatpush1.bf16.msra.mxu0 %v9065_v23  ;;  %5799 = vmatprep.subr.bf16.mxu1 %v9076_v36  ;;  %v9131_v23 = vld [vmem:[#allocation5 + $0x1380] ss:$16 sps:$4 sm:$0xff]   ;;  %v9140_v36 = vld [vmem:[#allocation5 + $0xfa8] ss:$16 sps:$4 sm:$0xff]  }
 0x312   : > { %5322 = vmatprep.subr.bf16.mxu0 %v9073_v27  ;;  %v9137_v27 = vld [vmem:[#allocation5 + $0x13a0] ss:$16 sps:$4 sm:$0xff]  }
 0x313   : > { %5785 = vmatmul.mubr.bf16.gmra.mrb[12].mxu1 %v10372_v28  ;;  %v9094_v28 = vld [vmem:[#allocation5 + $0xeac] ss:$16 sps:$4 sm:$0xff]  }
 0x314   : > { %5308 = vmatmul.mubr.bf16.gmra.mrb[4].mxu0 %v10418_v29  ;;  %5800 = vmatpush1.bf16.msra.mxu1 %v9074_v31  ;;  %v9146_v31 = vld [vmem:[#allocation5 + $0xfc8] ss:$16 sps:$4 sm:$0xff]  }
 0x315   : > { %5323 = vmatpush1.bf16.msra.mxu0 %v9071_v11  ;;  %5801 = vmatprep.subr.bf16.mxu1 %v9082_v21  ;;  %v9143_v11 = vld [vmem:[#allocation5 + $0x13c0] ss:$16 sps:$4 sm:$0xff]   ;;  %v9154_v21 = vld [vmem:[#allocation5 + $0xfec] ss:$16 sps:$4 sm:$0xff]  }
 0x316   : > { %5324 = vmatprep.subr.bf16.mxu0 %v9079_v33  ;;  %5350 = vmatprep.mubr.bf16.mxu0 %v10422_v34  ;;  %v9151_v33 = vld [vmem:[#allocation5 + $0x13e4] ss:$16 sps:$4 sm:$0xff]  }
 0x317   : > { %5827 = vmatprep.mubr.bf16.mxu1 %v10374_v32  ;;  %v9098_v32 = vld [vmem:[#allocation5 + $0xec8] ss:$16 sps:$4 sm:$0xff]  }
 0x318   : > { %5802 = vmatpush1.bf16.msra.mxu1 %v9080_v35  ;;  %v9152_v35 = vld [vmem:[#allocation5 + $0xfe8] ss:$16 sps:$4 sm:$0xff]  }
 0x319   : > { %5325 = vmatpush1.bf16.msra.mxu0 %v9077_v22  ;;  %5803 = vmatprep.subr.bf16.mxu1 %v9088_v56  ;;  %v9149_v22 = vld [vmem:[#allocation5 + $0x13e0] ss:$16 sps:$4 sm:$0xff]  }
 0x31a   : > { %5326 = vmatprep.subr.bf16.mxu0 %v9085_v37  ;;  %v481_v37 = vld [vmem:[%s10176_s25 + $0x90] sm:$0xff]  ;;  %v503_v56 = vld [vmem:[%s10176_s25 + $0x140] sm:$0xff] }
 0x31c   : > { %5804 = vmatpush1.bf16.msra.mxu1 %v9086_v26  ;;  %v9160_v26 = vld [vmem:[#allocation5 + $0x100c] ss:$16 sps:$4 sm:$0xff]  }
 0x31d   : > { %5327 = vmatpush1.bf16.msra.mxu0 %v9083_v39  ;;  %5805 = vmatprep.subr.bf16.mxu1 %v9094_v28  ;;  %v9157_v39 = vld [vmem:[#allocation5 + $0x1404] ss:$16 sps:$4 sm:$0xff]   ;;  %v526_v28 = vld [vmem:[%s10176_s25 + $0x1f8] sm:$0xff] }
 0x31e   : > { %5328 = vmatprep.subr.bf16.mxu0 %v9091_v43  ;;  %v10430_v43 = vpack.c.bf16 %v503_v56, %v481_v37  ;;  %v9217_v37 = vld [vmem:[#allocation5 + $0x1544] ss:$16 sps:$4 sm:$0xff]   ;;  %v9220_v56 = vld [vmem:[#allocation5 + $0x114c] ss:$16 sps:$4 sm:$0xff]  }
 0x320   : > { %5806 = vmatpush1.bf16.msra.mxu1 %v9092_v49  ;;  %v9155_v49 = vld [vmem:[#allocation5 + $0x1400] ss:$16 sps:$4 sm:$0xff]  }
 0x321   : > { %5329 = vmatpush1.bf16.msra.mxu0 %v9089_v61  ;;  %5807 = vmatprep.subr.bf16.mxu1 %v9100_v30  ;;  %v548_v61 = vld [vmem:[%s10176_s25 + $0x2a8] sm:$0xff]  ;;  %v9163_v30 = vld [vmem:[#allocation5 + $0x1424] ss:$16 sps:$4 sm:$0xff]  }
 0x322   : > { %5330 = vmatprep.subr.bf16.mxu0 %v9097_v52  ;;  %v9158_v52 = vld [vmem:[#allocation5 + $0x1008] ss:$16 sps:$4 sm:$0xff]  }
 0x324   : > { %5808 = vmatpush1.bf16.msra.mxu1 %v9098_v32  ;;  %v10434_v32 = vpack.c.bf16 %v548_v61, %v526_v28  ;;  %v9223_v28 = vld [vmem:[#allocation5 + $0x1564] ss:$16 sps:$4 sm:$0xff]   ;;  %v9226_v61 = vld [vmem:[#allocation5 + $0x116c] ss:$16 sps:$4 sm:$0xff]  }
 0x325   : > { %5331 = vmatpush1.bf16.msra.mxu0 %v9095_v12  ;;  %5809 = vmatprep.subr.bf16.mxu1 %v9106_v59  ;;  %v9166_v12 = vld [vmem:[#allocation5 + $0x102c] ss:$16 sps:$4 sm:$0xff]   ;;  %v9164_v59 = vld [vmem:[#allocation5 + $0x1028] ss:$16 sps:$4 sm:$0xff]  }
 0x326   : > { %5332 = vmatprep.subr.bf16.mxu0 %v9103_v58  ;;  %v9161_v58 = vld [vmem:[#allocation5 + $0x1420] ss:$16 sps:$4 sm:$0xff]  }
 0x328   : > { %5810 = vmatpush1.bf16.msra.mxu1 %v9104_v40  ;;  %v547_v40 = vld [vmem:[%s10176_s25 + $0x2a0] sm:$0xff] }
 0x329   : > { %5333 = vmatpush1.bf16.msra.mxu0 %v9101_v63  ;;  %5811 = vmatprep.subr.bf16.mxu1 %v9112_v62  ;;  %v525_v63 = vld [vmem:[%s10176_s25 + $0x1f0] sm:$0xff]  ;;  %v9172_v62 = vld [vmem:[#allocation5 + $0x104c] ss:$16 sps:$4 sm:$0xff]  }
 0x32a   : > { %5334 = vmatprep.subr.bf16.mxu0 %v9109_v1  ;;  %v9169_v1 = vld [vmem:[#allocation5 + $0x1444] ss:$16 sps:$4 sm:$0xff]  }
 0x32c   : > { %5812 = vmatpush1.bf16.msra.mxu1 %v9110_v38  ;;  %v484_v38 = vld [vmem:[%s10176_s25 + $0xa8] sm:$0xff] }
 0x32d   : > { %5335 = vmatpush1.bf16.msra.mxu0 %v9107_v3  ;;  %5813 = vmatprep.subr.bf16.mxu1 %v9118_v2  ;;  %v10442_v3 = vpack.c.bf16 %v547_v40, %v525_v63  ;;  %v9170_v2 = vld [vmem:[#allocation5 + $0x1048] ss:$16 sps:$4 sm:$0xff]   ;;  %v9235_v63 = vld [vmem:[#allocation5 + $0x15a4] ss:$16 sps:$4 sm:$0xff]   ;;  %v9238_v40 = vld [vmem:[#allocation5 + $0x11ac] ss:$16 sps:$4 sm:$0xff]  }
 0x32e   : > { %5336 = vmatprep.subr.bf16.mxu0 %v9115_v41  ;;  %v506_v41 = vld [vmem:[%s10176_s25 + $0x158] sm:$0xff] }
 0x330   : > { %5814 = vmatpush1.bf16.msra.mxu1 %v9116_v54  ;;  %v9178_v54 = vld [vmem:[#allocation5 + $0x106c] ss:$16 sps:$4 sm:$0xff]  }
 0x331   : > { %5337 = vmatpush1.bf16.msra.mxu0 %v9113_v6  ;;  %5815 = vmatprep.subr.bf16.mxu1 %v9124_v8  ;;  %v9175_v6 = vld [vmem:[#allocation5 + $0x1464] ss:$16 sps:$4 sm:$0xff]   ;;  %v9176_v8 = vld [vmem:[#allocation5 + $0x1068] ss:$16 sps:$4 sm:$0xff]  }
 0x332   : > { %5338 = vmatprep.subr.bf16.mxu0 %v9121_v7  ;;  %v10446_v7 = vpack.c.bf16 %v506_v41, %v484_v38  ;;  %v9241_v38 = vld [vmem:[#allocation5 + $0x15c4] ss:$16 sps:$4 sm:$0xff]   ;;  %v9244_v41 = vld [vmem:[#allocation5 + $0x11cc] ss:$16 sps:$4 sm:$0xff]  }
 0x334   : > { %5816 = vmatpush1.bf16.msra.mxu1 %v9122_v55  ;;  %v9184_v55 = vld [vmem:[#allocation5 + $0x108c] ss:$16 sps:$4 sm:$0xff]  }
 0x335   : > { %5339 = vmatpush1.bf16.msra.mxu0 %v9119_v15  ;;  %5817 = vmatprep.subr.bf16.mxu1 %v9130_v17  ;;  %v9181_v15 = vld [vmem:[#allocation5 + $0x1484] ss:$16 sps:$4 sm:$0xff]   ;;  %v9182_v17 = vld [vmem:[#allocation5 + $0x1088] ss:$16 sps:$4 sm:$0xff]  }
 0x336   : > { %5340 = vmatprep.subr.bf16.mxu0 %v9127_v16  ;;  %v9179_v16 = vld [vmem:[#allocation5 + $0x1480] ss:$16 sps:$4 sm:$0xff]  }
 0x338   : > { %5818 = vmatpush1.bf16.msra.mxu1 %v9128_v20  ;;  %v9185_v20 = vld [vmem:[#allocation5 + $0x14a0] ss:$16 sps:$4 sm:$0xff]  }
 0x339   : > { %5341 = vmatpush1.bf16.msra.mxu0 %v9125_v19  ;;  %5819 = vmatprep.subr.bf16.mxu1 %v9136_v53  ;;  %v9187_v19 = vld [vmem:[#allocation5 + $0x14a4] ss:$16 sps:$4 sm:$0xff]  }
 0x33a   : > { %5342 = vmatprep.subr.bf16.mxu0 %v9133_v13  ;;  %v9188_v13 = vld [vmem:[#allocation5 + $0x10a8] ss:$16 sps:$4 sm:$0xff]   ;;  %v9193_v53 = vld [vmem:[#allocation5 + $0x14c4] ss:$16 sps:$4 sm:$0xff]  }
 0x33c   : > { %5820 = vmatpush1.bf16.msra.mxu1 %v9134_v24  ;;  %v9191_v24 = vld [vmem:[#allocation5 + $0x14c0] ss:$16 sps:$4 sm:$0xff]  }
 0x33d   : > { %5343 = vmatpush1.bf16.msra.mxu0 %v9131_v23  ;;  %5821 = vmatprep.subr.bf16.mxu1 %v9142_v60  ;;  %v9196_v23 = vld [vmem:[#allocation5 + $0x10cc] ss:$16 sps:$4 sm:$0xff]  }
 0x33e   : > { %5344 = vmatprep.subr.bf16.mxu0 %v9139_v25  ;;  %v9199_v25 = vld [vmem:[#allocation5 + $0x14e4] ss:$16 sps:$4 sm:$0xff]   ;;  %v9202_v60 = vld [vmem:[#allocation5 + $0x10ec] ss:$16 sps:$4 sm:$0xff]  }
 0x340   : > { %5822 = vmatpush1.bf16.msra.mxu1 %v9140_v36  ;;  %v9200_v36 = vld [vmem:[#allocation5 + $0x10e8] ss:$16 sps:$4 sm:$0xff]  }
 0x341   : > { %5345 = vmatpush1.bf16.msra.mxu0 %v9137_v27  ;;  %5823 = vmatprep.subr.bf16.mxu1 %v9148_v44  ;;  %v9197_v27 = vld [vmem:[#allocation5 + $0x14e0] ss:$16 sps:$4 sm:$0xff]   ;;  %v9208_v44 = vld [vmem:[#allocation5 + $0x110c] ss:$16 sps:$4 sm:$0xff]  }
 0x342   : > { %5346 = vmatprep.subr.bf16.mxu0 %v9145_v14  ;;  %v9205_v14 = vld [vmem:[#allocation5 + $0x1504] ss:$16 sps:$4 sm:$0xff]  }
 0x344   : > { %5824 = vmatpush1.bf16.msra.mxu1 %v9146_v31  ;;  %v9206_v31 = vld [vmem:[#allocation5 + $0x1108] ss:$16 sps:$4 sm:$0xff]  }
 0x345   : > { %5347 = vmatpush1.bf16.msra.mxu0 %v9143_v11  ;;  %5825 = vmatprep.subr.bf16.mxu1 %v9154_v21  ;;  %v9203_v11 = vld [vmem:[#allocation5 + $0x1500] ss:$16 sps:$4 sm:$0xff]   ;;  %v9214_v21 = vld [vmem:[#allocation5 + $0x112c] ss:$16 sps:$4 sm:$0xff]  }
 0x346   : > { %5348 = vmatprep.subr.bf16.mxu0 %v9151_v33  ;;  %v9211_v33 = vld [vmem:[#allocation5 + $0x1524] ss:$16 sps:$4 sm:$0xff]  }
 0x348   : > { %5826 = vmatpush1.bf16.msra.mxu1 %v9152_v35  ;;  %v9212_v35 = vld [vmem:[#allocation5 + $0x1128] ss:$16 sps:$4 sm:$0xff]  }
 0x349   : > { %5349 = vmatpush1.bf16.msra.mxu0 %v9149_v22  ;;  %5848 = vmatprep.subr.bf16.mxu1 %v9160_v26  ;;  %v9209_v22 = vld [vmem:[#allocation5 + $0x1520] ss:$16 sps:$4 sm:$0xff]   ;;  %v9218_v26 = vld [vmem:[#allocation5 + $0x1148] ss:$16 sps:$4 sm:$0xff]  }
 0x34a   : > { %5371 = vmatprep.subr.bf16.mxu0 %v9157_v39  ;;  %v9215_v39 = vld [vmem:[#allocation5 + $0x1540] ss:$16 sps:$4 sm:$0xff]  }
 0x34b   : > { %5828 = vmatmul.mubr.bf16.vlgmr.msra.gmra.mrb[8].mxu1 %v10384_v42  ;;  %v9167_v42 = vld [vmem:[#allocation5 + $0x1440] ss:$16 sps:$4 sm:$0xff]  }
 0x34c   : > { %5351 = vmatmul.mubr.bf16.vlgmr.msra.gmra.mrb[0].mxu0 %v10430_v43  ;;  %5849 = vmatpush1.bf16.msra.mxu1 %v9158_v52  ;;  %v9224_v52 = vld [vmem:[#allocation5 + $0x1168] ss:$16 sps:$4 sm:$0xff]  }
 0x34d   : > { %5372 = vmatpush1.bf16.msra.mxu0 %v9155_v49  ;;  %5850 = vmatprep.subr.bf16.mxu1 %v9166_v12  ;;  %v9221_v49 = vld [vmem:[#allocation5 + $0x1560] ss:$16 sps:$4 sm:$0xff]   ;;  %v9232_v12 = vld [vmem:[#allocation5 + $0x118c] ss:$16 sps:$4 sm:$0xff]  }
 0x34e   : > { %5373 = vmatprep.subr.bf16.mxu0 %v9163_v30  ;;  %5360 = vmatprep.mubr.bf16.mxu0 %v10434_v32  ;;  %v9229_v30 = vld [vmem:[#allocation5 + $0x1584] ss:$16 sps:$4 sm:$0xff]  }
 0x34f   : > { %5837 = vmatprep.mubr.bf16.mxu1 %v10386_v57  ;;  %v9173_v57 = vld [vmem:[#allocation5 + $0x1460] ss:$16 sps:$4 sm:$0xff]  }
 0x350   : > { %5851 = vmatpush1.bf16.msra.mxu1 %v9164_v59  ;;  %v9230_v59 = vld [vmem:[#allocation5 + $0x1188] ss:$16 sps:$4 sm:$0xff]  }
 0x351   : > { %5374 = vmatpush1.bf16.msra.mxu0 %v9161_v58  ;;  %5852 = vmatprep.subr.bf16.mxu1 %v9172_v62  ;;  %v9227_v58 = vld [vmem:[#allocation5 + $0x1580] ss:$16 sps:$4 sm:$0xff]   ;;  %v9236_v62 = vld [vmem:[#allocation5 + $0x11a8] ss:$16 sps:$4 sm:$0xff]  }
 0x352   : > { %5375 = vmatprep.subr.bf16.mxu0 %v9169_v1  ;;  %v9233_v1 = vld [vmem:[#allocation5 + $0x15a0] ss:$16 sps:$4 sm:$0xff]  }
 0x353   : > { %5838 = vmatmul.mubr.bf16.gmra.mrb[12].mxu1 %v10396_v50  ;;  %v9190_v50 = vld [vmem:[#allocation5 + $0x10ac] ss:$16 sps:$4 sm:$0xff]  }
 0x354   : > { %5361 = vmatmul.mubr.bf16.gmra.mrb[4].mxu0 %v10442_v3  ;;  %5853 = vmatpush1.bf16.msra.mxu1 %v9170_v2  ;;  %v9242_v2 = vld [vmem:[#allocation5 + $0x11c8] ss:$16 sps:$4 sm:$0xff]  }
 0x355   : > { %5376 = vmatpush1.bf16.msra.mxu0 %v9167_v42  ;;  %5854 = vmatprep.subr.bf16.mxu1 %v9178_v54  ;;  %v9239_v42 = vld [vmem:[#allocation5 + $0x15c0] ss:$16 sps:$4 sm:$0xff]   ;;  %v9250_v54 = vld [vmem:[#allocation5 + $0x11ec] ss:$16 sps:$4 sm:$0xff]  }
 0x356   : > { %5377 = vmatprep.subr.bf16.mxu0 %v9175_v6  ;;  %5403 = vmatprep.mubr.bf16.mxu0 %v10446_v7  ;;  %v9247_v6 = vld [vmem:[#allocation5 + $0x15e4] ss:$16 sps:$4 sm:$0xff]  }
 0x357   : > { %5880 = vmatprep.mubr.bf16.mxu1 %v10398_v5  ;;  %v9194_v5 = vld [vmem:[#allocation5 + $0x10c8] ss:$16 sps:$4 sm:$0xff]  }
 0x358   : > { %5855 = vmatpush1.bf16.msra.mxu1 %v9176_v8  ;;  %v9248_v8 = vld [vmem:[#allocation5 + $0x11e8] ss:$16 sps:$4 sm:$0xff]  }
 0x359   : > { %5378 = vmatpush1.bf16.msra.mxu0 %v9173_v57  ;;  %5856 = vmatprep.subr.bf16.mxu1 %v9184_v55  ;;  %v9245_v57 = vld [vmem:[#allocation5 + $0x15e0] ss:$16 sps:$4 sm:$0xff]  }
 0x35a   : > { %5379 = vmatprep.subr.bf16.mxu0 %v9181_v15  ;;  %v483_v15 = vld [vmem:[%s10176_s25 + $0xa0] sm:$0xff]  ;;  %v505_v55 = vld [vmem:[%s10176_s25 + $0x150] sm:$0xff] }
 0x35c   : > { %5857 = vmatpush1.bf16.msra.mxu1 %v9182_v17  ;;  %v528_v17 = vld [vmem:[%s10176_s25 + $0x208] sm:$0xff] }
 0x35d   : > { %5380 = vmatpush1.bf16.msra.mxu0 %v9179_v16  ;;  %5858 = vmatprep.subr.bf16.mxu1 %v9190_v50  ;;  %v9253_v16 = vld [vmem:[#allocation5 + $0x120c] ss:$16 sps:$4 sm:$0xff]   ;;  %v10456_v50 = vpack.c.bf16 %v505_v55, %v483_v15 }
 0x35e   : > { %5381 = vmatprep.subr.bf16.mxu0 %v9187_v19  ;;  %v550_v19 = vld [vmem:[%s10176_s25 + $0x2b8] sm:$0xff] }
 0x35f   : > { %v9289_v15 = vld [vmem:[#allocation5 + $0x138c] ss:$16 sps:$4 sm:$0xff]  }
 0x360   : > { %5859 = vmatpush1.bf16.msra.mxu1 %v9188_v13  ;;  %v10458_v13 = vpack.c.bf16 %v550_v19, %v528_v17  ;;  %v9374_v55 = vld [vmem:[#allocation8 + $0x90] ss:$8 sps:$4 sm:$0xff]   ;;  %v9287_v17 = vld [vmem:[#allocation5 + $0x1388] ss:$16 sps:$4 sm:$0xff]  }
 0x361   : > { %5382 = vmatpush1.bf16.msra.mxu0 %v9185_v20  ;;  %5860 = vmatprep.subr.bf16.mxu1 %v9196_v23  ;;  %v9251_v20 = vld [vmem:[#allocation5 + $0x1208] ss:$16 sps:$4 sm:$0xff]   ;;  %v9292_v19 = vld [vmem:[#allocation5 + $0x13ac] ss:$16 sps:$4 sm:$0xff]  }
 0x362   : > { %5383 = vmatprep.subr.bf16.mxu0 %v9193_v53  ;;  %v9256_v53 = vld [vmem:[#allocation5 + $0x122c] ss:$16 sps:$4 sm:$0xff]   ;;  %v9254_v23 = vld [vmem:[#allocation5 + $0x1228] ss:$16 sps:$4 sm:$0xff]  }
 0x364   : > { %5861 = vmatpush1.bf16.msra.mxu1 %v9194_v5  ;;  %v549_v5 = vld [vmem:[%s10176_s25 + $0x2b0] sm:$0xff] }
 0x365   : > { %5384 = vmatpush1.bf16.msra.mxu0 %v9191_v24  ;;  %5862 = vmatprep.subr.bf16.mxu1 %v9202_v60  ;;  %v527_v24 = vld [vmem:[%s10176_s25 + $0x200] sm:$0xff] }
 0x366   : > { %5385 = vmatprep.subr.bf16.mxu0 %v9199_v25  ;;  %v9259_v25 = vld [vmem:[#allocation5 + $0x124c] ss:$16 sps:$4 sm:$0xff]   ;;  %v10466_v60 = vpack.c.bf16 %v549_v5, %v527_v24 }
 0x367   : > { %v9295_v24 = vld [vmem:[#allocation5 + $0x13cc] ss:$16 sps:$4 sm:$0xff]  }
 0x368   : > { %5863 = vmatpush1.bf16.msra.mxu1 %v9200_v36  ;;  %v9262_v36 = vld [vmem:[#allocation5 + $0x126c] ss:$16 sps:$4 sm:$0xff]  }
 0x369   : > { %5386 = vmatpush1.bf16.msra.mxu0 %v9197_v27  ;;  %5864 = vmatprep.subr.bf16.mxu1 %v9208_v44  ;;  %v9257_v27 = vld [vmem:[#allocation5 + $0x1248] ss:$16 sps:$4 sm:$0xff]   ;;  %v9380_v5 = vld [vmem:[#allocation8 + $0xb0] ss:$8 sps:$4 sm:$0xff]  }
 0x36a   : > { %5387 = vmatprep.subr.bf16.mxu0 %v9205_v14  ;;  %v9349_v14 = vld [vmem:[#allocation8 + $0x4] ss:$8 sps:$4 sm:$0xff]  }
 0x36b   : > { %v9260_v44 = vld [vmem:[#allocation5 + $0x1268] ss:$16 sps:$4 sm:$0xff]  }
 0x36c   : > { %5865 = vmatpush1.bf16.msra.mxu1 %v9206_v31  ;;  %v9265_v31 = vld [vmem:[#allocation5 + $0x128c] ss:$16 sps:$4 sm:$0xff]  }
 0x36d   : > { %5388 = vmatpush1.bf16.msra.mxu0 %v9203_v11  ;;  %5866 = vmatprep.subr.bf16.mxu1 %v9214_v21  ;;  %v9352_v11 = vld [vmem:[#allocation8 + $0x14] ss:$8 sps:$4 sm:$0xff]  }
 0x36e   : > { %5389 = vmatprep.subr.bf16.mxu0 %v9211_v33  ;;  %v9355_v33 = vld [vmem:[#allocation8 + $0x24] ss:$8 sps:$4 sm:$0xff]  }
 0x36f   : > { %v9263_v21 = vld [vmem:[#allocation5 + $0x1288] ss:$16 sps:$4 sm:$0xff]  }
 0x370   : > { %5867 = vmatpush1.bf16.msra.mxu1 %v9212_v35  ;;  %v9358_v35 = vld [vmem:[#allocation8 + $0x34] ss:$8 sps:$4 sm:$0xff]  }
 0x371   : > { %5390 = vmatpush1.bf16.msra.mxu0 %v9209_v22  ;;  %5868 = vmatprep.subr.bf16.mxu1 %v9220_v56  ;;  %v9268_v22 = vld [vmem:[#allocation5 + $0x12ac] ss:$16 sps:$4 sm:$0xff]  }
 0x372   : > { %5391 = vmatprep.subr.bf16.mxu0 %v9217_v37  ;;  %v9266_v37 = vld [vmem:[#allocation5 + $0x12a8] ss:$16 sps:$4 sm:$0xff]   ;;  %v9356_v56 = vld [vmem:[#allocation8 + $0x30] ss:$8 sps:$4 sm:$0xff]  }
 0x374   : > { %5869 = vmatpush1.bf16.msra.mxu1 %v9218_v26  ;;  %v9269_v26 = vld [vmem:[#allocation5 + $0x12c8] ss:$16 sps:$4 sm:$0xff]  }
 0x375   : > { %5392 = vmatpush1.bf16.msra.mxu0 %v9215_v39  ;;  %5870 = vmatprep.subr.bf16.mxu1 %v9226_v61  ;;  %v9361_v39 = vld [vmem:[#allocation8 + $0x44] ss:$8 sps:$4 sm:$0xff]   ;;  %v9359_v61 = vld [vmem:[#allocation8 + $0x40] ss:$8 sps:$4 sm:$0xff]  }
 0x376   : > { %5393 = vmatprep.subr.bf16.mxu0 %v9223_v28  ;;  %v9274_v28 = vld [vmem:[#allocation5 + $0x12ec] ss:$16 sps:$4 sm:$0xff]  }
 0x378   : > { %5871 = vmatpush1.bf16.msra.mxu1 %v9224_v52  ;;  %v9272_v52 = vld [vmem:[#allocation5 + $0x12e8] ss:$16 sps:$4 sm:$0xff]  }
 0x379   : > { %5394 = vmatpush1.bf16.msra.mxu0 %v9221_v49  ;;  %5872 = vmatprep.subr.bf16.mxu1 %v9232_v12  ;;  %v9364_v49 = vld [vmem:[#allocation8 + $0x54] ss:$8 sps:$4 sm:$0xff]   ;;  %v9362_v12 = vld [vmem:[#allocation8 + $0x50] ss:$8 sps:$4 sm:$0xff]  }
 0x37a   : > { %5395 = vmatprep.subr.bf16.mxu0 %v9229_v30  ;;  %v9277_v30 = vld [vmem:[#allocation5 + $0x130c] ss:$16 sps:$4 sm:$0xff]  }
 0x37c   : > { %5873 = vmatpush1.bf16.msra.mxu1 %v9230_v59  ;;  %v9275_v59 = vld [vmem:[#allocation5 + $0x1308] ss:$16 sps:$4 sm:$0xff]  }
 0x37d   : > { %5396 = vmatpush1.bf16.msra.mxu0 %v9227_v58  ;;  %5874 = vmatprep.subr.bf16.mxu1 %v9238_v40  ;;  %v9367_v58 = vld [vmem:[#allocation8 + $0x64] ss:$8 sps:$4 sm:$0xff]   ;;  %v9365_v40 = vld [vmem:[#allocation8 + $0x60] ss:$8 sps:$4 sm:$0xff]  }
 0x37e   : > { %5397 = vmatprep.subr.bf16.mxu0 %v9235_v63  ;;  %v9280_v63 = vld [vmem:[#allocation5 + $0x132c] ss:$16 sps:$4 sm:$0xff]  }
 0x380   : > { %5875 = vmatpush1.bf16.msra.mxu1 %v9236_v62  ;;  %v9278_v62 = vld [vmem:[#allocation5 + $0x1328] ss:$16 sps:$4 sm:$0xff]  }
 0x381   : > { %5398 = vmatpush1.bf16.msra.mxu0 %v9233_v1  ;;  %5876 = vmatprep.subr.bf16.mxu1 %v9244_v41  ;;  %v9370_v1 = vld [vmem:[#allocation8 + $0x74] ss:$8 sps:$4 sm:$0xff]   ;;  %v9368_v41 = vld [vmem:[#allocation8 + $0x70] ss:$8 sps:$4 sm:$0xff]  }
 0x382   : > { %5399 = vmatprep.subr.bf16.mxu0 %v9241_v38  ;;  %v9283_v38 = vld [vmem:[#allocation5 + $0x134c] ss:$16 sps:$4 sm:$0xff]  }
 0x384   : > { %5877 = vmatpush1.bf16.msra.mxu1 %v9242_v2  ;;  %v9281_v2 = vld [vmem:[#allocation5 + $0x1348] ss:$16 sps:$4 sm:$0xff]  }
 0x385   : > { %5400 = vmatpush1.bf16.msra.mxu0 %v9239_v42  ;;  %5878 = vmatprep.subr.bf16.mxu1 %v9250_v54  ;;  %v9373_v42 = vld [vmem:[#allocation8 + $0x84] ss:$8 sps:$4 sm:$0xff]   ;;  %v9371_v54 = vld [vmem:[#allocation8 + $0x80] ss:$8 sps:$4 sm:$0xff]  }
 0x386   : > { %5401 = vmatprep.subr.bf16.mxu0 %v9247_v6  ;;  %v9286_v6 = vld [vmem:[#allocation5 + $0x136c] ss:$16 sps:$4 sm:$0xff]  }
 0x388   : > { %5879 = vmatpush1.bf16.msra.mxu1 %v9248_v8  ;;  %v9284_v8 = vld [vmem:[#allocation5 + $0x1368] ss:$16 sps:$4 sm:$0xff]  }
 0x389   : > { %5402 = vmatpush1.bf16.msra.mxu0 %v9245_v57  ;;  %5901 = vmatprep.subr.bf16.mxu1 %v9253_v16  ;;  %v9376_v57 = vld [vmem:[#allocation8 + $0x94] ss:$8 sps:$4 sm:$0xff]   ;;  %v9379_v16 = vld [vmem:[#allocation8 + $0xa4] ss:$8 sps:$4 sm:$0xff]  }
 0x38a   : > { %6427 = vmatprep.subr.bf16.mxu0 %v9349_v14  ;;  %v9388_v14 = vld [vmem:[#allocation8 + $0xd4] ss:$8 sps:$4 sm:$0xff]  }
 0x38b   : > { %5881 = vmatmul.mubr.bf16.vlgmr.msra.gmra.mrb[8].mxu1 %v10406_v0  ;;  %v9347_v0 = vld [vmem:[#allocation8] ss:$8 sps:$4 sm:$0xff]  }
 0x38c   : > { %5404 = vmatmul.mubr.bf16.vlgmr.msra.gmra.mrb[0].mxu0 %v10456_v50  ;;  %5902 = vmatpush1.bf16.msra.mxu1 %v9251_v20  ;;  %v9377_v20 = vld [vmem:[#allocation8 + $0xa0] ss:$8 sps:$4 sm:$0xff]  }
 0x38d   : > { %5413 = vmatprep.mubr.bf16.mxu0 %v10458_v13  ;;  %5903 = vmatprep.subr.bf16.mxu1 %v9256_v53  ;;  %v9382_v53 = vld [vmem:[#allocation8 + $0xb4] ss:$8 sps:$4 sm:$0xff]  }
 0x38e   : > { %5890 = vmatprep.mubr.bf16.mxu1 %v10410_v4  ;;  %6428 = vmatpush1.bf16.msra.mxu0 %v9347_v0  ;;  %v9350_v4 = vld [vmem:[#allocation8 + $0x10] ss:$8 sps:$4 sm:$0xff]   ;;  %v9383_v0 = vld [vmem:[#allocation8 + $0xc0] ss:$8 sps:$4 sm:$0xff]  }
 0x38f   : > { %6429 = vmatprep.subr.bf16.mxu0 %v9352_v11  ;;  %v9301_v11 = vld [vmem:[#allocation5 + $0x140c] ss:$16 sps:$4 sm:$0xff]  }
 0x390   : > { %5904 = vmatpush1.bf16.msra.mxu1 %v9254_v23  ;;  %v9290_v23 = vld [vmem:[#allocation5 + $0x13a8] ss:$16 sps:$4 sm:$0xff]  }
 0x391   : > { %5905 = vmatprep.subr.bf16.mxu1 %v9259_v25  ;;  %v9385_v25 = vld [vmem:[#allocation8 + $0xc4] ss:$8 sps:$4 sm:$0xff]  }
 0x392   : > { %6430 = vmatpush1.bf16.msra.mxu0 %v9350_v4  ;;  %v9299_v4 = vld [vmem:[#allocation5 + $0x1408] ss:$16 sps:$4 sm:$0xff]  }
 0x393   : > { %5891 = vmatmul.mubr.bf16.gmra.mrb[12].mxu1 %v10418_v29  ;;  %v9353_v29 = vld [vmem:[#allocation8 + $0x20] ss:$8 sps:$4 sm:$0xff]   ;;  %6431 = vmatprep.subr.bf16.mxu0 %v9355_v33 }
 0x394   : > { %5414 = vmatmul.mubr.bf16.gmra.mrb[4].mxu0 %v10466_v60  ;;  %5906 = vmatpush1.bf16.msra.mxu1 %v9257_v27  ;;  %v9293_v27 = vld [vmem:[#allocation5 + $0x13c8] ss:$16 sps:$4 sm:$0xff]   ;;  %v9304_v33 = vld [vmem:[#allocation5 + $0x142c] ss:$16 sps:$4 sm:$0xff]  }
 0x395   : > { %5933 = vmatprep.mubr.bf16.mxu1 %v10422_v34  ;;  %5907 = vmatprep.subr.bf16.mxu1 %v9262_v36  ;;  %v9271_v34 = vld [vmem:[#allocation5 + $0x12cc] ss:$16 sps:$4 sm:$0xff]  }
 0x396   : > { %6432 = vmatpush1.bf16.msra.mxu0 %v9353_v29  ;;  %v9298_v36 = vld [vmem:[#allocation5 + $0x13ec] ss:$16 sps:$4 sm:$0xff]   ;;  %v9305_v29 = vld [vmem:[#allocation5 + $0x1448] ss:$16 sps:$4 sm:$0xff]  }
 0x397   : > { %6433 = vmatprep.subr.bf16.mxu0 %v9358_v35  ;;  %v9310_v35 = vld [vmem:[#allocation5 + $0x146c] ss:$16 sps:$4 sm:$0xff]  }
 0x398   : > { %5908 = vmatpush1.bf16.msra.mxu1 %v9260_v44  ;;  %v9296_v44 = vld [vmem:[#allocation5 + $0x13e8] ss:$16 sps:$4 sm:$0xff]  }
 0x399   : > { %5909 = vmatprep.subr.bf16.mxu1 %v9265_v31  ;;  %v9386_v31 = vld [vmem:[#allocation8 + $0xd0] ss:$8 sps:$4 sm:$0xff]  }
 0x39a   : > { %6434 = vmatpush1.bf16.msra.mxu0 %v9356_v56  ;;  %v9316_v56 = vld [vmem:[#allocation5 + $0x14ac] ss:$16 sps:$4 sm:$0xff]  }
 0x39b   : > { %6435 = vmatprep.subr.bf16.mxu0 %v9361_v39  ;;  %v9319_v39 = vld [vmem:[#allocation5 + $0x14cc] ss:$16 sps:$4 sm:$0xff]  }
 0x39c   : > { %5910 = vmatpush1.bf16.msra.mxu1 %v9263_v21  ;;  %v9302_v21 = vld [vmem:[#allocation5 + $0x1428] ss:$16 sps:$4 sm:$0xff]  }
 0x39d   : > { %5911 = vmatprep.subr.bf16.mxu1 %v9268_v22  ;;  %v9307_v22 = vld [vmem:[#allocation5 + $0x144c] ss:$16 sps:$4 sm:$0xff]  }
 0x39e   : > { %6436 = vmatpush1.bf16.msra.mxu0 %v9359_v61  ;;  %v9389_v61 = vld [vmem:[#allocation8 + $0xe0] ss:$8 sps:$4 sm:$0xff]  }
 0x39f   : > { %6437 = vmatprep.subr.bf16.mxu0 %v9364_v49  ;;  %v9394_v49 = vld [vmem:[#allocation8 + $0xf4] ss:$8 sps:$4 sm:$0xff]  }
 0x3a0   : > { %5912 = vmatpush1.bf16.msra.mxu1 %v9266_v37  ;;  %v9308_v37 = vld [vmem:[#allocation5 + $0x1468] ss:$16 sps:$4 sm:$0xff]  }
 0x3a1   : > { %5913 = vmatprep.subr.bf16.mxu1 %v9271_v34  ;;  %v9313_v34 = vld [vmem:[#allocation5 + $0x148c] ss:$16 sps:$4 sm:$0xff]  }
 0x3a2   : > { %6438 = vmatpush1.bf16.msra.mxu0 %v9362_v12  ;;  %v9323_v12 = vld [vmem:[#allocation5 + $0x1508] ss:$16 sps:$4 sm:$0xff]  }
 0x3a3   : > { %6439 = vmatprep.subr.bf16.mxu0 %v9367_v58  ;;  %v9328_v58 = vld [vmem:[#allocation5 + $0x152c] ss:$16 sps:$4 sm:$0xff]  }
 0x3a4   : > { %5914 = vmatpush1.bf16.msra.mxu1 %v9269_v26  ;;  %v9391_v26 = vld [vmem:[#allocation8 + $0xe4] ss:$8 sps:$4 sm:$0xff]  }
 0x3a5   : > { %5915 = vmatprep.subr.bf16.mxu1 %v9274_v28  ;;  %v9317_v28 = vld [vmem:[#allocation5 + $0x14c8] ss:$16 sps:$4 sm:$0xff]  }
 0x3a6   : > { %6440 = vmatpush1.bf16.msra.mxu0 %v9365_v40  ;;  %v9329_v40 = vld [vmem:[#allocation5 + $0x1548] ss:$16 sps:$4 sm:$0xff]  }
 0x3a7   : > { %6441 = vmatprep.subr.bf16.mxu0 %v9370_v1  ;;  %v9334_v1 = vld [vmem:[#allocation5 + $0x156c] ss:$16 sps:$4 sm:$0xff]  }
 0x3a8   : > { %5916 = vmatpush1.bf16.msra.mxu1 %v9272_v52  ;;  %v9392_v52 = vld [vmem:[#allocation8 + $0xf0] ss:$8 sps:$4 sm:$0xff]  }
 0x3a9   : > { %5917 = vmatprep.subr.bf16.mxu1 %v9277_v30  ;;  %v9325_v30 = vld [vmem:[#allocation5 + $0x150c] ss:$16 sps:$4 sm:$0xff]  }
 0x3aa   : > { %6442 = vmatpush1.bf16.msra.mxu0 %v9368_v41  ;;  %v9337_v41 = vld [vmem:[#allocation5 + $0x158c] ss:$16 sps:$4 sm:$0xff]  }
 0x3ab   : > { %6443 = vmatprep.subr.bf16.mxu0 %v9373_v42  ;;  %v9335_v42 = vld [vmem:[#allocation5 + $0x1588] ss:$16 sps:$4 sm:$0xff]  }
 0x3ac   : > { %5918 = vmatpush1.bf16.msra.mxu1 %v9275_v59  ;;  %v9326_v59 = vld [vmem:[#allocation5 + $0x1528] ss:$16 sps:$4 sm:$0xff]  }
 0x3ad   : > { %5919 = vmatprep.subr.bf16.mxu1 %v9280_v63  ;;  %v9331_v63 = vld [vmem:[#allocation5 + $0x154c] ss:$16 sps:$4 sm:$0xff]  }
 0x3ae   : > { %6444 = vmatpush1.bf16.msra.mxu0 %v9371_v54  ;;  %v9343_v54 = vld [vmem:[#allocation5 + $0x15cc] ss:$16 sps:$4 sm:$0xff]  }
 0x3af   : > { %6445 = vmatprep.subr.bf16.mxu0 %v9376_v57  ;;  %v9341_v57 = vld [vmem:[#allocation5 + $0x15c8] ss:$16 sps:$4 sm:$0xff]  }
 0x3b0   : > { %5920 = vmatpush1.bf16.msra.mxu1 %v9278_v62  ;;  %v9397_v62 = vld [vmem:[#allocation8 + $0x104] ss:$8 sps:$4 sm:$0xff]  }
 0x3b1   : > { %5921 = vmatprep.subr.bf16.mxu1 %v9283_v38  ;;  %v9332_v38 = vld [vmem:[#allocation5 + $0x1568] ss:$16 sps:$4 sm:$0xff]  }
 0x3b2   : > { %6446 = vmatpush1.bf16.msra.mxu0 %v9374_v55  ;;  %v1301_v55 = vlaneseq }
 0x3b3   : > { %6447 = vmatprep.subr.bf16.mxu0 %v9379_v16 }
 0x3b4   : > { %5922 = vmatpush1.bf16.msra.mxu1 %v9281_v2  ;;  %v9340_v2 = vld [vmem:[#allocation5 + $0x15ac] ss:$16 sps:$4 sm:$0xff]   ;;  %v10478_v16 = vshrl.u32 %v1301_v55, 7  ;;  %v9430_v55 = vld [vmem:[#allocation8 + $0x1b4] ss:$8 sps:$4 sm:$0xff]  }
 0x3b5   : > { %5923 = vmatprep.subr.bf16.mxu1 %v9286_v6  ;;  %v9338_v6 = vld [vmem:[#allocation5 + $0x15a8] ss:$16 sps:$4 sm:$0xff]  }
 0x3b6   : > { %6448 = vmatpush1.bf16.msra.mxu0 %v9377_v20  ;;  %v1307_v20 = vsub.s32 1, %v10478_v16 }
 0x3b7   : > { %6449 = vmatprep.subr.bf16.mxu0 %v9382_v53 }
 0x3b8   : > { %5924 = vmatpush1.bf16.msra.mxu1 %v9284_v8  ;;  %v9346_v8 = vld [vmem:[#allocation5 + $0x15ec] ss:$16 sps:$4 sm:$0xff]  }
 0x3b9   : > { %5925 = vmatprep.subr.bf16.mxu1 %v9289_v15  ;;  %v9344_v15 = vld [vmem:[#allocation5 + $0x15e8] ss:$16 sps:$4 sm:$0xff]  }
 0x3ba   : > { %6450 = vmatpush1.bf16.msra.mxu0 %v9380_v5 }
 0x3bb   : > { %6451 = vmatprep.subr.bf16.mxu0 %v9385_v25 }
 0x3bc   : > { %5926 = vmatpush1.bf16.msra.mxu1 %v9287_v17  ;;  %v1303_v17 = vsub.s32 0, %v10478_v16 }
 0x3bd   : > { %5927 = vmatprep.subr.bf16.mxu1 %v9292_v19  ;;  %v10481_v19 = vld [vmem:[#allocation7] sm:$0xf] }
 0x3be   : > { %6452 = vmatpush1.bf16.msra.mxu0 %v9383_v0  ;;  %v1304_v53 = vrot.slane %v10481_v19, %v1303_v17 }
 0x3bf   : > { %6453 = vmatprep.subr.bf16.mxu0 %v9388_v14 }
 0x3c0   : > { %5928 = vmatpush1.bf16.msra.mxu1 %v9290_v23 }
 0x3c1   : > { %5929 = vmatprep.subr.bf16.mxu1 %v9295_v24  ;;  %v4880_v24 = vadd.f32 %v10320_v48, %v1304_v53 }
 0x3c2   : > { %6454 = vmatpush1.bf16.msra.mxu0 %v9386_v31 }
 0x3c3   : > { %6455 = vmatprep.subr.bf16.mxu0 %v9391_v26 }
 0x3c4   : > { %5930 = vmatpush1.bf16.msra.mxu1 %v9293_v27 }
 0x3c5   : > { %5931 = vmatprep.subr.bf16.mxu1 %v9298_v36 }
 0x3c6   : > { %6456 = vmatpush1.bf16.msra.mxu0 %v9389_v61  ;;  %v9398_v61 = vld [vmem:[#allocation8 + $0x110] ss:$8 sps:$4 sm:$0xff]  }
 0x3c7   : > { %6457 = vmatprep.subr.bf16.mxu0 %v9394_v49  ;;  %v9403_v49 = vld [vmem:[#allocation8 + $0x124] ss:$8 sps:$4 sm:$0xff]  }
 0x3c8   : > { %5932 = vmatpush1.bf16.msra.mxu1 %v9296_v44 }
 0x3c9   : > { %5954 = vmatprep.subr.bf16.mxu1 %v9301_v11 }
 0x3ca   : > { %6458 = vmatpush1.bf16.msra.mxu0 %v9392_v52 }
 0x3cb   : > { %5934 = vmatmul.mubr.bf16.vlgmr.msra.gmra.mrb[8].mxu1 %v10430_v43  ;;  %v9311_v43 = vld [vmem:[#allocation5 + $0x1488] ss:$16 sps:$4 sm:$0xff]   ;;  %6480 = vmatprep.subr.bf16.mxu0 %v9397_v62 }
 0x3cc   : > { %5955 = vmatpush1.bf16.msra.mxu1 %v9299_v4  ;;  %5943 = vmatprep.mubr.bf16.mxu1 %v10434_v32  ;;  %v9314_v32 = vld [vmem:[#allocation5 + $0x14a8] ss:$16 sps:$4 sm:$0xff]  }
 0x3cd   : > { %5956 = vmatprep.subr.bf16.mxu1 %v9304_v33  ;;  %v9415_v62 = vld [vmem:[#allocation8 + $0x164] ss:$8 sps:$4 sm:$0xff]  }
 0x3d0   : > { %5957 = vmatpush1.bf16.msra.mxu1 %v9302_v21 }
 0x3d1   : > { %5958 = vmatprep.subr.bf16.mxu1 %v9307_v22 }
 0x3d3   : > { %5944 = vmatmul.mubr.bf16.gmra.mrb[12].mxu1 %v10442_v3  ;;  %v9322_v3 = vld [vmem:[#allocation5 + $0x14ec] ss:$16 sps:$4 sm:$0xff]  }
 0x3d4   : > { %5959 = vmatpush1.bf16.msra.mxu1 %v9305_v29  ;;  %5986 = vmatprep.mubr.bf16.mxu1 %v10446_v7  ;;  %v9320_v7 = vld [vmem:[#allocation5 + $0x14e8] ss:$16 sps:$4 sm:$0xff]  }
 0x3d5   : > { %5960 = vmatprep.subr.bf16.mxu1 %v9310_v35  ;;  %v9395_v35 = vld [vmem:[#allocation8 + $0x100] ss:$8 sps:$4 sm:$0xff]  }
 0x3d8   : > { %5961 = vmatpush1.bf16.msra.mxu1 %v9308_v37  ;;  %v4890_v37 = vadd.f32 %v10328_v46, %v1304_v53 }
 0x3d9   : > { %5962 = vmatprep.subr.bf16.mxu1 %v9313_v34 }
 0x3dc   : > { %5963 = vmatpush1.bf16.msra.mxu1 %v9311_v43  ;;  %v9400_v43 = vld [vmem:[#allocation8 + $0x114] ss:$8 sps:$4 sm:$0xff]  }
 0x3dd   : > { %5964 = vmatprep.subr.bf16.mxu1 %v9316_v56 }
 0x3e0   : > { %5965 = vmatpush1.bf16.msra.mxu1 %v9314_v32 }
 0x3e1   : > { %5966 = vmatprep.subr.bf16.mxu1 %v9319_v39 }
 0x3e4   : > { %5967 = vmatpush1.bf16.msra.mxu1 %v9317_v28 }
 0x3e5   : > { %5968 = vmatprep.subr.bf16.mxu1 %v9322_v3 }
 0x3e8   : > { %5969 = vmatpush1.bf16.msra.mxu1 %v9320_v7 }
 0x3e9   : > { %5970 = vmatprep.subr.bf16.mxu1 %v9325_v30 }
 0x3ec   : > { %5971 = vmatpush1.bf16.msra.mxu1 %v9323_v12  ;;  %v9401_v12 = vld [vmem:[#allocation8 + $0x120] ss:$8 sps:$4 sm:$0xff]  }
 0x3ed   : > { %5972 = vmatprep.subr.bf16.mxu1 %v9328_v58  ;;  %v9404_v58 = vld [vmem:[#allocation8 + $0x130] ss:$8 sps:$4 sm:$0xff]  }
 0x3f0   : > { %5973 = vmatpush1.bf16.msra.mxu1 %v9326_v59  ;;  %v9409_v59 = vld [vmem:[#allocation8 + $0x144] ss:$8 sps:$4 sm:$0xff]  }
 0x3f1   : > { %5974 = vmatprep.subr.bf16.mxu1 %v9331_v63  ;;  %v9407_v63 = vld [vmem:[#allocation8 + $0x140] ss:$8 sps:$4 sm:$0xff]  }
 0x3f4   : > { %5975 = vmatpush1.bf16.msra.mxu1 %v9329_v40  ;;  %v9412_v40 = vld [vmem:[#allocation8 + $0x154] ss:$8 sps:$4 sm:$0xff]  }
 0x3f5   : > { %5976 = vmatprep.subr.bf16.mxu1 %v9334_v1  ;;  %v9410_v1 = vld [vmem:[#allocation8 + $0x150] ss:$8 sps:$4 sm:$0xff]  }
 0x3f8   : > { %5977 = vmatpush1.bf16.msra.mxu1 %v9332_v38  ;;  %v9413_v38 = vld [vmem:[#allocation8 + $0x160] ss:$8 sps:$4 sm:$0xff]  }
 0x3f9   : > { %5978 = vmatprep.subr.bf16.mxu1 %v9337_v41  ;;  %v9418_v41 = vld [vmem:[#allocation8 + $0x174] ss:$8 sps:$4 sm:$0xff]  }
 0x3fc   : > { %5979 = vmatpush1.bf16.msra.mxu1 %v9335_v42  ;;  %v9416_v42 = vld [vmem:[#allocation8 + $0x170] ss:$8 sps:$4 sm:$0xff]  }
 0x3fd   : > { %5980 = vmatprep.subr.bf16.mxu1 %v9340_v2  ;;  %v9421_v2 = vld [vmem:[#allocation8 + $0x184] ss:$8 sps:$4 sm:$0xff]  }
 0x400   : > { %5981 = vmatpush1.bf16.msra.mxu1 %v9338_v6  ;;  %v9419_v6 = vld [vmem:[#allocation8 + $0x180] ss:$8 sps:$4 sm:$0xff]  }
 0x401   : > { %5982 = vmatprep.subr.bf16.mxu1 %v9343_v54  ;;  %v9424_v54 = vld [vmem:[#allocation8 + $0x194] ss:$8 sps:$4 sm:$0xff]  }
 0x404   : > { %5983 = vmatpush1.bf16.msra.mxu1 %v9341_v57  ;;  %v9422_v57 = vld [vmem:[#allocation8 + $0x190] ss:$8 sps:$4 sm:$0xff]  }
 0x405   : > { %5984 = vmatprep.subr.bf16.mxu1 %v9346_v8  ;;  %v9427_v8 = vld [vmem:[#allocation8 + $0x1a4] ss:$8 sps:$4 sm:$0xff]  }
 0x408   : > { %5985 = vmatpush1.bf16.msra.mxu1 %v9344_v15  ;;  %v9425_v15 = vld [vmem:[#allocation8 + $0x1a0] ss:$8 sps:$4 sm:$0xff]  }
 0x40b   : > { %5987 = vmatmul.mubr.bf16.vlgmr.msra.gmra.mrb[8].mxu1 %v10456_v50  ;;  %v1308_v50 = vrot.slane %v10481_v19, %v1307_v20 }
 0x40c   : > { %5996 = vmatprep.mubr.bf16.mxu1 %v10458_v13  ;;  %v4876_v13 = vadd.f32 %v10316_v45, %v1304_v53  ;;  %v4886_v45 = vadd.f32 %v10324_v9, %v1304_v53  ;;  %v9428_v53 = vld [vmem:[#allocation8 + $0x1b0] ss:$8 sps:$4 sm:$0xff]  }
 0x40d   : > { %v4882_v27 = vadd.f32 %v10322_v51, %v1308_v50  ;;  %v4892_v56 = vadd.f32 %v10330_v18, %v1308_v50  ;;  %v9406_v18 = vld [vmem:[#allocation8 + $0x134] ss:$8 sps:$4 sm:$0xff]  }
 0x413   : > { %5997 = vmatmul.mubr.bf16.gmra.mrb[12].mxu1 %v10466_v60  ;;  %v4878_v60 = vadd.f32 %v10318_v47, %v1308_v50  ;;  %v4888_v47 = vadd.f32 %v10326_v10, %v1308_v50  ;;  %v9433_v50 = vld [vmem:[#allocation8 + $0x1c4] ss:$8 sps:$4 sm:$0xff]  }
 0x45f   : > { %v5405_v23 = vpop.f32.mrb[0].mxu0 }
 0x460   : > { %v7960_v5 = vadd.f32 %v5405_v23, %v4876_v13  ;;  %v5407_v25 = vpop.f32.mrb[1].mxu0  ;;  %v9431_v13 = vld [vmem:[#allocation8 + $0x1c0] ss:$8 sps:$4 sm:$0xff]   ;;  %v9434_v23 = vld [vmem:[#allocation8 + $0x1d0] ss:$8 sps:$4 sm:$0xff]  }
 0x461   : > { %v7962_v36 = vadd.f32 %v5407_v25, %v4878_v60  ;;  %v5409_v0 = vpop.f32.mrb[2].mxu0  ;;  %v9436_v60 = vld [vmem:[#allocation8 + $0x1d4] ss:$8 sps:$4 sm:$0xff]  }
 0x462   : > { %v7964_v14 = vadd.f32 %v5409_v0, %v4880_v24  ;;  %v5411_v44 = vpop.f32.mrb[3].mxu0  ;;  %v6007_v31 = vmax.f32 %v7960_v5, 0.0  ;;  %v9439_v24 = vld [vmem:[#allocation8 + $0x1e4] ss:$8 sps:$4 sm:$0xff]   ;;  %v9437_v5 = vld [vmem:[#allocation8 + $0x1e0] ss:$8 sps:$4 sm:$0xff]  }
 0x463   : > { %v7966_v11 = vadd.f32 %v5411_v44, %v4882_v27  ;;  %v6008_v33 = vmax.f32 %v7962_v36, 0.0  ;;  %v9442_v25 = vld [vmem:[#allocation8 + $0x1f4] ss:$8 sps:$4 sm:$0xff]   ;;  %v9440_v27 = vld [vmem:[#allocation8 + $0x1f0] ss:$8 sps:$4 sm:$0xff]   ;;  %v9443_v36 = vld [vmem:[#allocation11 + $0x40] sm:$0xff]  }
 0x464   : > { %v6011_v4 = vmax.f32 %v7964_v14, 0.0  ;;  %v1311_v0 = vsub.s32 2, %v10478_v16  ;;  %v1315_v14 = vsub.s32 3, %v10478_v16 }
 0x465   : > { %v6012_v21 = vmax.f32 %v7966_v11, 0.0 }
 0x466   : > { %v6023_v22 = vpack.c.bf16 %v6011_v4, %v6007_v31  ;;  %v1312_v44 = vrot.slane %v10481_v19, %v1311_v0  ;;  %v1316_v11 = vrot.slane %v10481_v19, %v1315_v14 }
 0x467   : > { %v6024_v29 = vpack.c.bf16 %v6012_v21, %v6008_v33  ;;  %v5415_v48 = vpop.f32.mrb[4].mxu0 }
 0x468   : > { %v7968_v51 = vadd.f32 %v5415_v48, %v4886_v45  ;;  %v5417_v34 = vpop.f32.mrb[5].mxu0 }
 0x469   : > { %v7970_v32 = vadd.f32 %v5417_v34, %v4888_v47  ;;  %v5419_v39 = vpop.f32.mrb[6].mxu0  ;;  %6459 = vmatprep.mubr.bf16.mxu0 %v6024_v29 }
 0x46a   : > { %v7972_v26 = vadd.f32 %v5419_v39, %v4890_v37  ;;  %v5421_v28 = vpop.f32.mrb[7].mxu0  ;;  %6460 = vmatmul.mubr.bf16.vlgmr.msra.gmra.mrb[8].mxu0 %v6023_v22  ;;  %v6015_v10 = vmax.f32 %v7968_v51, 0.0 }
 0x46b   : > { %v7974_v9 = vadd.f32 %v5421_v28, %v4892_v56  ;;  %6481 = vmatpush1.bf16.msra.mxu0 %v9395_v35  ;;  %v6016_v7 = vmax.f32 %v7970_v32, 0.0  ;;  %v9444_v32 = vld [vmem:[#allocation11] sm:$0xff]   ;;  %v9445_v28 = vld [vmem:[#allocation11 + $0x48] sm:$0xff]  }
 0x46c   : > { %v6019_v3 = vmax.f32 %v7972_v26, 0.0  ;;  %6482 = vmatprep.subr.bf16.mxu0 %v9400_v43 }
 0x46d   : > { %v6020_v46 = vmax.f32 %v7974_v9, 0.0 }
 0x46e   : > { %v6027_v52 = vpack.c.bf16 %v6019_v3, %v6015_v10 }
 0x46f   : > { %v6028_v30 = vpack.c.bf16 %v6020_v46, %v6016_v7  ;;  %6483 = vmatpush1.bf16.msra.mxu0 %v9398_v61 }
 0x470   : > { %6484 = vmatprep.subr.bf16.mxu0 %v9403_v49  ;;  %v9446_v49 = vld [vmem:[#allocation11 + $0x8] sm:$0xff]  }
 0x471   : > { %6469 = vmatprep.mubr.bf16.mxu0 %v6028_v30 }
 0x472   : > { %6470 = vmatmul.mubr.bf16.gmra.mrb[12].mxu0 %v6027_v52  ;;  %v9447_v52 = vld [vmem:[#allocation11 + $0x50] sm:$0xff]  }
 0x473   : > { %6485 = vmatpush1.bf16.msra.mxu0 %v9401_v12 }
 0x474   : > { %6486 = vmatprep.subr.bf16.mxu0 %v9406_v18 }
 0x477   : > { %6487 = vmatpush1.bf16.msra.mxu0 %v9404_v58 }
 0x478   : > { %6488 = vmatprep.subr.bf16.mxu0 %v9409_v59  ;;  %v9448_v59 = vld [vmem:[#allocation11 + $0x10] sm:$0xff]  }
 0x47b   : > { %6489 = vmatpush1.bf16.msra.mxu0 %v9407_v63  ;;  %v9449_v63 = vld [vmem:[#allocation11 + $0x58] sm:$0xff]  }
 0x47c   : > { %6490 = vmatprep.subr.bf16.mxu0 %v9412_v40  ;;  %v9450_v40 = vld [vmem:[#allocation11 + $0x18] sm:$0xff]  }
 0x47f   : > { %6491 = vmatpush1.bf16.msra.mxu0 %v9410_v1  ;;  %v9451_v1 = vld [vmem:[#allocation11 + $0x60] sm:$0xff]  }
 0x480   : > { %6492 = vmatprep.subr.bf16.mxu0 %v9415_v62  ;;  %v9452_v62 = vld [vmem:[#allocation11 + $0x20] sm:$0xff]  }
 0x483   : > { %6493 = vmatpush1.bf16.msra.mxu0 %v9413_v38  ;;  %v9453_v38 = vld [vmem:[#allocation11 + $0x68] sm:$0xff]  }
 0x484   : > { %6494 = vmatprep.subr.bf16.mxu0 %v9418_v41  ;;  %v9454_v41 = vld [vmem:[#allocation11 + $0x28] sm:$0xff]  }
 0x487   : > { %6495 = vmatpush1.bf16.msra.mxu0 %v9416_v42  ;;  %v9455_v42 = vld [vmem:[#allocation11 + $0x70] sm:$0xff]  }
 0x488   : > { %6496 = vmatprep.subr.bf16.mxu0 %v9421_v2  ;;  %v9456_v2 = vld [vmem:[#allocation11 + $0x30] sm:$0xff]  }
 0x48b   : > { %6497 = vmatpush1.bf16.msra.mxu0 %v9419_v6  ;;  %v9457_v6 = vld [vmem:[#allocation11 + $0x78] sm:$0xff]  }
 0x48c   : > { %6498 = vmatprep.subr.bf16.mxu0 %v9424_v54  ;;  %v9458_v54 = vld [vmem:[#allocation11 + $0x38] sm:$0xff]  }
 0x48f   : > { %6499 = vmatpush1.bf16.msra.mxu0 %v9422_v57  ;;  %v9459_v57 = vld [vmem:[#allocation14] sm:$0xff]  }
 0x490   : > { %6500 = vmatprep.subr.bf16.mxu0 %v9427_v8  ;;  %v9460_v8 = vld [vmem:[#allocation14 + $0x8] sm:$0xff]   ;;  %7939 = vmatprep.subr.bf16.mxu1 %v9459_v57 }
 0x491   : > { %7940 = vmatpush3.bf16.msra.mxu1 %v9459_v57 }
 0x492   : > { %7941 = vmatprep.subr.bf16.mxu1 %v9460_v8 }
 0x493   : > { %6501 = vmatpush1.bf16.msra.mxu0 %v9425_v15  ;;  %v9461_v15 = vld [vmem:[#allocation14 + $0x10] sm:$0xff]  }
 0x494   : > { %6502 = vmatprep.subr.bf16.mxu0 %v9430_v55  ;;  %v6095_v55 = vld [vmem:[#allocation10] sm:$0x3] }
 0x495   : > { %7942 = vmatpush3.bf16.msra.mxu1 %v9460_v8 }
 0x496   : > { %7943 = vmatprep.subr.bf16.mxu1 %v9461_v15 }
 0x497   : > { %6503 = vmatpush1.bf16.msra.mxu0 %v9428_v53  ;;  %v6100_v53 = vrot.slane %v6095_v55, %v1303_v17 }
 0x498   : > { %6504 = vmatprep.subr.bf16.mxu0 %v9433_v50  ;;  %v6104_v50 = vrot.slane %v6095_v55, %v1307_v20 }
 0x499   : > { %7944 = vmatpush3.bf16.msra.mxu1 %v9461_v15 }
 0x49b   : > { %6505 = vmatpush1.bf16.msra.mxu0 %v9431_v13 }
 0x49c   : > { %6506 = vmatprep.subr.bf16.mxu0 %v9436_v60 }
 0x49f   : > { %6507 = vmatpush1.bf16.msra.mxu0 %v9434_v23 }
 0x4a0   : > { %6508 = vmatprep.subr.bf16.mxu0 %v9439_v24 }
 0x4a3   : > { %6509 = vmatpush1.bf16.msra.mxu0 %v9437_v5 }
 0x4a4   : > { %6510 = vmatprep.subr.bf16.mxu0 %v9442_v25 }
 0x4a7   : > { %6511 = vmatpush1.bf16.msra.mxu0 %v9440_v27 }
 0x4a8   : > { %7901 = vmatprep.subr.bf16.mxu0 %v9443_v36 }
 0x4de   : > { %v5988_v31 = vpop.f32.mrb[8].mxu1 }
 0x4df   : > { %v7975_v4 = vadd.f32 %v5988_v31, %v1312_v44  ;;  %v5990_v33 = vpop.f32.mrb[9].mxu1 }
 0x4e0   : > { %v7976_v21 = vadd.f32 %v5990_v33, %v1316_v11  ;;  %v5992_v45 = vpop.f32.mrb[10].mxu1 }
 0x4e1   : > { %v7977_v22 = vadd.f32 %v5992_v45, %v1312_v44  ;;  %v5994_v47 = vpop.f32.mrb[11].mxu1  ;;  %v6009_v48 = vmax.f32 %v7975_v4, 0.0 }
 0x4e2   : > { %v7978_v29 = vadd.f32 %v5994_v47, %v1316_v11  ;;  %v6010_v37 = vmax.f32 %v7976_v21, 0.0 }
 0x4e3   : > { %v6013_v35 = vmax.f32 %v7977_v22, 0.0 }
 0x4e4   : > { %v6014_v51 = vmax.f32 %v7978_v29, 0.0 }
 0x4e5   : > { %v6025_v34 = vpack.c.bf16 %v6013_v35, %v6009_v48 }
 0x4e6   : > { %v6026_v43 = vpack.c.bf16 %v6014_v51, %v6010_v37  ;;  %v5998_v56 = vpop.f32.mrb[12].mxu1 }
 0x4e7   : > { %v7979_v39 = vadd.f32 %v5998_v56, %v1312_v44  ;;  %v6000_v26 = vpop.f32.mrb[13].mxu1  ;;  %v9463_v56 = vld [vmem:[#allocation14 + $0x20] sm:$0xff]  }
 0x4e8   : > { %v7980_v19 = vadd.f32 %v6000_v26, %v1316_v11  ;;  %v6002_v9 = vpop.f32.mrb[14].mxu1  ;;  %6512 = vmatprep.mubr.bf16.mxu0 %v6026_v43  ;;  %v9462_v43 = vld [vmem:[#allocation14 + $0x18] sm:$0xff]  }
 0x4e9   : > { %v7981_v61 = vadd.f32 %v6002_v9, %v1312_v44  ;;  %v6004_v10 = vpop.f32.mrb[15].mxu1  ;;  %6513 = vmatmul.mubr.bf16.vlgmr.msra.gmra.mrb[8].mxu0 %v6025_v34  ;;  %v6017_v7 = vmax.f32 %v7979_v39, 0.0  ;;  %7945 = vmatprep.subr.bf16.mxu1 %v9462_v43  ;;  %v9465_v39 = vld [vmem:[#allocation14 + $0x30] sm:$0xff]   ;;  %v9466_v26 = vld [vmem:[#allocation14 + $0x38] sm:$0xff]  }
 0x4ea   : > { %v7982_v3 = vadd.f32 %v6004_v10, %v1316_v11  ;;  %7902 = vmatpush3.bf16.msra.mxu0 %v9444_v32  ;;  %v6018_v30 = vmax.f32 %v7980_v19, 0.0  ;;  %7946 = vmatpush3.bf16.msra.mxu1 %v9462_v43  ;;  %v9464_v32 = vld [vmem:[#allocation14 + $0x28] sm:$0xff]   ;;  %v7850_v19 = vld [vmem:[#allocation13] ss:$0 sm:$0xff] }
 0x4eb   : > { %v6021_v46 = vmax.f32 %v7981_v61, 0.0  ;;  %7903 = vmatprep.subr.bf16.mxu0 %v9445_v28  ;;  %7947 = vmatprep.subr.bf16.mxu1 %v9463_v56 }
 0x4ec   : > { %v6022_v12 = vmax.f32 %v7982_v3, 0.0 }
 0x4ed   : > { %v6029_v18 = vpack.c.bf16 %v6021_v46, %v6017_v7 }
 0x4ee   : > { %v6030_v58 = vpack.c.bf16 %v6022_v12, %v6018_v30  ;;  %7904 = vmatpush3.bf16.msra.mxu0 %v9446_v49  ;;  %7948 = vmatpush3.bf16.msra.mxu1 %v9463_v56 }
 0x4ef   : > { %7905 = vmatprep.subr.bf16.mxu0 %v9447_v52  ;;  %7949 = vmatprep.subr.bf16.mxu1 %v9464_v32 }
 0x4f0   : > { %6522 = vmatprep.mubr.bf16.mxu0 %v6030_v58 }
 0x4f1   : > { %6523 = vmatmul.mubr.bf16.gmra.mrb[12].mxu0 %v6029_v18 }
 0x4f2   : > { %7906 = vmatpush3.bf16.msra.mxu0 %v9448_v59  ;;  %7950 = vmatpush3.bf16.msra.mxu1 %v9464_v32 }
 0x4f3   : > { %7907 = vmatprep.subr.bf16.mxu0 %v9449_v63  ;;  %7951 = vmatprep.subr.bf16.mxu1 %v9465_v39 }
 0x4f6   : > { %7908 = vmatpush3.bf16.msra.mxu0 %v9450_v40  ;;  %7952 = vmatpush3.bf16.msra.mxu1 %v9465_v39 }
 0x4f7   : > { %7909 = vmatprep.subr.bf16.mxu0 %v9451_v1  ;;  %7953 = vmatprep.subr.bf16.mxu1 %v9466_v26 }
 0x4fa   : > { %7910 = vmatpush3.bf16.msra.mxu0 %v9452_v62  ;;  %7954 = vmatpush3.bf16.msra.mxu1 %v9466_v26 }
 0x4fb   : > { %7911 = vmatprep.subr.bf16.mxu0 %v9453_v38 }
 0x4fe   : > { %7912 = vmatpush3.bf16.msra.mxu0 %v9454_v41 }
 0x4ff   : > { %7913 = vmatprep.subr.bf16.mxu0 %v9455_v42 }
 0x502   : > { %7914 = vmatpush3.bf16.msra.mxu0 %v9456_v2 }
 0x503   : > { %7915 = vmatprep.subr.bf16.mxu0 %v9457_v6  ;;  %v7867_v6 = vld [vmem:[#allocation16] ss:$0 sm:$0xff] }
 0x506   : > { %7916 = vmatpush3.bf16.msra.mxu0 %v9458_v54 }
 0x5bc   : > { %v6514_v13 = vpop.f32.mrb[8].mxu0 }
 0x5bd   : > { %v7983_v60 = vadd.f32 %v6514_v13, %v6100_v53  ;;  %v6516_v23 = vpop.f32.mrb[9].mxu0 }
 0x5be   : > { %v7984_v24 = vadd.f32 %v6516_v23, %v6104_v50  ;;  %v6518_v5 = vpop.f32.mrb[10].mxu0 }
 0x5bf   : > { %v7985_v25 = vadd.f32 %v6518_v5, %v6100_v53  ;;  %v6520_v27 = vpop.f32.mrb[11].mxu0  ;;  %v6533_v0 = vmax.f32 %v7983_v60, 0.0 }
 0x5c0   : > { %v7986_v36 = vadd.f32 %v6520_v27, %v6104_v50  ;;  %v6534_v44 = vmax.f32 %v7984_v24, 0.0 }
 0x5c1   : > { %v6535_v14 = vmax.f32 %v7985_v25, 0.0 }
 0x5c2   : > { %v6536_v11 = vmax.f32 %v7986_v36, 0.0 }
 0x5c3   : > { %v6541_v31 = vpack.c.bf16 %v6535_v14, %v6533_v0 }
 0x5c4   : > { %v6542_v4 = vpack.c.bf16 %v6536_v11, %v6534_v44  ;;  %v6524_v33 = vpop.f32.mrb[12].mxu0 }
 0x5c5   : > { %v7987_v21 = vadd.f32 %v6524_v33, %v6100_v53  ;;  %v6526_v17 = vpop.f32.mrb[13].mxu0 }
 0x5c6   : > { %v7988_v45 = vadd.f32 %v6526_v17, %v6104_v50  ;;  %v6528_v16 = vpop.f32.mrb[14].mxu0  ;;  %6712 = vmatprep.mubr.bf16.mxu0 %v6542_v4 }
 0x5c7   : > { %v7989_v20 = vadd.f32 %v6528_v16, %v6100_v53  ;;  %v6530_v22 = vpop.f32.mrb[15].mxu0  ;;  %6713 = vmatmul.mubr.bf16.vlgmr.msra.gmra.mrb[16].mxu0 %v6541_v31  ;;  %v6537_v29 = vmax.f32 %v7987_v21, 0.0 }
 0x5c8   : > { %v7990_v47 = vadd.f32 %v6530_v22, %v6104_v50  ;;  %v6538_v35 = vmax.f32 %v7988_v45, 0.0 }
 0x5c9   : > { %v6539_v48 = vmax.f32 %v7989_v20, 0.0 }
 0x5ca   : > { %v6540_v37 = vmax.f32 %v7990_v47, 0.0 }
 0x5cb   : > { %v6543_v51 = vpack.c.bf16 %v6539_v48, %v6537_v29 }
 0x5cc   : > { %v6544_v34 = vpack.c.bf16 %v6540_v37, %v6538_v35 }
 0x5ce   : > { %6720 = vmatprep.mubr.bf16.mxu0 %v6544_v34 }
 0x5cf   : > { %6721 = vmatmul.mubr.bf16.gmra.mrb[20].mxu0 %v6543_v51 }
 0x69a   : > { %v7917_v28 = vpop.f32.mrb[16].mxu0 }
 0x69b   : > { %v7918_v9 = vpop.f32.mrb[17].mxu0 }
 0x69c   : > { %v7919_v61 = vadd.f32 %v7918_v9, %v7917_v28  ;;  %v7920_v10 = vpop.f32.mrb[18].mxu0 }
 0x69d   : > { %v7921_v3 = vpop.f32.mrb[19].mxu0 }
 0x69e   : > { %v6715_v49 = vadd.f32 %v7919_v61, %v7850_v19  ;;  %v7922_v7 = vadd.f32 %v7921_v3, %v7920_v10 }
 0x6a0   : > { %v6718_v46 = vadd.f32 %v7922_v7, %v7850_v19  ;;  %v6729_v52 = vmax.f32 %v6715_v49, 0.0 }
 0x6a2   : > { %v6730_v30 = vmax.f32 %v6718_v46, 0.0  ;;  %v7923_v12 = vpop.f32.mrb[20].mxu0 }
 0x6a3   : > { %v7924_v18 = vpop.f32.mrb[21].mxu0 }
 0x6a4   : > { %v7925_v58 = vadd.f32 %v7924_v18, %v7923_v12  ;;  %v7926_v59 = vpop.f32.mrb[22].mxu0  ;;  %v6733_v63 = vpack.c.bf16 %v6730_v30, %v6729_v52 }
 0x6a5   : > { %v7927_v40 = vpop.f32.mrb[23].mxu0 }
 0x6a6   : > { %v6723_v1 = vadd.f32 %v7925_v58, %v7850_v19  ;;  %v7928_v62 = vadd.f32 %v7927_v40, %v7926_v59  ;;  %7955 = vmatprep.mubr.bf16.mxu1 %v6733_v63 }
 0x6a8   : > { %v6726_v38 = vadd.f32 %v7928_v62, %v7850_v19  ;;  %v6731_v41 = vmax.f32 %v6723_v1, 0.0 }
 0x6aa   : > { %v6732_v42 = vmax.f32 %v6726_v38, 0.0 }
 0x6ac   : > { %v6734_v2 = vpack.c.bf16 %v6732_v42, %v6731_v41 }
 0x6ae   : > { %7956 = vmatmul.mubr.bf16.vlgmr.msra.gmra.mrb[16].mxu1 %v6734_v2 }
 0x781   : > { %v7957_v54 = vpop.f32.mrb[16].mxu1 }
 0x782   : > { %v6849_v57 = vadd.f32 %v7957_v54, %v7867_v6  ;;  %v6840_v8 = vpop.f32.mrb[17].mxu1 }
 0x783   : > { %v6841_v15 = vadd.f32 %v7867_v6, %v6840_v8  ;;  %v7958_v55 = vpop.f32.mrb[18].mxu1 }
 0x784   : > { %v6857_v53 = vsub.f32 0.0, %v6849_v57  ;;  %v6852_v50 = vadd.f32 %v7958_v55, %v7867_v6  ;;  %v6843_v13 = vpop.f32.mrb[19].mxu1 }
 0x785   : > { %v6855_v60 = vsub.f32 0.0, %v6841_v15  ;;  %v6844_v23 = vadd.f32 %v7867_v6, %v6843_v13 }
 0x786   : > { %v6863_v24 = vmul.f32 1.442695, %v6857_v53  ;;  %v6858_v5 = vsub.f32 0.0, %v6852_v50 }
 0x787   : > { %v6859_v25 = vmul.f32 1.442695, %v6855_v60  ;;  %v6856_v27 = vsub.f32 0.0, %v6844_v23 }
 0x788   : > { %9467 = vpow2.f32 %v6863_v24  ;;  %v6865_v36 = vmul.f32 1.442695, %v6858_v5 }
 0x789   : > { %9469 = vpow2.f32 %v6859_v25  ;;  %v6861_v0 = vmul.f32 1.442695, %v6856_v27 }
 0x78a   : > { %9471 = vpow2.f32 %v6865_v36 }
 0x78b   : > { %9473 = vpow2.f32 %v6861_v0 }
 0x792   : > { %v9468_v14 = vpop.eup %9467 }
 0x793   : > { %v9470_v44 = vpop.eup %9469  ;;  %v6869_v11 = vadd.f32 1.0, %v9468_v14 }
 0x794   : > { %v9472_v31 = vpop.eup %9471  ;;  %v6867_v4 = vadd.f32 1.0, %v9470_v44 }
 0x795   : > { %v9474_v33 = vpop.eup %9473  ;;  %9475 = vrcp.f32 %v6869_v11  ;;  %v6870_v21 = vadd.f32 1.0, %v9472_v31 }
 0x796   : > { %9477 = vrcp.f32 %v6867_v4  ;;  %v6868_v17 = vadd.f32 1.0, %v9474_v33 }
 0x797   : > { %9479 = vrcp.f32 %v6870_v21 }
 0x798   : > { %9481 = vrcp.f32 %v6868_v17 }
 0x79f   : > { %v9476_v45 = vpop.eup %9475 }
 0x7a0   : > { %v9478_v16 = vpop.eup %9477 }
 0x7a1   : > { %v9480_v20 = vpop.eup %9479 }
 0x7a2   : > { %v9482_v22 = vpop.eup %9481  ;;  %v7898_v47 = vpack.c.bf16 %v9480_v20, %v9476_v45 }
 0x7a3   : > { %v7893_v29 = vpack.c.bf16 %v9482_v22, %v9478_v16 }
 0x7a4   : > { %7900 = vst [vmem:[%s459_s23 + $0x8] sm:$0xff] %v7898_v47  }
 0x7a5   : > { %7894 = vst [vmem:[%s459_s23] sm:$0xff] %v7893_v29  }
 0x7a6   : > { %9750 = shalt.err (!%p9747_p9)
}
 0x7a7   : > { %s9751_s20 = scalar_lea.hbm %s10511_s1, 256  ;;  %s9755_s28 = scalar_lea.hbm %s10593_s18, 512 }
 0x7a8   : > { %p9752_p4 = scmp.ne.s32.totalorder %s10511_s1, %s9751_s20  ;;  %p9756_p2 = scmp.lt.u32.totalorder %s10511_s1, %s10593_s18 }
 0x7a9   : > { %p9757_p0 = scmp.lt.u32.totalorder %s9755_s28, %s9751_s20  ;;  %p9759_p10 = scmp.lt.u32.totalorder %s9751_s20, %s10511_s1 }
 0x7aa   : > { %p9753_p3 = pnand %p9752_p4, %p10594_p1 }
 0x7ab   : > { %p9758_p5 = por %p9757_p0, %p9756_p2 }
 0x7ac   : > { %p9754_p6 = pneg %p9753_p3 }
 0x7ad   : > { %p9760_p11 = por %p9759_p10, %p9758_p5 }
 0x7af   : > { %p9761_p12 = pnand %p9760_p11, %p9754_p6 }
 0x7b1   : > { %9764 = shalt.err (!%p9761_p12)
}
 0x7b2   : > { %s9839_s22 = smov 64   ;;  %s9840_s14 = smov 4  }
 0x7b3   : > { %8188 = dma.vmem_to_hbm [thread:$0]  (%p10594_p1), %s10513_s9, 256, %s10511_s1, %s6896_s15, %s9839_s22, %s9839_s22, %s9840_s14  }
 0x7b4 PF: > { %s6924_s27 = sand.u32 1, %s9807_s30   ;;  %p10595_p13 = scmp.ne.s32.totalorder %s10582_s13, 0 }
 0x7b5   : > { %p10596_p8 = scmp.ge.s32.totalorder %s9819_s12, 2  ;;  %s6925_s24 = scalar_lea.sflag [#allocation4], %s6924_s27 }
 0x7b7   : > { %p8220_p7 = pnand %p10596_p8, %p10595_p13 }
 0x7b9   : > { %9802 = dma.done.wait (!%p8220_p7), %s6925_s24, 256  }
 0x7ba   : > { %9804 = vsyncadd (!%p8220_p7), %s6925_s24, 4294967040  ;;  %p26_p9 = scmp.ge.s32.totalorder %s10099_s19, 4   ;;  %s10597_s30 = smov %s9811_s10 }
 0x7bb   : > { %s10598_s10 = smov %s9815_s11  ;;  %s10599_s11 = smov %s10110_s26 }
 0x7bc   : > { %s10600_s12 = smov %s10099_s19  ;;  %28 = sbr.rel (!%p26_p9) target bundleno = 13 (0xd), region = 133 }
 0x7c3   :  { %6930 = vsyncpa [#allocation3], 1 }
 0x7c4   :  { %6932 = vsyncpa [#allocation3 + $0x1], 1 }
 0x7c5   :  { %6933 = vsyncpa [#allocation6], 1 }
 0x7c6   :  { %6934 = vsyncpa [#allocation9], 1 }
 0x7c7   :  { %6935 = vsyncpa [#allocation12], 1 }
 0x7c8   :  { %6936 = vsyncpa [#allocation15], 1 }
 0x7c9   :  { %6937 = vsyncpa [#allocation4], 1 }
 0x7ca   :  { %6939 = vsyncpa [#allocation4 + $0x1], 1 }

// kernel: tpu_custom_call.1
= control target key start
LH: loop header
LB: loop body
LE: loop exit
PB: predicated region body
PF: predicated region fallthrough
CT: control target
= control target key end

     0   :  { %s10557_s0 = inlined_call_operand.hbm [shape: f32[64,2816], index: 0, kind: input, shape index: {}]   ;;  %s10558_s1 = inlined_call_operand.hbm [shape: bf16[2816,512], index: 1, kind: input, shape index: {}]   ;;  %s10559_s2 = inlined_call_operand.hbm [shape: f32[1,512], index: 2, kind: input, shape index: {}]   ;;  %s10560_s3 = inlined_call_operand.hbm [shape: bf16[512,256], index: 3, kind: input, shape index: {}]   ;;  %s10561_s4 = inlined_call_operand.hbm [shape: f32[1,256], index: 4, kind: input, shape index: {}]   ;;  %s10562_s5 = inlined_call_operand.hbm [shape: bf16[256,128], index: 5, kind: input, shape index: {}]   ;;  %s10563_s6 = inlined_call_operand.hbm [shape: f32[1,128], index: 6, kind: input, shape index: {}]   ;;  %s10564_s7 = inlined_call_operand.hbm [shape: bf16[128,128], index: 7, kind: input, shape index: {}]   ;;  %s10565_s8 = inlined_call_operand.hbm [shape: f32[1,128], index: 8, kind: input, shape index: {}]   ;;  %s10566_s9 = inlined_call_operand.hbm [shape: bf16[64,128], index: 9, kind: output, shape index: {}]  }
   0x1   :  { %10571 = sst [smem:[#allocation24_spill]] %s10558_s1 }
   0x2   :  { %10572 = sst [smem:[#allocation25_spill]] %s10560_s3 }
   0x3   :  { %10573 = sst [smem:[#allocation26_spill]] %s10566_s9 }
   0x4   :  { %14 = vsyncpa [#allocation3], 0 }
   0x5   :  { %16 = vsyncpa [#allocation3 + $0x1], 0 }
   0x6   :  { %17 = vsyncpa [#allocation6], 0 }
   0x7   :  { %18 = vsyncpa [#allocation9], 0 }
   0x8   :  { %19 = vsyncpa [#allocation12], 0 }
   0x9   :  { %20 = vsyncpa [#allocation15], 0 }
   0xa   :  { %21 = vsyncpa [#allocation4], 0 }
   0xb   :  { %23 = vsyncpa [#allocation4 + $0x1], 0  ;;  %s9891_s30 = smov 0   ;;  %s9893_s10 = smov 0  }
   0xc   :  { %s9895_s11 = smov 0   ;;  %s9897_s12 = smov 0  }
   0xd LB: > { %s9821_s13 = smov [#allocation5]   ;;  %s9912_s15 = sadd.s32 4294967295, %s9819_s12   ;;  %s9819_s12 = sphi %s9897_s12, %s10600_s12   ;;  %s9815_s11 = sphi %s9895_s11, %s10599_s11   ;;  %s9811_s10 = sphi %s9893_s10, %s10598_s10   ;;  %s9807_s30 = sphi %s9891_s30, %s10597_s30  }
   0xe   : > { %s266_s14 = sshll.u32 %s9821_s13, 4  ;;  %p7059_p0 = scmp.ge.s32.totalorder %s9819_s12, 1  ;;  %s9917_s14 = int_to_ptr.vmem [resolvable:$true] %s266_s14 }
   0xf   : > { %p10568_p1 = scmp.eq.s32.totalorder %s9912_s15, 0  ;;  %p254_p2 = scmp.lt.s32.totalorder %s9819_s12, 3 }
  0x10   : > { %s9822_s17 = smov [#allocation8]   ;;  %s9823_s20 = smov [#allocation11]  }
  0x11   : > { %p9919_p3 = pnand %p7059_p0, %p254_p2  ;;  %s290_s18 = sshll.u32 %s9822_s17, 4  ;;  %s9932_s18 = int_to_ptr.vmem [resolvable:$true] %s290_s18 }
  0x12   : > { %s9934_s21 = sshll.u32 %s9823_s20, 4  ;;  %s10576_s1 = sld [smem:[#allocation24_spill]]  ;;  %s315_s21 = int_to_ptr.vmem [resolvable:$true] %s9934_s21 }
  0x13   : > { %s10574_s16 = scalar_select %p9919_p3, 1, 0 }
  0x14   : > { %p8190_p5 = pneg %p9919_p3 }
  0x16   : > { %p9928_p6 = pnand %p8190_p5, %p10568_p1 }
  0x18   : > { %s9483_s24 = scalar_lea.hbm %s10576_s1, 90112  ;;  %p9944_p8 = pneg %p9928_p6 }
  0x19   : > { %p9484_p7 = scmp.ne.s32.totalorder %s10576_s1, %s9483_s24  ;;  %p9490_p11 = scmp.lt.u32.totalorder %s9483_s24, %s10576_s1 }
  0x1b   : > { %p9486_p9 = pnand %p9944_p8, %p9484_p7 }
  0x1d   : > { %p9487_p10 = pneg %p9486_p9 }
  0x1f   : > { %p9492_p12 = pnand %p9490_p11, %p9487_p10 }
  0x21   : > { %9495 = shalt.err (!%p9492_p12)
}
  0x22   : > { %s9496_s13 = scalar_lea.vmem %s9917_s14, 90112  ;;  %p9504_p5 = scmp.lt.s32.totalorder %s9917_s14, %s9917_s14 }
  0x23   : > { %p9497_p13 = scmp.ne.s32.totalorder %s9917_s14, %s9496_s13  ;;  %p9505_p4 = scmp.lt.s32.totalorder %s9496_s13, %s9496_s13 }
  0x25   : > { %p9499_p0 = pnand %p9497_p13, %p9944_p8  ;;  %p9506_p7 = por %p9505_p4, %p9504_p5 }
  0x27   : > { %p9500_p2 = pneg %p9499_p0 }
  0x29   : > { %p9507_p9 = pnand %p9506_p7, %p9500_p2 }
  0x2b   : > { %9510 = shalt.err (!%p9507_p9)
}
  0x2c   : > { %s9824_s17 = smov 256   ;;  %s9825_s20 = smov 16  }
  0x2d   : > { %8193 = dma.hbm_to_vmem [thread:$0]  (!%p9928_p6), %s10576_s1, 90112, %s9917_s14, [#allocation6], %s9824_s17, %s9824_s17, %s9825_s20  }
  0x2e   : > { %s10578_s3 = sld [smem:[#allocation25_spill]] }
  0x34   : > { %s9511_s26 = scalar_lea.hbm %s10578_s3, 8192 }
  0x35   : > { %p9512_p4 = scmp.ne.s32.totalorder %s10578_s3, %s9511_s26  ;;  %p9518_p12 = scmp.lt.u32.totalorder %s9511_s26, %s10578_s3 }
  0x37   : > { %p9514_p10 = pnand %p9512_p4, %p9944_p8 }
  0x39   : > { %p9515_p11 = pneg %p9514_p10 }
  0x3b   : > { %p9520_p13 = pnand %p9518_p12, %p9515_p11 }
  0x3d   : > { %9523 = shalt.err (!%p9520_p13)
}
  0x3e   : > { %s9524_s14 = scalar_lea.vmem %s9932_s18, 8192  ;;  %p9532_p7 = scmp.lt.s32.totalorder %s9932_s18, %s9932_s18 }
  0x3f   : > { %p9525_p0 = scmp.ne.s32.totalorder %s9932_s18, %s9524_s14  ;;  %p9533_p9 = scmp.lt.s32.totalorder %s9524_s14, %s9524_s14 }
  0x41   : > { %p9527_p2 = pnand %p9525_p0, %p9944_p8  ;;  %p9534_p4 = por %p9533_p9, %p9532_p7 }
  0x43   : > { %p9528_p5 = pneg %p9527_p2 }
  0x45   : > { %p9535_p10 = pnand %p9534_p4, %p9528_p5 }
  0x47   : > { %9538 = shalt.err (!%p9535_p10)
}
  0x48   : > { %s9826_s17 = smov 128   ;;  %s9827_s9 = smov 8  }
  0x49   : > { %8199 = dma.hbm_to_vmem [thread:$0]  (!%p9928_p6), %s10578_s3, 8192, %s9932_s18, [#allocation9], %s9826_s17, %s9826_s17, %s9827_s9  }
  0x4a   : > { %s9539_s25 = scalar_lea.hbm %s10562_s5, 2048 }
  0x4b   : > { %p9540_p11 = scmp.ne.s32.totalorder %s10562_s5, %s9539_s25  ;;  %p9546_p0 = scmp.lt.u32.totalorder %s9539_s25, %s10562_s5 }
  0x4d   : > { %p9542_p12 = pnand %p9540_p11, %p9944_p8 }
  0x4f   : > { %p9543_p13 = pneg %p9542_p12 }
  0x51   : > { %p9548_p2 = pnand %p9546_p0, %p9543_p13 }
  0x53   : > { %9551 = shalt.err (!%p9548_p2)
}
  0x54   : > { %s9552_s14 = scalar_lea.vmem %s315_s21, 2048  ;;  %p9560_p4 = scmp.lt.s32.totalorder %s315_s21, %s315_s21 }
  0x55   : > { %p9553_p5 = scmp.ne.s32.totalorder %s315_s21, %s9552_s14  ;;  %p9561_p10 = scmp.lt.s32.totalorder %s9552_s14, %s9552_s14 }
  0x57   : > { %p9555_p7 = pnand %p9553_p5, %p9944_p8  ;;  %p9562_p1 = por %p9561_p10, %p9560_p4 }
  0x59   : > { %p9556_p9 = pneg %p9555_p7 }
  0x5b   : > { %p9563_p3 = pnand %p9562_p1, %p9556_p9 }
  0x5d   : > { %9566 = shalt.err (!%p9563_p3)
}
  0x5e   : > { %s9828_s18 = smov 64   ;;  %s9829_s17 = smov 4  }
  0x5f   : > { %8205 = dma.hbm_to_vmem [thread:$0]  (!%p9928_p6), %s10562_s5, 2048, %s315_s21, [#allocation12], %s9828_s18, %s9828_s18, %s9829_s17  }
  0x60   : > { %s9830_s22 = smov [#allocation14]   ;;  %s9831_s24 = smov [#allocation7]  }
  0x61   : > { %s338_s23 = sshll.u32 %s9830_s22, 4  ;;  %s280_s25 = sshll.u32 %s9831_s24, 4  ;;  %s339_s23 = int_to_ptr.vmem [resolvable:$true] %s338_s23  ;;  %s281_s25 = int_to_ptr.vmem [resolvable:$true] %s280_s25 }
  0x62   : > { %s9567_s29 = scalar_lea.hbm %s10564_s7, 1024 }
  0x63   : > { %p9568_p1 = scmp.ne.s32.totalorder %s10564_s7, %s9567_s29  ;;  %p9574_p12 = scmp.lt.u32.totalorder %s9567_s29, %s10564_s7 }
  0x65   : > { %p9570_p3 = pnand %p9568_p1, %p9944_p8 }
  0x67   : > { %p9571_p11 = pneg %p9570_p3 }
  0x69   : > { %p9576_p13 = pnand %p9574_p12, %p9571_p11 }
  0x6b   : > { %9579 = shalt.err (!%p9576_p13)
}
  0x6c   : > { %s9580_s21 = scalar_lea.vmem %s339_s23, 1024  ;;  %p9588_p7 = scmp.lt.s32.totalorder %s339_s23, %s339_s23 }
  0x6d   : > { %p9581_p0 = scmp.ne.s32.totalorder %s339_s23, %s9580_s21  ;;  %p9589_p9 = scmp.lt.s32.totalorder %s9580_s21, %s9580_s21 }
  0x6f   : > { %p9583_p2 = pnand %p9581_p0, %p9944_p8  ;;  %p9590_p4 = por %p9589_p9, %p9588_p7 }
  0x71   : > { %p9584_p5 = pneg %p9583_p2 }
  0x73   : > { %p9591_p10 = pnand %p9590_p4, %p9584_p5 }
  0x75   : > { %9594 = shalt.err (!%p9591_p10)
}
  0x76   : > { %8211 = dma.hbm_to_vmem [thread:$0]  (!%p9928_p6), %s10564_s7, 1024, %s339_s23, [#allocation15], %s9828_s18, %s9828_s18, %s9829_s17  }
  0x77   : > { %s9595_s22 = scalar_lea.hbm %s10559_s2, 64 }
  0x78   : > { %p9596_p1 = scmp.ne.s32.totalorder %s10559_s2, %s9595_s22  ;;  %p9602_p12 = scmp.lt.u32.totalorder %s9595_s22, %s10559_s2 }
  0x7a   : > { %p9598_p3 = pnand %p9596_p1, %p9944_p8 }
  0x7c   : > { %p9599_p11 = pneg %p9598_p3 }
  0x7e   : > { %p9604_p13 = pnand %p9602_p12, %p9599_p11 }
  0x80   : > { %9607 = shalt.err (!%p9604_p13)
}
  0x81   : > { %s9608_s13 = scalar_lea.vmem %s281_s25, 64  ;;  %p9616_p7 = scmp.lt.s32.totalorder %s281_s25, %s281_s25 }
  0x82   : > { %p9609_p0 = scmp.ne.s32.totalorder %s281_s25, %s9608_s13  ;;  %p9617_p9 = scmp.lt.s32.totalorder %s9608_s13, %s9608_s13 }
  0x84   : > { %p9611_p2 = pnand %p9609_p0, %p9944_p8  ;;  %p9618_p4 = por %p9617_p9, %p9616_p7 }
  0x86   : > { %p9612_p5 = pneg %p9611_p2 }
  0x88   : > { %p9619_p10 = pnand %p9618_p4, %p9612_p5 }
  0x8a   : > { %9622 = shalt.err (!%p9619_p10)
}
  0x8b   : > { %8196 = dma.hbm_to_vmem [thread:$0]  (!%p9928_p6), %s10559_s2, 64, %s281_s25, [#allocation6]  }
  0x8c   : > { %s9832_s23 = smov [#allocation10]   ;;  %s9833_s21 = smov [#allocation13]  }
  0x8d   : > { %s304_s14 = sshll.u32 %s9832_s23, 4  ;;  %s328_s9 = sshll.u32 %s9833_s21, 4  ;;  %s305_s14 = int_to_ptr.vmem [resolvable:$true] %s304_s14  ;;  %s329_s9 = int_to_ptr.vmem [resolvable:$true] %s328_s9 }
  0x8e   : > { %s9623_s3 = scalar_lea.hbm %s10561_s4, 32 }
  0x8f   : > { %p9624_p1 = scmp.ne.s32.totalorder %s10561_s4, %s9623_s3  ;;  %p9630_p12 = scmp.lt.u32.totalorder %s9623_s3, %s10561_s4 }
  0x91   : > { %p9626_p3 = pnand %p9624_p1, %p9944_p8 }
  0x93   : > { %p9627_p11 = pneg %p9626_p3 }
  0x95   : > { %p9632_p13 = pnand %p9630_p12, %p9627_p11 }
  0x97   : > { %9635 = shalt.err (!%p9632_p13)
}
  0x98   : > { %s9636_s25 = scalar_lea.vmem %s305_s14, 32  ;;  %p9644_p7 = scmp.lt.s32.totalorder %s305_s14, %s305_s14 }
  0x99   : > { %p9637_p0 = scmp.ne.s32.totalorder %s305_s14, %s9636_s25  ;;  %p9645_p9 = scmp.lt.s32.totalorder %s9636_s25, %s9636_s25 }
  0x9b   : > { %p9639_p2 = pnand %p9637_p0, %p9944_p8  ;;  %p9646_p4 = por %p9645_p9, %p9644_p7 }
  0x9d   : > { %p9640_p5 = pneg %p9639_p2 }
  0x9f   : > { %p9647_p10 = pnand %p9646_p4, %p9640_p5 }
  0xa1   : > { %9650 = shalt.err (!%p9647_p10)
}
  0xa2   : > { %8202 = dma.hbm_to_vmem [thread:$0]  (!%p9928_p6), %s10561_s4, 32, %s305_s14, [#allocation9]  }
  0xa3   : > { %s9651_s23 = scalar_lea.hbm %s10563_s6, 16 }
  0xa4   : > { %p9652_p1 = scmp.ne.s32.totalorder %s10563_s6, %s9651_s23  ;;  %p9658_p12 = scmp.lt.u32.totalorder %s9651_s23, %s10563_s6 }
  0xa6   : > { %p9654_p3 = pnand %p9652_p1, %p9944_p8 }
  0xa8   : > { %p9655_p11 = pneg %p9654_p3 }
  0xaa   : > { %p9660_p13 = pnand %p9658_p12, %p9655_p11 }
  0xac   : > { %9663 = shalt.err (!%p9660_p13)
}
  0xad   : > { %s9664_s22 = scalar_lea.vmem %s329_s9, 16  ;;  %s9671_s14 = scalar_lea.vmem %s329_s9, 32 }
  0xae   : > { %p9665_p0 = scmp.ne.s32.totalorder %s329_s9, %s9664_s22  ;;  %p9672_p7 = scmp.lt.s32.totalorder %s329_s9, %s329_s9 }
  0xaf   : > { %p9673_p9 = scmp.lt.s32.totalorder %s9671_s14, %s9664_s22 }
  0xb0   : > { %p9667_p2 = pnand %p9665_p0, %p9944_p8 }
  0xb1   : > { %p9674_p4 = por %p9673_p9, %p9672_p7 }
  0xb2   : > { %p9668_p5 = pneg %p9667_p2 }
  0xb4   : > { %p9675_p10 = pnand %p9674_p4, %p9668_p5 }
  0xb6   : > { %9678 = shalt.err (!%p9675_p10)
}
  0xb7   : > { %8208 = dma.hbm_to_vmem [thread:$0]  (!%p9928_p6), %s10563_s6, 16, %s329_s9, [#allocation12]  }
  0xb8   : > { %s9834_s28 = smov [#allocation16]   ;;  %s9679_s18 = scalar_lea.hbm %s10565_s8, 16 }
  0xb9   : > { %s352_s25 = sshll.u32 %s9834_s28, 4  ;;  %p9680_p1 = scmp.ne.s32.totalorder %s10565_s8, %s9679_s18  ;;  %s353_s25 = int_to_ptr.vmem [resolvable:$true] %s352_s25 }
  0xba   : > { %p9686_p12 = scmp.lt.u32.totalorder %s9679_s18, %s10565_s8 }
  0xbb   : > { %p9682_p3 = pnand %p9680_p1, %p9944_p8 }
  0xbd   : > { %p9683_p11 = pneg %p9682_p3 }
  0xbf   : > { %p9688_p13 = pnand %p9686_p12, %p9683_p11 }
  0xc1   : > { %9691 = shalt.err (!%p9688_p13)
}
  0xc2   : > { %s9692_s9 = scalar_lea.vmem %s353_s25, 16  ;;  %s9699_s1 = scalar_lea.vmem %s353_s25, 32 }
  0xc3   : > { %p9693_p0 = scmp.ne.s32.totalorder %s353_s25, %s9692_s9  ;;  %p9700_p7 = scmp.lt.s32.totalorder %s353_s25, %s353_s25 }
  0xc4   : > { %p9701_p9 = scmp.lt.s32.totalorder %s9699_s1, %s9692_s9 }
  0xc5   : > { %p9695_p2 = pnand %p9693_p0, %p9944_p8 }
  0xc6   : > { %p9702_p4 = por %p9701_p9, %p9700_p7 }
  0xc7   : > { %p9696_p5 = pneg %p9695_p2 }
  0xc9   : > { %p9703_p10 = pnand %p9702_p4, %p9696_p5 }
  0xcb   : > { %9706 = shalt.err (!%p9703_p10)
}
  0xcc   : > { %8214 = dma.hbm_to_vmem [thread:$0]  (!%p9928_p6), %s10565_s8, 16, %s353_s25, [#allocation15]  }
  0xcd   : > { %s7058_s27 = sadd.s32 4294967294, %s9819_s12   ;;  %s10099_s19 = sadd.s32 1, %s9819_s12  }
  0xce   : > { %s33_s14 = ssub.s32 %s9819_s12, %s10099_s19  ;;  %s36_s24 = sadd.s32 1, %s9815_s11 }
  0xcf   : > { %p34_p8 = scmp.eq.s32.totalorder %s33_s14, 0  ;;  %p43_p1 = scmp.ne.s32.totalorder %s9815_s11, %s9811_s10 }
  0xd0   : > { %p44_p3 = scmp.eq.s32.totalorder %s9819_s12, 0  ;;  %p49_p11 = scmp.ne.s32.totalorder %s9811_s10, %s9807_s30 }
  0xd1   : > { %s10110_s26 = scalar_select %p34_p8, %s9815_s11, %s36_s24  }
  0xd2   : > { %p45_p12 = por %p44_p3, %p43_p1  ;;  %p10579_p13 = scmp.eq.s32.totalorder %s9912_s15, 0 }
  0xd3   : > { %p241_p6 = scmp.eq.s32.totalorder %s9912_s15, 1  ;;  %p247_p2 = scmp.eq.s32.totalorder %s7058_s27, 1 }
  0xd4   : > { %p10114_p0 = por %p10579_p13, %p49_p11  ;;  %p8231_p5 = scmp.lt.s32.totalorder %s9819_s12, 2 }
  0xd5   : > { %s363_s25 = sand.u32 1, %s9815_s11   ;;  %p10121_p7 = por %p241_p6, %p43_p1 }
  0xd6   : > { %p10125_p9 = por %p247_p2, %p49_p11  ;;  %s8151_s18 = smul.u32 704, %s363_s25 }
  0xd7   : > { %s10581_s29 = scalar_select %p10121_p7, 1, 0 }
  0xd8   : > { %s10582_s13 = scalar_select %p10125_p9, 1, 0 }
  0xd9   : > { %s8152_s17 = smul.u32 11264, %s9819_s12  ;;  %p10130_p4 = pnand %p8231_p5, %p45_p12 }
  0xda   : > { %s367_s1 = scalar_lea.vmem [#allocation2], %s8151_s18  ;;  %s10141_s22 = scalar_lea.sflag [#allocation3], %s363_s25 }
  0xdb   : > { %s10137_s9 = scalar_lea.hbm %s10557_s0, %s8152_s17  ;;  %s375_s3 = sshll.u32 %s367_s1, 4  ;;  %s10139_s3 = int_to_ptr.vmem [resolvable:$true] %s375_s3 }
  0xdc   : > { %s9707_s27 = scalar_lea.hbm %s10137_s9, 11264  ;;  %p9709_p8 = pneg %p10130_p4 }
  0xdd   : > { %p9708_p10 = scmp.ne.s32.totalorder %s10137_s9, %s9707_s27  ;;  %s9712_s17 = scalar_lea.hbm %s10557_s0, 22528 }
  0xde   : > { %p9713_p11 = scmp.lt.u32.totalorder %s10137_s9, %s10557_s0  ;;  %p9714_p12 = scmp.lt.u32.totalorder %s9712_s17, %s9707_s27 }
  0xdf   : > { %p9710_p1 = pnand %p9709_p8, %p9708_p10  ;;  %p9716_p6 = scmp.lt.u32.totalorder %s9707_s27, %s10137_s9 }
  0xe0   : > { %p9715_p13 = por %p9714_p12, %p9713_p11 }
  0xe1   : > { %p9711_p3 = pneg %p9710_p1 }
  0xe2   : > { %p9717_p2 = por %p9716_p6, %p9715_p13 }
  0xe4   : > { %p9718_p5 = pnand %p9717_p2, %p9711_p3 }
  0xe6   : > { %9721 = shalt.err (!%p9718_p5)
}
  0xe7   : > { %s9722_s25 = scalar_lea.vmem %s10139_s3, 11264  ;;  %s9835_s18 = smov [#allocation2]  }
  0xe8   : > { %p9723_p10 = scmp.ne.s32.totalorder %s10139_s3, %s9722_s25  ;;  %s9727_s1 = sshll.u32 %s9835_s18, 4  ;;  %s9728_s1 = int_to_ptr.vmem [resolvable:$false] %s9727_s1 }
  0xe9   : > { %s9729_s14 = scalar_lea.vmem %s9728_s1, 22528  ;;  %p9730_p7 = scmp.lt.s32.totalorder %s10139_s3, %s9728_s1 }
  0xea   : > { %p9725_p1 = pnand %p9723_p10, %p9709_p8  ;;  %p9731_p11 = scmp.lt.s32.totalorder %s9729_s14, %s9722_s25 }
  0xec   : > { %p9726_p9 = pneg %p9725_p1  ;;  %p9732_p12 = por %p9731_p11, %p9730_p7 }
  0xee   : > { %p9733_p13 = pnand %p9732_p12, %p9726_p9 }
  0xf0   : > { %9736 = shalt.err (!%p9733_p13)
}
  0xf1   : > { %s9836_s27 = smov 2816   ;;  %s9837_s24 = smov 176  }
  0xf2   : > { %8218 = dma.hbm_to_vmem [thread:$0]  (!%p10130_p4), %s10137_s9, 11264, %s10139_s3, %s10141_s22, %s9836_s27, %s9836_s27, %s9837_s24  }
  0xf3   : > { %p10584_p8 = scmp.ne.s32.totalorder %s10574_s16, 0 }
  0xf4   : > { %s10172_s17 = sand.u32 (!%p10584_p8), 1, %s9811_s10  }
  0xf5   : > { %387 = sbr.rel (%p10584_p8) target bundleno = 1972 (0x7b4), region = 56  ;;  %s390_s20 = scalar_lea.sflag (!%p10584_p8), [#allocation3], %s10172_s17 }
  0xf6   : > { %s8153_s21 = smul.u32 (!%p10584_p8), 704, %s10172_s17 }
  0xf8   : > { %s10176_s25 = scalar_lea.vmem (!%p10584_p8), [#allocation2], %s8153_s21 }
  0xfc   : > { %9782 = dma.done.wait (%p10114_p0), %s390_s20, 11264  }
  0xfd   : > { %9784 = vsyncadd (%p10114_p0), %s390_s20, 4294956032  ;;  %p10585_p7 = scmp.eq.s32.totalorder %s9912_s15, 0 }
  0xff   : > { %9786 = dma.done.wait (%p10585_p7), [#allocation6], 90176   ;;  %p10586_p9 = pmov %p10585_p7 }
 0x100   : > { %p10587_p4 = pmov %p10585_p7 }
 0x101   : > { %9788 = vsyncadd (%p10586_p9), [#allocation6], 4294877120 }
 0x102   : > { %9790 = dma.done.wait (%p10587_p4), [#allocation9], 8224   ;;  %p10588_p3 = pmov %p10587_p4 }
 0x104   : > { %9792 = vsyncadd (%p10588_p3), [#allocation9], 4294959072  ;;  %p10589_p6 = pmov %p10588_p3 }
 0x105   : > { %p10590_p2 = pmov %p10588_p3 }
 0x106   : > { %9794 = dma.done.wait (%p10589_p6), [#allocation12], 2064  }
 0x107   : > { %9796 = vsyncadd (%p10590_p2), [#allocation12], 4294965232  ;;  %p10591_p0 = pmov %p10590_p2 }
 0x109   : > { %9798 = dma.done.wait (%p10591_p0), [#allocation15], 1040   ;;  %p10592_p5 = pmov %p10591_p0 }
 0x10a   : > { %v8291_v0 = vld [vmem:[#allocation5 + $0x4] ss:$16 sps:$4 sm:$0xff]   ;;  %v8295_v2 = vld [vmem:[#allocation5] ss:$16 sps:$4 sm:$0xff]   ;;  %v464_v46 = vld [vmem:[%s10176_s25 + $0x8] sm:$0xff]  ;;  %s7081_s16 = sshll.u32 %s10172_s17, 4 }
 0x10b   : > { %9800 = vsyncadd (%p10592_p5), [#allocation15], 4294966256  ;;  %v8293_v1 = vld [vmem:[#allocation5 + $0x204] ss:$16 sps:$4 sm:$0xff]   ;;  %4841 = vmatprep.subr.bf16.mxu1 %v8291_v0  ;;  %v8296_v3 = vld [vmem:[#allocation5 + $0x200] ss:$16 sps:$4 sm:$0xff]  }
 0x10c   : > { %4894 = vmatprep.subr.bf16.mxu0 %v8293_v1  ;;  %v8297_v4 = vld [vmem:[#allocation5 + $0x24] ss:$16 sps:$4 sm:$0xff]   ;;  %4842 = vmatpush1.bf16.msra.mxu1 %v8295_v2  ;;  %v8301_v6 = vld [vmem:[#allocation5 + $0x20] ss:$16 sps:$4 sm:$0xff]   ;;  %v486_v49 = vld [vmem:[%s10176_s25 + $0xb8] sm:$0xff]  ;;  %s7889_s28 = sshll.u32 %s9912_s15, 8 }
 0x10d   : > { %4895 = vmatpush1.bf16.msra.mxu0 %v8296_v3  ;;  %v8299_v5 = vld [vmem:[#allocation5 + $0x224] ss:$16 sps:$4 sm:$0xff]   ;;  %4843 = vmatprep.subr.bf16.mxu1 %v8297_v4  ;;  %v8302_v7 = vld [vmem:[#allocation5 + $0x220] ss:$16 sps:$4 sm:$0xff]   ;;  %v10200_v50 = vpack.c.bf16 %v486_v49, %v464_v46  ;;  %v466_v51 = vld [vmem:[%s10176_s25 + $0x18] sm:$0xff]  ;;  %s459_s23 = scalar_lea.vmem [#allocation17], %s7081_s16 }
 0x10e   : > { %4896 = vmatprep.subr.bf16.mxu0 %v8299_v5  ;;  %v8303_v8 = vld [vmem:[#allocation5 + $0x44] ss:$16 sps:$4 sm:$0xff]   ;;  %v8307_v10 = vld [vmem:[#allocation5 + $0x40] ss:$16 sps:$4 sm:$0xff]   ;;  %v488_v52 = vld [vmem:[%s10176_s25 + $0xc8] sm:$0xff]  ;;  %s6909_s9 = sshll.u32 %s459_s23, 4  ;;  %s10513_s9 = int_to_ptr.vmem [resolvable:$true] %s6909_s9 }
 0x10f   : > { %v8305_v9 = vld [vmem:[#allocation5 + $0x244] ss:$16 sps:$4 sm:$0xff]   ;;  %v8308_v11 = vld [vmem:[#allocation5 + $0x240] ss:$16 sps:$4 sm:$0xff]   ;;  %v10204_v55 = vpack.c.bf16 %v488_v52, %v466_v51  ;;  %4873 = vmatprep.mubr.bf16.mxu1 %v10200_v50  ;;  %s10593_s18 = sld [smem:[#allocation26_spill]]  ;;  %s6896_s15 = scalar_lea.sflag [#allocation4], %s10172_s17 }
 0x110   : > { %4844 = vmatpush1.bf16.msra.mxu1 %v8301_v6  ;;  %v8309_v12 = vld [vmem:[#allocation5 + $0x64] ss:$16 sps:$4 sm:$0xff]   ;;  %v8313_v14 = vld [vmem:[#allocation5 + $0x60] ss:$16 sps:$4 sm:$0xff]   ;;  %s9737_s14 = scalar_lea.vmem %s10513_s9, 256  ;;  %p10594_p1 = scmp.ne.s32.totalorder %s10581_s29, 0 }
 0x111   : > { %4897 = vmatpush1.bf16.msra.mxu0 %v8302_v7  ;;  %4845 = vmatprep.subr.bf16.mxu1 %v8303_v8  ;;  %v8311_v13 = vld [vmem:[#allocation5 + $0x264] ss:$16 sps:$4 sm:$0xff]   ;;  %v8314_v15 = vld [vmem:[#allocation5 + $0x260] ss:$16 sps:$4 sm:$0xff]   ;;  %p9738_p10 = scmp.ne.s32.totalorder %s10513_s9, %s9737_s14  ;;  %s9838_s27 = smov [#allocation17]  }
 0x112   : > { %4898 = vmatprep.subr.bf16.mxu0 %v8305_v9  ;;  %v8315_v16 = vld [vmem:[#allocation5 + $0x84] ss:$16 sps:$4 sm:$0xff]   ;;  %v8319_v18 = vld [vmem:[#allocation5 + $0x80] ss:$16 sps:$4 sm:$0xff]   ;;  %4926 = vmatprep.mubr.bf16.mxu0 %v10204_v55  ;;  %s9741_s24 = sshll.u32 %s9838_s27, 4  ;;  %s9742_s24 = int_to_ptr.vmem [resolvable:$false] %s9741_s24 }
 0x113   : > { %v8317_v17 = vld [vmem:[#allocation5 + $0x284] ss:$16 sps:$4 sm:$0xff]   ;;  %v8320_v19 = vld [vmem:[#allocation5 + $0x280] ss:$16 sps:$4 sm:$0xff]   ;;  %p9739_p11 = pnand %p9738_p10, %p10594_p1  ;;  %s9743_s21 = scalar_lea.vmem %s9742_s24, 512 }
 0x114   : > { %4846 = vmatpush1.bf16.msra.mxu1 %v8307_v10  ;;  %v8321_v20 = vld [vmem:[#allocation5 + $0xa4] ss:$16 sps:$4 sm:$0xff]   ;;  %v8325_v22 = vld [vmem:[#allocation5 + $0xa0] ss:$16 sps:$4 sm:$0xff]   ;;  %p9744_p13 = scmp.lt.s32.totalorder %s10513_s9, %s9742_s24  ;;  %p9745_p8 = scmp.lt.s32.totalorder %s9743_s21, %s9737_s14 }
 0x115   : > { %4899 = vmatpush1.bf16.msra.mxu0 %v8308_v11  ;;  %4847 = vmatprep.subr.bf16.mxu1 %v8309_v12  ;;  %v8323_v21 = vld [vmem:[#allocation5 + $0x2a4] ss:$16 sps:$4 sm:$0xff]   ;;  %v8326_v23 = vld [vmem:[#allocation5 + $0x2a0] ss:$16 sps:$4 sm:$0xff]   ;;  %v8392_v11 = vld [vmem:[#allocation5 + $0xc] ss:$16 sps:$4 sm:$0xff]   ;;  %s10511_s1 = scalar_lea.hbm %s10593_s18, %s7889_s28  ;;  %p9740_p12 = pneg %p9739_p11 }
 0x116   : > { %4900 = vmatprep.subr.bf16.mxu0 %v8311_v13  ;;  %v8327_v24 = vld [vmem:[#allocation5 + $0xc4] ss:$16 sps:$4 sm:$0xff]   ;;  %v8331_v26 = vld [vmem:[#allocation5 + $0xc0] ss:$16 sps:$4 sm:$0xff]   ;;  %p9746_p7 = por %p9745_p8, %p9744_p13 }
 0x117   : > { %v8329_v25 = vld [vmem:[#allocation5 + $0x2c4] ss:$16 sps:$4 sm:$0xff]   ;;  %v8332_v27 = vld [vmem:[#allocation5 + $0x2c0] ss:$16 sps:$4 sm:$0xff]  }
 0x118   : > { %4848 = vmatpush1.bf16.msra.mxu1 %v8313_v14  ;;  %v8333_v28 = vld [vmem:[#allocation5 + $0xe4] ss:$16 sps:$4 sm:$0xff]   ;;  %v8337_v30 = vld [vmem:[#allocation5 + $0xe0] ss:$16 sps:$4 sm:$0xff]   ;;  %v8390_v14 = vld [vmem:[#allocation5 + $0x8] ss:$16 sps:$4 sm:$0xff]   ;;  %p9747_p9 = pnand %p9746_p7, %p9740_p12 }
 0x119   : > { %4901 = vmatpush1.bf16.msra.mxu0 %v8314_v15  ;;  %4849 = vmatprep.subr.bf16.mxu1 %v8315_v16  ;;  %v8335_v29 = vld [vmem:[#allocation5 + $0x2e4] ss:$16 sps:$4 sm:$0xff]   ;;  %v8338_v31 = vld [vmem:[#allocation5 + $0x2e0] ss:$16 sps:$4 sm:$0xff]  }
 0x11a   : > { %4902 = vmatprep.subr.bf16.mxu0 %v8317_v17  ;;  %v8339_v32 = vld [vmem:[#allocation5 + $0x104] ss:$16 sps:$4 sm:$0xff]   ;;  %v8343_v34 = vld [vmem:[#allocation5 + $0x100] ss:$16 sps:$4 sm:$0xff]   ;;  %v8398_v17 = vld [vmem:[#allocation5 + $0x2c] ss:$16 sps:$4 sm:$0xff]  }
 0x11b   : > { %v8341_v33 = vld [vmem:[#allocation5 + $0x304] ss:$16 sps:$4 sm:$0xff]   ;;  %v8344_v35 = vld [vmem:[#allocation5 + $0x300] ss:$16 sps:$4 sm:$0xff]  }
 0x11c   : > { %4850 = vmatpush1.bf16.msra.mxu1 %v8319_v18  ;;  %v8345_v36 = vld [vmem:[#allocation5 + $0x124] ss:$16 sps:$4 sm:$0xff]   ;;  %v8349_v38 = vld [vmem:[#allocation5 + $0x120] ss:$16 sps:$4 sm:$0xff]  }
 0x11d   : > { %4903 = vmatpush1.bf16.msra.mxu0 %v8320_v19  ;;  %4851 = vmatprep.subr.bf16.mxu1 %v8321_v20  ;;  %v8347_v37 = vld [vmem:[#allocation5 + $0x324] ss:$16 sps:$4 sm:$0xff]   ;;  %v8350_v39 = vld [vmem:[#allocation5 + $0x320] ss:$16 sps:$4 sm:$0xff]   ;;  %v8396_v19 = vld [vmem:[#allocation5 + $0x28] ss:$16 sps:$4 sm:$0xff]  }
 0x11e   : > { %4904 = vmatprep.subr.bf16.mxu0 %v8323_v21  ;;  %v8351_v40 = vld [vmem:[#allocation5 + $0x144] ss:$16 sps:$4 sm:$0xff]   ;;  %v8355_v42 = vld [vmem:[#allocation5 + $0x140] ss:$16 sps:$4 sm:$0xff]   ;;  %v8404_v21 = vld [vmem:[#allocation5 + $0x4c] ss:$16 sps:$4 sm:$0xff]  }
 0x11f   : > { %v8353_v41 = vld [vmem:[#allocation5 + $0x344] ss:$16 sps:$4 sm:$0xff]   ;;  %v8356_v43 = vld [vmem:[#allocation5 + $0x340] ss:$16 sps:$4 sm:$0xff]  }
 0x120   : > { %4852 = vmatpush1.bf16.msra.mxu1 %v8325_v22  ;;  %v8357_v44 = vld [vmem:[#allocation5 + $0x164] ss:$16 sps:$4 sm:$0xff]   ;;  %v8361_v47 = vld [vmem:[#allocation5 + $0x160] ss:$16 sps:$4 sm:$0xff]  }
 0x121   : > { %4905 = vmatpush1.bf16.msra.mxu0 %v8326_v23  ;;  %4853 = vmatprep.subr.bf16.mxu1 %v8327_v24  ;;  %v8359_v45 = vld [vmem:[#allocation5 + $0x364] ss:$16 sps:$4 sm:$0xff]   ;;  %v8362_v48 = vld [vmem:[#allocation5 + $0x360] ss:$16 sps:$4 sm:$0xff]   ;;  %v8402_v23 = vld [vmem:[#allocation5 + $0x48] ss:$16 sps:$4 sm:$0xff]  }
 0x122   : > { %4906 = vmatprep.subr.bf16.mxu0 %v8329_v25  ;;  %v8363_v53 = vld [vmem:[#allocation5 + $0x184] ss:$16 sps:$4 sm:$0xff]   ;;  %v8367_v56 = vld [vmem:[#allocation5 + $0x180] ss:$16 sps:$4 sm:$0xff]   ;;  %v8410_v25 = vld [vmem:[#allocation5 + $0x6c] ss:$16 sps:$4 sm:$0xff]  }
 0x123   : > { %v8365_v54 = vld [vmem:[#allocation5 + $0x384] ss:$16 sps:$4 sm:$0xff]   ;;  %v8368_v57 = vld [vmem:[#allocation5 + $0x380] ss:$16 sps:$4 sm:$0xff]  }
 0x124   : > { %4854 = vmatpush1.bf16.msra.mxu1 %v8331_v26  ;;  %v8369_v58 = vld [vmem:[#allocation5 + $0x1a4] ss:$16 sps:$4 sm:$0xff]   ;;  %v8373_v60 = vld [vmem:[#allocation5 + $0x1a0] ss:$16 sps:$4 sm:$0xff]  }
 0x125   : > { %4907 = vmatpush1.bf16.msra.mxu0 %v8332_v27  ;;  %4855 = vmatprep.subr.bf16.mxu1 %v8333_v28  ;;  %v8371_v59 = vld [vmem:[#allocation5 + $0x3a4] ss:$16 sps:$4 sm:$0xff]   ;;  %v8374_v61 = vld [vmem:[#allocation5 + $0x3a0] ss:$16 sps:$4 sm:$0xff]   ;;  %v8408_v27 = vld [vmem:[#allocation5 + $0x68] ss:$16 sps:$4 sm:$0xff]  }
 0x126   : > { %4908 = vmatprep.subr.bf16.mxu0 %v8335_v29  ;;  %v8375_v62 = vld [vmem:[#allocation5 + $0x1c4] ss:$16 sps:$4 sm:$0xff]   ;;  %v8379_v0 = vld [vmem:[#allocation5 + $0x1c0] ss:$16 sps:$4 sm:$0xff]   ;;  %v8416_v29 = vld [vmem:[#allocation5 + $0x8c] ss:$16 sps:$4 sm:$0xff]  }
 0x127   : > { %v8377_v63 = vld [vmem:[#allocation5 + $0x3c4] ss:$16 sps:$4 sm:$0xff]   ;;  %v8380_v1 = vld [vmem:[#allocation5 + $0x3c0] ss:$16 sps:$4 sm:$0xff]  }
 0x128   : > { %4856 = vmatpush1.bf16.msra.mxu1 %v8337_v30  ;;  %v8381_v2 = vld [vmem:[#allocation5 + $0x1e4] ss:$16 sps:$4 sm:$0xff]   ;;  %v8385_v4 = vld [vmem:[#allocation5 + $0x1e0] ss:$16 sps:$4 sm:$0xff]  }
 0x129   : > { %4909 = vmatpush1.bf16.msra.mxu0 %v8338_v31  ;;  %4857 = vmatprep.subr.bf16.mxu1 %v8339_v32  ;;  %v8383_v3 = vld [vmem:[#allocation5 + $0x3e4] ss:$16 sps:$4 sm:$0xff]   ;;  %v8386_v5 = vld [vmem:[#allocation5 + $0x3e0] ss:$16 sps:$4 sm:$0xff]   ;;  %v8414_v31 = vld [vmem:[#allocation5 + $0x88] ss:$16 sps:$4 sm:$0xff]  }
 0x12a   : > { %4910 = vmatprep.subr.bf16.mxu0 %v8341_v33  ;;  %v463_v6 = vld [vmem:[%s10176_s25] sm:$0xff]  ;;  %v485_v7 = vld [vmem:[%s10176_s25 + $0xb0] sm:$0xff]  ;;  %v8422_v33 = vld [vmem:[#allocation5 + $0xac] ss:$16 sps:$4 sm:$0xff]  }
 0x12b   : > { %v8389_v8 = vld [vmem:[#allocation5 + $0x404] ss:$16 sps:$4 sm:$0xff]   ;;  %v10212_v12 = vpack.c.bf16 %v485_v7, %v463_v6  ;;  %v8387_v13 = vld [vmem:[#allocation5 + $0x400] ss:$16 sps:$4 sm:$0xff]   ;;  %v8450_v7 = vld [vmem:[#allocation5 + $0x148] ss:$16 sps:$4 sm:$0xff]  }
 0x12c   : > { %4858 = vmatpush1.bf16.msra.mxu1 %v8343_v34  ;;  %v465_v9 = vld [vmem:[%s10176_s25 + $0x10] sm:$0xff]  ;;  %v487_v10 = vld [vmem:[%s10176_s25 + $0xc0] sm:$0xff] }
 0x12d   : > { %4911 = vmatpush1.bf16.msra.mxu0 %v8344_v35  ;;  %4859 = vmatprep.subr.bf16.mxu1 %v8345_v36  ;;  %v10214_v15 = vpack.c.bf16 %v487_v10, %v465_v9  ;;  %v8395_v16 = vld [vmem:[#allocation5 + $0x424] ss:$16 sps:$4 sm:$0xff]   ;;  %v8393_v18 = vld [vmem:[#allocation5 + $0x420] ss:$16 sps:$4 sm:$0xff]   ;;  %v8420_v35 = vld [vmem:[#allocation5 + $0xa8] ss:$16 sps:$4 sm:$0xff]  }
 0x12e   : > { %4912 = vmatprep.subr.bf16.mxu0 %v8347_v37  ;;  %v8401_v20 = vld [vmem:[#allocation5 + $0x444] ss:$16 sps:$4 sm:$0xff]   ;;  %v8399_v22 = vld [vmem:[#allocation5 + $0x440] ss:$16 sps:$4 sm:$0xff]   ;;  %v508_v36 = vld [vmem:[%s10176_s25 + $0x168] sm:$0xff] }
 0x12f   : > { %v8407_v24 = vld [vmem:[#allocation5 + $0x464] ss:$16 sps:$4 sm:$0xff]   ;;  %v8405_v26 = vld [vmem:[#allocation5 + $0x460] ss:$16 sps:$4 sm:$0xff]   ;;  %v530_v37 = vld [vmem:[%s10176_s25 + $0x218] sm:$0xff] }
 0x130   : > { %4860 = vmatpush1.bf16.msra.mxu1 %v8349_v38  ;;  %v8413_v28 = vld [vmem:[#allocation5 + $0x484] ss:$16 sps:$4 sm:$0xff]   ;;  %v8411_v30 = vld [vmem:[#allocation5 + $0x480] ss:$16 sps:$4 sm:$0xff]   ;;  %v8458_v9 = vld [vmem:[#allocation5 + $0x16c] ss:$16 sps:$4 sm:$0xff]  }
 0x131   : > { %4913 = vmatpush1.bf16.msra.mxu0 %v8350_v39  ;;  %4861 = vmatprep.subr.bf16.mxu1 %v8351_v40  ;;  %v8419_v32 = vld [vmem:[#allocation5 + $0x4a4] ss:$16 sps:$4 sm:$0xff]   ;;  %v8417_v34 = vld [vmem:[#allocation5 + $0x4a0] ss:$16 sps:$4 sm:$0xff]   ;;  %v10222_v40 = vpack.c.bf16 %v530_v37, %v508_v36 }
 0x132   : > { %4914 = vmatprep.subr.bf16.mxu0 %v8353_v41  ;;  %v507_v38 = vld [vmem:[%s10176_s25 + $0x160] sm:$0xff]  ;;  %v529_v39 = vld [vmem:[%s10176_s25 + $0x210] sm:$0xff] }
 0x133   : > { %v10224_v41 = vpack.c.bf16 %v529_v39, %v507_v38  ;;  %v509_v49 = vld [vmem:[%s10176_s25 + $0x170] sm:$0xff]  ;;  %v531_v51 = vld [vmem:[%s10176_s25 + $0x220] sm:$0xff]  ;;  %v8494_v38 = vld [vmem:[#allocation5 + $0x22c] ss:$16 sps:$4 sm:$0xff]  }
 0x134   : > { %4862 = vmatpush1.bf16.msra.mxu1 %v8355_v42  ;;  %v510_v42 = vld [vmem:[%s10176_s25 + $0x178] sm:$0xff]  ;;  %v8431_v52 = vld [vmem:[#allocation5 + $0x4e4] ss:$16 sps:$4 sm:$0xff]   ;;  %v8447_v6 = vld [vmem:[#allocation5 + $0x540] ss:$16 sps:$4 sm:$0xff]  }
 0x135   : > { %4915 = vmatpush1.bf16.msra.mxu0 %v8356_v43  ;;  %4863 = vmatprep.subr.bf16.mxu1 %v8357_v44  ;;  %v532_v43 = vld [vmem:[%s10176_s25 + $0x228] sm:$0xff]  ;;  %v8425_v44 = vld [vmem:[#allocation5 + $0x4c4] ss:$16 sps:$4 sm:$0xff]   ;;  %v8453_v10 = vld [vmem:[#allocation5 + $0x560] ss:$16 sps:$4 sm:$0xff]  }
 0x136   : > { %4916 = vmatprep.subr.bf16.mxu0 %v8359_v45  ;;  %v8428_v45 = vld [vmem:[#allocation5 + $0xcc] ss:$16 sps:$4 sm:$0xff]   ;;  %v10228_v46 = vpack.c.bf16 %v532_v43, %v510_v42  ;;  %v8491_v37 = vld [vmem:[#allocation5 + $0x624] ss:$16 sps:$4 sm:$0xff]   ;;  %v8489_v43 = vld [vmem:[#allocation5 + $0x620] ss:$16 sps:$4 sm:$0xff]  }
 0x137   : > { %v512_v39 = vld [vmem:[%s10176_s25 + $0x188] sm:$0xff]  ;;  %v534_v42 = vld [vmem:[%s10176_s25 + $0x238] sm:$0xff] }
 0x138   : > { %4864 = vmatpush1.bf16.msra.mxu1 %v8361_v47  ;;  %v8423_v47 = vld [vmem:[#allocation5 + $0x4c0] ss:$16 sps:$4 sm:$0xff]  }
 0x139   : > { %4917 = vmatpush1.bf16.msra.mxu0 %v8362_v48  ;;  %4865 = vmatprep.subr.bf16.mxu1 %v8363_v53  ;;  %v8426_v48 = vld [vmem:[#allocation5 + $0xc8] ss:$16 sps:$4 sm:$0xff]   ;;  %v10235_v53 = vpack.c.bf16 %v531_v51, %v509_v49  ;;  %v511_v49 = vld [vmem:[%s10176_s25 + $0x180] sm:$0xff]  ;;  %v533_v51 = vld [vmem:[%s10176_s25 + $0x230] sm:$0xff] }
 0x13a   : > { %4918 = vmatprep.subr.bf16.mxu0 %v8365_v54  ;;  %v8434_v54 = vld [vmem:[#allocation5 + $0xec] ss:$16 sps:$4 sm:$0xff]  }
 0x13c   : > { %4866 = vmatpush1.bf16.msra.mxu1 %v8367_v56  ;;  %v468_v56 = vld [vmem:[%s10176_s25 + $0x28] sm:$0xff] }
 0x13d   : > { %4919 = vmatpush1.bf16.msra.mxu0 %v8368_v57  ;;  %4867 = vmatprep.subr.bf16.mxu1 %v8369_v58  ;;  %v490_v57 = vld [vmem:[%s10176_s25 + $0xd8] sm:$0xff]  ;;  %v8429_v58 = vld [vmem:[#allocation5 + $0x4e0] ss:$16 sps:$4 sm:$0xff]  }
 0x13e   : > { %4920 = vmatprep.subr.bf16.mxu0 %v8371_v59  ;;  %v8432_v59 = vld [vmem:[#allocation5 + $0xe8] ss:$16 sps:$4 sm:$0xff]  }
 0x140   : > { %4868 = vmatpush1.bf16.msra.mxu1 %v8373_v60  ;;  %v10241_v60 = vpack.c.bf16 %v490_v57, %v468_v56  ;;  %v10258_v56 = vpack.c.bf16 %v533_v51, %v511_v49  ;;  %v492_v57 = vld [vmem:[%s10176_s25 + $0xe8] sm:$0xff]  ;;  %v8573_v49 = vld [vmem:[#allocation5 + $0x7e0] ss:$16 sps:$4 sm:$0xff]  }
 0x141   : > { %4921 = vmatpush1.bf16.msra.mxu0 %v8374_v61  ;;  %4869 = vmatprep.subr.bf16.mxu1 %v8375_v62  ;;  %v8437_v61 = vld [vmem:[#allocation5 + $0x504] ss:$16 sps:$4 sm:$0xff]   ;;  %v8440_v62 = vld [vmem:[#allocation5 + $0x10c] ss:$16 sps:$4 sm:$0xff]   ;;  %v8576_v51 = vld [vmem:[#allocation5 + $0x3e8] ss:$16 sps:$4 sm:$0xff]  }
 0x142   : > { %4922 = vmatprep.subr.bf16.mxu0 %v8377_v63  ;;  %v8435_v63 = vld [vmem:[#allocation5 + $0x500] ss:$16 sps:$4 sm:$0xff]  }
 0x144   : > { %4870 = vmatpush1.bf16.msra.mxu1 %v8379_v0  ;;  %v8438_v0 = vld [vmem:[#allocation5 + $0x108] ss:$16 sps:$4 sm:$0xff]  }
 0x145   : > { %4923 = vmatpush1.bf16.msra.mxu0 %v8380_v1  ;;  %4871 = vmatprep.subr.bf16.mxu1 %v8381_v2  ;;  %v8443_v1 = vld [vmem:[#allocation5 + $0x524] ss:$16 sps:$4 sm:$0xff]   ;;  %v8441_v2 = vld [vmem:[#allocation5 + $0x520] ss:$16 sps:$4 sm:$0xff]  }
 0x146   : > { %4924 = vmatprep.subr.bf16.mxu0 %v8383_v3  ;;  %v8444_v3 = vld [vmem:[#allocation5 + $0x128] ss:$16 sps:$4 sm:$0xff]  }
 0x148   : > { %4872 = vmatpush1.bf16.msra.mxu1 %v8385_v4  ;;  %v8449_v4 = vld [vmem:[#allocation5 + $0x544] ss:$16 sps:$4 sm:$0xff]  }
 0x149   : > { %4925 = vmatpush1.bf16.msra.mxu0 %v8386_v5  ;;  %5424 = vmatprep.subr.bf16.mxu1 %v8392_v11  ;;  %v8452_v5 = vld [vmem:[#allocation5 + $0x14c] ss:$16 sps:$4 sm:$0xff]   ;;  %v8456_v11 = vld [vmem:[#allocation5 + $0x168] ss:$16 sps:$4 sm:$0xff]  }
 0x14a   : > { %4947 = vmatprep.subr.bf16.mxu0 %v8389_v8  ;;  %v8455_v8 = vld [vmem:[#allocation5 + $0x564] ss:$16 sps:$4 sm:$0xff]  }
 0x14b   : > { %4874 = vmatmul.mubr.bf16.vlgmr.msra.gmra.mrb[0].mxu1 %v10212_v12 }
 0x14c   : > { %4927 = vmatmul.mubr.bf16.vlgmr.msra.gmra.mrb[0].mxu0 %v10214_v15  ;;  %5425 = vmatpush1.bf16.msra.mxu1 %v8390_v14  ;;  %v8464_v14 = vld [vmem:[#allocation5 + $0x18c] ss:$16 sps:$4 sm:$0xff]  }
 0x14d   : > { %4948 = vmatpush1.bf16.msra.mxu0 %v8387_v13  ;;  %5426 = vmatprep.subr.bf16.mxu1 %v8398_v17  ;;  %v8461_v13 = vld [vmem:[#allocation5 + $0x584] ss:$16 sps:$4 sm:$0xff]   ;;  %v8462_v17 = vld [vmem:[#allocation5 + $0x188] ss:$16 sps:$4 sm:$0xff]  }
 0x14e   : > { %4949 = vmatprep.subr.bf16.mxu0 %v8395_v16  ;;  %4883 = vmatprep.mubr.bf16.mxu1 %v10222_v40  ;;  %v8459_v16 = vld [vmem:[#allocation5 + $0x580] ss:$16 sps:$4 sm:$0xff]  }
 0x14f   : > { %4936 = vmatprep.mubr.bf16.mxu0 %v10228_v46 }
 0x150   : > { %5427 = vmatpush1.bf16.msra.mxu1 %v8396_v19  ;;  %v8470_v19 = vld [vmem:[#allocation5 + $0x1ac] ss:$16 sps:$4 sm:$0xff]  }
 0x151   : > { %4950 = vmatpush1.bf16.msra.mxu0 %v8393_v18  ;;  %5428 = vmatprep.subr.bf16.mxu1 %v8404_v21  ;;  %v8467_v18 = vld [vmem:[#allocation5 + $0x5a4] ss:$16 sps:$4 sm:$0xff]   ;;  %v8468_v21 = vld [vmem:[#allocation5 + $0x1a8] ss:$16 sps:$4 sm:$0xff]  }
 0x152   : > { %4951 = vmatprep.subr.bf16.mxu0 %v8401_v20  ;;  %v8465_v20 = vld [vmem:[#allocation5 + $0x5a0] ss:$16 sps:$4 sm:$0xff]  }
 0x153   : > { %4884 = vmatmul.mubr.bf16.gmra.mrb[4].mxu1 %v10224_v41 }
 0x154   : > { %5429 = vmatpush1.bf16.msra.mxu1 %v8402_v23  ;;  %4937 = vmatmul.mubr.bf16.gmra.mrb[4].mxu0 %v10235_v53  ;;  %v8476_v23 = vld [vmem:[#allocation5 + $0x1cc] ss:$16 sps:$4 sm:$0xff]  }
 0x155   : > { %4952 = vmatpush1.bf16.msra.mxu0 %v8399_v22  ;;  %5430 = vmatprep.subr.bf16.mxu1 %v8410_v25  ;;  %v8473_v22 = vld [vmem:[#allocation5 + $0x5c4] ss:$16 sps:$4 sm:$0xff]   ;;  %v8474_v25 = vld [vmem:[#allocation5 + $0x1c8] ss:$16 sps:$4 sm:$0xff]  }
 0x156   : > { %4953 = vmatprep.subr.bf16.mxu0 %v8407_v24  ;;  %5456 = vmatprep.mubr.bf16.mxu1 %v10200_v50  ;;  %v8446_v50 = vld [vmem:[#allocation5 + $0x12c] ss:$16 sps:$4 sm:$0xff]   ;;  %v8471_v24 = vld [vmem:[#allocation5 + $0x5c0] ss:$16 sps:$4 sm:$0xff]  }
 0x157   : > { %4979 = vmatprep.mubr.bf16.mxu0 %v10241_v60 }
 0x158   : > { %5431 = vmatpush1.bf16.msra.mxu1 %v8408_v27  ;;  %v8482_v27 = vld [vmem:[#allocation5 + $0x1ec] ss:$16 sps:$4 sm:$0xff]  }
 0x159   : > { %4954 = vmatpush1.bf16.msra.mxu0 %v8405_v26  ;;  %5432 = vmatprep.subr.bf16.mxu1 %v8416_v29  ;;  %v8479_v26 = vld [vmem:[#allocation5 + $0x5e4] ss:$16 sps:$4 sm:$0xff]   ;;  %v8480_v29 = vld [vmem:[#allocation5 + $0x1e8] ss:$16 sps:$4 sm:$0xff]  }
 0x15a   : > { %4955 = vmatprep.subr.bf16.mxu0 %v8413_v28  ;;  %v8477_v28 = vld [vmem:[#allocation5 + $0x5e0] ss:$16 sps:$4 sm:$0xff]  }
 0x15c   : > { %5433 = vmatpush1.bf16.msra.mxu1 %v8414_v31  ;;  %v467_v31 = vld [vmem:[%s10176_s25 + $0x20] sm:$0xff] }
 0x15d   : > { %4956 = vmatpush1.bf16.msra.mxu0 %v8411_v30  ;;  %5434 = vmatprep.subr.bf16.mxu1 %v8422_v33  ;;  %v8485_v30 = vld [vmem:[#allocation5 + $0x604] ss:$16 sps:$4 sm:$0xff]   ;;  %v8488_v33 = vld [vmem:[#allocation5 + $0x20c] ss:$16 sps:$4 sm:$0xff]  }
 0x15e   : > { %4957 = vmatprep.subr.bf16.mxu0 %v8419_v32  ;;  %v489_v32 = vld [vmem:[%s10176_s25 + $0xd0] sm:$0xff] }
 0x15f   : > { %v10246_v36 = vpack.c.bf16 %v489_v32, %v467_v31  ;;  %v8560_v31 = vld [vmem:[#allocation5 + $0x38c] ss:$16 sps:$4 sm:$0xff]   ;;  %v8555_v32 = vld [vmem:[#allocation5 + $0x780] ss:$16 sps:$4 sm:$0xff]  }
 0x160   : > { %5435 = vmatpush1.bf16.msra.mxu1 %v8420_v35  ;;  %v8486_v35 = vld [vmem:[#allocation5 + $0x208] ss:$16 sps:$4 sm:$0xff]  }
 0x161   : > { %4958 = vmatpush1.bf16.msra.mxu0 %v8417_v34  ;;  %5436 = vmatprep.subr.bf16.mxu1 %v8428_v45  ;;  %v8483_v34 = vld [vmem:[#allocation5 + $0x600] ss:$16 sps:$4 sm:$0xff]   ;;  %v8492_v45 = vld [vmem:[#allocation5 + $0x228] ss:$16 sps:$4 sm:$0xff]  }
 0x162   : > { %4959 = vmatprep.subr.bf16.mxu0 %v8425_v44  ;;  %v10250_v44 = vpack.c.bf16 %v534_v42, %v512_v39  ;;  %v8569_v39 = vld [vmem:[#allocation5 + $0x7c4] ss:$16 sps:$4 sm:$0xff]   ;;  %v8572_v42 = vld [vmem:[#allocation5 + $0x3cc] ss:$16 sps:$4 sm:$0xff]  }
 0x164   : > { %5437 = vmatpush1.bf16.msra.mxu1 %v8426_v48  ;;  %v8500_v48 = vld [vmem:[#allocation5 + $0x24c] ss:$16 sps:$4 sm:$0xff]  }
 0x165   : > { %4960 = vmatpush1.bf16.msra.mxu0 %v8423_v47  ;;  %5438 = vmatprep.subr.bf16.mxu1 %v8434_v54  ;;  %v8497_v47 = vld [vmem:[#allocation5 + $0x644] ss:$16 sps:$4 sm:$0xff]   ;;  %v8498_v54 = vld [vmem:[#allocation5 + $0x248] ss:$16 sps:$4 sm:$0xff]  }
 0x166   : > { %4961 = vmatprep.subr.bf16.mxu0 %v8431_v52  ;;  %v8495_v52 = vld [vmem:[#allocation5 + $0x640] ss:$16 sps:$4 sm:$0xff]  }
 0x168   : > { %5439 = vmatpush1.bf16.msra.mxu1 %v8432_v59  ;;  %v8506_v59 = vld [vmem:[#allocation5 + $0x26c] ss:$16 sps:$4 sm:$0xff]  }
 0x169   : > { %4962 = vmatpush1.bf16.msra.mxu0 %v8429_v58  ;;  %5440 = vmatprep.subr.bf16.mxu1 %v8440_v62  ;;  %v8503_v58 = vld [vmem:[#allocation5 + $0x664] ss:$16 sps:$4 sm:$0xff]   ;;  %v8501_v62 = vld [vmem:[#allocation5 + $0x660] ss:$16 sps:$4 sm:$0xff]  }
 0x16a   : > { %4963 = vmatprep.subr.bf16.mxu0 %v8437_v61 }
 0x16c   : > { %5441 = vmatpush1.bf16.msra.mxu1 %v8438_v0  ;;  %v8512_v0 = vld [vmem:[#allocation5 + $0x28c] ss:$16 sps:$4 sm:$0xff]  }
 0x16d   : > { %4964 = vmatpush1.bf16.msra.mxu0 %v8435_v63  ;;  %5442 = vmatprep.subr.bf16.mxu1 %v8446_v50  ;;  %v8504_v63 = vld [vmem:[#allocation5 + $0x268] ss:$16 sps:$4 sm:$0xff]  }
 0x16e   : > { %4965 = vmatprep.subr.bf16.mxu0 %v8443_v1  ;;  %v8507_v1 = vld [vmem:[#allocation5 + $0x680] ss:$16 sps:$4 sm:$0xff]   ;;  %v8510_v50 = vld [vmem:[#allocation5 + $0x288] ss:$16 sps:$4 sm:$0xff]  }
 0x170   : > { %5443 = vmatpush1.bf16.msra.mxu1 %v8444_v3  ;;  %v8518_v3 = vld [vmem:[#allocation5 + $0x2ac] ss:$16 sps:$4 sm:$0xff]  }
 0x171   : > { %4966 = vmatpush1.bf16.msra.mxu0 %v8441_v2  ;;  %5444 = vmatprep.subr.bf16.mxu1 %v8452_v5  ;;  %v8515_v2 = vld [vmem:[#allocation5 + $0x6a4] ss:$16 sps:$4 sm:$0xff]  }
 0x172   : > { %4967 = vmatprep.subr.bf16.mxu0 %v8449_v4  ;;  %v8513_v4 = vld [vmem:[#allocation5 + $0x6a0] ss:$16 sps:$4 sm:$0xff]   ;;  %v8521_v5 = vld [vmem:[#allocation5 + $0x6c4] ss:$16 sps:$4 sm:$0xff]  }
 0x174   : > { %5445 = vmatpush1.bf16.msra.mxu1 %v8450_v7  ;;  %v8519_v7 = vld [vmem:[#allocation5 + $0x6c0] ss:$16 sps:$4 sm:$0xff]  }
 0x175   : > { %4968 = vmatpush1.bf16.msra.mxu0 %v8447_v6  ;;  %5446 = vmatprep.subr.bf16.mxu1 %v8458_v9  ;;  %v8524_v6 = vld [vmem:[#allocation5 + $0x2cc] ss:$16 sps:$4 sm:$0xff]  }
 0x176   : > { %4969 = vmatprep.subr.bf16.mxu0 %v8455_v8  ;;  %v8522_v8 = vld [vmem:[#allocation5 + $0x2c8] ss:$16 sps:$4 sm:$0xff]   ;;  %v8530_v9 = vld [vmem:[#allocation5 + $0x2ec] ss:$16 sps:$4 sm:$0xff]  }
 0x178   : > { %5447 = vmatpush1.bf16.msra.mxu1 %v8456_v11  ;;  %v8528_v11 = vld [vmem:[#allocation5 + $0x2e8] ss:$16 sps:$4 sm:$0xff]  }
 0x179   : > { %4970 = vmatpush1.bf16.msra.mxu0 %v8453_v10  ;;  %5448 = vmatprep.subr.bf16.mxu1 %v8464_v14  ;;  %v8525_v10 = vld [vmem:[#allocation5 + $0x6e0] ss:$16 sps:$4 sm:$0xff]   ;;  %v8536_v14 = vld [vmem:[#allocation5 + $0x30c] ss:$16 sps:$4 sm:$0xff]  }
 0x17a   : > { %4971 = vmatprep.subr.bf16.mxu0 %v8461_v13  ;;  %v8533_v13 = vld [vmem:[#allocation5 + $0x704] ss:$16 sps:$4 sm:$0xff]  }
 0x17c   : > { %5449 = vmatpush1.bf16.msra.mxu1 %v8462_v17  ;;  %v8534_v17 = vld [vmem:[#allocation5 + $0x308] ss:$16 sps:$4 sm:$0xff]  }
 0x17d   : > { %4972 = vmatpush1.bf16.msra.mxu0 %v8459_v16  ;;  %5450 = vmatprep.subr.bf16.mxu1 %v8470_v19  ;;  %v8531_v16 = vld [vmem:[#allocation5 + $0x700] ss:$16 sps:$4 sm:$0xff]   ;;  %v8542_v19 = vld [vmem:[#allocation5 + $0x32c] ss:$16 sps:$4 sm:$0xff]  }
 0x17e   : > { %4973 = vmatprep.subr.bf16.mxu0 %v8467_v18  ;;  %v8539_v18 = vld [vmem:[#allocation5 + $0x724] ss:$16 sps:$4 sm:$0xff]  }
 0x180   : > { %5451 = vmatpush1.bf16.msra.mxu1 %v8468_v21  ;;  %v8540_v21 = vld [vmem:[#allocation5 + $0x328] ss:$16 sps:$4 sm:$0xff]  }
 0x181   : > { %4974 = vmatpush1.bf16.msra.mxu0 %v8465_v20  ;;  %5452 = vmatprep.subr.bf16.mxu1 %v8476_v23  ;;  %v8537_v20 = vld [vmem:[#allocation5 + $0x720] ss:$16 sps:$4 sm:$0xff]   ;;  %v8548_v23 = vld [vmem:[#allocation5 + $0x34c] ss:$16 sps:$4 sm:$0xff]  }
 0x182   : > { %4975 = vmatprep.subr.bf16.mxu0 %v8473_v22  ;;  %v8545_v22 = vld [vmem:[#allocation5 + $0x744] ss:$16 sps:$4 sm:$0xff]  }
 0x184   : > { %5453 = vmatpush1.bf16.msra.mxu1 %v8474_v25  ;;  %v8546_v25 = vld [vmem:[#allocation5 + $0x348] ss:$16 sps:$4 sm:$0xff]  }
 0x185   : > { %4976 = vmatpush1.bf16.msra.mxu0 %v8471_v24  ;;  %5454 = vmatprep.subr.bf16.mxu1 %v8482_v27  ;;  %v8543_v24 = vld [vmem:[#allocation5 + $0x740] ss:$16 sps:$4 sm:$0xff]   ;;  %v8554_v27 = vld [vmem:[#allocation5 + $0x36c] ss:$16 sps:$4 sm:$0xff]  }
 0x186   : > { %4977 = vmatprep.subr.bf16.mxu0 %v8479_v26  ;;  %v8551_v26 = vld [vmem:[#allocation5 + $0x764] ss:$16 sps:$4 sm:$0xff]  }
 0x188   : > { %5455 = vmatpush1.bf16.msra.mxu1 %v8480_v29  ;;  %v8552_v29 = vld [vmem:[#allocation5 + $0x368] ss:$16 sps:$4 sm:$0xff]  }
 0x189   : > { %4978 = vmatpush1.bf16.msra.mxu0 %v8477_v28  ;;  %5477 = vmatprep.subr.bf16.mxu1 %v8488_v33  ;;  %v8549_v28 = vld [vmem:[#allocation5 + $0x760] ss:$16 sps:$4 sm:$0xff]   ;;  %v8558_v33 = vld [vmem:[#allocation5 + $0x388] ss:$16 sps:$4 sm:$0xff]  }
 0x18a   : > { %5000 = vmatprep.subr.bf16.mxu0 %v8485_v30  ;;  %v8557_v30 = vld [vmem:[#allocation5 + $0x784] ss:$16 sps:$4 sm:$0xff]  }
 0x18b   : > { %5457 = vmatmul.mubr.bf16.vlgmr.msra.gmra.mrb[8].mxu1 %v10212_v12  ;;  %v470_v12 = vld [vmem:[%s10176_s25 + $0x38] sm:$0xff] }
 0x18c   : > { %4980 = vmatmul.mubr.bf16.vlgmr.msra.gmra.mrb[0].mxu0 %v10246_v36  ;;  %5478 = vmatpush1.bf16.msra.mxu1 %v8486_v35  ;;  %v10262_v61 = vpack.c.bf16 %v492_v57, %v470_v12  ;;  %v8566_v35 = vld [vmem:[#allocation5 + $0x3ac] ss:$16 sps:$4 sm:$0xff]   ;;  %v491_v12 = vld [vmem:[%s10176_s25 + $0xe0] sm:$0xff] }
 0x18d   : > { %5001 = vmatpush1.bf16.msra.mxu0 %v8483_v34  ;;  %5479 = vmatprep.subr.bf16.mxu1 %v8494_v38  ;;  %v8563_v34 = vld [vmem:[#allocation5 + $0x7a4] ss:$16 sps:$4 sm:$0xff]   ;;  %v8564_v38 = vld [vmem:[#allocation5 + $0x3a8] ss:$16 sps:$4 sm:$0xff]   ;;  %v8584_v57 = vld [vmem:[#allocation5 + $0x40c] ss:$16 sps:$4 sm:$0xff]  }
 0x18e   : > { %5002 = vmatprep.subr.bf16.mxu0 %v8491_v37  ;;  %4989 = vmatprep.mubr.bf16.mxu0 %v10250_v44  ;;  %v8561_v37 = vld [vmem:[#allocation5 + $0x7a0] ss:$16 sps:$4 sm:$0xff]  }
 0x18f   : > { %5466 = vmatprep.mubr.bf16.mxu1 %v10222_v40  ;;  %v8509_v40 = vld [vmem:[#allocation5 + $0x684] ss:$16 sps:$4 sm:$0xff]  }
 0x190   : > { %5480 = vmatpush1.bf16.msra.mxu1 %v8492_v45  ;;  %v8570_v45 = vld [vmem:[#allocation5 + $0x3c8] ss:$16 sps:$4 sm:$0xff]  }
 0x191   : > { %5003 = vmatpush1.bf16.msra.mxu0 %v8489_v43  ;;  %5481 = vmatprep.subr.bf16.mxu1 %v8500_v48  ;;  %v8567_v43 = vld [vmem:[#allocation5 + $0x7c0] ss:$16 sps:$4 sm:$0xff]   ;;  %v8578_v48 = vld [vmem:[#allocation5 + $0x3ec] ss:$16 sps:$4 sm:$0xff]  }
 0x192   : > { %5004 = vmatprep.subr.bf16.mxu0 %v8497_v47  ;;  %v8575_v47 = vld [vmem:[#allocation5 + $0x7e4] ss:$16 sps:$4 sm:$0xff]  }
 0x193   : > { %5467 = vmatmul.mubr.bf16.gmra.mrb[12].mxu1 %v10224_v41  ;;  %v8516_v41 = vld [vmem:[#allocation5 + $0x2a8] ss:$16 sps:$4 sm:$0xff]  }
 0x194   : > { %4990 = vmatmul.mubr.bf16.gmra.mrb[4].mxu0 %v10258_v56  ;;  %5482 = vmatpush1.bf16.msra.mxu1 %v8498_v54  ;;  %v469_v54 = vld [vmem:[%s10176_s25 + $0x30] sm:$0xff] }
 0x195   : > { %5005 = vmatpush1.bf16.msra.mxu0 %v8495_v52  ;;  %5483 = vmatprep.subr.bf16.mxu1 %v8506_v59  ;;  %v8581_v52 = vld [vmem:[#allocation5 + $0x804] ss:$16 sps:$4 sm:$0xff]   ;;  %v8582_v59 = vld [vmem:[#allocation5 + $0x408] ss:$16 sps:$4 sm:$0xff]  }
 0x196   : > { %5006 = vmatprep.subr.bf16.mxu0 %v8503_v58  ;;  %5032 = vmatprep.mubr.bf16.mxu0 %v10262_v61  ;;  %v8579_v58 = vld [vmem:[#allocation5 + $0x800] ss:$16 sps:$4 sm:$0xff]  }
 0x197   : > { %5509 = vmatprep.mubr.bf16.mxu1 %v10204_v55  ;;  %v8527_v55 = vld [vmem:[#allocation5 + $0x6e4] ss:$16 sps:$4 sm:$0xff]  }
 0x198   : > { %5484 = vmatpush1.bf16.msra.mxu1 %v8504_v63  ;;  %v514_v63 = vld [vmem:[%s10176_s25 + $0x198] sm:$0xff] }
 0x199   : > { %5007 = vmatpush1.bf16.msra.mxu0 %v8501_v62  ;;  %5485 = vmatprep.subr.bf16.mxu1 %v8512_v0  ;;  %v10270_v62 = vpack.c.bf16 %v491_v12, %v469_v54  ;;  %v8587_v0 = vld [vmem:[#allocation5 + $0x824] ss:$16 sps:$4 sm:$0xff]   ;;  %v8656_v54 = vld [vmem:[#allocation5 + $0x58c] ss:$16 sps:$4 sm:$0xff]   ;;  %v8651_v12 = vld [vmem:[#allocation5 + $0x980] ss:$16 sps:$4 sm:$0xff]  }
 0x19a   : > { %5008 = vmatprep.subr.bf16.mxu0 %v8509_v40  ;;  %v536_v40 = vld [vmem:[%s10176_s25 + $0x248] sm:$0xff] }
 0x19c   : > { %5486 = vmatpush1.bf16.msra.mxu1 %v8510_v50  ;;  %v8585_v50 = vld [vmem:[#allocation5 + $0x820] ss:$16 sps:$4 sm:$0xff]  }
 0x19d   : > { %5009 = vmatpush1.bf16.msra.mxu0 %v8507_v1  ;;  %5487 = vmatprep.subr.bf16.mxu1 %v8518_v3  ;;  %v8590_v1 = vld [vmem:[#allocation5 + $0x42c] ss:$16 sps:$4 sm:$0xff]   ;;  %v8588_v3 = vld [vmem:[#allocation5 + $0x428] ss:$16 sps:$4 sm:$0xff]  }
 0x19e   : > { %5010 = vmatprep.subr.bf16.mxu0 %v8515_v2  ;;  %v10274_v2 = vpack.c.bf16 %v536_v40, %v514_v63  ;;  %v8657_v63 = vld [vmem:[#allocation5 + $0x9a0] ss:$16 sps:$4 sm:$0xff]   ;;  %v8660_v40 = vld [vmem:[#allocation5 + $0x5a8] ss:$16 sps:$4 sm:$0xff]  }
 0x1a0   : > { %5488 = vmatpush1.bf16.msra.mxu1 %v8516_v41  ;;  %v535_v41 = vld [vmem:[%s10176_s25 + $0x240] sm:$0xff] }
 0x1a1   : > { %5011 = vmatpush1.bf16.msra.mxu0 %v8513_v4  ;;  %5489 = vmatprep.subr.bf16.mxu1 %v8524_v6  ;;  %v513_v4 = vld [vmem:[%s10176_s25 + $0x190] sm:$0xff]  ;;  %v8596_v6 = vld [vmem:[#allocation5 + $0x44c] ss:$16 sps:$4 sm:$0xff]  }
 0x1a2   : > { %5012 = vmatprep.subr.bf16.mxu0 %v8521_v5  ;;  %v8593_v5 = vld [vmem:[#allocation5 + $0x844] ss:$16 sps:$4 sm:$0xff]  }
 0x1a4   : > { %5490 = vmatpush1.bf16.msra.mxu1 %v8522_v8  ;;  %v472_v8 = vld [vmem:[%s10176_s25 + $0x48] sm:$0xff] }
 0x1a5   : > { %5013 = vmatpush1.bf16.msra.mxu0 %v8519_v7  ;;  %5491 = vmatprep.subr.bf16.mxu1 %v8530_v9  ;;  %v8591_v7 = vld [vmem:[#allocation5 + $0x840] ss:$16 sps:$4 sm:$0xff]   ;;  %v494_v9 = vld [vmem:[%s10176_s25 + $0xf8] sm:$0xff] }
 0x1a6   : > { %5014 = vmatprep.subr.bf16.mxu0 %v8527_v55  ;;  %v10283_v55 = vpack.c.bf16 %v535_v41, %v513_v4  ;;  %v8671_v4 = vld [vmem:[#allocation5 + $0x9e4] ss:$16 sps:$4 sm:$0xff]   ;;  %v8674_v41 = vld [vmem:[#allocation5 + $0x5ec] ss:$16 sps:$4 sm:$0xff]  }
 0x1a8   : > { %5492 = vmatpush1.bf16.msra.mxu1 %v8528_v11  ;;  %v8602_v11 = vld [vmem:[#allocation5 + $0x46c] ss:$16 sps:$4 sm:$0xff]  }
 0x1a9   : > { %5015 = vmatpush1.bf16.msra.mxu0 %v8525_v10  ;;  %5493 = vmatprep.subr.bf16.mxu1 %v8536_v14  ;;  %v8599_v10 = vld [vmem:[#allocation5 + $0x864] ss:$16 sps:$4 sm:$0xff]   ;;  %v8597_v14 = vld [vmem:[#allocation5 + $0x860] ss:$16 sps:$4 sm:$0xff]  }
 0x1aa   : > { %5016 = vmatprep.subr.bf16.mxu0 %v8533_v13  ;;  %v10286_v13 = vpack.c.bf16 %v494_v9, %v472_v8  ;;  %v493_v8 = vld [vmem:[%s10176_s25 + $0xf0] sm:$0xff] }
 0x1ab   : > { %v8677_v9 = vld [vmem:[#allocation5 + $0xa04] ss:$16 sps:$4 sm:$0xff]  }
 0x1ac   : > { %5494 = vmatpush1.bf16.msra.mxu1 %v8534_v17  ;;  %v8608_v17 = vld [vmem:[#allocation5 + $0x48c] ss:$16 sps:$4 sm:$0xff]  }
 0x1ad   : > { %5017 = vmatpush1.bf16.msra.mxu0 %v8531_v16  ;;  %5495 = vmatprep.subr.bf16.mxu1 %v8542_v19  ;;  %v8605_v16 = vld [vmem:[#allocation5 + $0x884] ss:$16 sps:$4 sm:$0xff]   ;;  %v8606_v19 = vld [vmem:[#allocation5 + $0x488] ss:$16 sps:$4 sm:$0xff]  }
 0x1ae   : > { %5018 = vmatprep.subr.bf16.mxu0 %v8539_v18  ;;  %v8603_v18 = vld [vmem:[#allocation5 + $0x880] ss:$16 sps:$4 sm:$0xff]  }
 0x1b0   : > { %5496 = vmatpush1.bf16.msra.mxu1 %v8540_v21  ;;  %v8614_v21 = vld [vmem:[#allocation5 + $0x4ac] ss:$16 sps:$4 sm:$0xff]  }
 0x1b1   : > { %5019 = vmatpush1.bf16.msra.mxu0 %v8537_v20  ;;  %5497 = vmatprep.subr.bf16.mxu1 %v8548_v23  ;;  %v8611_v20 = vld [vmem:[#allocation5 + $0x8a4] ss:$16 sps:$4 sm:$0xff]  }
 0x1b2   : > { %5020 = vmatprep.subr.bf16.mxu0 %v8545_v22  ;;  %v8612_v22 = vld [vmem:[#allocation5 + $0x4a8] ss:$16 sps:$4 sm:$0xff]   ;;  %v8617_v23 = vld [vmem:[#allocation5 + $0x8c4] ss:$16 sps:$4 sm:$0xff]  }
 0x1b4   : > { %5498 = vmatpush1.bf16.msra.mxu1 %v8546_v25  ;;  %v8615_v25 = vld [vmem:[#allocation5 + $0x8c0] ss:$16 sps:$4 sm:$0xff]  }
 0x1b5   : > { %5021 = vmatpush1.bf16.msra.mxu0 %v8543_v24  ;;  %5499 = vmatprep.subr.bf16.mxu1 %v8554_v27  ;;  %v8620_v24 = vld [vmem:[#allocation5 + $0x4cc] ss:$16 sps:$4 sm:$0xff]  }
 0x1b6   : > { %5022 = vmatprep.subr.bf16.mxu0 %v8551_v26  ;;  %v8623_v26 = vld [vmem:[#allocation5 + $0x8e4] ss:$16 sps:$4 sm:$0xff]   ;;  %v8626_v27 = vld [vmem:[#allocation5 + $0x4ec] ss:$16 sps:$4 sm:$0xff]  }
 0x1b8   : > { %5500 = vmatpush1.bf16.msra.mxu1 %v8552_v29  ;;  %v8624_v29 = vld [vmem:[#allocation5 + $0x4e8] ss:$16 sps:$4 sm:$0xff]  }
 0x1b9   : > { %5023 = vmatpush1.bf16.msra.mxu0 %v8549_v28  ;;  %5501 = vmatprep.subr.bf16.mxu1 %v8560_v31  ;;  %v8621_v28 = vld [vmem:[#allocation5 + $0x8e0] ss:$16 sps:$4 sm:$0xff]   ;;  %v8632_v31 = vld [vmem:[#allocation5 + $0x50c] ss:$16 sps:$4 sm:$0xff]  }
 0x1ba   : > { %5024 = vmatprep.subr.bf16.mxu0 %v8557_v30  ;;  %v8629_v30 = vld [vmem:[#allocation5 + $0x904] ss:$16 sps:$4 sm:$0xff]  }
 0x1bc   : > { %5502 = vmatpush1.bf16.msra.mxu1 %v8558_v33  ;;  %v8630_v33 = vld [vmem:[#allocation5 + $0x508] ss:$16 sps:$4 sm:$0xff]  }
 0x1bd   : > { %5025 = vmatpush1.bf16.msra.mxu0 %v8555_v32  ;;  %5503 = vmatprep.subr.bf16.mxu1 %v8566_v35  ;;  %v8627_v32 = vld [vmem:[#allocation5 + $0x900] ss:$16 sps:$4 sm:$0xff]   ;;  %v8638_v35 = vld [vmem:[#allocation5 + $0x52c] ss:$16 sps:$4 sm:$0xff]  }
 0x1be   : > { %5026 = vmatprep.subr.bf16.mxu0 %v8563_v34  ;;  %v8635_v34 = vld [vmem:[#allocation5 + $0x924] ss:$16 sps:$4 sm:$0xff]  }
 0x1c0   : > { %5504 = vmatpush1.bf16.msra.mxu1 %v8564_v38  ;;  %v8636_v38 = vld [vmem:[#allocation5 + $0x528] ss:$16 sps:$4 sm:$0xff]  }
 0x1c1   : > { %5027 = vmatpush1.bf16.msra.mxu0 %v8561_v37  ;;  %5505 = vmatprep.subr.bf16.mxu1 %v8572_v42  ;;  %v8633_v37 = vld [vmem:[#allocation5 + $0x920] ss:$16 sps:$4 sm:$0xff]   ;;  %v8644_v42 = vld [vmem:[#allocation5 + $0x54c] ss:$16 sps:$4 sm:$0xff]  }
 0x1c2   : > { %5028 = vmatprep.subr.bf16.mxu0 %v8569_v39  ;;  %v8641_v39 = vld [vmem:[#allocation5 + $0x944] ss:$16 sps:$4 sm:$0xff]  }
 0x1c4   : > { %5506 = vmatpush1.bf16.msra.mxu1 %v8570_v45  ;;  %v8642_v45 = vld [vmem:[#allocation5 + $0x548] ss:$16 sps:$4 sm:$0xff]  }
 0x1c5   : > { %5029 = vmatpush1.bf16.msra.mxu0 %v8567_v43  ;;  %5507 = vmatprep.subr.bf16.mxu1 %v8578_v48  ;;  %v8639_v43 = vld [vmem:[#allocation5 + $0x940] ss:$16 sps:$4 sm:$0xff]   ;;  %v8650_v48 = vld [vmem:[#allocation5 + $0x56c] ss:$16 sps:$4 sm:$0xff]  }
 0x1c6   : > { %5030 = vmatprep.subr.bf16.mxu0 %v8575_v47  ;;  %v8647_v47 = vld [vmem:[#allocation5 + $0x964] ss:$16 sps:$4 sm:$0xff]  }
 0x1c8   : > { %5508 = vmatpush1.bf16.msra.mxu1 %v8576_v51  ;;  %v8648_v51 = vld [vmem:[#allocation5 + $0x568] ss:$16 sps:$4 sm:$0xff]  }
 0x1c9   : > { %5031 = vmatpush1.bf16.msra.mxu0 %v8573_v49  ;;  %5530 = vmatprep.subr.bf16.mxu1 %v8584_v57  ;;  %v8645_v49 = vld [vmem:[#allocation5 + $0x960] ss:$16 sps:$4 sm:$0xff]   ;;  %v8654_v57 = vld [vmem:[#allocation5 + $0x588] ss:$16 sps:$4 sm:$0xff]  }
 0x1ca   : > { %5053 = vmatprep.subr.bf16.mxu0 %v8581_v52  ;;  %v8653_v52 = vld [vmem:[#allocation5 + $0x984] ss:$16 sps:$4 sm:$0xff]  }
 0x1cb   : > { %5510 = vmatmul.mubr.bf16.vlgmr.msra.gmra.mrb[8].mxu1 %v10214_v15  ;;  %v8594_v15 = vld [vmem:[#allocation5 + $0x448] ss:$16 sps:$4 sm:$0xff]  }
 0x1cc   : > { %5033 = vmatmul.mubr.bf16.vlgmr.msra.gmra.mrb[0].mxu0 %v10270_v62  ;;  %5531 = vmatpush1.bf16.msra.mxu1 %v8582_v59  ;;  %v8662_v59 = vld [vmem:[#allocation5 + $0x5ac] ss:$16 sps:$4 sm:$0xff]  }
 0x1cd   : > { %5054 = vmatpush1.bf16.msra.mxu0 %v8579_v58  ;;  %5532 = vmatprep.subr.bf16.mxu1 %v8590_v1  ;;  %v8659_v58 = vld [vmem:[#allocation5 + $0x9a4] ss:$16 sps:$4 sm:$0xff]   ;;  %v8668_v1 = vld [vmem:[#allocation5 + $0x5cc] ss:$16 sps:$4 sm:$0xff]  }
 0x1ce   : > { %5055 = vmatprep.subr.bf16.mxu0 %v8587_v0  ;;  %5042 = vmatprep.mubr.bf16.mxu0 %v10274_v2  ;;  %v8665_v0 = vld [vmem:[#allocation5 + $0x9c4] ss:$16 sps:$4 sm:$0xff]  }
 0x1cf   : > { %5519 = vmatprep.mubr.bf16.mxu1 %v10228_v46  ;;  %v8600_v46 = vld [vmem:[#allocation5 + $0x468] ss:$16 sps:$4 sm:$0xff]  }
 0x1d0   : > { %5533 = vmatpush1.bf16.msra.mxu1 %v8588_v3  ;;  %v8666_v3 = vld [vmem:[#allocation5 + $0x5c8] ss:$16 sps:$4 sm:$0xff]  }
 0x1d1   : > { %5056 = vmatpush1.bf16.msra.mxu0 %v8585_v50  ;;  %5534 = vmatprep.subr.bf16.mxu1 %v8596_v6  ;;  %v8663_v50 = vld [vmem:[#allocation5 + $0x9c0] ss:$16 sps:$4 sm:$0xff]   ;;  %v8672_v6 = vld [vmem:[#allocation5 + $0x5e8] ss:$16 sps:$4 sm:$0xff]  }
 0x1d2   : > { %5057 = vmatprep.subr.bf16.mxu0 %v8593_v5  ;;  %v8669_v5 = vld [vmem:[#allocation5 + $0x9e0] ss:$16 sps:$4 sm:$0xff]  }
 0x1d3   : > { %5520 = vmatmul.mubr.bf16.gmra.mrb[12].mxu1 %v10235_v53  ;;  %v8609_v53 = vld [vmem:[#allocation5 + $0x8a0] ss:$16 sps:$4 sm:$0xff]  }
 0x1d4   : > { %5043 = vmatmul.mubr.bf16.gmra.mrb[4].mxu0 %v10283_v55  ;;  %5535 = vmatpush1.bf16.msra.mxu1 %v8594_v15  ;;  %v8680_v15 = vld [vmem:[#allocation5 + $0x60c] ss:$16 sps:$4 sm:$0xff]  }
 0x1d5   : > { %5058 = vmatpush1.bf16.msra.mxu0 %v8591_v7  ;;  %5536 = vmatprep.subr.bf16.mxu1 %v8602_v11  ;;  %v471_v7 = vld [vmem:[%s10176_s25 + $0x40] sm:$0xff]  ;;  %v516_v11 = vld [vmem:[%s10176_s25 + $0x1a8] sm:$0xff] }
 0x1d6   : > { %5059 = vmatprep.subr.bf16.mxu0 %v8599_v10  ;;  %5085 = vmatprep.mubr.bf16.mxu0 %v10286_v13  ;;  %v8675_v10 = vld [vmem:[#allocation5 + $0xa00] ss:$16 sps:$4 sm:$0xff]  }
 0x1d7   : > { %5562 = vmatprep.mubr.bf16.mxu1 %v10241_v60  ;;  %v8618_v60 = vld [vmem:[#allocation5 + $0x4c8] ss:$16 sps:$4 sm:$0xff]  }
 0x1d8   : > { %5537 = vmatpush1.bf16.msra.mxu1 %v8600_v46  ;;  %v538_v46 = vld [vmem:[%s10176_s25 + $0x258] sm:$0xff] }
 0x1d9   : > { %5060 = vmatpush1.bf16.msra.mxu0 %v8597_v14  ;;  %5538 = vmatprep.subr.bf16.mxu1 %v8608_v17  ;;  %v10295_v14 = vpack.c.bf16 %v493_v8, %v471_v7  ;;  %v8683_v17 = vld [vmem:[#allocation5 + $0xa24] ss:$16 sps:$4 sm:$0xff]   ;;  %v8746_v8 = vld [vmem:[#allocation5 + $0x76c] ss:$16 sps:$4 sm:$0xff]  }
 0x1da   : > { %5061 = vmatprep.subr.bf16.mxu0 %v8605_v16  ;;  %v8678_v16 = vld [vmem:[#allocation5 + $0x608] ss:$16 sps:$4 sm:$0xff]   ;;  %v8743_v7 = vld [vmem:[#allocation5 + $0xb64] ss:$16 sps:$4 sm:$0xff]  }
 0x1dc   : > { %5539 = vmatpush1.bf16.msra.mxu1 %v8606_v19  ;;  %v8681_v19 = vld [vmem:[#allocation5 + $0xa20] ss:$16 sps:$4 sm:$0xff]  }
 0x1dd   : > { %5062 = vmatpush1.bf16.msra.mxu0 %v8603_v18  ;;  %5540 = vmatprep.subr.bf16.mxu1 %v8614_v21  ;;  %v8686_v18 = vld [vmem:[#allocation5 + $0x62c] ss:$16 sps:$4 sm:$0xff]   ;;  %v10298_v21 = vpack.c.bf16 %v538_v46, %v516_v11  ;;  %v8744_v11 = vld [vmem:[#allocation5 + $0x768] ss:$16 sps:$4 sm:$0xff]  }
 0x1de   : > { %5063 = vmatprep.subr.bf16.mxu0 %v8611_v20  ;;  %v8684_v20 = vld [vmem:[#allocation5 + $0x628] ss:$16 sps:$4 sm:$0xff]  }
 0x1e0   : > { %5541 = vmatpush1.bf16.msra.mxu1 %v8612_v22  ;;  %v537_v22 = vld [vmem:[%s10176_s25 + $0x250] sm:$0xff] }
 0x1e1   : > { %5064 = vmatpush1.bf16.msra.mxu0 %v8609_v53  ;;  %5542 = vmatprep.subr.bf16.mxu1 %v8620_v24  ;;  %v515_v53 = vld [vmem:[%s10176_s25 + $0x1a0] sm:$0xff]  ;;  %v8692_v24 = vld [vmem:[#allocation5 + $0x64c] ss:$16 sps:$4 sm:$0xff]  }
 0x1e2   : > { %5065 = vmatprep.subr.bf16.mxu0 %v8617_v23  ;;  %v8689_v23 = vld [vmem:[#allocation5 + $0xa44] ss:$16 sps:$4 sm:$0xff]  }
 0x1e4   : > { %5543 = vmatpush1.bf16.msra.mxu1 %v8618_v60  ;;  %v474_v60 = vld [vmem:[%s10176_s25 + $0x58] sm:$0xff] }
 0x1e5   : > { %5066 = vmatpush1.bf16.msra.mxu0 %v8615_v25  ;;  %5544 = vmatprep.subr.bf16.mxu1 %v8626_v27  ;;  %v8687_v25 = vld [vmem:[#allocation5 + $0xa40] ss:$16 sps:$4 sm:$0xff]   ;;  %v496_v27 = vld [vmem:[%s10176_s25 + $0x108] sm:$0xff] }
 0x1e6   : > { %5067 = vmatprep.subr.bf16.mxu0 %v8623_v26  ;;  %v10307_v26 = vpack.c.bf16 %v537_v22, %v515_v53  ;;  %v8755_v53 = vld [vmem:[#allocation5 + $0xba4] ss:$16 sps:$4 sm:$0xff]   ;;  %v8758_v22 = vld [vmem:[#allocation5 + $0x7ac] ss:$16 sps:$4 sm:$0xff]  }
 0x1e8   : > { %5545 = vmatpush1.bf16.msra.mxu1 %v8624_v29  ;;  %v8698_v29 = vld [vmem:[#allocation5 + $0x66c] ss:$16 sps:$4 sm:$0xff]  }
 0x1e9   : > { %5068 = vmatpush1.bf16.msra.mxu0 %v8621_v28  ;;  %5546 = vmatprep.subr.bf16.mxu1 %v8632_v31  ;;  %v8695_v28 = vld [vmem:[#allocation5 + $0xa64] ss:$16 sps:$4 sm:$0xff]   ;;  %v8696_v31 = vld [vmem:[#allocation5 + $0x668] ss:$16 sps:$4 sm:$0xff]  }
 0x1ea   : > { %5069 = vmatprep.subr.bf16.mxu0 %v8629_v30  ;;  %v10310_v30 = vpack.c.bf16 %v496_v27, %v474_v60  ;;  %v8764_v60 = vld [vmem:[#allocation5 + $0x7cc] ss:$16 sps:$4 sm:$0xff]   ;;  %v8759_v27 = vld [vmem:[#allocation5 + $0xbc0] ss:$16 sps:$4 sm:$0xff]  }
 0x1ec   : > { %5547 = vmatpush1.bf16.msra.mxu1 %v8630_v33  ;;  %v8704_v33 = vld [vmem:[#allocation5 + $0x68c] ss:$16 sps:$4 sm:$0xff]  }
 0x1ed   : > { %5070 = vmatpush1.bf16.msra.mxu0 %v8627_v32  ;;  %5548 = vmatprep.subr.bf16.mxu1 %v8638_v35  ;;  %v8701_v32 = vld [vmem:[#allocation5 + $0xa84] ss:$16 sps:$4 sm:$0xff]   ;;  %v8702_v35 = vld [vmem:[#allocation5 + $0x688] ss:$16 sps:$4 sm:$0xff]  }
 0x1ee   : > { %5071 = vmatprep.subr.bf16.mxu0 %v8635_v34  ;;  %v8699_v34 = vld [vmem:[#allocation5 + $0xa80] ss:$16 sps:$4 sm:$0xff]  }
 0x1f0   : > { %5549 = vmatpush1.bf16.msra.mxu1 %v8636_v38  ;;  %v8705_v38 = vld [vmem:[#allocation5 + $0xaa0] ss:$16 sps:$4 sm:$0xff]  }
 0x1f1   : > { %5072 = vmatpush1.bf16.msra.mxu0 %v8633_v37  ;;  %5550 = vmatprep.subr.bf16.mxu1 %v8644_v42  ;;  %v8707_v37 = vld [vmem:[#allocation5 + $0xaa4] ss:$16 sps:$4 sm:$0xff]  }
 0x1f2   : > { %5073 = vmatprep.subr.bf16.mxu0 %v8641_v39  ;;  %v8708_v39 = vld [vmem:[#allocation5 + $0x6a8] ss:$16 sps:$4 sm:$0xff]   ;;  %v8713_v42 = vld [vmem:[#allocation5 + $0xac4] ss:$16 sps:$4 sm:$0xff]  }
 0x1f4   : > { %5551 = vmatpush1.bf16.msra.mxu1 %v8642_v45 }
 0x1f5   : > { %5074 = vmatpush1.bf16.msra.mxu0 %v8639_v43  ;;  %5552 = vmatprep.subr.bf16.mxu1 %v8650_v48  ;;  %v8716_v43 = vld [vmem:[#allocation5 + $0x6cc] ss:$16 sps:$4 sm:$0xff]  }
 0x1f6   : > { %5075 = vmatprep.subr.bf16.mxu0 %v8647_v47 }
 0x1f8   : > { %5553 = vmatpush1.bf16.msra.mxu1 %v8648_v51 }
 0x1f9   : > { %5076 = vmatpush1.bf16.msra.mxu0 %v8645_v49  ;;  %5554 = vmatprep.subr.bf16.mxu1 %v8656_v54  ;;  %v8714_v49 = vld [vmem:[#allocation5 + $0x6c8] ss:$16 sps:$4 sm:$0xff]   ;;  %v8722_v54 = vld [vmem:[#allocation5 + $0x6ec] ss:$16 sps:$4 sm:$0xff]  }
 0x1fa   : > { %5077 = vmatprep.subr.bf16.mxu0 %v8653_v52  ;;  %v8719_v52 = vld [vmem:[#allocation5 + $0xae4] ss:$16 sps:$4 sm:$0xff]  }
 0x1fc   : > { %5555 = vmatpush1.bf16.msra.mxu1 %v8654_v57  ;;  %v8720_v57 = vld [vmem:[#allocation5 + $0x6e8] ss:$16 sps:$4 sm:$0xff]  }
 0x1fd   : > { %5078 = vmatpush1.bf16.msra.mxu0 %v8651_v12  ;;  %5556 = vmatprep.subr.bf16.mxu1 %v8662_v59  ;;  %v8717_v12 = vld [vmem:[#allocation5 + $0xae0] ss:$16 sps:$4 sm:$0xff]   ;;  %v8728_v59 = vld [vmem:[#allocation5 + $0x70c] ss:$16 sps:$4 sm:$0xff]  }
 0x1fe   : > { %5079 = vmatprep.subr.bf16.mxu0 %v8659_v58  ;;  %v8725_v58 = vld [vmem:[#allocation5 + $0xb04] ss:$16 sps:$4 sm:$0xff]  }
 0x200   : > { %5557 = vmatpush1.bf16.msra.mxu1 %v8660_v40  ;;  %v8726_v40 = vld [vmem:[#allocation5 + $0x708] ss:$16 sps:$4 sm:$0xff]  }
 0x201   : > { %5080 = vmatpush1.bf16.msra.mxu0 %v8657_v63  ;;  %5558 = vmatprep.subr.bf16.mxu1 %v8668_v1  ;;  %v8723_v63 = vld [vmem:[#allocation5 + $0xb00] ss:$16 sps:$4 sm:$0xff]   ;;  %v8734_v1 = vld [vmem:[#allocation5 + $0x72c] ss:$16 sps:$4 sm:$0xff]  }
 0x202   : > { %5081 = vmatprep.subr.bf16.mxu0 %v8665_v0  ;;  %v8731_v0 = vld [vmem:[#allocation5 + $0xb24] ss:$16 sps:$4 sm:$0xff]  }
 0x204   : > { %5559 = vmatpush1.bf16.msra.mxu1 %v8666_v3  ;;  %v8732_v3 = vld [vmem:[#allocation5 + $0x728] ss:$16 sps:$4 sm:$0xff]  }
 0x205   : > { %5082 = vmatpush1.bf16.msra.mxu0 %v8663_v50  ;;  %5560 = vmatprep.subr.bf16.mxu1 %v8674_v41  ;;  %v8729_v50 = vld [vmem:[#allocation5 + $0xb20] ss:$16 sps:$4 sm:$0xff]   ;;  %v8740_v41 = vld [vmem:[#allocation5 + $0x74c] ss:$16 sps:$4 sm:$0xff]  }
 0x206   : > { %5083 = vmatprep.subr.bf16.mxu0 %v8671_v4  ;;  %v8737_v4 = vld [vmem:[#allocation5 + $0xb44] ss:$16 sps:$4 sm:$0xff]  }
 0x208   : > { %5561 = vmatpush1.bf16.msra.mxu1 %v8672_v6  ;;  %v8738_v6 = vld [vmem:[#allocation5 + $0x748] ss:$16 sps:$4 sm:$0xff]  }
 0x209   : > { %5084 = vmatpush1.bf16.msra.mxu0 %v8669_v5  ;;  %5583 = vmatprep.subr.bf16.mxu1 %v8680_v15  ;;  %v8735_v5 = vld [vmem:[#allocation5 + $0xb40] ss:$16 sps:$4 sm:$0xff]  }
 0x20a   : > { %5106 = vmatprep.subr.bf16.mxu0 %v8677_v9  ;;  %v8741_v15 = vld [vmem:[#allocation5 + $0xb60] ss:$16 sps:$4 sm:$0xff]  }
 0x20b   : > { %5563 = vmatmul.mubr.bf16.vlgmr.msra.gmra.mrb[8].mxu1 %v10246_v36  ;;  %v8690_v36 = vld [vmem:[#allocation5 + $0x648] ss:$16 sps:$4 sm:$0xff]  }
 0x20c   : > { %5086 = vmatmul.mubr.bf16.vlgmr.msra.gmra.mrb[0].mxu0 %v10295_v14  ;;  %5584 = vmatpush1.bf16.msra.mxu1 %v8678_v16  ;;  %v8749_v16 = vld [vmem:[#allocation5 + $0xb84] ss:$16 sps:$4 sm:$0xff]  }
 0x20d   : > { %5107 = vmatpush1.bf16.msra.mxu0 %v8675_v10  ;;  %5585 = vmatprep.subr.bf16.mxu1 %v8686_v18 }
 0x20e   : > { %5108 = vmatprep.subr.bf16.mxu0 %v8683_v17  ;;  %5095 = vmatprep.mubr.bf16.mxu0 %v10298_v21  ;;  %v8752_v17 = vld [vmem:[#allocation5 + $0x78c] ss:$16 sps:$4 sm:$0xff]  }
 0x20f   : > { %5572 = vmatprep.mubr.bf16.mxu1 %v10250_v44  ;;  %v8693_v44 = vld [vmem:[#allocation5 + $0xa60] ss:$16 sps:$4 sm:$0xff]  }
 0x210   : > { %5586 = vmatpush1.bf16.msra.mxu1 %v8684_v20  ;;  %v8750_v20 = vld [vmem:[#allocation5 + $0x788] ss:$16 sps:$4 sm:$0xff]  }
 0x211   : > { %5109 = vmatpush1.bf16.msra.mxu0 %v8681_v19  ;;  %5587 = vmatprep.subr.bf16.mxu1 %v8692_v24  ;;  %v8747_v19 = vld [vmem:[#allocation5 + $0xb80] ss:$16 sps:$4 sm:$0xff]   ;;  %v8756_v24 = vld [vmem:[#allocation5 + $0x7a8] ss:$16 sps:$4 sm:$0xff]  }
 0x212   : > { %5110 = vmatprep.subr.bf16.mxu0 %v8689_v23  ;;  %v8753_v23 = vld [vmem:[#allocation5 + $0xba0] ss:$16 sps:$4 sm:$0xff]  }
 0x213   : > { %5573 = vmatmul.mubr.bf16.gmra.mrb[12].mxu1 %v10258_v56  ;;  %v8710_v56 = vld [vmem:[#allocation5 + $0x6ac] ss:$16 sps:$4 sm:$0xff]  }
 0x214   : > { %5096 = vmatmul.mubr.bf16.gmra.mrb[4].mxu0 %v10307_v26  ;;  %5588 = vmatpush1.bf16.msra.mxu1 %v8690_v36  ;;  %v8762_v36 = vld [vmem:[#allocation5 + $0x7c8] ss:$16 sps:$4 sm:$0xff]  }
 0x215   : > { %5111 = vmatpush1.bf16.msra.mxu0 %v8687_v25  ;;  %5589 = vmatprep.subr.bf16.mxu1 %v8698_v29  ;;  %v8761_v25 = vld [vmem:[#allocation5 + $0xbc4] ss:$16 sps:$4 sm:$0xff]   ;;  %v8770_v29 = vld [vmem:[#allocation5 + $0x7ec] ss:$16 sps:$4 sm:$0xff]  }
 0x216   : > { %5112 = vmatprep.subr.bf16.mxu0 %v8695_v28  ;;  %5138 = vmatprep.mubr.bf16.mxu0 %v10310_v30  ;;  %v8767_v28 = vld [vmem:[#allocation5 + $0xbe4] ss:$16 sps:$4 sm:$0xff]  }
 0x217   : > { %5615 = vmatprep.mubr.bf16.mxu1 %v10262_v61  ;;  %v8711_v61 = vld [vmem:[#allocation5 + $0xac0] ss:$16 sps:$4 sm:$0xff]  }
 0x218   : > { %5590 = vmatpush1.bf16.msra.mxu1 %v8696_v31  ;;  %v8768_v31 = vld [vmem:[#allocation5 + $0x7e8] ss:$16 sps:$4 sm:$0xff]  }
 0x219   : > { %5113 = vmatpush1.bf16.msra.mxu0 %v8693_v44  ;;  %5591 = vmatprep.subr.bf16.mxu1 %v8704_v33  ;;  %v8765_v44 = vld [vmem:[#allocation5 + $0xbe0] ss:$16 sps:$4 sm:$0xff]   ;;  %v8776_v33 = vld [vmem:[#allocation5 + $0x80c] ss:$16 sps:$4 sm:$0xff]  }
 0x21a   : > { %5114 = vmatprep.subr.bf16.mxu0 %v8701_v32  ;;  %v8773_v32 = vld [vmem:[#allocation5 + $0xc04] ss:$16 sps:$4 sm:$0xff]  }
 0x21c   : > { %5592 = vmatpush1.bf16.msra.mxu1 %v8702_v35  ;;  %v495_v35 = vld [vmem:[%s10176_s25 + $0x100] sm:$0xff] }
 0x21d   : > { %5115 = vmatpush1.bf16.msra.mxu0 %v8699_v34  ;;  %5593 = vmatprep.subr.bf16.mxu1 %v8710_v56  ;;  %v473_v34 = vld [vmem:[%s10176_s25 + $0x50] sm:$0xff]  ;;  %v540_v56 = vld [vmem:[%s10176_s25 + $0x268] sm:$0xff] }
 0x21e   : > { %5116 = vmatprep.subr.bf16.mxu0 %v8707_v37  ;;  %v10316_v45 = vpop.f32.mrb[0].mxu1  ;;  %v518_v37 = vld [vmem:[%s10176_s25 + $0x1b8] sm:$0xff] }
 0x21f   : > { %v10318_v47 = vpop.f32.mrb[1].mxu1 }
 0x220   : > { %v10320_v48 = vpop.f32.mrb[2].mxu1  ;;  %5594 = vmatpush1.bf16.msra.mxu1 %v8708_v39  ;;  %v8771_v39 = vld [vmem:[#allocation5 + $0xc00] ss:$16 sps:$4 sm:$0xff]  }
 0x221   : > { %5117 = vmatpush1.bf16.msra.mxu0 %v8705_v38  ;;  %v10322_v51 = vpop.f32.mrb[3].mxu1  ;;  %5595 = vmatprep.subr.bf16.mxu1 %v8716_v43  ;;  %v10336_v38 = vpack.c.bf16 %v495_v35, %v473_v34  ;;  %v8779_v43 = vld [vmem:[#allocation5 + $0xc24] ss:$16 sps:$4 sm:$0xff]   ;;  %v8831_v34 = vld [vmem:[#allocation5 + $0xd40] ss:$16 sps:$4 sm:$0xff]  }
 0x222   : > { %5118 = vmatprep.subr.bf16.mxu0 %v8713_v42  ;;  %v8774_v42 = vld [vmem:[#allocation5 + $0x808] ss:$16 sps:$4 sm:$0xff]  }
 0x223   : > { %v8834_v35 = vld [vmem:[#allocation5 + $0x948] ss:$16 sps:$4 sm:$0xff]  }
 0x224   : > { %5596 = vmatpush1.bf16.msra.mxu1 %v8714_v49  ;;  %v8777_v49 = vld [vmem:[#allocation5 + $0xc20] ss:$16 sps:$4 sm:$0xff]  }
 0x225   : > { %5119 = vmatpush1.bf16.msra.mxu0 %v8711_v61  ;;  %5597 = vmatprep.subr.bf16.mxu1 %v8722_v54  ;;  %v8782_v61 = vld [vmem:[#allocation5 + $0x82c] ss:$16 sps:$4 sm:$0xff]   ;;  %v10338_v54 = vpack.c.bf16 %v540_v56, %v518_v37  ;;  %v8839_v37 = vld [vmem:[#allocation5 + $0xd64] ss:$16 sps:$4 sm:$0xff]  }
 0x226   : > { %5120 = vmatprep.subr.bf16.mxu0 %v8719_v52  ;;  %v10324_v9 = vpop.f32.mrb[4].mxu1  ;;  %v8780_v52 = vld [vmem:[#allocation5 + $0x828] ss:$16 sps:$4 sm:$0xff]   ;;  %v8842_v56 = vld [vmem:[#allocation5 + $0x96c] ss:$16 sps:$4 sm:$0xff]  }
 0x227   : > { %v10326_v10 = vpop.f32.mrb[5].mxu1 }
 0x228   : > { %5598 = vmatpush1.bf16.msra.mxu1 %v8720_v57  ;;  %v10328_v46 = vpop.f32.mrb[6].mxu1  ;;  %v8788_v57 = vld [vmem:[#allocation5 + $0x84c] ss:$16 sps:$4 sm:$0xff]  }
 0x229   : > { %5121 = vmatpush1.bf16.msra.mxu0 %v8717_v12  ;;  %5599 = vmatprep.subr.bf16.mxu1 %v8728_v59  ;;  %v10330_v18 = vpop.f32.mrb[7].mxu1  ;;  %v8785_v12 = vld [vmem:[#allocation5 + $0xc44] ss:$16 sps:$4 sm:$0xff]  }
 0x22a   : > { %5122 = vmatprep.subr.bf16.mxu0 %v8725_v58  ;;  %v517_v58 = vld [vmem:[%s10176_s25 + $0x1b0] sm:$0xff]  ;;  %v539_v59 = vld [vmem:[%s10176_s25 + $0x260] sm:$0xff] }
 0x22c   : > { %5600 = vmatpush1.bf16.msra.mxu1 %v8726_v40  ;;  %v498_v40 = vld [vmem:[%s10176_s25 + $0x118] sm:$0xff] }
 0x22d   : > { %5123 = vmatpush1.bf16.msra.mxu0 %v8723_v63  ;;  %5601 = vmatprep.subr.bf16.mxu1 %v8734_v1  ;;  %v476_v63 = vld [vmem:[%s10176_s25 + $0x68] sm:$0xff]  ;;  %v8783_v1 = vld [vmem:[#allocation5 + $0xc40] ss:$16 sps:$4 sm:$0xff]  }
 0x22e   : > { %5124 = vmatprep.subr.bf16.mxu0 %v8731_v0  ;;  %v10348_v0 = vpack.c.bf16 %v539_v59, %v517_v58  ;;  %v8849_v58 = vld [vmem:[#allocation5 + $0xda0] ss:$16 sps:$4 sm:$0xff]   ;;  %v8852_v59 = vld [vmem:[#allocation5 + $0x9a8] ss:$16 sps:$4 sm:$0xff]  }
 0x230   : > { %5602 = vmatpush1.bf16.msra.mxu1 %v8732_v3  ;;  %v8794_v3 = vld [vmem:[#allocation5 + $0x86c] ss:$16 sps:$4 sm:$0xff]  }
 0x231   : > { %5125 = vmatpush1.bf16.msra.mxu0 %v8729_v50  ;;  %5603 = vmatprep.subr.bf16.mxu1 %v8740_v41  ;;  %v8791_v50 = vld [vmem:[#allocation5 + $0xc64] ss:$16 sps:$4 sm:$0xff]   ;;  %v8789_v41 = vld [vmem:[#allocation5 + $0xc60] ss:$16 sps:$4 sm:$0xff]  }
 0x232   : > { %5126 = vmatprep.subr.bf16.mxu0 %v8737_v4  ;;  %v10350_v4 = vpack.c.bf16 %v498_v40, %v476_v63  ;;  %v8857_v63 = vld [vmem:[#allocation5 + $0xdc4] ss:$16 sps:$4 sm:$0xff]   ;;  %v8860_v40 = vld [vmem:[#allocation5 + $0x9cc] ss:$16 sps:$4 sm:$0xff]  }
 0x234   : > { %5604 = vmatpush1.bf16.msra.mxu1 %v8738_v6  ;;  %v8800_v6 = vld [vmem:[#allocation5 + $0x88c] ss:$16 sps:$4 sm:$0xff]  }
 0x235   : > { %5127 = vmatpush1.bf16.msra.mxu0 %v8735_v5  ;;  %5605 = vmatprep.subr.bf16.mxu1 %v8746_v8  ;;  %v8797_v5 = vld [vmem:[#allocation5 + $0xc84] ss:$16 sps:$4 sm:$0xff]   ;;  %v8798_v8 = vld [vmem:[#allocation5 + $0x888] ss:$16 sps:$4 sm:$0xff]  }
 0x236   : > { %5128 = vmatprep.subr.bf16.mxu0 %v8743_v7  ;;  %v8795_v7 = vld [vmem:[#allocation5 + $0xc80] ss:$16 sps:$4 sm:$0xff]  }
 0x238   : > { %5606 = vmatpush1.bf16.msra.mxu1 %v8744_v11  ;;  %v8801_v11 = vld [vmem:[#allocation5 + $0xca0] ss:$16 sps:$4 sm:$0xff]  }
 0x239   : > { %5129 = vmatpush1.bf16.msra.mxu0 %v8741_v15  ;;  %5607 = vmatprep.subr.bf16.mxu1 %v8752_v17  ;;  %v8803_v15 = vld [vmem:[#allocation5 + $0xca4] ss:$16 sps:$4 sm:$0xff]  }
 0x23a   : > { %5130 = vmatprep.subr.bf16.mxu0 %v8749_v16  ;;  %v8804_v16 = vld [vmem:[#allocation5 + $0x8a8] ss:$16 sps:$4 sm:$0xff]   ;;  %v8809_v17 = vld [vmem:[#allocation5 + $0xcc4] ss:$16 sps:$4 sm:$0xff]  }
 0x23c   : > { %5608 = vmatpush1.bf16.msra.mxu1 %v8750_v20  ;;  %v8807_v20 = vld [vmem:[#allocation5 + $0xcc0] ss:$16 sps:$4 sm:$0xff]  }
 0x23d   : > { %5131 = vmatpush1.bf16.msra.mxu0 %v8747_v19  ;;  %5609 = vmatprep.subr.bf16.mxu1 %v8758_v22  ;;  %v8812_v19 = vld [vmem:[#allocation5 + $0x8cc] ss:$16 sps:$4 sm:$0xff]  }
 0x23e   : > { %5132 = vmatprep.subr.bf16.mxu0 %v8755_v53  ;;  %v8815_v53 = vld [vmem:[#allocation5 + $0xce4] ss:$16 sps:$4 sm:$0xff]   ;;  %v8818_v22 = vld [vmem:[#allocation5 + $0x8ec] ss:$16 sps:$4 sm:$0xff]  }
 0x240   : > { %5610 = vmatpush1.bf16.msra.mxu1 %v8756_v24  ;;  %v8816_v24 = vld [vmem:[#allocation5 + $0x8e8] ss:$16 sps:$4 sm:$0xff]  }
 0x241   : > { %5133 = vmatpush1.bf16.msra.mxu0 %v8753_v23  ;;  %5611 = vmatprep.subr.bf16.mxu1 %v8764_v60  ;;  %v8813_v23 = vld [vmem:[#allocation5 + $0xce0] ss:$16 sps:$4 sm:$0xff]   ;;  %v8824_v60 = vld [vmem:[#allocation5 + $0x90c] ss:$16 sps:$4 sm:$0xff]  }
 0x242   : > { %5134 = vmatprep.subr.bf16.mxu0 %v8761_v25  ;;  %v8821_v25 = vld [vmem:[#allocation5 + $0xd04] ss:$16 sps:$4 sm:$0xff]  }
 0x244   : > { %5612 = vmatpush1.bf16.msra.mxu1 %v8762_v36  ;;  %v8822_v36 = vld [vmem:[#allocation5 + $0x908] ss:$16 sps:$4 sm:$0xff]  }
 0x245   : > { %5135 = vmatpush1.bf16.msra.mxu0 %v8759_v27  ;;  %5613 = vmatprep.subr.bf16.mxu1 %v8770_v29  ;;  %v8819_v27 = vld [vmem:[#allocation5 + $0xd00] ss:$16 sps:$4 sm:$0xff]   ;;  %v8830_v29 = vld [vmem:[#allocation5 + $0x92c] ss:$16 sps:$4 sm:$0xff]  }
 0x246   : > { %5136 = vmatprep.subr.bf16.mxu0 %v8767_v28  ;;  %v8827_v28 = vld [vmem:[#allocation5 + $0xd24] ss:$16 sps:$4 sm:$0xff]  }
 0x248   : > { %5614 = vmatpush1.bf16.msra.mxu1 %v8768_v31  ;;  %v8828_v31 = vld [vmem:[#allocation5 + $0x928] ss:$16 sps:$4 sm:$0xff]  }
 0x249   : > { %5137 = vmatpush1.bf16.msra.mxu0 %v8765_v44  ;;  %5636 = vmatprep.subr.bf16.mxu1 %v8776_v33  ;;  %v8825_v44 = vld [vmem:[#allocation5 + $0xd20] ss:$16 sps:$4 sm:$0xff]   ;;  %v8836_v33 = vld [vmem:[#allocation5 + $0x94c] ss:$16 sps:$4 sm:$0xff]  }
 0x24a   : > { %5159 = vmatprep.subr.bf16.mxu0 %v8773_v32  ;;  %v8833_v32 = vld [vmem:[#allocation5 + $0xd44] ss:$16 sps:$4 sm:$0xff]  }
 0x24b   : > { %5616 = vmatmul.mubr.bf16.vlgmr.msra.gmra.mrb[8].mxu1 %v10270_v62  ;;  %v8786_v62 = vld [vmem:[#allocation5 + $0x848] ss:$16 sps:$4 sm:$0xff]  }
 0x24c   : > { %5139 = vmatmul.mubr.bf16.vlgmr.msra.gmra.mrb[0].mxu0 %v10336_v38  ;;  %5637 = vmatpush1.bf16.msra.mxu1 %v8774_v42  ;;  %v8840_v42 = vld [vmem:[#allocation5 + $0x968] ss:$16 sps:$4 sm:$0xff]  }
 0x24d   : > { %5160 = vmatpush1.bf16.msra.mxu0 %v8771_v39  ;;  %5638 = vmatprep.subr.bf16.mxu1 %v8782_v61  ;;  %v8837_v39 = vld [vmem:[#allocation5 + $0xd60] ss:$16 sps:$4 sm:$0xff]   ;;  %v8848_v61 = vld [vmem:[#allocation5 + $0x98c] ss:$16 sps:$4 sm:$0xff]  }
 0x24e   : > { %5161 = vmatprep.subr.bf16.mxu0 %v8779_v43  ;;  %5148 = vmatprep.mubr.bf16.mxu0 %v10338_v54  ;;  %v8845_v43 = vld [vmem:[#allocation5 + $0xd84] ss:$16 sps:$4 sm:$0xff]  }
 0x24f   : > { %5625 = vmatprep.mubr.bf16.mxu1 %v10274_v2  ;;  %v8792_v2 = vld [vmem:[#allocation5 + $0x868] ss:$16 sps:$4 sm:$0xff]  }
 0x250   : > { %5639 = vmatpush1.bf16.msra.mxu1 %v8780_v52  ;;  %v8846_v52 = vld [vmem:[#allocation5 + $0x988] ss:$16 sps:$4 sm:$0xff]  }
 0x251   : > { %5162 = vmatpush1.bf16.msra.mxu0 %v8777_v49  ;;  %5640 = vmatprep.subr.bf16.mxu1 %v8788_v57  ;;  %v8843_v49 = vld [vmem:[#allocation5 + $0xd80] ss:$16 sps:$4 sm:$0xff]   ;;  %v8854_v57 = vld [vmem:[#allocation5 + $0x9ac] ss:$16 sps:$4 sm:$0xff]  }
 0x252   : > { %5163 = vmatprep.subr.bf16.mxu0 %v8785_v12  ;;  %v8851_v12 = vld [vmem:[#allocation5 + $0xda4] ss:$16 sps:$4 sm:$0xff]  }
 0x253   : > { %5626 = vmatmul.mubr.bf16.gmra.mrb[12].mxu1 %v10283_v55  ;;  %v8806_v55 = vld [vmem:[#allocation5 + $0x8ac] ss:$16 sps:$4 sm:$0xff]  }
 0x254   : > { %5149 = vmatmul.mubr.bf16.gmra.mrb[4].mxu0 %v10348_v0  ;;  %5641 = vmatpush1.bf16.msra.mxu1 %v8786_v62  ;;  %v8858_v62 = vld [vmem:[#allocation5 + $0x9c8] ss:$16 sps:$4 sm:$0xff]  }
 0x255   : > { %5164 = vmatpush1.bf16.msra.mxu0 %v8783_v1  ;;  %5642 = vmatprep.subr.bf16.mxu1 %v8794_v3  ;;  %v8855_v1 = vld [vmem:[#allocation5 + $0xdc0] ss:$16 sps:$4 sm:$0xff]   ;;  %v8866_v3 = vld [vmem:[#allocation5 + $0x9ec] ss:$16 sps:$4 sm:$0xff]  }
 0x256   : > { %5165 = vmatprep.subr.bf16.mxu0 %v8791_v50  ;;  %5191 = vmatprep.mubr.bf16.mxu0 %v10350_v4  ;;  %v8863_v50 = vld [vmem:[#allocation5 + $0xde4] ss:$16 sps:$4 sm:$0xff]  }
 0x257   : > { %5668 = vmatprep.mubr.bf16.mxu1 %v10286_v13  ;;  %v8810_v13 = vld [vmem:[#allocation5 + $0x8c8] ss:$16 sps:$4 sm:$0xff]  }
 0x258   : > { %5643 = vmatpush1.bf16.msra.mxu1 %v8792_v2  ;;  %v8864_v2 = vld [vmem:[#allocation5 + $0x9e8] ss:$16 sps:$4 sm:$0xff]  }
 0x259   : > { %5166 = vmatpush1.bf16.msra.mxu0 %v8789_v41  ;;  %5644 = vmatprep.subr.bf16.mxu1 %v8800_v6  ;;  %v8861_v41 = vld [vmem:[#allocation5 + $0xde0] ss:$16 sps:$4 sm:$0xff]   ;;  %v8872_v6 = vld [vmem:[#allocation5 + $0xa0c] ss:$16 sps:$4 sm:$0xff]  }
 0x25a   : > { %5167 = vmatprep.subr.bf16.mxu0 %v8797_v5  ;;  %v8869_v5 = vld [vmem:[#allocation5 + $0xe04] ss:$16 sps:$4 sm:$0xff]  }
 0x25c   : > { %5645 = vmatpush1.bf16.msra.mxu1 %v8798_v8  ;;  %v497_v8 = vld [vmem:[%s10176_s25 + $0x110] sm:$0xff] }
 0x25d   : > { %5168 = vmatpush1.bf16.msra.mxu0 %v8795_v7  ;;  %5646 = vmatprep.subr.bf16.mxu1 %v8806_v55  ;;  %v475_v7 = vld [vmem:[%s10176_s25 + $0x60] sm:$0xff]  ;;  %v542_v55 = vld [vmem:[%s10176_s25 + $0x278] sm:$0xff] }
 0x25e   : > { %5169 = vmatprep.subr.bf16.mxu0 %v8803_v15  ;;  %v520_v15 = vld [vmem:[%s10176_s25 + $0x1c8] sm:$0xff] }
 0x260   : > { %5647 = vmatpush1.bf16.msra.mxu1 %v8804_v16  ;;  %v8867_v16 = vld [vmem:[#allocation5 + $0xe00] ss:$16 sps:$4 sm:$0xff]  }
 0x261   : > { %5170 = vmatpush1.bf16.msra.mxu0 %v8801_v11  ;;  %5648 = vmatprep.subr.bf16.mxu1 %v8812_v19  ;;  %v10360_v11 = vpack.c.bf16 %v497_v8, %v475_v7  ;;  %v8875_v19 = vld [vmem:[#allocation5 + $0xe24] ss:$16 sps:$4 sm:$0xff]   ;;  %v8927_v7 = vld [vmem:[#allocation5 + $0xf40] ss:$16 sps:$4 sm:$0xff]   ;;  %v8930_v8 = vld [vmem:[#allocation5 + $0xb48] ss:$16 sps:$4 sm:$0xff]  }
 0x262   : > { %5171 = vmatprep.subr.bf16.mxu0 %v8809_v17  ;;  %v8870_v17 = vld [vmem:[#allocation5 + $0xa08] ss:$16 sps:$4 sm:$0xff]  }
 0x264   : > { %5649 = vmatpush1.bf16.msra.mxu1 %v8810_v13  ;;  %v8873_v13 = vld [vmem:[#allocation5 + $0xe20] ss:$16 sps:$4 sm:$0xff]  }
 0x265   : > { %5172 = vmatpush1.bf16.msra.mxu0 %v8807_v20  ;;  %5650 = vmatprep.subr.bf16.mxu1 %v8818_v22  ;;  %v8878_v20 = vld [vmem:[#allocation5 + $0xa2c] ss:$16 sps:$4 sm:$0xff]   ;;  %v10362_v22 = vpack.c.bf16 %v542_v55, %v520_v15  ;;  %v8935_v15 = vld [vmem:[#allocation5 + $0xf64] ss:$16 sps:$4 sm:$0xff]  }
 0x266   : > { %5173 = vmatprep.subr.bf16.mxu0 %v8815_v53  ;;  %v8876_v53 = vld [vmem:[#allocation5 + $0xa28] ss:$16 sps:$4 sm:$0xff]   ;;  %v8938_v55 = vld [vmem:[#allocation5 + $0xb6c] ss:$16 sps:$4 sm:$0xff]  }
 0x268   : > { %5651 = vmatpush1.bf16.msra.mxu1 %v8816_v24  ;;  %v8884_v24 = vld [vmem:[#allocation5 + $0xa4c] ss:$16 sps:$4 sm:$0xff]  }
 0x269   : > { %5174 = vmatpush1.bf16.msra.mxu0 %v8813_v23  ;;  %5652 = vmatprep.subr.bf16.mxu1 %v8824_v60  ;;  %v8881_v23 = vld [vmem:[#allocation5 + $0xe44] ss:$16 sps:$4 sm:$0xff]  }
 0x26a   : > { %5175 = vmatprep.subr.bf16.mxu0 %v8821_v25  ;;  %v519_v25 = vld [vmem:[%s10176_s25 + $0x1c0] sm:$0xff]  ;;  %v541_v60 = vld [vmem:[%s10176_s25 + $0x270] sm:$0xff] }
 0x26c   : > { %5653 = vmatpush1.bf16.msra.mxu1 %v8822_v36  ;;  %v500_v36 = vld [vmem:[%s10176_s25 + $0x128] sm:$0xff] }
 0x26d   : > { %5176 = vmatpush1.bf16.msra.mxu0 %v8819_v27  ;;  %5654 = vmatprep.subr.bf16.mxu1 %v8830_v29  ;;  %v478_v27 = vld [vmem:[%s10176_s25 + $0x78] sm:$0xff]  ;;  %v8879_v29 = vld [vmem:[#allocation5 + $0xe40] ss:$16 sps:$4 sm:$0xff]  }
 0x26e   : > { %5177 = vmatprep.subr.bf16.mxu0 %v8827_v28  ;;  %v10372_v28 = vpack.c.bf16 %v541_v60, %v519_v25  ;;  %v8945_v25 = vld [vmem:[#allocation5 + $0xfa0] ss:$16 sps:$4 sm:$0xff]   ;;  %v8948_v60 = vld [vmem:[#allocation5 + $0xba8] ss:$16 sps:$4 sm:$0xff]  }
 0x270   : > { %5655 = vmatpush1.bf16.msra.mxu1 %v8828_v31  ;;  %v8890_v31 = vld [vmem:[#allocation5 + $0xa6c] ss:$16 sps:$4 sm:$0xff]  }
 0x271   : > { %5178 = vmatpush1.bf16.msra.mxu0 %v8825_v44  ;;  %5656 = vmatprep.subr.bf16.mxu1 %v8836_v33  ;;  %v8887_v44 = vld [vmem:[#allocation5 + $0xe64] ss:$16 sps:$4 sm:$0xff]   ;;  %v8885_v33 = vld [vmem:[#allocation5 + $0xe60] ss:$16 sps:$4 sm:$0xff]  }
 0x272   : > { %5179 = vmatprep.subr.bf16.mxu0 %v8833_v32  ;;  %v10374_v32 = vpack.c.bf16 %v500_v36, %v478_v27  ;;  %v8953_v27 = vld [vmem:[#allocation5 + $0xfc4] ss:$16 sps:$4 sm:$0xff]   ;;  %v8956_v36 = vld [vmem:[#allocation5 + $0xbcc] ss:$16 sps:$4 sm:$0xff]  }
 0x274   : > { %5657 = vmatpush1.bf16.msra.mxu1 %v8834_v35  ;;  %v8896_v35 = vld [vmem:[#allocation5 + $0xa8c] ss:$16 sps:$4 sm:$0xff]  }
 0x275   : > { %5180 = vmatpush1.bf16.msra.mxu0 %v8831_v34  ;;  %5658 = vmatprep.subr.bf16.mxu1 %v8842_v56  ;;  %v8893_v34 = vld [vmem:[#allocation5 + $0xe84] ss:$16 sps:$4 sm:$0xff]   ;;  %v8894_v56 = vld [vmem:[#allocation5 + $0xa88] ss:$16 sps:$4 sm:$0xff]  }
 0x276   : > { %5181 = vmatprep.subr.bf16.mxu0 %v8839_v37  ;;  %v8891_v37 = vld [vmem:[#allocation5 + $0xe80] ss:$16 sps:$4 sm:$0xff]  }
 0x278   : > { %5659 = vmatpush1.bf16.msra.mxu1 %v8840_v42  ;;  %v8897_v42 = vld [vmem:[#allocation5 + $0xea0] ss:$16 sps:$4 sm:$0xff]  }
 0x279   : > { %5182 = vmatpush1.bf16.msra.mxu0 %v8837_v39  ;;  %5660 = vmatprep.subr.bf16.mxu1 %v8848_v61  ;;  %v8899_v39 = vld [vmem:[#allocation5 + $0xea4] ss:$16 sps:$4 sm:$0xff]  }
 0x27a   : > { %5183 = vmatprep.subr.bf16.mxu0 %v8845_v43  ;;  %v8900_v43 = vld [vmem:[#allocation5 + $0xaa8] ss:$16 sps:$4 sm:$0xff]   ;;  %v8905_v61 = vld [vmem:[#allocation5 + $0xec4] ss:$16 sps:$4 sm:$0xff]  }
 0x27c   : > { %5661 = vmatpush1.bf16.msra.mxu1 %v8846_v52  ;;  %v8903_v52 = vld [vmem:[#allocation5 + $0xec0] ss:$16 sps:$4 sm:$0xff]  }
 0x27d   : > { %5184 = vmatpush1.bf16.msra.mxu0 %v8843_v49  ;;  %5662 = vmatprep.subr.bf16.mxu1 %v8854_v57  ;;  %v8908_v49 = vld [vmem:[#allocation5 + $0xacc] ss:$16 sps:$4 sm:$0xff]  }
 0x27e   : > { %5185 = vmatprep.subr.bf16.mxu0 %v8851_v12  ;;  %v8911_v12 = vld [vmem:[#allocation5 + $0xee4] ss:$16 sps:$4 sm:$0xff]   ;;  %v8914_v57 = vld [vmem:[#allocation5 + $0xaec] ss:$16 sps:$4 sm:$0xff]  }
 0x280   : > { %5663 = vmatpush1.bf16.msra.mxu1 %v8852_v59  ;;  %v8912_v59 = vld [vmem:[#allocation5 + $0xae8] ss:$16 sps:$4 sm:$0xff]  }
 0x281   : > { %5186 = vmatpush1.bf16.msra.mxu0 %v8849_v58  ;;  %5664 = vmatprep.subr.bf16.mxu1 %v8860_v40  ;;  %v8909_v58 = vld [vmem:[#allocation5 + $0xee0] ss:$16 sps:$4 sm:$0xff]   ;;  %v8920_v40 = vld [vmem:[#allocation5 + $0xb0c] ss:$16 sps:$4 sm:$0xff]  }
 0x282   : > { %5187 = vmatprep.subr.bf16.mxu0 %v8857_v63  ;;  %v8917_v63 = vld [vmem:[#allocation5 + $0xf04] ss:$16 sps:$4 sm:$0xff]  }
 0x284   : > { %5665 = vmatpush1.bf16.msra.mxu1 %v8858_v62  ;;  %v8918_v62 = vld [vmem:[#allocation5 + $0xb08] ss:$16 sps:$4 sm:$0xff]  }
 0x285   : > { %5188 = vmatpush1.bf16.msra.mxu0 %v8855_v1  ;;  %5666 = vmatprep.subr.bf16.mxu1 %v8866_v3  ;;  %v8915_v1 = vld [vmem:[#allocation5 + $0xf00] ss:$16 sps:$4 sm:$0xff]   ;;  %v8926_v3 = vld [vmem:[#allocation5 + $0xb2c] ss:$16 sps:$4 sm:$0xff]  }
 0x286   : > { %5189 = vmatprep.subr.bf16.mxu0 %v8863_v50  ;;  %v8923_v50 = vld [vmem:[#allocation5 + $0xf24] ss:$16 sps:$4 sm:$0xff]  }
 0x288   : > { %5667 = vmatpush1.bf16.msra.mxu1 %v8864_v2  ;;  %v8924_v2 = vld [vmem:[#allocation5 + $0xb28] ss:$16 sps:$4 sm:$0xff]  }
 0x289   : > { %5190 = vmatpush1.bf16.msra.mxu0 %v8861_v41  ;;  %5689 = vmatprep.subr.bf16.mxu1 %v8872_v6  ;;  %v8921_v41 = vld [vmem:[#allocation5 + $0xf20] ss:$16 sps:$4 sm:$0xff]   ;;  %v8932_v6 = vld [vmem:[#allocation5 + $0xb4c] ss:$16 sps:$4 sm:$0xff]  }
 0x28a   : > { %5212 = vmatprep.subr.bf16.mxu0 %v8869_v5  ;;  %v8929_v5 = vld [vmem:[#allocation5 + $0xf44] ss:$16 sps:$4 sm:$0xff]  }
 0x28b   : > { %5669 = vmatmul.mubr.bf16.vlgmr.msra.gmra.mrb[8].mxu1 %v10295_v14  ;;  %v8882_v14 = vld [vmem:[#allocation5 + $0xa48] ss:$16 sps:$4 sm:$0xff]  }
 0x28c   : > { %5192 = vmatmul.mubr.bf16.vlgmr.msra.gmra.mrb[0].mxu0 %v10360_v11  ;;  %5690 = vmatpush1.bf16.msra.mxu1 %v8870_v17  ;;  %v8936_v17 = vld [vmem:[#allocation5 + $0xb68] ss:$16 sps:$4 sm:$0xff]  }
 0x28d   : > { %5213 = vmatpush1.bf16.msra.mxu0 %v8867_v16  ;;  %5691 = vmatprep.subr.bf16.mxu1 %v8878_v20  ;;  %v8933_v16 = vld [vmem:[#allocation5 + $0xf60] ss:$16 sps:$4 sm:$0xff]   ;;  %v8944_v20 = vld [vmem:[#allocation5 + $0xb8c] ss:$16 sps:$4 sm:$0xff]  }
 0x28e   : > { %5214 = vmatprep.subr.bf16.mxu0 %v8875_v19  ;;  %5201 = vmatprep.mubr.bf16.mxu0 %v10362_v22  ;;  %v8941_v19 = vld [vmem:[#allocation5 + $0xf84] ss:$16 sps:$4 sm:$0xff]  }
 0x28f   : > { %5678 = vmatprep.mubr.bf16.mxu1 %v10298_v21  ;;  %v8888_v21 = vld [vmem:[#allocation5 + $0xa68] ss:$16 sps:$4 sm:$0xff]  }
 0x290   : > { %5692 = vmatpush1.bf16.msra.mxu1 %v8876_v53  ;;  %v8942_v53 = vld [vmem:[#allocation5 + $0xb88] ss:$16 sps:$4 sm:$0xff]  }
 0x291   : > { %5215 = vmatpush1.bf16.msra.mxu0 %v8873_v13  ;;  %5693 = vmatprep.subr.bf16.mxu1 %v8884_v24  ;;  %v8939_v13 = vld [vmem:[#allocation5 + $0xf80] ss:$16 sps:$4 sm:$0xff]   ;;  %v8950_v24 = vld [vmem:[#allocation5 + $0xbac] ss:$16 sps:$4 sm:$0xff]  }
 0x292   : > { %5216 = vmatprep.subr.bf16.mxu0 %v8881_v23  ;;  %v8947_v23 = vld [vmem:[#allocation5 + $0xfa4] ss:$16 sps:$4 sm:$0xff]  }
 0x293   : > { %5679 = vmatmul.mubr.bf16.gmra.mrb[12].mxu1 %v10307_v26  ;;  %v8902_v26 = vld [vmem:[#allocation5 + $0xaac] ss:$16 sps:$4 sm:$0xff]  }
 0x294   : > { %5202 = vmatmul.mubr.bf16.gmra.mrb[4].mxu0 %v10372_v28  ;;  %5694 = vmatpush1.bf16.msra.mxu1 %v8882_v14  ;;  %v8954_v14 = vld [vmem:[#allocation5 + $0xbc8] ss:$16 sps:$4 sm:$0xff]  }
 0x295   : > { %5217 = vmatpush1.bf16.msra.mxu0 %v8879_v29  ;;  %5695 = vmatprep.subr.bf16.mxu1 %v8890_v31  ;;  %v8951_v29 = vld [vmem:[#allocation5 + $0xfc0] ss:$16 sps:$4 sm:$0xff]   ;;  %v8962_v31 = vld [vmem:[#allocation5 + $0xbec] ss:$16 sps:$4 sm:$0xff]  }
 0x296   : > { %5218 = vmatprep.subr.bf16.mxu0 %v8887_v44  ;;  %5244 = vmatprep.mubr.bf16.mxu0 %v10374_v32  ;;  %v8959_v44 = vld [vmem:[#allocation5 + $0xfe4] ss:$16 sps:$4 sm:$0xff]  }
 0x297   : > { %5721 = vmatprep.mubr.bf16.mxu1 %v10310_v30  ;;  %v8906_v30 = vld [vmem:[#allocation5 + $0xac8] ss:$16 sps:$4 sm:$0xff]  }
 0x298   : > { %5696 = vmatpush1.bf16.msra.mxu1 %v8888_v21  ;;  %v8960_v21 = vld [vmem:[#allocation5 + $0xbe8] ss:$16 sps:$4 sm:$0xff]  }
 0x299   : > { %5219 = vmatpush1.bf16.msra.mxu0 %v8885_v33  ;;  %5697 = vmatprep.subr.bf16.mxu1 %v8896_v35  ;;  %v8957_v33 = vld [vmem:[#allocation5 + $0xfe0] ss:$16 sps:$4 sm:$0xff]   ;;  %v8968_v35 = vld [vmem:[#allocation5 + $0xc0c] ss:$16 sps:$4 sm:$0xff]  }
 0x29a   : > { %5220 = vmatprep.subr.bf16.mxu0 %v8893_v34  ;;  %v8965_v34 = vld [vmem:[#allocation5 + $0x1004] ss:$16 sps:$4 sm:$0xff]  }
 0x29c   : > { %5698 = vmatpush1.bf16.msra.mxu1 %v8894_v56  ;;  %v499_v56 = vld [vmem:[%s10176_s25 + $0x120] sm:$0xff] }
 0x29d   : > { %5221 = vmatpush1.bf16.msra.mxu0 %v8891_v37  ;;  %5699 = vmatprep.subr.bf16.mxu1 %v8902_v26  ;;  %v477_v37 = vld [vmem:[%s10176_s25 + $0x70] sm:$0xff]  ;;  %v544_v26 = vld [vmem:[%s10176_s25 + $0x288] sm:$0xff] }
 0x29e   : > { %5222 = vmatprep.subr.bf16.mxu0 %v8899_v39  ;;  %v522_v39 = vld [vmem:[%s10176_s25 + $0x1d8] sm:$0xff] }
 0x2a0   : > { %5700 = vmatpush1.bf16.msra.mxu1 %v8900_v43  ;;  %v8963_v43 = vld [vmem:[#allocation5 + $0x1000] ss:$16 sps:$4 sm:$0xff]  }
 0x2a1   : > { %5223 = vmatpush1.bf16.msra.mxu0 %v8897_v42  ;;  %5701 = vmatprep.subr.bf16.mxu1 %v8908_v49  ;;  %v10384_v42 = vpack.c.bf16 %v499_v56, %v477_v37  ;;  %v8971_v49 = vld [vmem:[#allocation5 + $0x1024] ss:$16 sps:$4 sm:$0xff]   ;;  %v9023_v37 = vld [vmem:[#allocation5 + $0x1140] ss:$16 sps:$4 sm:$0xff]   ;;  %v9026_v56 = vld [vmem:[#allocation5 + $0xd48] ss:$16 sps:$4 sm:$0xff]  }
 0x2a2   : > { %5224 = vmatprep.subr.bf16.mxu0 %v8905_v61  ;;  %v8966_v61 = vld [vmem:[#allocation5 + $0xc08] ss:$16 sps:$4 sm:$0xff]  }
 0x2a4   : > { %5702 = vmatpush1.bf16.msra.mxu1 %v8906_v30  ;;  %v8969_v30 = vld [vmem:[#allocation5 + $0x1020] ss:$16 sps:$4 sm:$0xff]  }
 0x2a5   : > { %5225 = vmatpush1.bf16.msra.mxu0 %v8903_v52  ;;  %5703 = vmatprep.subr.bf16.mxu1 %v8914_v57  ;;  %v8974_v52 = vld [vmem:[#allocation5 + $0xc2c] ss:$16 sps:$4 sm:$0xff]   ;;  %v10386_v57 = vpack.c.bf16 %v544_v26, %v522_v39  ;;  %v9031_v39 = vld [vmem:[#allocation5 + $0x1164] ss:$16 sps:$4 sm:$0xff]  }
 0x2a6   : > { %5226 = vmatprep.subr.bf16.mxu0 %v8911_v12  ;;  %v8972_v12 = vld [vmem:[#allocation5 + $0xc28] ss:$16 sps:$4 sm:$0xff]   ;;  %v9034_v26 = vld [vmem:[#allocation5 + $0xd6c] ss:$16 sps:$4 sm:$0xff]  }
 0x2a8   : > { %5704 = vmatpush1.bf16.msra.mxu1 %v8912_v59  ;;  %v8980_v59 = vld [vmem:[#allocation5 + $0xc4c] ss:$16 sps:$4 sm:$0xff]  }
 0x2a9   : > { %5227 = vmatpush1.bf16.msra.mxu0 %v8909_v58  ;;  %5705 = vmatprep.subr.bf16.mxu1 %v8920_v40  ;;  %v8977_v58 = vld [vmem:[#allocation5 + $0x1044] ss:$16 sps:$4 sm:$0xff]  }
 0x2aa   : > { %5228 = vmatprep.subr.bf16.mxu0 %v8917_v63  ;;  %v521_v63 = vld [vmem:[%s10176_s25 + $0x1d0] sm:$0xff]  ;;  %v543_v40 = vld [vmem:[%s10176_s25 + $0x280] sm:$0xff] }
 0x2ac   : > { %5706 = vmatpush1.bf16.msra.mxu1 %v8918_v62  ;;  %v502_v62 = vld [vmem:[%s10176_s25 + $0x138] sm:$0xff] }
 0x2ad   : > { %5229 = vmatpush1.bf16.msra.mxu0 %v8915_v1  ;;  %5707 = vmatprep.subr.bf16.mxu1 %v8926_v3  ;;  %v480_v1 = vld [vmem:[%s10176_s25 + $0x88] sm:$0xff]  ;;  %v8975_v3 = vld [vmem:[#allocation5 + $0x1040] ss:$16 sps:$4 sm:$0xff]  }
 0x2ae   : > { %5230 = vmatprep.subr.bf16.mxu0 %v8923_v50  ;;  %v10396_v50 = vpack.c.bf16 %v543_v40, %v521_v63  ;;  %v9041_v63 = vld [vmem:[#allocation5 + $0x11a0] ss:$16 sps:$4 sm:$0xff]   ;;  %v9044_v40 = vld [vmem:[#allocation5 + $0xda8] ss:$16 sps:$4 sm:$0xff]  }
 0x2b0   : > { %5708 = vmatpush1.bf16.msra.mxu1 %v8924_v2  ;;  %v8986_v2 = vld [vmem:[#allocation5 + $0xc6c] ss:$16 sps:$4 sm:$0xff]  }
 0x2b1   : > { %5231 = vmatpush1.bf16.msra.mxu0 %v8921_v41  ;;  %5709 = vmatprep.subr.bf16.mxu1 %v8932_v6  ;;  %v8983_v41 = vld [vmem:[#allocation5 + $0x1064] ss:$16 sps:$4 sm:$0xff]   ;;  %v8981_v6 = vld [vmem:[#allocation5 + $0x1060] ss:$16 sps:$4 sm:$0xff]  }
 0x2b2   : > { %5232 = vmatprep.subr.bf16.mxu0 %v8929_v5  ;;  %v10398_v5 = vpack.c.bf16 %v502_v62, %v480_v1  ;;  %v9049_v1 = vld [vmem:[#allocation5 + $0x11c4] ss:$16 sps:$4 sm:$0xff]   ;;  %v9052_v62 = vld [vmem:[#allocation5 + $0xdcc] ss:$16 sps:$4 sm:$0xff]  }
 0x2b4   : > { %5710 = vmatpush1.bf16.msra.mxu1 %v8930_v8  ;;  %v8992_v8 = vld [vmem:[#allocation5 + $0xc8c] ss:$16 sps:$4 sm:$0xff]  }
 0x2b5   : > { %5233 = vmatpush1.bf16.msra.mxu0 %v8927_v7  ;;  %5711 = vmatprep.subr.bf16.mxu1 %v8938_v55  ;;  %v8989_v7 = vld [vmem:[#allocation5 + $0x1084] ss:$16 sps:$4 sm:$0xff]   ;;  %v8990_v55 = vld [vmem:[#allocation5 + $0xc88] ss:$16 sps:$4 sm:$0xff]  }
 0x2b6   : > { %5234 = vmatprep.subr.bf16.mxu0 %v8935_v15  ;;  %v8987_v15 = vld [vmem:[#allocation5 + $0x1080] ss:$16 sps:$4 sm:$0xff]  }
 0x2b8   : > { %5712 = vmatpush1.bf16.msra.mxu1 %v8936_v17  ;;  %v8993_v17 = vld [vmem:[#allocation5 + $0x10a0] ss:$16 sps:$4 sm:$0xff]  }
 0x2b9   : > { %5235 = vmatpush1.bf16.msra.mxu0 %v8933_v16  ;;  %5713 = vmatprep.subr.bf16.mxu1 %v8944_v20  ;;  %v8995_v16 = vld [vmem:[#allocation5 + $0x10a4] ss:$16 sps:$4 sm:$0xff]  }
 0x2ba   : > { %5236 = vmatprep.subr.bf16.mxu0 %v8941_v19  ;;  %v8996_v19 = vld [vmem:[#allocation5 + $0xca8] ss:$16 sps:$4 sm:$0xff]   ;;  %v9001_v20 = vld [vmem:[#allocation5 + $0x10c4] ss:$16 sps:$4 sm:$0xff]  }
 0x2bc   : > { %5714 = vmatpush1.bf16.msra.mxu1 %v8942_v53  ;;  %v8999_v53 = vld [vmem:[#allocation5 + $0x10c0] ss:$16 sps:$4 sm:$0xff]  }
 0x2bd   : > { %5237 = vmatpush1.bf16.msra.mxu0 %v8939_v13  ;;  %5715 = vmatprep.subr.bf16.mxu1 %v8950_v24  ;;  %v9004_v13 = vld [vmem:[#allocation5 + $0xccc] ss:$16 sps:$4 sm:$0xff]  }
 0x2be   : > { %5238 = vmatprep.subr.bf16.mxu0 %v8947_v23  ;;  %v9007_v23 = vld [vmem:[#allocation5 + $0x10e4] ss:$16 sps:$4 sm:$0xff]   ;;  %v9010_v24 = vld [vmem:[#allocation5 + $0xcec] ss:$16 sps:$4 sm:$0xff]  }
 0x2c0   : > { %5716 = vmatpush1.bf16.msra.mxu1 %v8948_v60  ;;  %v9008_v60 = vld [vmem:[#allocation5 + $0xce8] ss:$16 sps:$4 sm:$0xff]  }
 0x2c1   : > { %5239 = vmatpush1.bf16.msra.mxu0 %v8945_v25  ;;  %5717 = vmatprep.subr.bf16.mxu1 %v8956_v36  ;;  %v9005_v25 = vld [vmem:[#allocation5 + $0x10e0] ss:$16 sps:$4 sm:$0xff]   ;;  %v9016_v36 = vld [vmem:[#allocation5 + $0xd0c] ss:$16 sps:$4 sm:$0xff]  }
 0x2c2   : > { %5240 = vmatprep.subr.bf16.mxu0 %v8953_v27  ;;  %v9013_v27 = vld [vmem:[#allocation5 + $0x1104] ss:$16 sps:$4 sm:$0xff]  }
 0x2c4   : > { %5718 = vmatpush1.bf16.msra.mxu1 %v8954_v14  ;;  %v9014_v14 = vld [vmem:[#allocation5 + $0xd08] ss:$16 sps:$4 sm:$0xff]  }
 0x2c5   : > { %5241 = vmatpush1.bf16.msra.mxu0 %v8951_v29  ;;  %5719 = vmatprep.subr.bf16.mxu1 %v8962_v31  ;;  %v9011_v29 = vld [vmem:[#allocation5 + $0x1100] ss:$16 sps:$4 sm:$0xff]   ;;  %v9022_v31 = vld [vmem:[#allocation5 + $0xd2c] ss:$16 sps:$4 sm:$0xff]  }
 0x2c6   : > { %5242 = vmatprep.subr.bf16.mxu0 %v8959_v44  ;;  %v9019_v44 = vld [vmem:[#allocation5 + $0x1124] ss:$16 sps:$4 sm:$0xff]  }
 0x2c8   : > { %5720 = vmatpush1.bf16.msra.mxu1 %v8960_v21  ;;  %v9020_v21 = vld [vmem:[#allocation5 + $0xd28] ss:$16 sps:$4 sm:$0xff]  }
 0x2c9   : > { %5243 = vmatpush1.bf16.msra.mxu0 %v8957_v33  ;;  %5742 = vmatprep.subr.bf16.mxu1 %v8968_v35  ;;  %v9017_v33 = vld [vmem:[#allocation5 + $0x1120] ss:$16 sps:$4 sm:$0xff]   ;;  %v9028_v35 = vld [vmem:[#allocation5 + $0xd4c] ss:$16 sps:$4 sm:$0xff]  }
 0x2ca   : > { %5265 = vmatprep.subr.bf16.mxu0 %v8965_v34  ;;  %v9025_v34 = vld [vmem:[#allocation5 + $0x1144] ss:$16 sps:$4 sm:$0xff]  }
 0x2cb   : > { %5722 = vmatmul.mubr.bf16.vlgmr.msra.gmra.mrb[8].mxu1 %v10336_v38  ;;  %v8978_v38 = vld [vmem:[#allocation5 + $0xc48] ss:$16 sps:$4 sm:$0xff]  }
 0x2cc   : > { %5245 = vmatmul.mubr.bf16.vlgmr.msra.gmra.mrb[0].mxu0 %v10384_v42  ;;  %5743 = vmatpush1.bf16.msra.mxu1 %v8966_v61  ;;  %v9032_v61 = vld [vmem:[#allocation5 + $0xd68] ss:$16 sps:$4 sm:$0xff]  }
 0x2cd   : > { %5266 = vmatpush1.bf16.msra.mxu0 %v8963_v43  ;;  %5744 = vmatprep.subr.bf16.mxu1 %v8974_v52  ;;  %v9029_v43 = vld [vmem:[#allocation5 + $0x1160] ss:$16 sps:$4 sm:$0xff]   ;;  %v9040_v52 = vld [vmem:[#allocation5 + $0xd8c] ss:$16 sps:$4 sm:$0xff]  }
 0x2ce   : > { %5267 = vmatprep.subr.bf16.mxu0 %v8971_v49  ;;  %5254 = vmatprep.mubr.bf16.mxu0 %v10386_v57  ;;  %v9037_v49 = vld [vmem:[#allocation5 + $0x1184] ss:$16 sps:$4 sm:$0xff]  }
 0x2cf   : > { %5731 = vmatprep.mubr.bf16.mxu1 %v10338_v54  ;;  %v8984_v54 = vld [vmem:[#allocation5 + $0xc68] ss:$16 sps:$4 sm:$0xff]  }
 0x2d0   : > { %5745 = vmatpush1.bf16.msra.mxu1 %v8972_v12  ;;  %v9038_v12 = vld [vmem:[#allocation5 + $0xd88] ss:$16 sps:$4 sm:$0xff]  }
 0x2d1   : > { %5268 = vmatpush1.bf16.msra.mxu0 %v8969_v30  ;;  %5746 = vmatprep.subr.bf16.mxu1 %v8980_v59  ;;  %v9035_v30 = vld [vmem:[#allocation5 + $0x1180] ss:$16 sps:$4 sm:$0xff]   ;;  %v9046_v59 = vld [vmem:[#allocation5 + $0xdac] ss:$16 sps:$4 sm:$0xff]  }
 0x2d2   : > { %5269 = vmatprep.subr.bf16.mxu0 %v8977_v58  ;;  %v9043_v58 = vld [vmem:[#allocation5 + $0x11a4] ss:$16 sps:$4 sm:$0xff]  }
 0x2d3   : > { %5732 = vmatmul.mubr.bf16.gmra.mrb[12].mxu1 %v10348_v0  ;;  %v8998_v0 = vld [vmem:[#allocation5 + $0xcac] ss:$16 sps:$4 sm:$0xff]  }
 0x2d4   : > { %5255 = vmatmul.mubr.bf16.gmra.mrb[4].mxu0 %v10396_v50  ;;  %5747 = vmatpush1.bf16.msra.mxu1 %v8978_v38  ;;  %v9050_v38 = vld [vmem:[#allocation5 + $0xdc8] ss:$16 sps:$4 sm:$0xff]  }
 0x2d5   : > { %5270 = vmatpush1.bf16.msra.mxu0 %v8975_v3  ;;  %5748 = vmatprep.subr.bf16.mxu1 %v8986_v2  ;;  %v9047_v3 = vld [vmem:[#allocation5 + $0x11c0] ss:$16 sps:$4 sm:$0xff]   ;;  %v9058_v2 = vld [vmem:[#allocation5 + $0xdec] ss:$16 sps:$4 sm:$0xff]  }
 0x2d6   : > { %5271 = vmatprep.subr.bf16.mxu0 %v8983_v41  ;;  %5297 = vmatprep.mubr.bf16.mxu0 %v10398_v5  ;;  %v9055_v41 = vld [vmem:[#allocation5 + $0x11e4] ss:$16 sps:$4 sm:$0xff]  }
 0x2d7   : > { %5774 = vmatprep.mubr.bf16.mxu1 %v10350_v4  ;;  %v9002_v4 = vld [vmem:[#allocation5 + $0xcc8] ss:$16 sps:$4 sm:$0xff]  }
 0x2d8   : > { %5749 = vmatpush1.bf16.msra.mxu1 %v8984_v54  ;;  %v9056_v54 = vld [vmem:[#allocation5 + $0xde8] ss:$16 sps:$4 sm:$0xff]  }
 0x2d9   : > { %5272 = vmatpush1.bf16.msra.mxu0 %v8981_v6  ;;  %5750 = vmatprep.subr.bf16.mxu1 %v8992_v8  ;;  %v9053_v6 = vld [vmem:[#allocation5 + $0x11e0] ss:$16 sps:$4 sm:$0xff]  }
 0x2da   : > { %5273 = vmatprep.subr.bf16.mxu0 %v8989_v7  ;;  %v479_v7 = vld [vmem:[%s10176_s25 + $0x80] sm:$0xff]  ;;  %v501_v8 = vld [vmem:[%s10176_s25 + $0x130] sm:$0xff] }
 0x2dc   : > { %5751 = vmatpush1.bf16.msra.mxu1 %v8990_v55  ;;  %v9064_v55 = vld [vmem:[#allocation5 + $0xe0c] ss:$16 sps:$4 sm:$0xff]  }
 0x2dd   : > { %5274 = vmatpush1.bf16.msra.mxu0 %v8987_v15  ;;  %5752 = vmatprep.subr.bf16.mxu1 %v8998_v0  ;;  %v9061_v15 = vld [vmem:[#allocation5 + $0x1204] ss:$16 sps:$4 sm:$0xff]   ;;  %v10406_v0 = vpack.c.bf16 %v501_v8, %v479_v7  ;;  %v9124_v8 = vld [vmem:[#allocation5 + $0xf4c] ss:$16 sps:$4 sm:$0xff]  }
 0x2de   : > { %5275 = vmatprep.subr.bf16.mxu0 %v8995_v16  ;;  %v9059_v16 = vld [vmem:[#allocation5 + $0x1200] ss:$16 sps:$4 sm:$0xff]   ;;  %v9121_v7 = vld [vmem:[#allocation5 + $0x1344] ss:$16 sps:$4 sm:$0xff]  }
 0x2e0   : > { %5753 = vmatpush1.bf16.msra.mxu1 %v8996_v19  ;;  %v546_v19 = vld [vmem:[%s10176_s25 + $0x298] sm:$0xff] }
 0x2e1   : > { %5276 = vmatpush1.bf16.msra.mxu0 %v8993_v17  ;;  %5754 = vmatprep.subr.bf16.mxu1 %v9004_v13  ;;  %v524_v17 = vld [vmem:[%s10176_s25 + $0x1e8] sm:$0xff]  ;;  %v9067_v13 = vld [vmem:[#allocation5 + $0x1224] ss:$16 sps:$4 sm:$0xff]  }
 0x2e2   : > { %5277 = vmatprep.subr.bf16.mxu0 %v9001_v20  ;;  %v9062_v20 = vld [vmem:[#allocation5 + $0xe08] ss:$16 sps:$4 sm:$0xff]  }
 0x2e4   : > { %5755 = vmatpush1.bf16.msra.mxu1 %v9002_v4  ;;  %v10410_v4 = vpack.c.bf16 %v546_v19, %v524_v17  ;;  %v9130_v17 = vld [vmem:[#allocation5 + $0xf6c] ss:$16 sps:$4 sm:$0xff]   ;;  %v9125_v19 = vld [vmem:[#allocation5 + $0x1360] ss:$16 sps:$4 sm:$0xff]  }
 0x2e5   : > { %5278 = vmatpush1.bf16.msra.mxu0 %v8999_v53  ;;  %5756 = vmatprep.subr.bf16.mxu1 %v9010_v24  ;;  %v9070_v53 = vld [vmem:[#allocation5 + $0xe2c] ss:$16 sps:$4 sm:$0xff]   ;;  %v9068_v24 = vld [vmem:[#allocation5 + $0xe28] ss:$16 sps:$4 sm:$0xff]  }
 0x2e6   : > { %5279 = vmatprep.subr.bf16.mxu0 %v9007_v23  ;;  %v9065_v23 = vld [vmem:[#allocation5 + $0x1220] ss:$16 sps:$4 sm:$0xff]  }
 0x2e8   : > { %5757 = vmatpush1.bf16.msra.mxu1 %v9008_v60  ;;  %v545_v60 = vld [vmem:[%s10176_s25 + $0x290] sm:$0xff] }
 0x2e9   : > { %5280 = vmatpush1.bf16.msra.mxu0 %v9005_v25  ;;  %5758 = vmatprep.subr.bf16.mxu1 %v9016_v36  ;;  %v523_v25 = vld [vmem:[%s10176_s25 + $0x1e0] sm:$0xff]  ;;  %v9076_v36 = vld [vmem:[#allocation5 + $0xe4c] ss:$16 sps:$4 sm:$0xff]  }
 0x2ea   : > { %5281 = vmatprep.subr.bf16.mxu0 %v9013_v27  ;;  %v9073_v27 = vld [vmem:[#allocation5 + $0x1244] ss:$16 sps:$4 sm:$0xff]  }
 0x2ec   : > { %5759 = vmatpush1.bf16.msra.mxu1 %v9014_v14  ;;  %v482_v14 = vld [vmem:[%s10176_s25 + $0x98] sm:$0xff] }
 0x2ed   : > { %5282 = vmatpush1.bf16.msra.mxu0 %v9011_v29  ;;  %5760 = vmatprep.subr.bf16.mxu1 %v9022_v31  ;;  %v10418_v29 = vpack.c.bf16 %v545_v60, %v523_v25  ;;  %v9074_v31 = vld [vmem:[#allocation5 + $0xe48] ss:$16 sps:$4 sm:$0xff]   ;;  %v9139_v25 = vld [vmem:[#allocation5 + $0x13a4] ss:$16 sps:$4 sm:$0xff]   ;;  %v9142_v60 = vld [vmem:[#allocation5 + $0xfac] ss:$16 sps:$4 sm:$0xff]  }
 0x2ee   : > { %5283 = vmatprep.subr.bf16.mxu0 %v9019_v44  ;;  %v504_v44 = vld [vmem:[%s10176_s25 + $0x148] sm:$0xff] }
 0x2f0   : > { %5761 = vmatpush1.bf16.msra.mxu1 %v9020_v21  ;;  %v9082_v21 = vld [vmem:[#allocation5 + $0xe6c] ss:$16 sps:$4 sm:$0xff]  }
 0x2f1   : > { %5284 = vmatpush1.bf16.msra.mxu0 %v9017_v33  ;;  %5762 = vmatprep.subr.bf16.mxu1 %v9028_v35  ;;  %v9079_v33 = vld [vmem:[#allocation5 + $0x1264] ss:$16 sps:$4 sm:$0xff]   ;;  %v9080_v35 = vld [vmem:[#allocation5 + $0xe68] ss:$16 sps:$4 sm:$0xff]  }
 0x2f2   : > { %5285 = vmatprep.subr.bf16.mxu0 %v9025_v34  ;;  %v10422_v34 = vpack.c.bf16 %v504_v44, %v482_v14  ;;  %v9145_v14 = vld [vmem:[#allocation5 + $0x13c4] ss:$16 sps:$4 sm:$0xff]   ;;  %v9148_v44 = vld [vmem:[#allocation5 + $0xfcc] ss:$16 sps:$4 sm:$0xff]  }
 0x2f4   : > { %5763 = vmatpush1.bf16.msra.mxu1 %v9026_v56  ;;  %v9088_v56 = vld [vmem:[#allocation5 + $0xe8c] ss:$16 sps:$4 sm:$0xff]  }
 0x2f5   : > { %5286 = vmatpush1.bf16.msra.mxu0 %v9023_v37  ;;  %5764 = vmatprep.subr.bf16.mxu1 %v9034_v26  ;;  %v9085_v37 = vld [vmem:[#allocation5 + $0x1284] ss:$16 sps:$4 sm:$0xff]   ;;  %v9086_v26 = vld [vmem:[#allocation5 + $0xe88] ss:$16 sps:$4 sm:$0xff]  }
 0x2f6   : > { %5287 = vmatprep.subr.bf16.mxu0 %v9031_v39  ;;  %v9083_v39 = vld [vmem:[#allocation5 + $0x1280] ss:$16 sps:$4 sm:$0xff]  }
 0x2f8   : > { %5765 = vmatpush1.bf16.msra.mxu1 %v9032_v61  ;;  %v9089_v61 = vld [vmem:[#allocation5 + $0x12a0] ss:$16 sps:$4 sm:$0xff]  }
 0x2f9   : > { %5288 = vmatpush1.bf16.msra.mxu0 %v9029_v43  ;;  %5766 = vmatprep.subr.bf16.mxu1 %v9040_v52  ;;  %v9091_v43 = vld [vmem:[#allocation5 + $0x12a4] ss:$16 sps:$4 sm:$0xff]  }
 0x2fa   : > { %5289 = vmatprep.subr.bf16.mxu0 %v9037_v49  ;;  %v9092_v49 = vld [vmem:[#allocation5 + $0xea8] ss:$16 sps:$4 sm:$0xff]   ;;  %v9097_v52 = vld [vmem:[#allocation5 + $0x12c4] ss:$16 sps:$4 sm:$0xff]  }
 0x2fc   : > { %5767 = vmatpush1.bf16.msra.mxu1 %v9038_v12  ;;  %v9095_v12 = vld [vmem:[#allocation5 + $0x12c0] ss:$16 sps:$4 sm:$0xff]  }
 0x2fd   : > { %5290 = vmatpush1.bf16.msra.mxu0 %v9035_v30  ;;  %5768 = vmatprep.subr.bf16.mxu1 %v9046_v59  ;;  %v9100_v30 = vld [vmem:[#allocation5 + $0xecc] ss:$16 sps:$4 sm:$0xff]  }
 0x2fe   : > { %5291 = vmatprep.subr.bf16.mxu0 %v9043_v58  ;;  %v9103_v58 = vld [vmem:[#allocation5 + $0x12e4] ss:$16 sps:$4 sm:$0xff]   ;;  %v9106_v59 = vld [vmem:[#allocation5 + $0xeec] ss:$16 sps:$4 sm:$0xff]  }
 0x300   : > { %5769 = vmatpush1.bf16.msra.mxu1 %v9044_v40  ;;  %v9104_v40 = vld [vmem:[#allocation5 + $0xee8] ss:$16 sps:$4 sm:$0xff]  }
 0x301   : > { %5292 = vmatpush1.bf16.msra.mxu0 %v9041_v63  ;;  %5770 = vmatprep.subr.bf16.mxu1 %v9052_v62  ;;  %v9101_v63 = vld [vmem:[#allocation5 + $0x12e0] ss:$16 sps:$4 sm:$0xff]   ;;  %v9112_v62 = vld [vmem:[#allocation5 + $0xf0c] ss:$16 sps:$4 sm:$0xff]  }
 0x302   : > { %5293 = vmatprep.subr.bf16.mxu0 %v9049_v1  ;;  %v9109_v1 = vld [vmem:[#allocation5 + $0x1304] ss:$16 sps:$4 sm:$0xff]  }
 0x304   : > { %5771 = vmatpush1.bf16.msra.mxu1 %v9050_v38  ;;  %v9110_v38 = vld [vmem:[#allocation5 + $0xf08] ss:$16 sps:$4 sm:$0xff]  }
 0x305   : > { %5294 = vmatpush1.bf16.msra.mxu0 %v9047_v3  ;;  %5772 = vmatprep.subr.bf16.mxu1 %v9058_v2  ;;  %v9107_v3 = vld [vmem:[#allocation5 + $0x1300] ss:$16 sps:$4 sm:$0xff]   ;;  %v9118_v2 = vld [vmem:[#allocation5 + $0xf2c] ss:$16 sps:$4 sm:$0xff]  }
 0x306   : > { %5295 = vmatprep.subr.bf16.mxu0 %v9055_v41  ;;  %v9115_v41 = vld [vmem:[#allocation5 + $0x1324] ss:$16 sps:$4 sm:$0xff]  }
 0x308   : > { %5773 = vmatpush1.bf16.msra.mxu1 %v9056_v54  ;;  %v9116_v54 = vld [vmem:[#allocation5 + $0xf28] ss:$16 sps:$4 sm:$0xff]  }
 0x309   : > { %5296 = vmatpush1.bf16.msra.mxu0 %v9053_v6  ;;  %5795 = vmatprep.subr.bf16.mxu1 %v9064_v55  ;;  %v9113_v6 = vld [vmem:[#allocation5 + $0x1320] ss:$16 sps:$4 sm:$0xff]   ;;  %v9122_v55 = vld [vmem:[#allocation5 + $0xf48] ss:$16 sps:$4 sm:$0xff]  }
 0x30a   : > { %5318 = vmatprep.subr.bf16.mxu0 %v9061_v15  ;;  %v9119_v15 = vld [vmem:[#allocation5 + $0x1340] ss:$16 sps:$4 sm:$0xff]  }
 0x30b   : > { %5775 = vmatmul.mubr.bf16.vlgmr.msra.gmra.mrb[8].mxu1 %v10360_v11  ;;  %v9071_v11 = vld [vmem:[#allocation5 + $0x1240] ss:$16 sps:$4 sm:$0xff]  }
 0x30c   : > { %5298 = vmatmul.mubr.bf16.vlgmr.msra.gmra.mrb[0].mxu0 %v10406_v0  ;;  %5796 = vmatpush1.bf16.msra.mxu1 %v9062_v20  ;;  %v9128_v20 = vld [vmem:[#allocation5 + $0xf68] ss:$16 sps:$4 sm:$0xff]  }
 0x30d   : > { %5319 = vmatpush1.bf16.msra.mxu0 %v9059_v16  ;;  %5797 = vmatprep.subr.bf16.mxu1 %v9070_v53  ;;  %v9127_v16 = vld [vmem:[#allocation5 + $0x1364] ss:$16 sps:$4 sm:$0xff]   ;;  %v9136_v53 = vld [vmem:[#allocation5 + $0xf8c] ss:$16 sps:$4 sm:$0xff]  }
 0x30e   : > { %5320 = vmatprep.subr.bf16.mxu0 %v9067_v13  ;;  %5307 = vmatprep.mubr.bf16.mxu0 %v10410_v4  ;;  %v9133_v13 = vld [vmem:[#allocation5 + $0x1384] ss:$16 sps:$4 sm:$0xff]  }
 0x30f   : > { %5784 = vmatprep.mubr.bf16.mxu1 %v10362_v22  ;;  %v9077_v22 = vld [vmem:[#allocation5 + $0x1260] ss:$16 sps:$4 sm:$0xff]  }
 0x310   : > { %5798 = vmatpush1.bf16.msra.mxu1 %v9068_v24  ;;  %v9134_v24 = vld [vmem:[#allocation5 + $0xf88] ss:$16 sps:$4 sm:$0xff]  }
 0x311   : > { %5321 = vmatpush1.bf16.msra.mxu0 %v9065_v23  ;;  %5799 = vmatprep.subr.bf16.mxu1 %v9076_v36  ;;  %v9131_v23 = vld [vmem:[#allocation5 + $0x1380] ss:$16 sps:$4 sm:$0xff]   ;;  %v9140_v36 = vld [vmem:[#allocation5 + $0xfa8] ss:$16 sps:$4 sm:$0xff]  }
 0x312   : > { %5322 = vmatprep.subr.bf16.mxu0 %v9073_v27  ;;  %v9137_v27 = vld [vmem:[#allocation5 + $0x13a0] ss:$16 sps:$4 sm:$0xff]  }
 0x313   : > { %5785 = vmatmul.mubr.bf16.gmra.mrb[12].mxu1 %v10372_v28  ;;  %v9094_v28 = vld [vmem:[#allocation5 + $0xeac] ss:$16 sps:$4 sm:$0xff]  }
 0x314   : > { %5308 = vmatmul.mubr.bf16.gmra.mrb[4].mxu0 %v10418_v29  ;;  %5800 = vmatpush1.bf16.msra.mxu1 %v9074_v31  ;;  %v9146_v31 = vld [vmem:[#allocation5 + $0xfc8] ss:$16 sps:$4 sm:$0xff]  }
 0x315   : > { %5323 = vmatpush1.bf16.msra.mxu0 %v9071_v11  ;;  %5801 = vmatprep.subr.bf16.mxu1 %v9082_v21  ;;  %v9143_v11 = vld [vmem:[#allocation5 + $0x13c0] ss:$16 sps:$4 sm:$0xff]   ;;  %v9154_v21 = vld [vmem:[#allocation5 + $0xfec] ss:$16 sps:$4 sm:$0xff]  }
 0x316   : > { %5324 = vmatprep.subr.bf16.mxu0 %v9079_v33  ;;  %5350 = vmatprep.mubr.bf16.mxu0 %v10422_v34  ;;  %v9151_v33 = vld [vmem:[#allocation5 + $0x13e4] ss:$16 sps:$4 sm:$0xff]  }
 0x317   : > { %5827 = vmatprep.mubr.bf16.mxu1 %v10374_v32  ;;  %v9098_v32 = vld [vmem:[#allocation5 + $0xec8] ss:$16 sps:$4 sm:$0xff]  }
 0x318   : > { %5802 = vmatpush1.bf16.msra.mxu1 %v9080_v35  ;;  %v9152_v35 = vld [vmem:[#allocation5 + $0xfe8] ss:$16 sps:$4 sm:$0xff]  }
 0x319   : > { %5325 = vmatpush1.bf16.msra.mxu0 %v9077_v22  ;;  %5803 = vmatprep.subr.bf16.mxu1 %v9088_v56  ;;  %v9149_v22 = vld [vmem:[#allocation5 + $0x13e0] ss:$16 sps:$4 sm:$0xff]  }
 0x31a   : > { %5326 = vmatprep.subr.bf16.mxu0 %v9085_v37  ;;  %v481_v37 = vld [vmem:[%s10176_s25 + $0x90] sm:$0xff]  ;;  %v503_v56 = vld [vmem:[%s10176_s25 + $0x140] sm:$0xff] }
 0x31c   : > { %5804 = vmatpush1.bf16.msra.mxu1 %v9086_v26  ;;  %v9160_v26 = vld [vmem:[#allocation5 + $0x100c] ss:$16 sps:$4 sm:$0xff]  }
 0x31d   : > { %5327 = vmatpush1.bf16.msra.mxu0 %v9083_v39  ;;  %5805 = vmatprep.subr.bf16.mxu1 %v9094_v28  ;;  %v9157_v39 = vld [vmem:[#allocation5 + $0x1404] ss:$16 sps:$4 sm:$0xff]   ;;  %v526_v28 = vld [vmem:[%s10176_s25 + $0x1f8] sm:$0xff] }
 0x31e   : > { %5328 = vmatprep.subr.bf16.mxu0 %v9091_v43  ;;  %v10430_v43 = vpack.c.bf16 %v503_v56, %v481_v37  ;;  %v9217_v37 = vld [vmem:[#allocation5 + $0x1544] ss:$16 sps:$4 sm:$0xff]   ;;  %v9220_v56 = vld [vmem:[#allocation5 + $0x114c] ss:$16 sps:$4 sm:$0xff]  }
 0x320   : > { %5806 = vmatpush1.bf16.msra.mxu1 %v9092_v49  ;;  %v9155_v49 = vld [vmem:[#allocation5 + $0x1400] ss:$16 sps:$4 sm:$0xff]  }
 0x321   : > { %5329 = vmatpush1.bf16.msra.mxu0 %v9089_v61  ;;  %5807 = vmatprep.subr.bf16.mxu1 %v9100_v30  ;;  %v548_v61 = vld [vmem:[%s10176_s25 + $0x2a8] sm:$0xff]  ;;  %v9163_v30 = vld [vmem:[#allocation5 + $0x1424] ss:$16 sps:$4 sm:$0xff]  }
 0x322   : > { %5330 = vmatprep.subr.bf16.mxu0 %v9097_v52  ;;  %v9158_v52 = vld [vmem:[#allocation5 + $0x1008] ss:$16 sps:$4 sm:$0xff]  }
 0x324   : > { %5808 = vmatpush1.bf16.msra.mxu1 %v9098_v32  ;;  %v10434_v32 = vpack.c.bf16 %v548_v61, %v526_v28  ;;  %v9223_v28 = vld [vmem:[#allocation5 + $0x1564] ss:$16 sps:$4 sm:$0xff]   ;;  %v9226_v61 = vld [vmem:[#allocation5 + $0x116c] ss:$16 sps:$4 sm:$0xff]  }
 0x325   : > { %5331 = vmatpush1.bf16.msra.mxu0 %v9095_v12  ;;  %5809 = vmatprep.subr.bf16.mxu1 %v9106_v59  ;;  %v9166_v12 = vld [vmem:[#allocation5 + $0x102c] ss:$16 sps:$4 sm:$0xff]   ;;  %v9164_v59 = vld [vmem:[#allocation5 + $0x1028] ss:$16 sps:$4 sm:$0xff]  }
 0x326   : > { %5332 = vmatprep.subr.bf16.mxu0 %v9103_v58  ;;  %v9161_v58 = vld [vmem:[#allocation5 + $0x1420] ss:$16 sps:$4 sm:$0xff]  }
 0x328   : > { %5810 = vmatpush1.bf16.msra.mxu1 %v9104_v40  ;;  %v547_v40 = vld [vmem:[%s10176_s25 + $0x2a0] sm:$0xff] }
 0x329   : > { %5333 = vmatpush1.bf16.msra.mxu0 %v9101_v63  ;;  %5811 = vmatprep.subr.bf16.mxu1 %v9112_v62  ;;  %v525_v63 = vld [vmem:[%s10176_s25 + $0x1f0] sm:$0xff]  ;;  %v9172_v62 = vld [vmem:[#allocation5 + $0x104c] ss:$16 sps:$4 sm:$0xff]  }
 0x32a   : > { %5334 = vmatprep.subr.bf16.mxu0 %v9109_v1  ;;  %v9169_v1 = vld [vmem:[#allocation5 + $0x1444] ss:$16 sps:$4 sm:$0xff]  }
 0x32c   : > { %5812 = vmatpush1.bf16.msra.mxu1 %v9110_v38  ;;  %v484_v38 = vld [vmem:[%s10176_s25 + $0xa8] sm:$0xff] }
 0x32d   : > { %5335 = vmatpush1.bf16.msra.mxu0 %v9107_v3  ;;  %5813 = vmatprep.subr.bf16.mxu1 %v9118_v2  ;;  %v10442_v3 = vpack.c.bf16 %v547_v40, %v525_v63  ;;  %v9170_v2 = vld [vmem:[#allocation5 + $0x1048] ss:$16 sps:$4 sm:$0xff]   ;;  %v9235_v63 = vld [vmem:[#allocation5 + $0x15a4] ss:$16 sps:$4 sm:$0xff]   ;;  %v9238_v40 = vld [vmem:[#allocation5 + $0x11ac] ss:$16 sps:$4 sm:$0xff]  }
 0x32e   : > { %5336 = vmatprep.subr.bf16.mxu0 %v9115_v41  ;;  %v506_v41 = vld [vmem:[%s10176_s25 + $0x158] sm:$0xff] }
 0x330   : > { %5814 = vmatpush1.bf16.msra.mxu1 %v9116_v54  ;;  %v9178_v54 = vld [vmem:[#allocation5 + $0x106c] ss:$16 sps:$4 sm:$0xff]  }
 0x331   : > { %5337 = vmatpush1.bf16.msra.mxu0 %v9113_v6  ;;  %5815 = vmatprep.subr.bf16.mxu1 %v9124_v8  ;;  %v9175_v6 = vld [vmem:[#allocation5 + $0x1464] ss:$16 sps:$4 sm:$0xff]   ;;  %v9176_v8 = vld [vmem:[#allocation5 + $0x1068] ss:$16 sps:$4 sm:$0xff]  }
 0x332   : > { %5338 = vmatprep.subr.bf16.mxu0 %v9121_v7  ;;  %v10446_v7 = vpack.c.bf16 %v506_v41, %v484_v38  ;;  %v9241_v38 = vld [vmem:[#allocation5 + $0x15c4] ss:$16 sps:$4 sm:$0xff]   ;;  %v9244_v41 = vld [vmem:[#allocation5 + $0x11cc] ss:$16 sps:$4 sm:$0xff]  }
 0x334   : > { %5816 = vmatpush1.bf16.msra.mxu1 %v9122_v55  ;;  %v9184_v55 = vld [vmem:[#allocation5 + $0x108c] ss:$16 sps:$4 sm:$0xff]  }
 0x335   : > { %5339 = vmatpush1.bf16.msra.mxu0 %v9119_v15  ;;  %5817 = vmatprep.subr.bf16.mxu1 %v9130_v17  ;;  %v9181_v15 = vld [vmem:[#allocation5 + $0x1484] ss:$16 sps:$4 sm:$0xff]   ;;  %v9182_v17 = vld [vmem:[#allocation5 + $0x1088] ss:$16 sps:$4 sm:$0xff]  }
 0x336   : > { %5340 = vmatprep.subr.bf16.mxu0 %v9127_v16  ;;  %v9179_v16 = vld [vmem:[#allocation5 + $0x1480] ss:$16 sps:$4 sm:$0xff]  }
 0x338   : > { %5818 = vmatpush1.bf16.msra.mxu1 %v9128_v20  ;;  %v9185_v20 = vld [vmem:[#allocation5 + $0x14a0] ss:$16 sps:$4 sm:$0xff]  }
 0x339   : > { %5341 = vmatpush1.bf16.msra.mxu0 %v9125_v19  ;;  %5819 = vmatprep.subr.bf16.mxu1 %v9136_v53  ;;  %v9187_v19 = vld [vmem:[#allocation5 + $0x14a4] ss:$16 sps:$4 sm:$0xff]  }
 0x33a   : > { %5342 = vmatprep.subr.bf16.mxu0 %v9133_v13  ;;  %v9188_v13 = vld [vmem:[#allocation5 + $0x10a8] ss:$16 sps:$4 sm:$0xff]   ;;  %v9193_v53 = vld [vmem:[#allocation5 + $0x14c4] ss:$16 sps:$4 sm:$0xff]  }
 0x33c   : > { %5820 = vmatpush1.bf16.msra.mxu1 %v9134_v24  ;;  %v9191_v24 = vld [vmem:[#allocation5 + $0x14c0] ss:$16 sps:$4 sm:$0xff]  }
 0x33d   : > { %5343 = vmatpush1.bf16.msra.mxu0 %v9131_v23  ;;  %5821 = vmatprep.subr.bf16.mxu1 %v9142_v60  ;;  %v9196_v23 = vld [vmem:[#allocation5 + $0x10cc] ss:$16 sps:$4 sm:$0xff]  }
 0x33e   : > { %5344 = vmatprep.subr.bf16.mxu0 %v9139_v25  ;;  %v9199_v25 = vld [vmem:[#allocation5 + $0x14e4] ss:$16 sps:$4 sm:$0xff]   ;;  %v9202_v60 = vld [vmem:[#allocation5 + $0x10ec] ss:$16 sps:$4 sm:$0xff]  }
 0x340   : > { %5822 = vmatpush1.bf16.msra.mxu1 %v9140_v36  ;;  %v9200_v36 = vld [vmem:[#allocation5 + $0x10e8] ss:$16 sps:$4 sm:$0xff]  }
 0x341   : > { %5345 = vmatpush1.bf16.msra.mxu0 %v9137_v27  ;;  %5823 = vmatprep.subr.bf16.mxu1 %v9148_v44  ;;  %v9197_v27 = vld [vmem:[#allocation5 + $0x14e0] ss:$16 sps:$4 sm:$0xff]   ;;  %v9208_v44 = vld [vmem:[#allocation5 + $0x110c] ss:$16 sps:$4 sm:$0xff]  }
 0x342   : > { %5346 = vmatprep.subr.bf16.mxu0 %v9145_v14  ;;  %v9205_v14 = vld [vmem:[#allocation5 + $0x1504] ss:$16 sps:$4 sm:$0xff]  }
 0x344   : > { %5824 = vmatpush1.bf16.msra.mxu1 %v9146_v31  ;;  %v9206_v31 = vld [vmem:[#allocation5 + $0x1108] ss:$16 sps:$4 sm:$0xff]  }
 0x345   : > { %5347 = vmatpush1.bf16.msra.mxu0 %v9143_v11  ;;  %5825 = vmatprep.subr.bf16.mxu1 %v9154_v21  ;;  %v9203_v11 = vld [vmem:[#allocation5 + $0x1500] ss:$16 sps:$4 sm:$0xff]   ;;  %v9214_v21 = vld [vmem:[#allocation5 + $0x112c] ss:$16 sps:$4 sm:$0xff]  }
 0x346   : > { %5348 = vmatprep.subr.bf16.mxu0 %v9151_v33  ;;  %v9211_v33 = vld [vmem:[#allocation5 + $0x1524] ss:$16 sps:$4 sm:$0xff]  }
 0x348   : > { %5826 = vmatpush1.bf16.msra.mxu1 %v9152_v35  ;;  %v9212_v35 = vld [vmem:[#allocation5 + $0x1128] ss:$16 sps:$4 sm:$0xff]  }
 0x349   : > { %5349 = vmatpush1.bf16.msra.mxu0 %v9149_v22  ;;  %5848 = vmatprep.subr.bf16.mxu1 %v9160_v26  ;;  %v9209_v22 = vld [vmem:[#allocation5 + $0x1520] ss:$16 sps:$4 sm:$0xff]   ;;  %v9218_v26 = vld [vmem:[#allocation5 + $0x1148] ss:$16 sps:$4 sm:$0xff]  }
 0x34a   : > { %5371 = vmatprep.subr.bf16.mxu0 %v9157_v39  ;;  %v9215_v39 = vld [vmem:[#allocation5 + $0x1540] ss:$16 sps:$4 sm:$0xff]  }
 0x34b   : > { %5828 = vmatmul.mubr.bf16.vlgmr.msra.gmra.mrb[8].mxu1 %v10384_v42  ;;  %v9167_v42 = vld [vmem:[#allocation5 + $0x1440] ss:$16 sps:$4 sm:$0xff]  }
 0x34c   : > { %5351 = vmatmul.mubr.bf16.vlgmr.msra.gmra.mrb[0].mxu0 %v10430_v43  ;;  %5849 = vmatpush1.bf16.msra.mxu1 %v9158_v52  ;;  %v9224_v52 = vld [vmem:[#allocation5 + $0x1168] ss:$16 sps:$4 sm:$0xff]  }
 0x34d   : > { %5372 = vmatpush1.bf16.msra.mxu0 %v9155_v49  ;;  %5850 = vmatprep.subr.bf16.mxu1 %v9166_v12  ;;  %v9221_v49 = vld [vmem:[#allocation5 + $0x1560] ss:$16 sps:$4 sm:$0xff]   ;;  %v9232_v12 = vld [vmem:[#allocation5 + $0x118c] ss:$16 sps:$4 sm:$0xff]  }
 0x34e   : > { %5373 = vmatprep.subr.bf16.mxu0 %v9163_v30  ;;  %5360 = vmatprep.mubr.bf16.mxu0 %v10434_v32  ;;  %v9229_v30 = vld [vmem:[#allocation5 + $0x1584] ss:$16 sps:$4 sm:$0xff]  }
 0x34f   : > { %5837 = vmatprep.mubr.bf16.mxu1 %v10386_v57  ;;  %v9173_v57 = vld [vmem:[#allocation5 + $0x1460] ss:$16 sps:$4 sm:$0xff]  }
 0x350   : > { %5851 = vmatpush1.bf16.msra.mxu1 %v9164_v59  ;;  %v9230_v59 = vld [vmem:[#allocation5 + $0x1188] ss:$16 sps:$4 sm:$0xff]  }
 0x351   : > { %5374 = vmatpush1.bf16.msra.mxu0 %v9161_v58  ;;  %5852 = vmatprep.subr.bf16.mxu1 %v9172_v62  ;;  %v9227_v58 = vld [vmem:[#allocation5 + $0x1580] ss:$16 sps:$4 sm:$0xff]   ;;  %v9236_v62 = vld [vmem:[#allocation5 + $0x11a8] ss:$16 sps:$4 sm:$0xff]  }
 0x352   : > { %5375 = vmatprep.subr.bf16.mxu0 %v9169_v1  ;;  %v9233_v1 = vld [vmem:[#allocation5 + $0x15a0] ss:$16 sps:$4 sm:$0xff]  }
 0x353   : > { %5838 = vmatmul.mubr.bf16.gmra.mrb[12].mxu1 %v10396_v50  ;;  %v9190_v50 = vld [vmem:[#allocation5 + $0x10ac] ss:$16 sps:$4 sm:$0xff]  }
 0x354   : > { %5361 = vmatmul.mubr.bf16.gmra.mrb[4].mxu0 %v10442_v3  ;;  %5853 = vmatpush1.bf16.msra.mxu1 %v9170_v2  ;;  %v9242_v2 = vld [vmem:[#allocation5 + $0x11c8] ss:$16 sps:$4 sm:$0xff]  }
 0x355   : > { %5376 = vmatpush1.bf16.msra.mxu0 %v9167_v42  ;;  %5854 = vmatprep.subr.bf16.mxu1 %v9178_v54  ;;  %v9239_v42 = vld [vmem:[#allocation5 + $0x15c0] ss:$16 sps:$4 sm:$0xff]   ;;  %v9250_v54 = vld [vmem:[#allocation5 + $0x11ec] ss:$16 sps:$4 sm:$0xff]  }
 0x356   : > { %5377 = vmatprep.subr.bf16.mxu0 %v9175_v6  ;;  %5403 = vmatprep.mubr.bf16.mxu0 %v10446_v7  ;;  %v9247_v6 = vld [vmem:[#allocation5 + $0x15e4] ss:$16 sps:$4 sm:$0xff]  }
 0x357   : > { %5880 = vmatprep.mubr.bf16.mxu1 %v10398_v5  ;;  %v9194_v5 = vld [vmem:[#allocation5 + $0x10c8] ss:$16 sps:$4 sm:$0xff]  }
 0x358   : > { %5855 = vmatpush1.bf16.msra.mxu1 %v9176_v8  ;;  %v9248_v8 = vld [vmem:[#allocation5 + $0x11e8] ss:$16 sps:$4 sm:$0xff]  }
 0x359   : > { %5378 = vmatpush1.bf16.msra.mxu0 %v9173_v57  ;;  %5856 = vmatprep.subr.bf16.mxu1 %v9184_v55  ;;  %v9245_v57 = vld [vmem:[#allocation5 + $0x15e0] ss:$16 sps:$4 sm:$0xff]  }
 0x35a   : > { %5379 = vmatprep.subr.bf16.mxu0 %v9181_v15  ;;  %v483_v15 = vld [vmem:[%s10176_s25 + $0xa0] sm:$0xff]  ;;  %v505_v55 = vld [vmem:[%s10176_s25 + $0x150] sm:$0xff] }
 0x35c   : > { %5857 = vmatpush1.bf16.msra.mxu1 %v9182_v17  ;;  %v528_v17 = vld [vmem:[%s10176_s25 + $0x208] sm:$0xff] }
 0x35d   : > { %5380 = vmatpush1.bf16.msra.mxu0 %v9179_v16  ;;  %5858 = vmatprep.subr.bf16.mxu1 %v9190_v50  ;;  %v9253_v16 = vld [vmem:[#allocation5 + $0x120c] ss:$16 sps:$4 sm:$0xff]   ;;  %v10456_v50 = vpack.c.bf16 %v505_v55, %v483_v15 }
 0x35e   : > { %5381 = vmatprep.subr.bf16.mxu0 %v9187_v19  ;;  %v550_v19 = vld [vmem:[%s10176_s25 + $0x2b8] sm:$0xff] }
 0x35f   : > { %v9289_v15 = vld [vmem:[#allocation5 + $0x138c] ss:$16 sps:$4 sm:$0xff]  }
 0x360   : > { %5859 = vmatpush1.bf16.msra.mxu1 %v9188_v13  ;;  %v10458_v13 = vpack.c.bf16 %v550_v19, %v528_v17  ;;  %v9374_v55 = vld [vmem:[#allocation8 + $0x90] ss:$8 sps:$4 sm:$0xff]   ;;  %v9287_v17 = vld [vmem:[#allocation5 + $0x1388] ss:$16 sps:$4 sm:$0xff]  }
 0x361   : > { %5382 = vmatpush1.bf16.msra.mxu0 %v9185_v20  ;;  %5860 = vmatprep.subr.bf16.mxu1 %v9196_v23  ;;  %v9251_v20 = vld [vmem:[#allocation5 + $0x1208] ss:$16 sps:$4 sm:$0xff]   ;;  %v9292_v19 = vld [vmem:[#allocation5 + $0x13ac] ss:$16 sps:$4 sm:$0xff]  }
 0x362   : > { %5383 = vmatprep.subr.bf16.mxu0 %v9193_v53  ;;  %v9256_v53 = vld [vmem:[#allocation5 + $0x122c] ss:$16 sps:$4 sm:$0xff]   ;;  %v9254_v23 = vld [vmem:[#allocation5 + $0x1228] ss:$16 sps:$4 sm:$0xff]  }
 0x364   : > { %5861 = vmatpush1.bf16.msra.mxu1 %v9194_v5  ;;  %v549_v5 = vld [vmem:[%s10176_s25 + $0x2b0] sm:$0xff] }
 0x365   : > { %5384 = vmatpush1.bf16.msra.mxu0 %v9191_v24  ;;  %5862 = vmatprep.subr.bf16.mxu1 %v9202_v60  ;;  %v527_v24 = vld [vmem:[%s10176_s25 + $0x200] sm:$0xff] }
 0x366   : > { %5385 = vmatprep.subr.bf16.mxu0 %v9199_v25  ;;  %v9259_v25 = vld [vmem:[#allocation5 + $0x124c] ss:$16 sps:$4 sm:$0xff]   ;;  %v10466_v60 = vpack.c.bf16 %v549_v5, %v527_v24 }
 0x367   : > { %v9295_v24 = vld [vmem:[#allocation5 + $0x13cc] ss:$16 sps:$4 sm:$0xff]  }
 0x368   : > { %5863 = vmatpush1.bf16.msra.mxu1 %v9200_v36  ;;  %v9262_v36 = vld [vmem:[#allocation5 + $0x126c] ss:$16 sps:$4 sm:$0xff]  }
 0x369   : > { %5386 = vmatpush1.bf16.msra.mxu0 %v9197_v27  ;;  %5864 = vmatprep.subr.bf16.mxu1 %v9208_v44  ;;  %v9257_v27 = vld [vmem:[#allocation5 + $0x1248] ss:$16 sps:$4 sm:$0xff]   ;;  %v9380_v5 = vld [vmem:[#allocation8 + $0xb0] ss:$8 sps:$4 sm:$0xff]  }
 0x36a   : > { %5387 = vmatprep.subr.bf16.mxu0 %v9205_v14  ;;  %v9349_v14 = vld [vmem:[#allocation8 + $0x4] ss:$8 sps:$4 sm:$0xff]  }
 0x36b   : > { %v9260_v44 = vld [vmem:[#allocation5 + $0x1268] ss:$16 sps:$4 sm:$0xff]  }
 0x36c   : > { %5865 = vmatpush1.bf16.msra.mxu1 %v9206_v31  ;;  %v9265_v31 = vld [vmem:[#allocation5 + $0x128c] ss:$16 sps:$4 sm:$0xff]  }
 0x36d   : > { %5388 = vmatpush1.bf16.msra.mxu0 %v9203_v11  ;;  %5866 = vmatprep.subr.bf16.mxu1 %v9214_v21  ;;  %v9352_v11 = vld [vmem:[#allocation8 + $0x14] ss:$8 sps:$4 sm:$0xff]  }
 0x36e   : > { %5389 = vmatprep.subr.bf16.mxu0 %v9211_v33  ;;  %v9355_v33 = vld [vmem:[#allocation8 + $0x24] ss:$8 sps:$4 sm:$0xff]  }
 0x36f   : > { %v9263_v21 = vld [vmem:[#allocation5 + $0x1288] ss:$16 sps:$4 sm:$0xff]  }
 0x370   : > { %5867 = vmatpush1.bf16.msra.mxu1 %v9212_v35  ;;  %v9358_v35 = vld [vmem:[#allocation8 + $0x34] ss:$8 sps:$4 sm:$0xff]  }
 0x371   : > { %5390 = vmatpush1.bf16.msra.mxu0 %v9209_v22  ;;  %5868 = vmatprep.subr.bf16.mxu1 %v9220_v56  ;;  %v9268_v22 = vld [vmem:[#allocation5 + $0x12ac] ss:$16 sps:$4 sm:$0xff]  }
 0x372   : > { %5391 = vmatprep.subr.bf16.mxu0 %v9217_v37  ;;  %v9266_v37 = vld [vmem:[#allocation5 + $0x12a8] ss:$16 sps:$4 sm:$0xff]   ;;  %v9356_v56 = vld [vmem:[#allocation8 + $0x30] ss:$8 sps:$4 sm:$0xff]  }
 0x374   : > { %5869 = vmatpush1.bf16.msra.mxu1 %v9218_v26  ;;  %v9269_v26 = vld [vmem:[#allocation5 + $0x12c8] ss:$16 sps:$4 sm:$0xff]  }
 0x375   : > { %5392 = vmatpush1.bf16.msra.mxu0 %v9215_v39  ;;  %5870 = vmatprep.subr.bf16.mxu1 %v9226_v61  ;;  %v9361_v39 = vld [vmem:[#allocation8 + $0x44] ss:$8 sps:$4 sm:$0xff]   ;;  %v9359_v61 = vld [vmem:[#allocation8 + $0x40] ss:$8 sps:$4 sm:$0xff]  }
 0x376   : > { %5393 = vmatprep.subr.bf16.mxu0 %v9223_v28  ;;  %v9274_v28 = vld [vmem:[#allocation5 + $0x12ec] ss:$16 sps:$4 sm:$0xff]  }
 0x378   : > { %5871 = vmatpush1.bf16.msra.mxu1 %v9224_v52  ;;  %v9272_v52 = vld [vmem:[#allocation5 + $0x12e8] ss:$16 sps:$4 sm:$0xff]  }
 0x379   : > { %5394 = vmatpush1.bf16.msra.mxu0 %v9221_v49  ;;  %5872 = vmatprep.subr.bf16.mxu1 %v9232_v12  ;;  %v9364_v49 = vld [vmem:[#allocation8 + $0x54] ss:$8 sps:$4 sm:$0xff]   ;;  %v9362_v12 = vld [vmem:[#allocation8 + $0x50] ss:$8 sps:$4 sm:$0xff]  }
 0x37a   : > { %5395 = vmatprep.subr.bf16.mxu0 %v9229_v30  ;;  %v9277_v30 = vld [vmem:[#allocation5 + $0x130c] ss:$16 sps:$4 sm:$0xff]  }
 0x37c   : > { %5873 = vmatpush1.bf16.msra.mxu1 %v9230_v59  ;;  %v9275_v59 = vld [vmem:[#allocation5 + $0x1308] ss:$16 sps:$4 sm:$0xff]  }
 0x37d   : > { %5396 = vmatpush1.bf16.msra.mxu0 %v9227_v58  ;;  %5874 = vmatprep.subr.bf16.mxu1 %v9238_v40  ;;  %v9367_v58 = vld [vmem:[#allocation8 + $0x64] ss:$8 sps:$4 sm:$0xff]   ;;  %v9365_v40 = vld [vmem:[#allocation8 + $0x60] ss:$8 sps:$4 sm:$0xff]  }
 0x37e   : > { %5397 = vmatprep.subr.bf16.mxu0 %v9235_v63  ;;  %v9280_v63 = vld [vmem:[#allocation5 + $0x132c] ss:$16 sps:$4 sm:$0xff]  }
 0x380   : > { %5875 = vmatpush1.bf16.msra.mxu1 %v9236_v62  ;;  %v9278_v62 = vld [vmem:[#allocation5 + $0x1328] ss:$16 sps:$4 sm:$0xff]  }
 0x381   : > { %5398 = vmatpush1.bf16.msra.mxu0 %v9233_v1  ;;  %5876 = vmatprep.subr.bf16.mxu1 %v9244_v41  ;;  %v9370_v1 = vld [vmem:[#allocation8 + $0x74] ss:$8 sps:$4 sm:$0xff]   ;;  %v9368_v41 = vld [vmem:[#allocation8 + $0x70] ss:$8 sps:$4 sm:$0xff]  }
 0x382   : > { %5399 = vmatprep.subr.bf16.mxu0 %v9241_v38  ;;  %v9283_v38 = vld [vmem:[#allocation5 + $0x134c] ss:$16 sps:$4 sm:$0xff]  }
 0x384   : > { %5877 = vmatpush1.bf16.msra.mxu1 %v9242_v2  ;;  %v9281_v2 = vld [vmem:[#allocation5 + $0x1348] ss:$16 sps:$4 sm:$0xff]  }
 0x385   : > { %5400 = vmatpush1.bf16.msra.mxu0 %v9239_v42  ;;  %5878 = vmatprep.subr.bf16.mxu1 %v9250_v54  ;;  %v9373_v42 = vld [vmem:[#allocation8 + $0x84] ss:$8 sps:$4 sm:$0xff]   ;;  %v9371_v54 = vld [vmem:[#allocation8 + $0x80] ss:$8 sps:$4 sm:$0xff]  }
 0x386   : > { %5401 = vmatprep.subr.bf16.mxu0 %v9247_v6  ;;  %v9286_v6 = vld [vmem:[#allocation5 + $0x136c] ss:$16 sps:$4 sm:$0xff]  }
 0x388   : > { %5879 = vmatpush1.bf16.msra.mxu1 %v9248_v8  ;;  %v9284_v8 = vld [vmem:[#allocation5 + $0x1368] ss:$16 sps:$4 sm:$0xff]  }
 0x389   : > { %5402 = vmatpush1.bf16.msra.mxu0 %v9245_v57  ;;  %5901 = vmatprep.subr.bf16.mxu1 %v9253_v16  ;;  %v9376_v57 = vld [vmem:[#allocation8 + $0x94] ss:$8 sps:$4 sm:$0xff]   ;;  %v9379_v16 = vld [vmem:[#allocation8 + $0xa4] ss:$8 sps:$4 sm:$0xff]  }
 0x38a   : > { %6427 = vmatprep.subr.bf16.mxu0 %v9349_v14  ;;  %v9388_v14 = vld [vmem:[#allocation8 + $0xd4] ss:$8 sps:$4 sm:$0xff]  }
 0x38b   : > { %5881 = vmatmul.mubr.bf16.vlgmr.msra.gmra.mrb[8].mxu1 %v10406_v0  ;;  %v9347_v0 = vld [vmem:[#allocation8] ss:$8 sps:$4 sm:$0xff]  }
 0x38c   : > { %5404 = vmatmul.mubr.bf16.vlgmr.msra.gmra.mrb[0].mxu0 %v10456_v50  ;;  %5902 = vmatpush1.bf16.msra.mxu1 %v9251_v20  ;;  %v9377_v20 = vld [vmem:[#allocation8 + $0xa0] ss:$8 sps:$4 sm:$0xff]  }
 0x38d   : > { %5413 = vmatprep.mubr.bf16.mxu0 %v10458_v13  ;;  %5903 = vmatprep.subr.bf16.mxu1 %v9256_v53  ;;  %v9382_v53 = vld [vmem:[#allocation8 + $0xb4] ss:$8 sps:$4 sm:$0xff]  }
 0x38e   : > { %5890 = vmatprep.mubr.bf16.mxu1 %v10410_v4  ;;  %6428 = vmatpush1.bf16.msra.mxu0 %v9347_v0  ;;  %v9350_v4 = vld [vmem:[#allocation8 + $0x10] ss:$8 sps:$4 sm:$0xff]   ;;  %v9383_v0 = vld [vmem:[#allocation8 + $0xc0] ss:$8 sps:$4 sm:$0xff]  }
 0x38f   : > { %6429 = vmatprep.subr.bf16.mxu0 %v9352_v11  ;;  %v9301_v11 = vld [vmem:[#allocation5 + $0x140c] ss:$16 sps:$4 sm:$0xff]  }
 0x390   : > { %5904 = vmatpush1.bf16.msra.mxu1 %v9254_v23  ;;  %v9290_v23 = vld [vmem:[#allocation5 + $0x13a8] ss:$16 sps:$4 sm:$0xff]  }
 0x391   : > { %5905 = vmatprep.subr.bf16.mxu1 %v9259_v25  ;;  %v9385_v25 = vld [vmem:[#allocation8 + $0xc4] ss:$8 sps:$4 sm:$0xff]  }
 0x392   : > { %6430 = vmatpush1.bf16.msra.mxu0 %v9350_v4  ;;  %v9299_v4 = vld [vmem:[#allocation5 + $0x1408] ss:$16 sps:$4 sm:$0xff]  }
 0x393   : > { %5891 = vmatmul.mubr.bf16.gmra.mrb[12].mxu1 %v10418_v29  ;;  %v9353_v29 = vld [vmem:[#allocation8 + $0x20] ss:$8 sps:$4 sm:$0xff]   ;;  %6431 = vmatprep.subr.bf16.mxu0 %v9355_v33 }
 0x394   : > { %5414 = vmatmul.mubr.bf16.gmra.mrb[4].mxu0 %v10466_v60  ;;  %5906 = vmatpush1.bf16.msra.mxu1 %v9257_v27  ;;  %v9293_v27 = vld [vmem:[#allocation5 + $0x13c8] ss:$16 sps:$4 sm:$0xff]   ;;  %v9304_v33 = vld [vmem:[#allocation5 + $0x142c] ss:$16 sps:$4 sm:$0xff]  }
 0x395   : > { %5933 = vmatprep.mubr.bf16.mxu1 %v10422_v34  ;;  %5907 = vmatprep.subr.bf16.mxu1 %v9262_v36  ;;  %v9271_v34 = vld [vmem:[#allocation5 + $0x12cc] ss:$16 sps:$4 sm:$0xff]  }
 0x396   : > { %6432 = vmatpush1.bf16.msra.mxu0 %v9353_v29  ;;  %v9298_v36 = vld [vmem:[#allocation5 + $0x13ec] ss:$16 sps:$4 sm:$0xff]   ;;  %v9305_v29 = vld [vmem:[#allocation5 + $0x1448] ss:$16 sps:$4 sm:$0xff]  }
 0x397   : > { %6433 = vmatprep.subr.bf16.mxu0 %v9358_v35  ;;  %v9310_v35 = vld [vmem:[#allocation5 + $0x146c] ss:$16 sps:$4 sm:$0xff]  }
 0x398   : > { %5908 = vmatpush1.bf16.msra.mxu1 %v9260_v44  ;;  %v9296_v44 = vld [vmem:[#allocation5 + $0x13e8] ss:$16 sps:$4 sm:$0xff]  }
 0x399   : > { %5909 = vmatprep.subr.bf16.mxu1 %v9265_v31  ;;  %v9386_v31 = vld [vmem:[#allocation8 + $0xd0] ss:$8 sps:$4 sm:$0xff]  }
 0x39a   : > { %6434 = vmatpush1.bf16.msra.mxu0 %v9356_v56  ;;  %v9316_v56 = vld [vmem:[#allocation5 + $0x14ac] ss:$16 sps:$4 sm:$0xff]  }
 0x39b   : > { %6435 = vmatprep.subr.bf16.mxu0 %v9361_v39  ;;  %v9319_v39 = vld [vmem:[#allocation5 + $0x14cc] ss:$16 sps:$4 sm:$0xff]  }
 0x39c   : > { %5910 = vmatpush1.bf16.msra.mxu1 %v9263_v21  ;;  %v9302_v21 = vld [vmem:[#allocation5 + $0x1428] ss:$16 sps:$4 sm:$0xff]  }
 0x39d   : > { %5911 = vmatprep.subr.bf16.mxu1 %v9268_v22  ;;  %v9307_v22 = vld [vmem:[#allocation5 + $0x144c] ss:$16 sps:$4 sm:$0xff]  }
 0x39e   : > { %6436 = vmatpush1.bf16.msra.mxu0 %v9359_v61  ;;  %v9389_v61 = vld [vmem:[#allocation8 + $0xe0] ss:$8 sps:$4 sm:$0xff]  }
 0x39f   : > { %6437 = vmatprep.subr.bf16.mxu0 %v9364_v49  ;;  %v9394_v49 = vld [vmem:[#allocation8 + $0xf4] ss:$8 sps:$4 sm:$0xff]  }
 0x3a0   : > { %5912 = vmatpush1.bf16.msra.mxu1 %v9266_v37  ;;  %v9308_v37 = vld [vmem:[#allocation5 + $0x1468] ss:$16 sps:$4 sm:$0xff]  }
 0x3a1   : > { %5913 = vmatprep.subr.bf16.mxu1 %v9271_v34  ;;  %v9313_v34 = vld [vmem:[#allocation5 + $0x148c] ss:$16 sps:$4 sm:$0xff]  }
 0x3a2   : > { %6438 = vmatpush1.bf16.msra.mxu0 %v9362_v12  ;;  %v9323_v12 = vld [vmem:[#allocation5 + $0x1508] ss:$16 sps:$4 sm:$0xff]  }
 0x3a3   : > { %6439 = vmatprep.subr.bf16.mxu0 %v9367_v58  ;;  %v9328_v58 = vld [vmem:[#allocation5 + $0x152c] ss:$16 sps:$4 sm:$0xff]  }
 0x3a4   : > { %5914 = vmatpush1.bf16.msra.mxu1 %v9269_v26  ;;  %v9391_v26 = vld [vmem:[#allocation8 + $0xe4] ss:$8 sps:$4 sm:$0xff]  }
 0x3a5   : > { %5915 = vmatprep.subr.bf16.mxu1 %v9274_v28  ;;  %v9317_v28 = vld [vmem:[#allocation5 + $0x14c8] ss:$16 sps:$4 sm:$0xff]  }
 0x3a6   : > { %6440 = vmatpush1.bf16.msra.mxu0 %v9365_v40  ;;  %v9329_v40 = vld [vmem:[#allocation5 + $0x1548] ss:$16 sps:$4 sm:$0xff]  }
 0x3a7   : > { %6441 = vmatprep.subr.bf16.mxu0 %v9370_v1  ;;  %v9334_v1 = vld [vmem:[#allocation5 + $0x156c] ss:$16 sps:$4 sm:$0xff]  }
 0x3a8   : > { %5916 = vmatpush1.bf16.msra.mxu1 %v9272_v52  ;;  %v9392_v52 = vld [vmem:[#allocation8 + $0xf0] ss:$8 sps:$4 sm:$0xff]  }
 0x3a9   : > { %5917 = vmatprep.subr.bf16.mxu1 %v9277_v30  ;;  %v9325_v30 = vld [vmem:[#allocation5 + $0x150c] ss:$16 sps:$4 sm:$0xff]  }
 0x3aa   : > { %6442 = vmatpush1.bf16.msra.mxu0 %v9368_v41  ;;  %v9337_v41 = vld [vmem:[#allocation5 + $0x158c] ss:$16 sps:$4 sm:$0xff]  }
 0x3ab   : > { %6443 = vmatprep.subr.bf16.mxu0 %v9373_v42  ;;  %v9335_v42 = vld [vmem:[#allocation5 + $0x1588] ss:$16 sps:$4 sm:$0xff]  }
 0x3ac   : > { %5918 = vmatpush1.bf16.msra.mxu1 %v9275_v59  ;;  %v9326_v59 = vld [vmem:[#allocation5 + $0x1528] ss:$16 sps:$4 sm:$0xff]  }
 0x3ad   : > { %5919 = vmatprep.subr.bf16.mxu1 %v9280_v63  ;;  %v9331_v63 = vld [vmem:[#allocation5 + $0x154c] ss:$16 sps:$4 sm:$0xff]  }
 0x3ae   : > { %6444 = vmatpush1.bf16.msra.mxu0 %v9371_v54  ;;  %v9343_v54 = vld [vmem:[#allocation5 + $0x15cc] ss:$16 sps:$4 sm:$0xff]  }
 0x3af   : > { %6445 = vmatprep.subr.bf16.mxu0 %v9376_v57  ;;  %v9341_v57 = vld [vmem:[#allocation5 + $0x15c8] ss:$16 sps:$4 sm:$0xff]  }
 0x3b0   : > { %5920 = vmatpush1.bf16.msra.mxu1 %v9278_v62  ;;  %v9397_v62 = vld [vmem:[#allocation8 + $0x104] ss:$8 sps:$4 sm:$0xff]  }
 0x3b1   : > { %5921 = vmatprep.subr.bf16.mxu1 %v9283_v38  ;;  %v9332_v38 = vld [vmem:[#allocation5 + $0x1568] ss:$16 sps:$4 sm:$0xff]  }
 0x3b2   : > { %6446 = vmatpush1.bf16.msra.mxu0 %v9374_v55  ;;  %v1301_v55 = vlaneseq }
 0x3b3   : > { %6447 = vmatprep.subr.bf16.mxu0 %v9379_v16 }
 0x3b4   : > { %5922 = vmatpush1.bf16.msra.mxu1 %v9281_v2  ;;  %v9340_v2 = vld [vmem:[#allocation5 + $0x15ac] ss:$16 sps:$4 sm:$0xff]   ;;  %v10478_v16 = vshrl.u32 %v1301_v55, 7  ;;  %v9430_v55 = vld [vmem:[#allocation8 + $0x1b4] ss:$8 sps:$4 sm:$0xff]  }
 0x3b5   : > { %5923 = vmatprep.subr.bf16.mxu1 %v9286_v6  ;;  %v9338_v6 = vld [vmem:[#allocation5 + $0x15a8] ss:$16 sps:$4 sm:$0xff]  }
 0x3b6   : > { %6448 = vmatpush1.bf16.msra.mxu0 %v9377_v20  ;;  %v1307_v20 = vsub.s32 1, %v10478_v16 }
 0x3b7   : > { %6449 = vmatprep.subr.bf16.mxu0 %v9382_v53 }
 0x3b8   : > { %5924 = vmatpush1.bf16.msra.mxu1 %v9284_v8  ;;  %v9346_v8 = vld [vmem:[#allocation5 + $0x15ec] ss:$16 sps:$4 sm:$0xff]  }
 0x3b9   : > { %5925 = vmatprep.subr.bf16.mxu1 %v9289_v15  ;;  %v9344_v15 = vld [vmem:[#allocation5 + $0x15e8] ss:$16 sps:$4 sm:$0xff]  }
 0x3ba   : > { %6450 = vmatpush1.bf16.msra.mxu0 %v9380_v5 }
 0x3bb   : > { %6451 = vmatprep.subr.bf16.mxu0 %v9385_v25 }
 0x3bc   : > { %5926 = vmatpush1.bf16.msra.mxu1 %v9287_v17  ;;  %v1303_v17 = vsub.s32 0, %v10478_v16 }
 0x3bd   : > { %5927 = vmatprep.subr.bf16.mxu1 %v9292_v19  ;;  %v10481_v19 = vld [vmem:[#allocation7] sm:$0xf] }
 0x3be   : > { %6452 = vmatpush1.bf16.msra.mxu0 %v9383_v0  ;;  %v1304_v53 = vrot.slane %v10481_v19, %v1303_v17 }
 0x3bf   : > { %6453 = vmatprep.subr.bf16.mxu0 %v9388_v14 }
 0x3c0   : > { %5928 = vmatpush1.bf16.msra.mxu1 %v9290_v23 }
 0x3c1   : > { %5929 = vmatprep.subr.bf16.mxu1 %v9295_v24  ;;  %v4880_v24 = vadd.f32 %v10320_v48, %v1304_v53 }
 0x3c2   : > { %6454 = vmatpush1.bf16.msra.mxu0 %v9386_v31 }
 0x3c3   : > { %6455 = vmatprep.subr.bf16.mxu0 %v9391_v26 }
 0x3c4   : > { %5930 = vmatpush1.bf16.msra.mxu1 %v9293_v27 }
 0x3c5   : > { %5931 = vmatprep.subr.bf16.mxu1 %v9298_v36 }
 0x3c6   : > { %6456 = vmatpush1.bf16.msra.mxu0 %v9389_v61  ;;  %v9398_v61 = vld [vmem:[#allocation8 + $0x110] ss:$8 sps:$4 sm:$0xff]  }
 0x3c7   : > { %6457 = vmatprep.subr.bf16.mxu0 %v9394_v49  ;;  %v9403_v49 = vld [vmem:[#allocation8 + $0x124] ss:$8 sps:$4 sm:$0xff]  }
 0x3c8   : > { %5932 = vmatpush1.bf16.msra.mxu1 %v9296_v44 }
 0x3c9   : > { %5954 = vmatprep.subr.bf16.mxu1 %v9301_v11 }
 0x3ca   : > { %6458 = vmatpush1.bf16.msra.mxu0 %v9392_v52 }
 0x3cb   : > { %5934 = vmatmul.mubr.bf16.vlgmr.msra.gmra.mrb[8].mxu1 %v10430_v43  ;;  %v9311_v43 = vld [vmem:[#allocation5 + $0x1488] ss:$16 sps:$4 sm:$0xff]   ;;  %6480 = vmatprep.subr.bf16.mxu0 %v9397_v62 }
 0x3cc   : > { %5955 = vmatpush1.bf16.msra.mxu1 %v9299_v4  ;;  %5943 = vmatprep.mubr.bf16.mxu1 %v10434_v32  ;;  %v9314_v32 = vld [vmem:[#allocation5 + $0x14a8] ss:$16 sps:$4 sm:$0xff]  }
 0x3cd   : > { %5956 = vmatprep.subr.bf16.mxu1 %v9304_v33  ;;  %v9415_v62 = vld [vmem:[#allocation8 + $0x164] ss:$8 sps:$4 sm:$0xff]  }
 0x3d0   : > { %5957 = vmatpush1.bf16.msra.mxu1 %v9302_v21 }
 0x3d1   : > { %5958 = vmatprep.subr.bf16.mxu1 %v9307_v22 }
 0x3d3   : > { %5944 = vmatmul.mubr.bf16.gmra.mrb[12].mxu1 %v10442_v3  ;;  %v9322_v3 = vld [vmem:[#allocation5 + $0x14ec] ss:$16 sps:$4 sm:$0xff]  }
 0x3d4   : > { %5959 = vmatpush1.bf16.msra.mxu1 %v9305_v29  ;;  %5986 = vmatprep.mubr.bf16.mxu1 %v10446_v7  ;;  %v9320_v7 = vld [vmem:[#allocation5 + $0x14e8] ss:$16 sps:$4 sm:$0xff]  }
 0x3d5   : > { %5960 = vmatprep.subr.bf16.mxu1 %v9310_v35  ;;  %v9395_v35 = vld [vmem:[#allocation8 + $0x100] ss:$8 sps:$4 sm:$0xff]  }
 0x3d8   : > { %5961 = vmatpush1.bf16.msra.mxu1 %v9308_v37  ;;  %v4890_v37 = vadd.f32 %v10328_v46, %v1304_v53 }
 0x3d9   : > { %5962 = vmatprep.subr.bf16.mxu1 %v9313_v34 }
 0x3dc   : > { %5963 = vmatpush1.bf16.msra.mxu1 %v9311_v43  ;;  %v9400_v43 = vld [vmem:[#allocation8 + $0x114] ss:$8 sps:$4 sm:$0xff]  }
 0x3dd   : > { %5964 = vmatprep.subr.bf16.mxu1 %v9316_v56 }
 0x3e0   : > { %5965 = vmatpush1.bf16.msra.mxu1 %v9314_v32 }
 0x3e1   : > { %5966 = vmatprep.subr.bf16.mxu1 %v9319_v39 }
 0x3e4   : > { %5967 = vmatpush1.bf16.msra.mxu1 %v9317_v28 }
 0x3e5   : > { %5968 = vmatprep.subr.bf16.mxu1 %v9322_v3 }
 0x3e8   : > { %5969 = vmatpush1.bf16.msra.mxu1 %v9320_v7 }
 0x3e9   : > { %5970 = vmatprep.subr.bf16.mxu1 %v9325_v30 }
 0x3ec   : > { %5971 = vmatpush1.bf16.msra.mxu1 %v9323_v12  ;;  %v9401_v12 = vld [vmem:[#allocation8 + $0x120] ss:$8 sps:$4 sm:$0xff]  }
 0x3ed   : > { %5972 = vmatprep.subr.bf16.mxu1 %v9328_v58  ;;  %v9404_v58 = vld [vmem:[#allocation8 + $0x130] ss:$8 sps:$4 sm:$0xff]  }
 0x3f0   : > { %5973 = vmatpush1.bf16.msra.mxu1 %v9326_v59  ;;  %v9409_v59 = vld [vmem:[#allocation8 + $0x144] ss:$8 sps:$4 sm:$0xff]  }
 0x3f1   : > { %5974 = vmatprep.subr.bf16.mxu1 %v9331_v63  ;;  %v9407_v63 = vld [vmem:[#allocation8 + $0x140] ss:$8 sps:$4 sm:$0xff]  }
 0x3f4   : > { %5975 = vmatpush1.bf16.msra.mxu1 %v9329_v40  ;;  %v9412_v40 = vld [vmem:[#allocation8 + $0x154] ss:$8 sps:$4 sm:$0xff]  }
 0x3f5   : > { %5976 = vmatprep.subr.bf16.mxu1 %v9334_v1  ;;  %v9410_v1 = vld [vmem:[#allocation8 + $0x150] ss:$8 sps:$4 sm:$0xff]  }
 0x3f8   : > { %5977 = vmatpush1.bf16.msra.mxu1 %v9332_v38  ;;  %v9413_v38 = vld [vmem:[#allocation8 + $0x160] ss:$8 sps:$4 sm:$0xff]  }
 0x3f9   : > { %5978 = vmatprep.subr.bf16.mxu1 %v9337_v41  ;;  %v9418_v41 = vld [vmem:[#allocation8 + $0x174] ss:$8 sps:$4 sm:$0xff]  }
 0x3fc   : > { %5979 = vmatpush1.bf16.msra.mxu1 %v9335_v42  ;;  %v9416_v42 = vld [vmem:[#allocation8 + $0x170] ss:$8 sps:$4 sm:$0xff]  }
 0x3fd   : > { %5980 = vmatprep.subr.bf16.mxu1 %v9340_v2  ;;  %v9421_v2 = vld [vmem:[#allocation8 + $0x184] ss:$8 sps:$4 sm:$0xff]  }
 0x400   : > { %5981 = vmatpush1.bf16.msra.mxu1 %v9338_v6  ;;  %v9419_v6 = vld [vmem:[#allocation8 + $0x180] ss:$8 sps:$4 sm:$0xff]  }
 0x401   : > { %5982 = vmatprep.subr.bf16.mxu1 %v9343_v54  ;;  %v9424_v54 = vld [vmem:[#allocation8 + $0x194] ss:$8 sps:$4 sm:$0xff]  }
 0x404   : > { %5983 = vmatpush1.bf16.msra.mxu1 %v9341_v57  ;;  %v9422_v57 = vld [vmem:[#allocation8 + $0x190] ss:$8 sps:$4 sm:$0xff]  }
 0x405   : > { %5984 = vmatprep.subr.bf16.mxu1 %v9346_v8  ;;  %v9427_v8 = vld [vmem:[#allocation8 + $0x1a4] ss:$8 sps:$4 sm:$0xff]  }
 0x408   : > { %5985 = vmatpush1.bf16.msra.mxu1 %v9344_v15  ;;  %v9425_v15 = vld [vmem:[#allocation8 + $0x1a0] ss:$8 sps:$4 sm:$0xff]  }
 0x40b   : > { %5987 = vmatmul.mubr.bf16.vlgmr.msra.gmra.mrb[8].mxu1 %v10456_v50  ;;  %v1308_v50 = vrot.slane %v10481_v19, %v1307_v20 }
 0x40c   : > { %5996 = vmatprep.mubr.bf16.mxu1 %v10458_v13  ;;  %v4876_v13 = vadd.f32 %v10316_v45, %v1304_v53  ;;  %v4886_v45 = vadd.f32 %v10324_v9, %v1304_v53  ;;  %v9428_v53 = vld [vmem:[#allocation8 + $0x1b0] ss:$8 sps:$4 sm:$0xff]  }
 0x40d   : > { %v4882_v27 = vadd.f32 %v10322_v51, %v1308_v50  ;;  %v4892_v56 = vadd.f32 %v10330_v18, %v1308_v50  ;;  %v9406_v18 = vld [vmem:[#allocation8 + $0x134] ss:$8 sps:$4 sm:$0xff]  }
 0x413   : > { %5997 = vmatmul.mubr.bf16.gmra.mrb[12].mxu1 %v10466_v60  ;;  %v4878_v60 = vadd.f32 %v10318_v47, %v1308_v50  ;;  %v4888_v47 = vadd.f32 %v10326_v10, %v1308_v50  ;;  %v9433_v50 = vld [vmem:[#allocation8 + $0x1c4] ss:$8 sps:$4 sm:$0xff]  }
 0x45f   : > { %v5405_v23 = vpop.f32.mrb[0].mxu0 }
 0x460   : > { %v7960_v5 = vadd.f32 %v5405_v23, %v4876_v13  ;;  %v5407_v25 = vpop.f32.mrb[1].mxu0  ;;  %v9431_v13 = vld [vmem:[#allocation8 + $0x1c0] ss:$8 sps:$4 sm:$0xff]   ;;  %v9434_v23 = vld [vmem:[#allocation8 + $0x1d0] ss:$8 sps:$4 sm:$0xff]  }
 0x461   : > { %v7962_v36 = vadd.f32 %v5407_v25, %v4878_v60  ;;  %v5409_v0 = vpop.f32.mrb[2].mxu0  ;;  %v9436_v60 = vld [vmem:[#allocation8 + $0x1d4] ss:$8 sps:$4 sm:$0xff]  }
 0x462   : > { %v7964_v14 = vadd.f32 %v5409_v0, %v4880_v24  ;;  %v5411_v44 = vpop.f32.mrb[3].mxu0  ;;  %v6007_v31 = vmax.f32 %v7960_v5, 0.0  ;;  %v9439_v24 = vld [vmem:[#allocation8 + $0x1e4] ss:$8 sps:$4 sm:$0xff]   ;;  %v9437_v5 = vld [vmem:[#allocation8 + $0x1e0] ss:$8 sps:$4 sm:$0xff]  }
 0x463   : > { %v7966_v11 = vadd.f32 %v5411_v44, %v4882_v27  ;;  %v6008_v33 = vmax.f32 %v7962_v36, 0.0  ;;  %v9442_v25 = vld [vmem:[#allocation8 + $0x1f4] ss:$8 sps:$4 sm:$0xff]   ;;  %v9440_v27 = vld [vmem:[#allocation8 + $0x1f0] ss:$8 sps:$4 sm:$0xff]   ;;  %v9443_v36 = vld [vmem:[#allocation11 + $0x40] sm:$0xff]  }
 0x464   : > { %v6011_v4 = vmax.f32 %v7964_v14, 0.0  ;;  %v1311_v0 = vsub.s32 2, %v10478_v16  ;;  %v1315_v14 = vsub.s32 3, %v10478_v16 }
 0x465   : > { %v6012_v21 = vmax.f32 %v7966_v11, 0.0 }
 0x466   : > { %v6023_v22 = vpack.c.bf16 %v6011_v4, %v6007_v31  ;;  %v1312_v44 = vrot.slane %v10481_v19, %v1311_v0  ;;  %v1316_v11 = vrot.slane %v10481_v19, %v1315_v14 }
 0x467   : > { %v6024_v29 = vpack.c.bf16 %v6012_v21, %v6008_v33  ;;  %v5415_v48 = vpop.f32.mrb[4].mxu0 }
 0x468   : > { %v7968_v51 = vadd.f32 %v5415_v48, %v4886_v45  ;;  %v5417_v34 = vpop.f32.mrb[5].mxu0 }
 0x469   : > { %v7970_v32 = vadd.f32 %v5417_v34, %v4888_v47  ;;  %v5419_v39 = vpop.f32.mrb[6].mxu0  ;;  %6459 = vmatprep.mubr.bf16.mxu0 %v6024_v29 }
 0x46a   : > { %v7972_v26 = vadd.f32 %v5419_v39, %v4890_v37  ;;  %v5421_v28 = vpop.f32.mrb[7].mxu0  ;;  %6460 = vmatmul.mubr.bf16.vlgmr.msra.gmra.mrb[8].mxu0 %v6023_v22  ;;  %v6015_v10 = vmax.f32 %v7968_v51, 0.0 }
 0x46b   : > { %v7974_v9 = vadd.f32 %v5421_v28, %v4892_v56  ;;  %6481 = vmatpush1.bf16.msra.mxu0 %v9395_v35  ;;  %v6016_v7 = vmax.f32 %v7970_v32, 0.0  ;;  %v9444_v32 = vld [vmem:[#allocation11] sm:$0xff]   ;;  %v9445_v28 = vld [vmem:[#allocation11 + $0x48] sm:$0xff]  }
 0x46c   : > { %v6019_v3 = vmax.f32 %v7972_v26, 0.0  ;;  %6482 = vmatprep.subr.bf16.mxu0 %v9400_v43 }
 0x46d   : > { %v6020_v46 = vmax.f32 %v7974_v9, 0.0 }
 0x46e   : > { %v6027_v52 = vpack.c.bf16 %v6019_v3, %v6015_v10 }
 0x46f   : > { %v6028_v30 = vpack.c.bf16 %v6020_v46, %v6016_v7  ;;  %6483 = vmatpush1.bf16.msra.mxu0 %v9398_v61 }
 0x470   : > { %6484 = vmatprep.subr.bf16.mxu0 %v9403_v49  ;;  %v9446_v49 = vld [vmem:[#allocation11 + $0x8] sm:$0xff]  }
 0x471   : > { %6469 = vmatprep.mubr.bf16.mxu0 %v6028_v30 }
 0x472   : > { %6470 = vmatmul.mubr.bf16.gmra.mrb[12].mxu0 %v6027_v52  ;;  %v9447_v52 = vld [vmem:[#allocation11 + $0x50] sm:$0xff]  }
 0x473   : > { %6485 = vmatpush1.bf16.msra.mxu0 %v9401_v12 }
 0x474   : > { %6486 = vmatprep.subr.bf16.mxu0 %v9406_v18 }
 0x477   : > { %6487 = vmatpush1.bf16.msra.mxu0 %v9404_v58 }
 0x478   : > { %6488 = vmatprep.subr.bf16.mxu0 %v9409_v59  ;;  %v9448_v59 = vld [vmem:[#allocation11 + $0x10] sm:$0xff]  }
 0x47b   : > { %6489 = vmatpush1.bf16.msra.mxu0 %v9407_v63  ;;  %v9449_v63 = vld [vmem:[#allocation11 + $0x58] sm:$0xff]  }
 0x47c   : > { %6490 = vmatprep.subr.bf16.mxu0 %v9412_v40  ;;  %v9450_v40 = vld [vmem:[#allocation11 + $0x18] sm:$0xff]  }
 0x47f   : > { %6491 = vmatpush1.bf16.msra.mxu0 %v9410_v1  ;;  %v9451_v1 = vld [vmem:[#allocation11 + $0x60] sm:$0xff]  }
 0x480   : > { %6492 = vmatprep.subr.bf16.mxu0 %v9415_v62  ;;  %v9452_v62 = vld [vmem:[#allocation11 + $0x20] sm:$0xff]  }
 0x483   : > { %6493 = vmatpush1.bf16.msra.mxu0 %v9413_v38  ;;  %v9453_v38 = vld [vmem:[#allocation11 + $0x68] sm:$0xff]  }
 0x484   : > { %6494 = vmatprep.subr.bf16.mxu0 %v9418_v41  ;;  %v9454_v41 = vld [vmem:[#allocation11 + $0x28] sm:$0xff]  }
 0x487   : > { %6495 = vmatpush1.bf16.msra.mxu0 %v9416_v42  ;;  %v9455_v42 = vld [vmem:[#allocation11 + $0x70] sm:$0xff]  }
 0x488   : > { %6496 = vmatprep.subr.bf16.mxu0 %v9421_v2  ;;  %v9456_v2 = vld [vmem:[#allocation11 + $0x30] sm:$0xff]  }
 0x48b   : > { %6497 = vmatpush1.bf16.msra.mxu0 %v9419_v6  ;;  %v9457_v6 = vld [vmem:[#allocation11 + $0x78] sm:$0xff]  }
 0x48c   : > { %6498 = vmatprep.subr.bf16.mxu0 %v9424_v54  ;;  %v9458_v54 = vld [vmem:[#allocation11 + $0x38] sm:$0xff]  }
 0x48f   : > { %6499 = vmatpush1.bf16.msra.mxu0 %v9422_v57  ;;  %v9459_v57 = vld [vmem:[#allocation14] sm:$0xff]  }
 0x490   : > { %6500 = vmatprep.subr.bf16.mxu0 %v9427_v8  ;;  %v9460_v8 = vld [vmem:[#allocation14 + $0x8] sm:$0xff]   ;;  %7939 = vmatprep.subr.bf16.mxu1 %v9459_v57 }
 0x491   : > { %7940 = vmatpush3.bf16.msra.mxu1 %v9459_v57 }
 0x492   : > { %7941 = vmatprep.subr.bf16.mxu1 %v9460_v8 }
 0x493   : > { %6501 = vmatpush1.bf16.msra.mxu0 %v9425_v15  ;;  %v9461_v15 = vld [vmem:[#allocation14 + $0x10] sm:$0xff]  }
 0x494   : > { %6502 = vmatprep.subr.bf16.mxu0 %v9430_v55  ;;  %v6095_v55 = vld [vmem:[#allocation10] sm:$0x3] }
 0x495   : > { %7942 = vmatpush3.bf16.msra.mxu1 %v9460_v8 }
 0x496   : > { %7943 = vmatprep.subr.bf16.mxu1 %v9461_v15 }
 0x497   : > { %6503 = vmatpush1.bf16.msra.mxu0 %v9428_v53  ;;  %v6100_v53 = vrot.slane %v6095_v55, %v1303_v17 }
 0x498   : > { %6504 = vmatprep.subr.bf16.mxu0 %v9433_v50  ;;  %v6104_v50 = vrot.slane %v6095_v55, %v1307_v20 }
 0x499   : > { %7944 = vmatpush3.bf16.msra.mxu1 %v9461_v15 }
 0x49b   : > { %6505 = vmatpush1.bf16.msra.mxu0 %v9431_v13 }
 0x49c   : > { %6506 = vmatprep.subr.bf16.mxu0 %v9436_v60 }
 0x49f   : > { %6507 = vmatpush1.bf16.msra.mxu0 %v9434_v23 }
 0x4a0   : > { %6508 = vmatprep.subr.bf16.mxu0 %v9439_v24 }
 0x4a3   : > { %6509 = vmatpush1.bf16.msra.mxu0 %v9437_v5 }
 0x4a4   : > { %6510 = vmatprep.subr.bf16.mxu0 %v9442_v25 }
 0x4a7   : > { %6511 = vmatpush1.bf16.msra.mxu0 %v9440_v27 }
 0x4a8   : > { %7901 = vmatprep.subr.bf16.mxu0 %v9443_v36 }
 0x4de   : > { %v5988_v31 = vpop.f32.mrb[8].mxu1 }
 0x4df   : > { %v7975_v4 = vadd.f32 %v5988_v31, %v1312_v44  ;;  %v5990_v33 = vpop.f32.mrb[9].mxu1 }
 0x4e0   : > { %v7976_v21 = vadd.f32 %v5990_v33, %v1316_v11  ;;  %v5992_v45 = vpop.f32.mrb[10].mxu1 }
 0x4e1   : > { %v7977_v22 = vadd.f32 %v5992_v45, %v1312_v44  ;;  %v5994_v47 = vpop.f32.mrb[11].mxu1  ;;  %v6009_v48 = vmax.f32 %v7975_v4, 0.0 }
 0x4e2   : > { %v7978_v29 = vadd.f32 %v5994_v47, %v1316_v11  ;;  %v6010_v37 = vmax.f32 %v7976_v21, 0.0 }
 0x4e3   : > { %v6013_v35 = vmax.f32 %v7977_v22, 0.0 }
 0x4e4   : > { %v6014_v51 = vmax.f32 %v7978_v29, 0.0 }
 0x4e5   : > { %v6025_v34 = vpack.c.bf16 %v6013_v35, %v6009_v48 }
 0x4e6   : > { %v6026_v43 = vpack.c.bf16 %v6014_v51, %v6010_v37  ;;  %v5998_v56 = vpop.f32.mrb[12].mxu1 }
 0x4e7   : > { %v7979_v39 = vadd.f32 %v5998_v56, %v1312_v44  ;;  %v6000_v26 = vpop.f32.mrb[13].mxu1  ;;  %v9463_v56 = vld [vmem:[#allocation14 + $0x20] sm:$0xff]  }
 0x4e8   : > { %v7980_v19 = vadd.f32 %v6000_v26, %v1316_v11  ;;  %v6002_v9 = vpop.f32.mrb[14].mxu1  ;;  %6512 = vmatprep.mubr.bf16.mxu0 %v6026_v43  ;;  %v9462_v43 = vld [vmem:[#allocation14 + $0x18] sm:$0xff]  }
 0x4e9   : > { %v7981_v61 = vadd.f32 %v6002_v9, %v1312_v44  ;;  %v6004_v10 = vpop.f32.mrb[15].mxu1  ;;  %6513 = vmatmul.mubr.bf16.vlgmr.msra.gmra.mrb[8].mxu0 %v6025_v34  ;;  %v6017_v7 = vmax.f32 %v7979_v39, 0.0  ;;  %7945 = vmatprep.subr.bf16.mxu1 %v9462_v43  ;;  %v9465_v39 = vld [vmem:[#allocation14 + $0x30] sm:$0xff]   ;;  %v9466_v26 = vld [vmem:[#allocation14 + $0x38] sm:$0xff]  }
 0x4ea   : > { %v7982_v3 = vadd.f32 %v6004_v10, %v1316_v11  ;;  %7902 = vmatpush3.bf16.msra.mxu0 %v9444_v32  ;;  %v6018_v30 = vmax.f32 %v7980_v19, 0.0  ;;  %7946 = vmatpush3.bf16.msra.mxu1 %v9462_v43  ;;  %v9464_v32 = vld [vmem:[#allocation14 + $0x28] sm:$0xff]   ;;  %v7850_v19 = vld [vmem:[#allocation13] ss:$0 sm:$0xff] }
 0x4eb   : > { %v6021_v46 = vmax.f32 %v7981_v61, 0.0  ;;  %7903 = vmatprep.subr.bf16.mxu0 %v9445_v28  ;;  %7947 = vmatprep.subr.bf16.mxu1 %v9463_v56 }
 0x4ec   : > { %v6022_v12 = vmax.f32 %v7982_v3, 0.0 }
 0x4ed   : > { %v6029_v18 = vpack.c.bf16 %v6021_v46, %v6017_v7 }
 0x4ee   : > { %v6030_v58 = vpack.c.bf16 %v6022_v12, %v6018_v30  ;;  %7904 = vmatpush3.bf16.msra.mxu0 %v9446_v49  ;;  %7948 = vmatpush3.bf16.msra.mxu1 %v9463_v56 }
 0x4ef   : > { %7905 = vmatprep.subr.bf16.mxu0 %v9447_v52  ;;  %7949 = vmatprep.subr.bf16.mxu1 %v9464_v32 }
 0x4f0   : > { %6522 = vmatprep.mubr.bf16.mxu0 %v6030_v58 }
 0x4f1   : > { %6523 = vmatmul.mubr.bf16.gmra.mrb[12].mxu0 %v6029_v18 }
 0x4f2   : > { %7906 = vmatpush3.bf16.msra.mxu0 %v9448_v59  ;;  %7950 = vmatpush3.bf16.msra.mxu1 %v9464_v32 }
 0x4f3   : > { %7907 = vmatprep.subr.bf16.mxu0 %v9449_v63  ;;  %7951 = vmatprep.subr.bf16.mxu1 %v9465_v39 }
 0x4f6   : > { %7908 = vmatpush3.bf16.msra.mxu0 %v9450_v40  ;;  %7952 = vmatpush3.bf16.msra.mxu1 %v9465_v39 }
 0x4f7   : > { %7909 = vmatprep.subr.bf16.mxu0 %v9451_v1  ;;  %7953 = vmatprep.subr.bf16.mxu1 %v9466_v26 }
 0x4fa   : > { %7910 = vmatpush3.bf16.msra.mxu0 %v9452_v62  ;;  %7954 = vmatpush3.bf16.msra.mxu1 %v9466_v26 }
 0x4fb   : > { %7911 = vmatprep.subr.bf16.mxu0 %v9453_v38 }
 0x4fe   : > { %7912 = vmatpush3.bf16.msra.mxu0 %v9454_v41 }
 0x4ff   : > { %7913 = vmatprep.subr.bf16.mxu0 %v9455_v42 }
 0x502   : > { %7914 = vmatpush3.bf16.msra.mxu0 %v9456_v2 }
 0x503   : > { %7915 = vmatprep.subr.bf16.mxu0 %v9457_v6  ;;  %v7867_v6 = vld [vmem:[#allocation16] ss:$0 sm:$0xff] }
 0x506   : > { %7916 = vmatpush3.bf16.msra.mxu0 %v9458_v54 }
 0x5bc   : > { %v6514_v13 = vpop.f32.mrb[8].mxu0 }
 0x5bd   : > { %v7983_v60 = vadd.f32 %v6514_v13, %v6100_v53  ;;  %v6516_v23 = vpop.f32.mrb[9].mxu0 }
 0x5be   : > { %v7984_v24 = vadd.f32 %v6516_v23, %v6104_v50  ;;  %v6518_v5 = vpop.f32.mrb[10].mxu0 }
 0x5bf   : > { %v7985_v25 = vadd.f32 %v6518_v5, %v6100_v53  ;;  %v6520_v27 = vpop.f32.mrb[11].mxu0  ;;  %v6533_v0 = vmax.f32 %v7983_v60, 0.0 }
 0x5c0   : > { %v7986_v36 = vadd.f32 %v6520_v27, %v6104_v50  ;;  %v6534_v44 = vmax.f32 %v7984_v24, 0.0 }
 0x5c1   : > { %v6535_v14 = vmax.f32 %v7985_v25, 0.0 }
 0x5c2   : > { %v6536_v11 = vmax.f32 %v7986_v36, 0.0 }
 0x5c3   : > { %v6541_v31 = vpack.c.bf16 %v6535_v14, %v6533_v0 }
 0x5c4   : > { %v6542_v4 = vpack.c.bf16 %v6536_v11, %v6534_v44  ;;  %v6524_v33 = vpop.f32.mrb[12].mxu0 }
 0x5c5   : > { %v7987_v21 = vadd.f32 %v6524_v33, %v6100_v53  ;;  %v6526_v17 = vpop.f32.mrb[13].mxu0 }
 0x5c6   : > { %v7988_v45 = vadd.f32 %v6526_v17, %v6104_v50  ;;  %v6528_v16 = vpop.f32.mrb[14].mxu0  ;;  %6712 = vmatprep.mubr.bf16.mxu0 %v6542_v4 }
 0x5c7   : > { %v7989_v20 = vadd.f32 %v6528_v16, %v6100_v53  ;;  %v6530_v22 = vpop.f32.mrb[15].mxu0  ;;  %6713 = vmatmul.mubr.bf16.vlgmr.msra.gmra.mrb[16].mxu0 %v6541_v31  ;;  %v6537_v29 = vmax.f32 %v7987_v21, 0.0 }
 0x5c8   : > { %v7990_v47 = vadd.f32 %v6530_v22, %v6104_v50  ;;  %v6538_v35 = vmax.f32 %v7988_v45, 0.0 }
 0x5c9   : > { %v6539_v48 = vmax.f32 %v7989_v20, 0.0 }
 0x5ca   : > { %v6540_v37 = vmax.f32 %v7990_v47, 0.0 }
 0x5cb   : > { %v6543_v51 = vpack.c.bf16 %v6539_v48, %v6537_v29 }
 0x5cc   : > { %v6544_v34 = vpack.c.bf16 %v6540_v37, %v6538_v35 }
 0x5ce   : > { %6720 = vmatprep.mubr.bf16.mxu0 %v6544_v34 }
 0x5cf   : > { %6721 = vmatmul.mubr.bf16.gmra.mrb[20].mxu0 %v6543_v51 }
 0x69a   : > { %v7917_v28 = vpop.f32.mrb[16].mxu0 }
 0x69b   : > { %v7918_v9 = vpop.f32.mrb[17].mxu0 }
 0x69c   : > { %v7919_v61 = vadd.f32 %v7918_v9, %v7917_v28  ;;  %v7920_v10 = vpop.f32.mrb[18].mxu0 }
 0x69d   : > { %v7921_v3 = vpop.f32.mrb[19].mxu0 }
 0x69e   : > { %v6715_v49 = vadd.f32 %v7919_v61, %v7850_v19  ;;  %v7922_v7 = vadd.f32 %v7921_v3, %v7920_v10 }
 0x6a0   : > { %v6718_v46 = vadd.f32 %v7922_v7, %v7850_v19  ;;  %v6729_v52 = vmax.f32 %v6715_v49, 0.0 }
 0x6a2   : > { %v6730_v30 = vmax.f32 %v6718_v46, 0.0  ;;  %v7923_v12 = vpop.f32.mrb[20].mxu0 }
 0x6a3   : > { %v7924_v18 = vpop.f32.mrb[21].mxu0 }
 0x6a4   : > { %v7925_v58 = vadd.f32 %v7924_v18, %v7923_v12  ;;  %v7926_v59 = vpop.f32.mrb[22].mxu0  ;;  %v6733_v63 = vpack.c.bf16 %v6730_v30, %v6729_v52 }
 0x6a5   : > { %v7927_v40 = vpop.f32.mrb[23].mxu0 }
 0x6a6   : > { %v6723_v1 = vadd.f32 %v7925_v58, %v7850_v19  ;;  %v7928_v62 = vadd.f32 %v7927_v40, %v7926_v59  ;;  %7955 = vmatprep.mubr.bf16.mxu1 %v6733_v63 }
 0x6a8   : > { %v6726_v38 = vadd.f32 %v7928_v62, %v7850_v19  ;;  %v6731_v41 = vmax.f32 %v6723_v1, 0.0 }
 0x6aa   : > { %v6732_v42 = vmax.f32 %v6726_v38, 0.0 }
 0x6ac   : > { %v6734_v2 = vpack.c.bf16 %v6732_v42, %v6731_v41 }
 0x6ae   : > { %7956 = vmatmul.mubr.bf16.vlgmr.msra.gmra.mrb[16].mxu1 %v6734_v2 }
 0x781   : > { %v7957_v54 = vpop.f32.mrb[16].mxu1 }
 0x782   : > { %v6849_v57 = vadd.f32 %v7957_v54, %v7867_v6  ;;  %v6840_v8 = vpop.f32.mrb[17].mxu1 }
 0x783   : > { %v6841_v15 = vadd.f32 %v7867_v6, %v6840_v8  ;;  %v7958_v55 = vpop.f32.mrb[18].mxu1 }
 0x784   : > { %v6857_v53 = vsub.f32 0.0, %v6849_v57  ;;  %v6852_v50 = vadd.f32 %v7958_v55, %v7867_v6  ;;  %v6843_v13 = vpop.f32.mrb[19].mxu1 }
 0x785   : > { %v6855_v60 = vsub.f32 0.0, %v6841_v15  ;;  %v6844_v23 = vadd.f32 %v7867_v6, %v6843_v13 }
 0x786   : > { %v6863_v24 = vmul.f32 1.442695, %v6857_v53  ;;  %v6858_v5 = vsub.f32 0.0, %v6852_v50 }
 0x787   : > { %v6859_v25 = vmul.f32 1.442695, %v6855_v60  ;;  %v6856_v27 = vsub.f32 0.0, %v6844_v23 }
 0x788   : > { %9467 = vpow2.f32 %v6863_v24  ;;  %v6865_v36 = vmul.f32 1.442695, %v6858_v5 }
 0x789   : > { %9469 = vpow2.f32 %v6859_v25  ;;  %v6861_v0 = vmul.f32 1.442695, %v6856_v27 }
 0x78a   : > { %9471 = vpow2.f32 %v6865_v36 }
 0x78b   : > { %9473 = vpow2.f32 %v6861_v0 }
 0x792   : > { %v9468_v14 = vpop.eup %9467 }
 0x793   : > { %v9470_v44 = vpop.eup %9469  ;;  %v6869_v11 = vadd.f32 1.0, %v9468_v14 }
 0x794   : > { %v9472_v31 = vpop.eup %9471  ;;  %v6867_v4 = vadd.f32 1.0, %v9470_v44 }
 0x795   : > { %v9474_v33 = vpop.eup %9473  ;;  %9475 = vrcp.f32 %v6869_v11  ;;  %v6870_v21 = vadd.f32 1.0, %v9472_v31 }
 0x796   : > { %9477 = vrcp.f32 %v6867_v4  ;;  %v6868_v17 = vadd.f32 1.0, %v9474_v33 }
 0x797   : > { %9479 = vrcp.f32 %v6870_v21 }
 0x798   : > { %9481 = vrcp.f32 %v6868_v17 }
 0x79f   : > { %v9476_v45 = vpop.eup %9475 }
 0x7a0   : > { %v9478_v16 = vpop.eup %9477 }
 0x7a1   : > { %v9480_v20 = vpop.eup %9479 }
 0x7a2   : > { %v9482_v22 = vpop.eup %9481  ;;  %v7898_v47 = vpack.c.bf16 %v9480_v20, %v9476_v45 }
 0x7a3   : > { %v7893_v29 = vpack.c.bf16 %v9482_v22, %v9478_v16 }
 0x7a4   : > { %7900 = vst [vmem:[%s459_s23 + $0x8] sm:$0xff] %v7898_v47  }
 0x7a5   : > { %7894 = vst [vmem:[%s459_s23] sm:$0xff] %v7893_v29  }
 0x7a6   : > { %9750 = shalt.err (!%p9747_p9)
}
 0x7a7   : > { %s9751_s20 = scalar_lea.hbm %s10511_s1, 256  ;;  %s9755_s28 = scalar_lea.hbm %s10593_s18, 512 }
 0x7a8   : > { %p9752_p4 = scmp.ne.s32.totalorder %s10511_s1, %s9751_s20  ;;  %p9756_p2 = scmp.lt.u32.totalorder %s10511_s1, %s10593_s18 }
 0x7a9   : > { %p9757_p0 = scmp.lt.u32.totalorder %s9755_s28, %s9751_s20  ;;  %p9759_p10 = scmp.lt.u32.totalorder %s9751_s20, %s10511_s1 }
 0x7aa   : > { %p9753_p3 = pnand %p9752_p4, %p10594_p1 }
 0x7ab   : > { %p9758_p5 = por %p9757_p0, %p9756_p2 }
 0x7ac   : > { %p9754_p6 = pneg %p9753_p3 }
 0x7ad   : > { %p9760_p11 = por %p9759_p10, %p9758_p5 }
 0x7af   : > { %p9761_p12 = pnand %p9760_p11, %p9754_p6 }
 0x7b1   : > { %9764 = shalt.err (!%p9761_p12)
}
 0x7b2   : > { %s9839_s22 = smov 64   ;;  %s9840_s14 = smov 4  }
 0x7b3   : > { %8188 = dma.vmem_to_hbm [thread:$0]  (%p10594_p1), %s10513_s9, 256, %s10511_s1, %s6896_s15, %s9839_s22, %s9839_s22, %s9840_s14  }
 0x7b4 PF: > { %s6924_s27 = sand.u32 1, %s9807_s30   ;;  %p10595_p13 = scmp.ne.s32.totalorder %s10582_s13, 0 }
 0x7b5   : > { %p10596_p8 = scmp.ge.s32.totalorder %s9819_s12, 2  ;;  %s6925_s24 = scalar_lea.sflag [#allocation4], %s6924_s27 }
 0x7b7   : > { %p8220_p7 = pnand %p10596_p8, %p10595_p13 }
 0x7b9   : > { %9802 = dma.done.wait (!%p8220_p7), %s6925_s24, 256  }
 0x7ba   : > { %9804 = vsyncadd (!%p8220_p7), %s6925_s24, 4294967040  ;;  %p26_p9 = scmp.ge.s32.totalorder %s10099_s19, 4   ;;  %s10597_s30 = smov %s9811_s10 }
 0x7bb   : > { %s10598_s10 = smov %s9815_s11  ;;  %s10599_s11 = smov %s10110_s26 }
 0x7bc   : > { %s10600_s12 = smov %s10099_s19  ;;  %28 = sbr.rel (!%p26_p9) target bundleno = 13 (0xd), region = 133 }
 0x7c3   :  { %6930 = vsyncpa [#allocation3], 1 }
 0x7c4   :  { %6932 = vsyncpa [#allocation3 + $0x1], 1 }
 0x7c5   :  { %6933 = vsyncpa [#allocation6], 1 }
 0x7c6   :  { %6934 = vsyncpa [#allocation9], 1 }
 0x7c7   :  { %6935 = vsyncpa [#allocation12], 1 }
 0x7c8   :  { %6936 = vsyncpa [#allocation15], 1 }
 0x7c9   :  { %6937 = vsyncpa [#allocation4], 1 }
 0x7ca   :  { %6939 = vsyncpa [#allocation4 + $0x1], 1 }

</bundles_post_ra>
